<compile_context>
chip_gen: v7x
topology: tpu7x:2x2x1
jax: 0.10.0
libtpu: 0.0.40
codegen_flags: <defaults>
</compile_context>

<pallas_src>
import jax
import jax.numpy as jnp
from jax.experimental import pallas as pl
from jax.experimental.pallas import tpu as pltpu

_LANE = 128
_EPS = 1e-5
_VMEM_LIMIT = 32 * 1024 * 1024  # far above what the tiny blocks need; safe on v5e/v6e/v7x


def _round_up(x, m):
    return ((x + m - 1) // m) * m


def _cdiv(a, b):
    return -(-a // b)


# ----------------------------- layout helpers (plain JAX, tiny) -----------------------

def _flatten_padded(a):
    """NHWC bf16 activation -> zero-padded, row-flattened slab for the conv kernels.

    Row index m = h_pad*(W+2) + w_pad walks the spatially padded image.  A 3x3 tap
    (kh, kw) of output pixel m is then the constant shift kh*(W+2)+kw in this flat
    layout.  Enough extra zero rows are appended so every shifted window of MO_P rows
    stays in range.  Returns (x_flat (N, MIN, C), MO, MO_P) with MO = H*(W+2).
    """
    n, h, w, c = a.shape
    mo = h * (w + 2)
    mo_p = _round_up(mo, 16)               # bf16 native sublane packing is (16, 128)
    slack = mo_p - mo + 2                  # +2 covers the largest kw shift on the last row
    e = _cdiv(slack, w + 2)                # extra zero rows at the bottom (>= 1)
    ap = jnp.pad(a, ((0, 0), (1, 1 + e), (1, 1), (0, 0)))
    x_flat = ap.reshape(n, (h + 2 + e) * (w + 2), c)
    return x_flat, mo, mo_p


def _valid_mask(img_w, mo, mo_p):
    """(MO_P, 1) f32: 1.0 only on rows that correspond to real output pixels
    (excludes the 2 padded-width garbage columns per row and the MO_P-MO tail rows)."""
    m = jnp.arange(mo_p, dtype=jnp.int32)
    valid = (m < mo) & ((m % (img_w + 2)) < img_w)
    return valid.astype(jnp.float32)[:, None]


# ----------------------------- Pallas kernels -----------------------------------------

def _accumulate_taps(xf_ref, w_ref, acc_ref, shifts, mo_p):
    """9 accumulating (MO_P, Cin) x (Cin, Cp) bf16 MXU matmuls over tap-shifted windows
    of the f32-unpacked flattened image held in VMEM scratch."""
    acc_ref[...] = jnp.zeros_like(acc_ref)
    for t, shift in enumerate(shifts):
        xs = xf_ref[pl.ds(shift, mo_p), :].astype(jnp.bfloat16)
        acc_ref[...] += jnp.dot(xs, w_ref[t], preferred_element_type=jnp.float32)


def _conv_stats_pallas(x_flat, wp, mask, img_w, mo, mo_p):
    """Conv(3x3, pad=1, stride=1) for one image per grid step, emitting bf16 y and the
    per-image per-channel masked sum / sum-of-squares needed for train-mode BN."""
    n, m_in, cin = x_flat.shape
    cp = wp.shape[-1]
    shifts = tuple(kh * (img_w + 2) + kw for kh in range(3) for kw in range(3))

    def kernel(x_ref, w_ref, m_ref, y_ref, sum_ref, ssq_ref, xf_ref, acc_ref):
        # Unpack the halo'd bf16 image once to f32 scratch: every tap window is then an
        # (unaligned-offset) sublane slice of 32-bit data, the most robust layout path.
        xf_ref[...] = x_ref[0].astype(jnp.float32)
        _accumulate_taps(xf_ref, w_ref, acc_ref, shifts, mo_p)
        acc = acc_ref[...]
        y_ref[0] = acc.astype(y_ref.dtype)                   # bf16 writeback (item #2)
        am = acc * m_ref[...]                                 # zero pad/garbage rows
        s = jnp.sum(am, axis=0, keepdims=True)                # (1, Cp)
        q = jnp.sum(am * acc, axis=0, keepdims=True)          # (1, Cp)
        z = jnp.zeros((7, cp), jnp.float32)
        sum_ref[...] = jnp.concatenate([s, z], axis=0)
        ssq_ref[...] = jnp.concatenate([q, z], axis=0)

    cost = pl.CostEstimate(
        flops=2 * n * 9 * mo_p * cin * cp,
        transcendentals=0,
        bytes_accessed=(x_flat.size * 2 + wp.size * 2 + mask.size * 4
                        + n * mo_p * cp * 2 + 2 * n * 8 * cp * 4))
    return pl.pallas_call(
        kernel,
        grid=(n,),
        in_specs=[pl.BlockSpec((1, m_in, cin), lambda i: (i, 0, 0)),
                  pl.BlockSpec((9, cin, cp), lambda i: (0, 0, 0)),
                  pl.BlockSpec((mo_p, 1), lambda i: (0, 0))],
        out_specs=(pl.BlockSpec((1, mo_p, cp), lambda i: (i, 0, 0)),
                   pl.BlockSpec((8, cp), lambda i: (i, 0)),
                   pl.BlockSpec((8, cp), lambda i: (i, 0))),
        out_shape=(jax.ShapeDtypeStruct((n, mo_p, cp), jnp.bfloat16),
                   jax.ShapeDtypeStruct((n * 8, cp), jnp.float32),
                   jax.ShapeDtypeStruct((n * 8, cp), jnp.float32)),
        scratch_shapes=[pltpu.VMEM((m_in, cin), jnp.float32),
                        pltpu.VMEM((mo_p, cp), jnp.float32)],
        compiler_params=pltpu.CompilerParams(
            dimension_semantics=("parallel",), vmem_limit_bytes=_VMEM_LIMIT),
        cost_estimate=cost,
    )(x_flat, wp, mask)


def _conv_bias_pallas(x_flat, wp, bias_p, img_w, mo, mo_p, cout):
    """Final conv: same tap-shift matmuls + f32 bias add, no BN/ReLU, f32 out."""
    n, m_in, cin = x_flat.shape
    cp = wp.shape[-1]
    shifts = tuple(kh * (img_w + 2) + kw for kh in range(3) for kw in range(3))

    def kernel(x_ref, w_ref, b_ref, y_ref, xf_ref, acc_ref):
        xf_ref[...] = x_ref[0].astype(jnp.float32)
        _accumulate_taps(xf_ref, w_ref, acc_ref, shifts, mo_p)
        y = acc_ref[...] + b_ref[...]
        y_ref[0] = y[:, :cout]

    cost = pl.CostEstimate(
        flops=2 * n * 9 * mo_p * cin * cp,
        transcendentals=0,
        bytes_accessed=(x_flat.size * 2 + wp.size * 2 + bias_p.size * 4
                        + n * mo_p * cout * 4))
    return pl.pallas_call(
        kernel,
        grid=(n,),
        in_specs=[pl.BlockSpec((1, m_in, cin), lambda i: (i, 0, 0)),
                  pl.BlockSpec((9, cin, cp), lambda i: (0, 0, 0)),
                  pl.BlockSpec((1, cp), lambda i: (0, 0))],
        out_specs=pl.BlockSpec((1, mo_p, cout), lambda i: (i, 0, 0)),
        out_shape=jax.ShapeDtypeStruct((n, mo_p, cout), jnp.float32),
        scratch_shapes=[pltpu.VMEM((m_in, cin), jnp.float32),
                        pltpu.VMEM((mo_p, cp), jnp.float32)],
        compiler_params=pltpu.CompilerParams(
            dimension_semantics=("parallel",), vmem_limit_bytes=_VMEM_LIMIT),
        cost_estimate=cost,
    )(x_flat, wp, bias_p)


def _bn_relu_pallas(y, sums, ssqs, gamma_p, beta_p, count, cout):
    """Pass 2: mean/var/rsqrt/scale/shift computed in-kernel from the conv-pass stats
    (item #7), then fused normalize + affine + ReLU; stores native-Cout bf16."""
    n, mo_p, cp = y.shape
    nrows = sums.shape[0]
    inv_cnt = 1.0 / float(count)

    def kernel(y_ref, sum_ref, ssq_ref, g_ref, b_ref, o_ref):
        s = jnp.sum(sum_ref[...], axis=0, keepdims=True)      # (1, Cp) batch sum
        q = jnp.sum(ssq_ref[...], axis=0, keepdims=True)
        mean = s * inv_cnt
        # NOTE: E[x^2]-E[x]^2 in f32 can cancel for huge counts; guarded by max(.,0).
        var = jnp.maximum(q * inv_cnt - mean * mean, 0.0)
        scale = g_ref[...] * jax.lax.rsqrt(var + _EPS)         # EUP, effectively free
        shift = b_ref[...] - mean * scale
        yv = y_ref[0].astype(jnp.float32)
        o = jnp.maximum(yv * scale + shift, 0.0)
        o_ref[0] = o[:, :cout].astype(o_ref.dtype)

    cost = pl.CostEstimate(
        flops=4 * n * mo_p * cp,
        transcendentals=cp,
        bytes_accessed=n * mo_p * cp * 2 + n * mo_p * cout * 2 + 2 * nrows * cp * 4)
    return pl.pallas_call(
        kernel,
        grid=(n,),
        in_specs=[pl.BlockSpec((1, mo_p, cp), lambda i: (i, 0, 0)),
                  pl.BlockSpec((nrows, cp), lambda i: (0, 0)),
                  pl.BlockSpec((nrows, cp), lambda i: (0, 0)),
                  pl.BlockSpec((1, cp), lambda i: (0, 0)),
                  pl.BlockSpec((1, cp), lambda i: (0, 0))],
        out_specs=pl.BlockSpec((1, mo_p, cout), lambda i: (i, 0, 0)),
        out_shape=jax.ShapeDtypeStruct((n, mo_p, cout), jnp.bfloat16),
        compiler_params=pltpu.CompilerParams(
            dimension_semantics=("parallel",), vmem_limit_bytes=_VMEM_LIMIT),
        cost_estimate=cost,
    )(y, sums, ssqs, gamma_p, beta_p)


# ----------------------------- layer wrappers ------------------------------------------

def _conv_bn_relu_layer(a, w, gamma, beta):
    """Conv(3x3, pad=1, stride=1) -> BatchNorm2d(train batch stats) -> ReLU on bf16 NHWC.
    The conv bias is dropped: a per-channel constant before train-mode BN is exactly
    cancelled by the mean subtraction (zero numeric change)."""
    n, h, width, cin = a.shape
    cout = w.shape[-1]
    cp = _round_up(cout, _LANE)

    x_flat, mo, mo_p = _flatten_padded(a)
    wp = jnp.pad(w.astype(jnp.bfloat16).reshape(9, cin, cout),
                 ((0, 0), (0, 0), (0, cp - cout)))
    mask = _valid_mask(width, mo, mo_p)

    y, sums, ssqs = _conv_stats_pallas(x_flat, wp, mask, width, mo, mo_p)

    gamma_p = jnp.pad(gamma.astype(jnp.float32), (0, cp - cout)).reshape(1, cp)
    beta_p = jnp.pad(beta.astype(jnp.float32), (0, cp - cout)).reshape(1, cp)
    out = _bn_relu_pallas(y, sums, ssqs, gamma_p, beta_p, n * h * width, cout)

    # drop tail rows / padded-width garbage columns -> (N, H, W, Cout) bf16
    out = out[:, :mo, :].reshape(n, h, width + 2, cout)[:, :, :width, :]
    return out


def _conv_stride2_layer(a, w, b):
    """Final Conv(3x3, pad=1, stride=2) + bias: computed at stride 1 on the flattened
    grid (same kernel machinery) and subsampled in the wrapper."""
    n, h, width, cin = a.shape
    cout = w.shape[-1]
    cp = _round_up(cout, _LANE)
    x_flat, mo, mo_p = _flatten_padded(a)
    wp = jnp.pad(w.astype(jnp.bfloat16).reshape(9, cin, cout),
                 ((0, 0), (0, 0), (0, cp - cout)))
    bias_p = jnp.pad(b.astype(jnp.float32), (0, cp - cout)).reshape(1, cp)
    y = _conv_bias_pallas(x_flat, wp, bias_p, width, mo, mo_p, cout)
    y = y[:, :mo, :].reshape(n, h, width + 2, cout)
    return y[:, ::2, 0:width:2, :]


# ----------------------------- module-level API -----------------------------------------

def init_encoder_params(key, in_channels, out_channels, depth, kernel_width=3):
    params = []
    for i in range(depth):
        cin = in_channels if i == 0 else out_channels
        key, kw_key, kb_key = jax.random.split(key, 3)
        params.append(dict(
            w=0.1 * jax.random.normal(
                kw_key, (kernel_width, kernel_width, cin, out_channels), jnp.float32),
            b=0.1 * jax.random.normal(kb_key, (out_channels,), jnp.float32),
            gamma=jnp.ones((out_channels,), jnp.float32),   # nn.BatchNorm2d default init
            beta=jnp.zeros((out_channels,), jnp.float32),
        ))
    # final stride-2 conv (no BN / ReLU after it)
    key, kw_key, kb_key = jax.random.split(key, 3)
    params.append(dict(
        w=0.1 * jax.random.normal(
            kw_key, (kernel_width, kernel_width, out_channels, out_channels), jnp.float32),
        b=0.1 * jax.random.normal(kb_key, (out_channels,), jnp.float32),
    ))
    return params


def encoder_forward(x_nchw, params, depth):
    # NCHW (PyTorch) -> NHWC, cast to bf16 once up front (item #6).
    x = jnp.transpose(x_nchw, (0, 2, 3, 1)).astype(jnp.bfloat16)
    for i in range(depth):
        p = params[i]
        x = _conv_bn_relu_layer(x, p["w"], p["gamma"], p["beta"])
    p = params[-1]
    x = _conv_stride2_layer(x, p["w"], p["b"])
    # NHWC -> NCHW
    return jnp.transpose(x, (0, 3, 1, 2)).astype(jnp.float32)


# --- pure-JAX f32 reference for the correctness check ------------------------------------
def _ref_forward(x_nchw, params, depth):
    def conv(x, w, b, stride):
        y = jax.lax.conv_general_dilated(
            x, w, window_strides=(stride, stride), padding=((1, 1), (1, 1)),
            dimension_numbers=("NHWC", "HWIO", "NHWC"))
        return y + b[None, None, None, :]

    x = jnp.transpose(x_nchw, (0, 2, 3, 1))
    for i in range(depth):
        p = params[i]
        y = conv(x, p["w"], p["b"], 1)
        mean = jnp.mean(y, axis=(0, 1, 2), keepdims=True)
        var = jnp.mean((y - mean) ** 2, axis=(0, 1, 2), keepdims=True)
        y = (y - mean) * jax.lax.rsqrt(var + _EPS)
        y = y * p["gamma"][None, None, None, :] + p["beta"][None, None, None, :]
        x = jnp.maximum(y, 0.0)
    p = params[-1]
    x = conv(x, p["w"], p["b"], 2)
    return jnp.transpose(x, (0, 3, 1, 2))


if __name__ == "__main__":
    N, IN_C, OUT_C, H, W, DEPTH = 2, 4, 8, 16, 16, 2

    key = jax.random.PRNGKey(0)
    key, xk = jax.random.split(key)
    x = jax.random.normal(xk, (N, IN_C, H, W), jnp.float32)   # NCHW like PyTorch

    params = init_encoder_params(key, IN_C, OUT_C, DEPTH)

    fwd = jax.jit(encoder_forward, static_argnames=("depth",))
    out = jax.block_until_ready(fwd(x, params, depth=DEPTH))
    assert out.shape == (N, OUT_C, H // 2, W // 2), out.shape

    ref = jax.block_until_ready(_ref_forward(x, params, DEPTH))
    # Tolerance accounts for bf16 MXU operands / bf16 inter-layer activations vs f32 ref.
    max_err = float(jnp.max(jnp.abs(out - ref)))
    assert jnp.allclose(out, ref, atol=3e-2, rtol=3e-2), max_err

    print("KERNEL_OK")
</pallas_src>

<mosaic_0001>
module attributes {stable_mosaic.version = 11 : i64} {
  func.func @kernel(%arg0: i32, %arg1: memref<1x342x4xbf16, #tpu.memory_space<vmem>>, %arg2: memref<9x4x128xbf16, #tpu.memory_space<vmem>>, %arg3: memref<288x1xf32, #tpu.memory_space<vmem>>, %arg4: memref<1x288x128xbf16, #tpu.memory_space<vmem>>, %arg5: memref<8x128xf32, #tpu.memory_space<vmem>>, %arg6: memref<8x128xf32, #tpu.memory_space<vmem>>, %arg7: memref<342x4xf32, #tpu.memory_space<vmem>>, %arg8: memref<288x128xf32, #tpu.memory_space<vmem>>) attributes {dimension_semantics = [#tpu.dimension_semantics<parallel>], iteration_bounds = array<i64: 2>, scalar_prefetch = 0 : i64, scratch_operands = 2 : i64, tpu.core_type = #tpu.core_type<tc>, window_params = [{transform_indices = @transform_0, window_bounds = array<i64: 1, 342, 4>}, {pipeline_mode = #tpu.pipeline_mode<synchronous>, transform_indices = @transform_1, window_bounds = array<i64: 9, 4, 128>}, {pipeline_mode = #tpu.pipeline_mode<synchronous>, transform_indices = @transform_2, window_bounds = array<i64: 288, 1>}, {transform_indices = @transform_3, window_bounds = array<i64: 1, 288, 128>}, {transform_indices = @transform_4, window_bounds = array<i64: 8, 128>}, {transform_indices = @transform_5, window_bounds = array<i64: 8, 128>}]} {
    %c0 = arith.constant 0 : index
    %c0_0 = arith.constant 0 : index
    %c0_1 = arith.constant 0 : index
    %0 = vector.load %arg1[%c0, %c0_0, %c0_1] : memref<1x342x4xbf16, #tpu.memory_space<vmem>>, vector<1x342x4xbf16>
    %1 = vector.shape_cast %0 : vector<1x342x4xbf16> to vector<342x4xbf16>
    %2 = arith.extf %1 : vector<342x4xbf16> to vector<342x4xf32>
    %c0_2 = arith.constant 0 : index
    %c0_3 = arith.constant 0 : index
    %3 = vector.load %arg7[%c0_2, %c0_3] : memref<342x4xf32, #tpu.memory_space<vmem>>, vector<342x4xf32>
    tpu.vector_store %arg7[%c0_2, %c0_3], %2 {strides = array<i32>} : memref<342x4xf32, #tpu.memory_space<vmem>>, vector<342x4xf32>,
    %cst = arith.constant 0.000000e+00 : f32
    %4 = vector.broadcast %cst : f32 to vector<288x128xf32>
    %c0_4 = arith.constant 0 : index
    %c0_5 = arith.constant 0 : index
    %5 = vector.load %arg8[%c0_4, %c0_5] : memref<288x128xf32, #tpu.memory_space<vmem>>, vector<288x128xf32>
    tpu.vector_store %arg8[%c0_4, %c0_5], %4 {strides = array<i32>} : memref<288x128xf32, #tpu.memory_space<vmem>>, vector<288x128xf32>,
    %c0_6 = arith.constant 0 : index
    %c0_7 = arith.constant 0 : index
    %6 = vector.load %arg7[%c0_6, %c0_7] : memref<342x4xf32, #tpu.memory_space<vmem>>, vector<288x4xf32>
    %7 = arith.truncf %6 : vector<288x4xf32> to vector<288x4xbf16>
    %c0_8 = arith.constant 0 : index
    %c0_9 = arith.constant 0 : index
    %8 = vector.load %arg8[%c0_8, %c0_9] : memref<288x128xf32, #tpu.memory_space<vmem>>, vector<288x128xf32>
    %c0_10 = arith.constant 0 : index
    %c0_11 = arith.constant 0 : index
    %c0_12 = arith.constant 0 : index
    %9 = vector.load %arg2[%c0_10, %c0_11, %c0_12] : memref<9x4x128xbf16, #tpu.memory_space<vmem>>, vector<1x4x128xbf16>
    %10 = vector.shape_cast %9 : vector<1x4x128xbf16> to vector<4x128xbf16>
    %cst_13 = arith.constant dense<0.000000e+00> : vector<288x128xf32>
    %11 = tpu.matmul %7, %10, %cst_13 {dimension_numbers = #tpu.dot_dimension_numbers<[1], [0], [0], [1], [0, 0, 1, 1], [], []>} : vector<288x4xbf16>, vector<4x128xbf16>, vector<288x128xf32> -> vector<288x128xf32>
    %12 = arith.addf %8, %11 : vector<288x128xf32>
    %c0_14 = arith.constant 0 : index
    %c0_15 = arith.constant 0 : index
    %13 = vector.load %arg8[%c0_14, %c0_15] : memref<288x128xf32, #tpu.memory_space<vmem>>, vector<288x128xf32>
    tpu.vector_store %arg8[%c0_14, %c0_15], %12 {strides = array<i32>} : memref<288x128xf32, #tpu.memory_space<vmem>>, vector<288x128xf32>,
    %c1 = arith.constant 1 : index
    %c0_16 = arith.constant 0 : index
    %14 = vector.load %arg7[%c1, %c0_16] : memref<342x4xf32, #tpu.memory_space<vmem>>, vector<288x4xf32>
    %15 = arith.truncf %14 : vector<288x4xf32> to vector<288x4xbf16>
    %c0_17 = arith.constant 0 : index
    %c0_18 = arith.constant 0 : index
    %16 = vector.load %arg8[%c0_17, %c0_18] : memref<288x128xf32, #tpu.memory_space<vmem>>, vector<288x128xf32>
    %c1_19 = arith.constant 1 : index
    %c0_20 = arith.constant 0 : index
    %c0_21 = arith.constant 0 : index
    %17 = vector.load %arg2[%c1_19, %c0_20, %c0_21] : memref<9x4x128xbf16, #tpu.memory_space<vmem>>, vector<1x4x128xbf16>
    %18 = vector.shape_cast %17 : vector<1x4x128xbf16> to vector<4x128xbf16>
    %cst_22 = arith.constant dense<0.000000e+00> : vector<288x128xf32>
    %19 = tpu.matmul %15, %18, %cst_22 {dimension_numbers = #tpu.dot_dimension_numbers<[1], [0], [0], [1], [0, 0, 1, 1], [], []>} : vector<288x4xbf16>, vector<4x128xbf16>, vector<288x128xf32> -> vector<288x128xf32>
    %20 = arith.addf %16, %19 : vector<288x128xf32>
    %c0_23 = arith.constant 0 : index
    %c0_24 = arith.constant 0 : index
    %21 = vector.load %arg8[%c0_23, %c0_24] : memref<288x128xf32, #tpu.memory_space<vmem>>, vector<288x128xf32>
    tpu.vector_store %arg8[%c0_23, %c0_24], %20 {strides = array<i32>} : memref<288x128xf32, #tpu.memory_space<vmem>>, vector<288x128xf32>,
    %c2 = arith.constant 2 : index
    %c0_25 = arith.constant 0 : index
    %22 = vector.load %arg7[%c2, %c0_25] : memref<342x4xf32, #tpu.memory_space<vmem>>, vector<288x4xf32>
    %23 = arith.truncf %22 : vector<288x4xf32> to vector<288x4xbf16>
    %c0_26 = arith.constant 0 : index
    %c0_27 = arith.constant 0 : index
    %24 = vector.load %arg8[%c0_26, %c0_27] : memref<288x128xf32, #tpu.memory_space<vmem>>, vector<288x128xf32>
    %c2_28 = arith.constant 2 : index
    %c0_29 = arith.constant 0 : index
    %c0_30 = arith.constant 0 : index
    %25 = vector.load %arg2[%c2_28, %c0_29, %c0_30] : memref<9x4x128xbf16, #tpu.memory_space<vmem>>, vector<1x4x128xbf16>
    %26 = vector.shape_cast %25 : vector<1x4x128xbf16> to vector<4x128xbf16>
    %cst_31 = arith.constant dense<0.000000e+00> : vector<288x128xf32>
    %27 = tpu.matmul %23, %26, %cst_31 {dimension_numbers = #tpu.dot_dimension_numbers<[1], [0], [0], [1], [0, 0, 1, 1], [], []>} : vector<288x4xbf16>, vector<4x128xbf16>, vector<288x128xf32> -> vector<288x128xf32>
    %28 = arith.addf %24, %27 : vector<288x128xf32>
    %c0_32 = arith.constant 0 : index
    %c0_33 = arith.constant 0 : index
    %29 = vector.load %arg8[%c0_32, %c0_33] : memref<288x128xf32, #tpu.memory_space<vmem>>, vector<288x128xf32>
    tpu.vector_store %arg8[%c0_32, %c0_33], %28 {strides = array<i32>} : memref<288x128xf32, #tpu.memory_space<vmem>>, vector<288x128xf32>,
    %c18 = arith.constant 18 : index
    %c0_34 = arith.constant 0 : index
    %30 = vector.load %arg7[%c18, %c0_34] : memref<342x4xf32, #tpu.memory_space<vmem>>, vector<288x4xf32>
    %31 = arith.truncf %30 : vector<288x4xf32> to vector<288x4xbf16>
    %c0_35 = arith.constant 0 : index
    %c0_36 = arith.constant 0 : index
    %32 = vector.load %arg8[%c0_35, %c0_36] : memref<288x128xf32, #tpu.memory_space<vmem>>, vector<288x128xf32>
    %c3 = arith.constant 3 : index
    %c0_37 = arith.constant 0 : index
    %c0_38 = arith.constant 0 : index
    %33 = vector.load %arg2[%c3, %c0_37, %c0_38] : memref<9x4x128xbf16, #tpu.memory_space<vmem>>, vector<1x4x128xbf16>
    %34 = vector.shape_cast %33 : vector<1x4x128xbf16> to vector<4x128xbf16>
    %cst_39 = arith.constant dense<0.000000e+00> : vector<288x128xf32>
    %35 = tpu.matmul %31, %34, %cst_39 {dimension_numbers = #tpu.dot_dimension_numbers<[1], [0], [0], [1], [0, 0, 1, 1], [], []>} : vector<288x4xbf16>, vector<4x128xbf16>, vector<288x128xf32> -> vector<288x128xf32>
    %36 = arith.addf %32, %35 : vector<288x128xf32>
    %c0_40 = arith.constant 0 : index
    %c0_41 = arith.constant 0 : index
    %37 = vector.load %arg8[%c0_40, %c0_41] : memref<288x128xf32, #tpu.memory_space<vmem>>, vector<288x128xf32>
    tpu.vector_store %arg8[%c0_40, %c0_41], %36 {strides = array<i32>} : memref<288x128xf32, #tpu.memory_space<vmem>>, vector<288x128xf32>,
    %c19 = arith.constant 19 : index
    %c0_42 = arith.constant 0 : index
    %38 = vector.load %arg7[%c19, %c0_42] : memref<342x4xf32, #tpu.memory_space<vmem>>, vector<288x4xf32>
    %39 = arith.truncf %38 : vector<288x4xf32> to vector<288x4xbf16>
    %c0_43 = arith.constant 0 : index
    %c0_44 = arith.constant 0 : index
    %40 = vector.load %arg8[%c0_43, %c0_44] : memref<288x128xf32, #tpu.memory_space<vmem>>, vector<288x128xf32>
    %c4 = arith.constant 4 : index
    %c0_45 = arith.constant 0 : index
    %c0_46 = arith.constant 0 : index
    %41 = vector.load %arg2[%c4, %c0_45, %c0_46] : memref<9x4x128xbf16, #tpu.memory_space<vmem>>, vector<1x4x128xbf16>
    %42 = vector.shape_cast %41 : vector<1x4x128xbf16> to vector<4x128xbf16>
    %cst_47 = arith.constant dense<0.000000e+00> : vector<288x128xf32>
    %43 = tpu.matmul %39, %42, %cst_47 {dimension_numbers = #tpu.dot_dimension_numbers<[1], [0], [0], [1], [0, 0, 1, 1], [], []>} : vector<288x4xbf16>, vector<4x128xbf16>, vector<288x128xf32> -> vector<288x128xf32>
    %44 = arith.addf %40, %43 : vector<288x128xf32>
    %c0_48 = arith.constant 0 : index
    %c0_49 = arith.constant 0 : index
    %45 = vector.load %arg8[%c0_48, %c0_49] : memref<288x128xf32, #tpu.memory_space<vmem>>, vector<288x128xf32>
    tpu.vector_store %arg8[%c0_48, %c0_49], %44 {strides = array<i32>} : memref<288x128xf32, #tpu.memory_space<vmem>>, vector<288x128xf32>,
    %c20 = arith.constant 20 : index
    %c0_50 = arith.constant 0 : index
    %46 = vector.load %arg7[%c20, %c0_50] : memref<342x4xf32, #tpu.memory_space<vmem>>, vector<288x4xf32>
    %47 = arith.truncf %46 : vector<288x4xf32> to vector<288x4xbf16>
    %c0_51 = arith.constant 0 : index
    %c0_52 = arith.constant 0 : index
    %48 = vector.load %arg8[%c0_51, %c0_52] : memref<288x128xf32, #tpu.memory_space<vmem>>, vector<288x128xf32>
    %c5 = arith.constant 5 : index
    %c0_53 = arith.constant 0 : index
    %c0_54 = arith.constant 0 : index
    %49 = vector.load %arg2[%c5, %c0_53, %c0_54] : memref<9x4x128xbf16, #tpu.memory_space<vmem>>, vector<1x4x128xbf16>
    %50 = vector.shape_cast %49 : vector<1x4x128xbf16> to vector<4x128xbf16>
    %cst_55 = arith.constant dense<0.000000e+00> : vector<288x128xf32>
    %51 = tpu.matmul %47, %50, %cst_55 {dimension_numbers = #tpu.dot_dimension_numbers<[1], [0], [0], [1], [0, 0, 1, 1], [], []>} : vector<288x4xbf16>, vector<4x128xbf16>, vector<288x128xf32> -> vector<288x128xf32>
    %52 = arith.addf %48, %51 : vector<288x128xf32>
    %c0_56 = arith.constant 0 : index
    %c0_57 = arith.constant 0 : index
    %53 = vector.load %arg8[%c0_56, %c0_57] : memref<288x128xf32, #tpu.memory_space<vmem>>, vector<288x128xf32>
    tpu.vector_store %arg8[%c0_56, %c0_57], %52 {strides = array<i32>} : memref<288x128xf32, #tpu.memory_space<vmem>>, vector<288x128xf32>,
    %c36 = arith.constant 36 : index
    %c0_58 = arith.constant 0 : index
    %54 = vector.load %arg7[%c36, %c0_58] : memref<342x4xf32, #tpu.memory_space<vmem>>, vector<288x4xf32>
    %55 = arith.truncf %54 : vector<288x4xf32> to vector<288x4xbf16>
    %c0_59 = arith.constant 0 : index
    %c0_60 = arith.constant 0 : index
    %56 = vector.load %arg8[%c0_59, %c0_60] : memref<288x128xf32, #tpu.memory_space<vmem>>, vector<288x128xf32>
    %c6 = arith.constant 6 : index
    %c0_61 = arith.constant 0 : index
    %c0_62 = arith.constant 0 : index
    %57 = vector.load %arg2[%c6, %c0_61, %c0_62] : memref<9x4x128xbf16, #tpu.memory_space<vmem>>, vector<1x4x128xbf16>
    %58 = vector.shape_cast %57 : vector<1x4x128xbf16> to vector<4x128xbf16>
    %cst_63 = arith.constant dense<0.000000e+00> : vector<288x128xf32>
    %59 = tpu.matmul %55, %58, %cst_63 {dimension_numbers = #tpu.dot_dimension_numbers<[1], [0], [0], [1], [0, 0, 1, 1], [], []>} : vector<288x4xbf16>, vector<4x128xbf16>, vector<288x128xf32> -> vector<288x128xf32>
    %60 = arith.addf %56, %59 : vector<288x128xf32>
    %c0_64 = arith.constant 0 : index
    %c0_65 = arith.constant 0 : index
    %61 = vector.load %arg8[%c0_64, %c0_65] : memref<288x128xf32, #tpu.memory_space<vmem>>, vector<288x128xf32>
    tpu.vector_store %arg8[%c0_64, %c0_65], %60 {strides = array<i32>} : memref<288x128xf32, #tpu.memory_space<vmem>>, vector<288x128xf32>,
    %c37 = arith.constant 37 : index
    %c0_66 = arith.constant 0 : index
    %62 = vector.load %arg7[%c37, %c0_66] : memref<342x4xf32, #tpu.memory_space<vmem>>, vector<288x4xf32>
    %63 = arith.truncf %62 : vector<288x4xf32> to vector<288x4xbf16>
    %c0_67 = arith.constant 0 : index
    %c0_68 = arith.constant 0 : index
    %64 = vector.load %arg8[%c0_67, %c0_68] : memref<288x128xf32, #tpu.memory_space<vmem>>, vector<288x128xf32>
    %c7 = arith.constant 7 : index
    %c0_69 = arith.constant 0 : index
    %c0_70 = arith.constant 0 : index
    %65 = vector.load %arg2[%c7, %c0_69, %c0_70] : memref<9x4x128xbf16, #tpu.memory_space<vmem>>, vector<1x4x128xbf16>
    %66 = vector.shape_cast %65 : vector<1x4x128xbf16> to vector<4x128xbf16>
    %cst_71 = arith.constant dense<0.000000e+00> : vector<288x128xf32>
    %67 = tpu.matmul %63, %66, %cst_71 {dimension_numbers = #tpu.dot_dimension_numbers<[1], [0], [0], [1], [0, 0, 1, 1], [], []>} : vector<288x4xbf16>, vector<4x128xbf16>, vector<288x128xf32> -> vector<288x128xf32>
    %68 = arith.addf %64, %67 : vector<288x128xf32>
    %c0_72 = arith.constant 0 : index
    %c0_73 = arith.constant 0 : index
    %69 = vector.load %arg8[%c0_72, %c0_73] : memref<288x128xf32, #tpu.memory_space<vmem>>, vector<288x128xf32>
    tpu.vector_store %arg8[%c0_72, %c0_73], %68 {strides = array<i32>} : memref<288x128xf32, #tpu.memory_space<vmem>>, vector<288x128xf32>,
    %c38 = arith.constant 38 : index
    %c0_74 = arith.constant 0 : index
    %70 = vector.load %arg7[%c38, %c0_74] : memref<342x4xf32, #tpu.memory_space<vmem>>, vector<288x4xf32>
    %71 = arith.truncf %70 : vector<288x4xf32> to vector<288x4xbf16>
    %c0_75 = arith.constant 0 : index
    %c0_76 = arith.constant 0 : index
    %72 = vector.load %arg8[%c0_75, %c0_76] : memref<288x128xf32, #tpu.memory_space<vmem>>, vector<288x128xf32>
    %c8 = arith.constant 8 : index
    %c0_77 = arith.constant 0 : index
    %c0_78 = arith.constant 0 : index
    %73 = vector.load %arg2[%c8, %c0_77, %c0_78] : memref<9x4x128xbf16, #tpu.memory_space<vmem>>, vector<1x4x128xbf16>
    %74 = vector.shape_cast %73 : vector<1x4x128xbf16> to vector<4x128xbf16>
    %cst_79 = arith.constant dense<0.000000e+00> : vector<288x128xf32>
    %75 = tpu.matmul %71, %74, %cst_79 {dimension_numbers = #tpu.dot_dimension_numbers<[1], [0], [0], [1], [0, 0, 1, 1], [], []>} : vector<288x4xbf16>, vector<4x128xbf16>, vector<288x128xf32> -> vector<288x128xf32>
    %76 = arith.addf %72, %75 : vector<288x128xf32>
    %c0_80 = arith.constant 0 : index
    %c0_81 = arith.constant 0 : index
    %77 = vector.load %arg8[%c0_80, %c0_81] : memref<288x128xf32, #tpu.memory_space<vmem>>, vector<288x128xf32>
    tpu.vector_store %arg8[%c0_80, %c0_81], %76 {strides = array<i32>} : memref<288x128xf32, #tpu.memory_space<vmem>>, vector<288x128xf32>,
    %c0_82 = arith.constant 0 : index
    %c0_83 = arith.constant 0 : index
    %78 = vector.load %arg8[%c0_82, %c0_83] : memref<288x128xf32, #tpu.memory_space<vmem>>, vector<288x128xf32>
    %79 = arith.truncf %78 : vector<288x128xf32> to vector<288x128xbf16>
    %c0_84 = arith.constant 0 : index
    %c0_85 = arith.constant 0 : index
    %c0_86 = arith.constant 0 : index
    %80 = vector.load %arg4[%c0_84, %c0_85, %c0_86] : memref<1x288x128xbf16, #tpu.memory_space<vmem>>, vector<1x288x128xbf16>
    %81 = vector.shape_cast %80 : vector<1x288x128xbf16> to vector<288x128xbf16>
    %82 = vector.shape_cast %79 : vector<288x128xbf16> to vector<1x288x128xbf16>
    tpu.vector_store %arg4[%c0_84, %c0_85, %c0_86], %82 {strides = array<i32>} : memref<1x288x128xbf16, #tpu.memory_space<vmem>>, vector<1x288x128xbf16>,
    %c0_87 = arith.constant 0 : index
    %c0_88 = arith.constant 0 : index
    %83 = vector.load %arg3[%c0_87, %c0_88] : memref<288x1xf32, #tpu.memory_space<vmem>>, vector<288x1xf32>
    %84 = vector.broadcast %83 : vector<288x1xf32> to vector<288x128xf32>
    %85 = arith.mulf %78, %84 : vector<288x128xf32>
    %cst_89 = arith.constant dense<0.000000e+00> : vector<128xf32>
    %86 = vector.multi_reduction <add>, %85, %cst_89 [0] : vector<288x128xf32> to vector<128xf32>
    %87 = vector.shape_cast %86 : vector<128xf32> to vector<1x128xf32>
    %88 = arith.mulf %85, %78 : vector<288x128xf32>
    %cst_90 = arith.constant dense<0.000000e+00> : vector<128xf32>
    %89 = vector.multi_reduction <add>, %88, %cst_90 [0] : vector<288x128xf32> to vector<128xf32>
    %90 = vector.shape_cast %89 : vector<128xf32> to vector<1x128xf32>
    %cst_91 = arith.constant 0.000000e+00 : f32
    %91 = vector.broadcast %cst_91 : f32 to vector<7x128xf32>
    %92 = tpu.concatenate %87, %91 in 0 : vector<1x128xf32>, vector<7x128xf32> -> vector<8x128xf32>
    %c0_92 = arith.constant 0 : index
    %c0_93 = arith.constant 0 : index
    %93 = vector.load %arg5[%c0_92, %c0_93] : memref<8x128xf32, #tpu.memory_space<vmem>>, vector<8x128xf32>
    tpu.vector_store %arg5[%c0_92, %c0_93], %92 {strides = array<i32>} : memref<8x128xf32, #tpu.memory_space<vmem>>, vector<8x128xf32>,
    %94 = tpu.concatenate %90, %91 in 0 : vector<1x128xf32>, vector<7x128xf32> -> vector<8x128xf32>
    %c0_94 = arith.constant 0 : index
    %c0_95 = arith.constant 0 : index
    %95 = vector.load %arg6[%c0_94, %c0_95] : memref<8x128xf32, #tpu.memory_space<vmem>>, vector<8x128xf32>
    tpu.vector_store %arg6[%c0_94, %c0_95], %94 {strides = array<i32>} : memref<8x128xf32, #tpu.memory_space<vmem>>, vector<8x128xf32>,
    return
  }
  func.func @transform_0(%arg0: i32) -> (i32, i32, i32) {
    %c0_i32 = arith.constant 0 : i32
    %c0_i32_0 = arith.constant 0 : i32
    %c0_i32_1 = arith.constant 0 : i32
    return %arg0, %c0_i32, %c0_i32_0 : i32, i32, i32
  }
  func.func @transform_1(%arg0: i32) -> (i32, i32, i32) {
    %c0_i32 = arith.constant 0 : i32
    %c0_i32_0 = arith.constant 0 : i32
    %c0_i32_1 = arith.constant 0 : i32
    %c0_i32_2 = arith.constant 0 : i32
    return %c0_i32, %c0_i32_0, %c0_i32_1 : i32, i32, i32
  }
  func.func @transform_2(%arg0: i32) -> (i32, i32) {
    %c0_i32 = arith.constant 0 : i32
    %c0_i32_0 = arith.constant 0 : i32
    %c0_i32_1 = arith.constant 0 : i32
    return %c0_i32, %c0_i32_0 : i32, i32
  }
  func.func @transform_3(%arg0: i32) -> (i32, i32, i32) {
    %c0_i32 = arith.constant 0 : i32
    %c0_i32_0 = arith.constant 0 : i32
    %c0_i32_1 = arith.constant 0 : i32
    return %arg0, %c0_i32, %c0_i32_0 : i32, i32, i32
  }
  func.func @transform_4(%arg0: i32) -> (i32, i32) {
    %c0_i32 = arith.constant 0 : i32
    %c0_i32_0 = arith.constant 0 : i32
    return %arg0, %c0_i32 : i32, i32
  }
  func.func @transform_5(%arg0: i32) -> (i32, i32) {
    %c0_i32 = arith.constant 0 : i32
    %c0_i32_0 = arith.constant 0 : i32
    return %arg0, %c0_i32 : i32, i32
  }
}

module attributes {stable_mosaic.version = 11 : i64} {
  func.func @kernel(%arg0: i32, %arg1: memref<1x288x128xbf16, #tpu.memory_space<vmem>>, %arg2: memref<16x128xf32, #tpu.memory_space<vmem>>, %arg3: memref<16x128xf32, #tpu.memory_space<vmem>>, %arg4: memref<1x128xf32, #tpu.memory_space<vmem>>, %arg5: memref<1x128xf32, #tpu.memory_space<vmem>>, %arg6: memref<1x288x8xbf16, #tpu.memory_space<vmem>>) attributes {dimension_semantics = [#tpu.dimension_semantics<parallel>], iteration_bounds = array<i64: 2>, scalar_prefetch = 0 : i64, scratch_operands = 0 : i64, tpu.core_type = #tpu.core_type<tc>, window_params = [{transform_indices = @transform_0, window_bounds = array<i64: 1, 288, 128>}, {pipeline_mode = #tpu.pipeline_mode<synchronous>, transform_indices = @transform_1, window_bounds = array<i64: 16, 128>}, {pipeline_mode = #tpu.pipeline_mode<synchronous>, transform_indices = @transform_2, window_bounds = array<i64: 16, 128>}, {pipeline_mode = #tpu.pipeline_mode<synchronous>, transform_indices = @transform_3, window_bounds = array<i64: 1, 128>}, {pipeline_mode = #tpu.pipeline_mode<synchronous>, transform_indices = @transform_4, window_bounds = array<i64: 1, 128>}, {transform_indices = @transform_5, window_bounds = array<i64: 1, 288, 8>}]} {
    %c0 = arith.constant 0 : index
    %c0_0 = arith.constant 0 : index
    %0 = vector.load %arg2[%c0, %c0_0] : memref<16x128xf32, #tpu.memory_space<vmem>>, vector<16x128xf32>
    %cst = arith.constant dense<0.000000e+00> : vector<128xf32>
    %1 = vector.multi_reduction <add>, %0, %cst [0] : vector<16x128xf32> to vector<128xf32>
    %2 = vector.shape_cast %1 : vector<128xf32> to vector<1x128xf32>
    %c0_1 = arith.constant 0 : index
    %c0_2 = arith.constant 0 : index
    %3 = vector.load %arg3[%c0_1, %c0_2] : memref<16x128xf32, #tpu.memory_space<vmem>>, vector<16x128xf32>
    %cst_3 = arith.constant dense<0.000000e+00> : vector<128xf32>
    %4 = vector.multi_reduction <add>, %3, %cst_3 [0] : vector<16x128xf32> to vector<128xf32>
    %5 = vector.shape_cast %4 : vector<128xf32> to vector<1x128xf32>
    %cst_4 = arith.constant 0.001953125 : f32
    %6 = vector.broadcast %cst_4 : f32 to vector<1x128xf32>
    %7 = arith.mulf %2, %6 : vector<1x128xf32>
    %cst_5 = arith.constant 0.001953125 : f32
    %8 = vector.broadcast %cst_5 : f32 to vector<1x128xf32>
    %9 = arith.mulf %5, %8 : vector<1x128xf32>
    %10 = arith.mulf %7, %7 : vector<1x128xf32>
    %11 = arith.subf %9, %10 : vector<1x128xf32>
    %cst_6 = arith.constant 0.000000e+00 : f32
    %12 = vector.broadcast %cst_6 : f32 to vector<1x128xf32>
    %13 = arith.maximumf %11, %12 : vector<1x128xf32>
    %c0_7 = arith.constant 0 : index
    %c0_8 = arith.constant 0 : index
    %14 = vector.load %arg4[%c0_7, %c0_8] : memref<1x128xf32, #tpu.memory_space<vmem>>, vector<1x128xf32>
    %cst_9 = arith.constant 9.99999974E-6 : f32
    %15 = vector.broadcast %cst_9 : f32 to vector<1x128xf32>
    %16 = arith.addf %13, %15 : vector<1x128xf32>
    %17 = math.rsqrt %16 : vector<1x128xf32>
    %18 = arith.mulf %14, %17 : vector<1x128xf32>
    %c0_10 = arith.constant 0 : index
    %c0_11 = arith.constant 0 : index
    %19 = vector.load %arg5[%c0_10, %c0_11] : memref<1x128xf32, #tpu.memory_space<vmem>>, vector<1x128xf32>
    %20 = arith.mulf %7, %18 : vector<1x128xf32>
    %21 = arith.subf %19, %20 : vector<1x128xf32>
    %c0_12 = arith.constant 0 : index
    %c0_13 = arith.constant 0 : index
    %c0_14 = arith.constant 0 : index
    %22 = vector.load %arg1[%c0_12, %c0_13, %c0_14] : memref<1x288x128xbf16, #tpu.memory_space<vmem>>, vector<1x288x128xbf16>
    %23 = vector.shape_cast %22 : vector<1x288x128xbf16> to vector<288x128xbf16>
    %24 = arith.extf %23 : vector<288x128xbf16> to vector<288x128xf32>
    %25 = vector.broadcast %18 : vector<1x128xf32> to vector<288x128xf32>
    %26 = arith.mulf %24, %25 : vector<288x128xf32>
    %27 = vector.broadcast %21 : vector<1x128xf32> to vector<288x128xf32>
    %28 = arith.addf %26, %27 : vector<288x128xf32>
    %cst_15 = arith.constant 0.000000e+00 : f32
    %29 = vector.broadcast %cst_15 : f32 to vector<288x128xf32>
    %30 = arith.maximumf %28, %29 : vector<288x128xf32>
    %31 = vector.extract_strided_slice %30 {offsets = [0, 0], sizes = [288, 8], strides = [1, 1]} : vector<288x128xf32> to vector<288x8xf32>
    %32 = arith.truncf %31 : vector<288x8xf32> to vector<288x8xbf16>
    %c0_16 = arith.constant 0 : index
    %c0_17 = arith.constant 0 : index
    %c0_18 = arith.constant 0 : index
    %33 = vector.load %arg6[%c0_16, %c0_17, %c0_18] : memref<1x288x8xbf16, #tpu.memory_space<vmem>>, vector<1x288x8xbf16>
    %34 = vector.shape_cast %33 : vector<1x288x8xbf16> to vector<288x8xbf16>
    %35 = vector.shape_cast %32 : vector<288x8xbf16> to vector<1x288x8xbf16>
    tpu.vector_store %arg6[%c0_16, %c0_17, %c0_18], %35 {strides = array<i32>} : memref<1x288x8xbf16, #tpu.memory_space<vmem>>, vector<1x288x8xbf16>,
    return
  }
  func.func @transform_0(%arg0: i32) -> (i32, i32, i32) {
    %c0_i32 = arith.constant 0 : i32
    %c0_i32_0 = arith.constant 0 : i32
    %c0_i32_1 = arith.constant 0 : i32
    return %arg0, %c0_i32, %c0_i32_0 : i32, i32, i32
  }
  func.func @transform_1(%arg0: i32) -> (i32, i32) {
    %c0_i32 = arith.constant 0 : i32
    %c0_i32_0 = arith.constant 0 : i32
    %c0_i32_1 = arith.constant 0 : i32
    return %c0_i32, %c0_i32_0 : i32, i32
  }
  func.func @transform_2(%arg0: i32) -> (i32, i32) {
    %c0_i32 = arith.constant 0 : i32
    %c0_i32_0 = arith.constant 0 : i32
    %c0_i32_1 = arith.constant 0 : i32
    return %c0_i32, %c0_i32_0 : i32, i32
  }
  func.func @transform_3(%arg0: i32) -> (i32, i32) {
    %c0_i32 = arith.constant 0 : i32
    %c0_i32_0 = arith.constant 0 : i32
    %c0_i32_1 = arith.constant 0 : i32
    return %c0_i32, %c0_i32_0 : i32, i32
  }
  func.func @transform_4(%arg0: i32) -> (i32, i32) {
    %c0_i32 = arith.constant 0 : i32
    %c0_i32_0 = arith.constant 0 : i32
    %c0_i32_1 = arith.constant 0 : i32
    return %c0_i32, %c0_i32_0 : i32, i32
  }
  func.func @transform_5(%arg0: i32) -> (i32, i32, i32) {
    %c0_i32 = arith.constant 0 : i32
    %c0_i32_0 = arith.constant 0 : i32
    %c0_i32_1 = arith.constant 0 : i32
    return %arg0, %c0_i32, %c0_i32_0 : i32, i32, i32
  }
}

module attributes {stable_mosaic.version = 11 : i64} {
  func.func @kernel(%arg0: i32, %arg1: memref<1x342x8xbf16, #tpu.memory_space<vmem>>, %arg2: memref<9x8x128xbf16, #tpu.memory_space<vmem>>, %arg3: memref<288x1xf32, #tpu.memory_space<vmem>>, %arg4: memref<1x288x128xbf16, #tpu.memory_space<vmem>>, %arg5: memref<8x128xf32, #tpu.memory_space<vmem>>, %arg6: memref<8x128xf32, #tpu.memory_space<vmem>>, %arg7: memref<342x8xf32, #tpu.memory_space<vmem>>, %arg8: memref<288x128xf32, #tpu.memory_space<vmem>>) attributes {dimension_semantics = [#tpu.dimension_semantics<parallel>], iteration_bounds = array<i64: 2>, scalar_prefetch = 0 : i64, scratch_operands = 2 : i64, tpu.core_type = #tpu.core_type<tc>, window_params = [{transform_indices = @transform_0, window_bounds = array<i64: 1, 342, 8>}, {pipeline_mode = #tpu.pipeline_mode<synchronous>, transform_indices = @transform_1, window_bounds = array<i64: 9, 8, 128>}, {pipeline_mode = #tpu.pipeline_mode<synchronous>, transform_indices = @transform_2, window_bounds = array<i64: 288, 1>}, {transform_indices = @transform_3, window_bounds = array<i64: 1, 288, 128>}, {transform_indices = @transform_4, window_bounds = array<i64: 8, 128>}, {transform_indices = @transform_5, window_bounds = array<i64: 8, 128>}]} {
    %c0 = arith.constant 0 : index
    %c0_0 = arith.constant 0 : index
    %c0_1 = arith.constant 0 : index
    %0 = vector.load %arg1[%c0, %c0_0, %c0_1] : memref<1x342x8xbf16, #tpu.memory_space<vmem>>, vector<1x342x8xbf16>
    %1 = vector.shape_cast %0 : vector<1x342x8xbf16> to vector<342x8xbf16>
    %2 = arith.extf %1 : vector<342x8xbf16> to vector<342x8xf32>
    %c0_2 = arith.constant 0 : index
    %c0_3 = arith.constant 0 : index
    %3 = vector.load %arg7[%c0_2, %c0_3] : memref<342x8xf32, #tpu.memory_space<vmem>>, vector<342x8xf32>
    tpu.vector_store %arg7[%c0_2, %c0_3], %2 {strides = array<i32>} : memref<342x8xf32, #tpu.memory_space<vmem>>, vector<342x8xf32>,
    %cst = arith.constant 0.000000e+00 : f32
    %4 = vector.broadcast %cst : f32 to vector<288x128xf32>
    %c0_4 = arith.constant 0 : index
    %c0_5 = arith.constant 0 : index
    %5 = vector.load %arg8[%c0_4, %c0_5] : memref<288x128xf32, #tpu.memory_space<vmem>>, vector<288x128xf32>
    tpu.vector_store %arg8[%c0_4, %c0_5], %4 {strides = array<i32>} : memref<288x128xf32, #tpu.memory_space<vmem>>, vector<288x128xf32>,
    %c0_6 = arith.constant 0 : index
    %c0_7 = arith.constant 0 : index
    %6 = vector.load %arg7[%c0_6, %c0_7] : memref<342x8xf32, #tpu.memory_space<vmem>>, vector<288x8xf32>
    %7 = arith.truncf %6 : vector<288x8xf32> to vector<288x8xbf16>
    %c0_8 = arith.constant 0 : index
    %c0_9 = arith.constant 0 : index
    %8 = vector.load %arg8[%c0_8, %c0_9] : memref<288x128xf32, #tpu.memory_space<vmem>>, vector<288x128xf32>
    %c0_10 = arith.constant 0 : index
    %c0_11 = arith.constant 0 : index
    %c0_12 = arith.constant 0 : index
    %9 = vector.load %arg2[%c0_10, %c0_11, %c0_12] : memref<9x8x128xbf16, #tpu.memory_space<vmem>>, vector<1x8x128xbf16>
    %10 = vector.shape_cast %9 : vector<1x8x128xbf16> to vector<8x128xbf16>
    %cst_13 = arith.constant dense<0.000000e+00> : vector<288x128xf32>
    %11 = tpu.matmul %7, %10, %cst_13 {dimension_numbers = #tpu.dot_dimension_numbers<[1], [0], [0], [1], [0, 0, 1, 1], [], []>} : vector<288x8xbf16>, vector<8x128xbf16>, vector<288x128xf32> -> vector<288x128xf32>
    %12 = arith.addf %8, %11 : vector<288x128xf32>
    %c0_14 = arith.constant 0 : index
    %c0_15 = arith.constant 0 : index
    %13 = vector.load %arg8[%c0_14, %c0_15] : memref<288x128xf32, #tpu.memory_space<vmem>>, vector<288x128xf32>
    tpu.vector_store %arg8[%c0_14, %c0_15], %12 {strides = array<i32>} : memref<288x128xf32, #tpu.memory_space<vmem>>, vector<288x128xf32>,
    %c1 = arith.constant 1 : index
    %c0_16 = arith.constant 0 : index
    %14 = vector.load %arg7[%c1, %c0_16] : memref<342x8xf32, #tpu.memory_space<vmem>>, vector<288x8xf32>
    %15 = arith.truncf %14 : vector<288x8xf32> to vector<288x8xbf16>
    %c0_17 = arith.constant 0 : index
    %c0_18 = arith.constant 0 : index
    %16 = vector.load %arg8[%c0_17, %c0_18] : memref<288x128xf32, #tpu.memory_space<vmem>>, vector<288x128xf32>
    %c1_19 = arith.constant 1 : index
    %c0_20 = arith.constant 0 : index
    %c0_21 = arith.constant 0 : index
    %17 = vector.load %arg2[%c1_19, %c0_20, %c0_21] : memref<9x8x128xbf16, #tpu.memory_space<vmem>>, vector<1x8x128xbf16>
    %18 = vector.shape_cast %17 : vector<1x8x128xbf16> to vector<8x128xbf16>
    %cst_22 = arith.constant dense<0.000000e+00> : vector<288x128xf32>
    %19 = tpu.matmul %15, %18, %cst_22 {dimension_numbers = #tpu.dot_dimension_numbers<[1], [0], [0], [1], [0, 0, 1, 1], [], []>} : vector<288x8xbf16>, vector<8x128xbf16>, vector<288x128xf32> -> vector<288x128xf32>
    %20 = arith.addf %16, %19 : vector<288x128xf32>
    %c0_23 = arith.constant 0 : index
    %c0_24 = arith.constant 0 : index
    %21 = vector.load %arg8[%c0_23, %c0_24] : memref<288x128xf32, #tpu.memory_space<vmem>>, vector<288x128xf32>
    tpu.vector_store %arg8[%c0_23, %c0_24], %20 {strides = array<i32>} : memref<288x128xf32, #tpu.memory_space<vmem>>, vector<288x128xf32>,
    %c2 = arith.constant 2 : index
    %c0_25 = arith.constant 0 : index
    %22 = vector.load %arg7[%c2, %c0_25] : memref<342x8xf32, #tpu.memory_space<vmem>>, vector<288x8xf32>
    %23 = arith.truncf %22 : vector<288x8xf32> to vector<288x8xbf16>
    %c0_26 = arith.constant 0 : index
    %c0_27 = arith.constant 0 : index
    %24 = vector.load %arg8[%c0_26, %c0_27] : memref<288x128xf32, #tpu.memory_space<vmem>>, vector<288x128xf32>
    %c2_28 = arith.constant 2 : index
    %c0_29 = arith.constant 0 : index
    %c0_30 = arith.constant 0 : index
    %25 = vector.load %arg2[%c2_28, %c0_29, %c0_30] : memref<9x8x128xbf16, #tpu.memory_space<vmem>>, vector<1x8x128xbf16>
    %26 = vector.shape_cast %25 : vector<1x8x128xbf16> to vector<8x128xbf16>
    %cst_31 = arith.constant dense<0.000000e+00> : vector<288x128xf32>
    %27 = tpu.matmul %23, %26, %cst_31 {dimension_numbers = #tpu.dot_dimension_numbers<[1], [0], [0], [1], [0, 0, 1, 1], [], []>} : vector<288x8xbf16>, vector<8x128xbf16>, vector<288x128xf32> -> vector<288x128xf32>
    %28 = arith.addf %24, %27 : vector<288x128xf32>
    %c0_32 = arith.constant 0 : index
    %c0_33 = arith.constant 0 : index
    %29 = vector.load %arg8[%c0_32, %c0_33] : memref<288x128xf32, #tpu.memory_space<vmem>>, vector<288x128xf32>
    tpu.vector_store %arg8[%c0_32, %c0_33], %28 {strides = array<i32>} : memref<288x128xf32, #tpu.memory_space<vmem>>, vector<288x128xf32>,
    %c18 = arith.constant 18 : index
    %c0_34 = arith.constant 0 : index
    %30 = vector.load %arg7[%c18, %c0_34] : memref<342x8xf32, #tpu.memory_space<vmem>>, vector<288x8xf32>
    %31 = arith.truncf %30 : vector<288x8xf32> to vector<288x8xbf16>
    %c0_35 = arith.constant 0 : index
    %c0_36 = arith.constant 0 : index
    %32 = vector.load %arg8[%c0_35, %c0_36] : memref<288x128xf32, #tpu.memory_space<vmem>>, vector<288x128xf32>
    %c3 = arith.constant 3 : index
    %c0_37 = arith.constant 0 : index
    %c0_38 = arith.constant 0 : index
    %33 = vector.load %arg2[%c3, %c0_37, %c0_38] : memref<9x8x128xbf16, #tpu.memory_space<vmem>>, vector<1x8x128xbf16>
    %34 = vector.shape_cast %33 : vector<1x8x128xbf16> to vector<8x128xbf16>
    %cst_39 = arith.constant dense<0.000000e+00> : vector<288x128xf32>
    %35 = tpu.matmul %31, %34, %cst_39 {dimension_numbers = #tpu.dot_dimension_numbers<[1], [0], [0], [1], [0, 0, 1, 1], [], []>} : vector<288x8xbf16>, vector<8x128xbf16>, vector<288x128xf32> -> vector<288x128xf32>
    %36 = arith.addf %32, %35 : vector<288x128xf32>
    %c0_40 = arith.constant 0 : index
    %c0_41 = arith.constant 0 : index
    %37 = vector.load %arg8[%c0_40, %c0_41] : memref<288x128xf32, #tpu.memory_space<vmem>>, vector<288x128xf32>
    tpu.vector_store %arg8[%c0_40, %c0_41], %36 {strides = array<i32>} : memref<288x128xf32, #tpu.memory_space<vmem>>, vector<288x128xf32>,
    %c19 = arith.constant 19 : index
    %c0_42 = arith.constant 0 : index
    %38 = vector.load %arg7[%c19, %c0_42] : memref<342x8xf32, #tpu.memory_space<vmem>>, vector<288x8xf32>
    %39 = arith.truncf %38 : vector<288x8xf32> to vector<288x8xbf16>
    %c0_43 = arith.constant 0 : index
    %c0_44 = arith.constant 0 : index
    %40 = vector.load %arg8[%c0_43, %c0_44] : memref<288x128xf32, #tpu.memory_space<vmem>>, vector<288x128xf32>
    %c4 = arith.constant 4 : index
    %c0_45 = arith.constant 0 : index
    %c0_46 = arith.constant 0 : index
    %41 = vector.load %arg2[%c4, %c0_45, %c0_46] : memref<9x8x128xbf16, #tpu.memory_space<vmem>>, vector<1x8x128xbf16>
    %42 = vector.shape_cast %41 : vector<1x8x128xbf16> to vector<8x128xbf16>
    %cst_47 = arith.constant dense<0.000000e+00> : vector<288x128xf32>
    %43 = tpu.matmul %39, %42, %cst_47 {dimension_numbers = #tpu.dot_dimension_numbers<[1], [0], [0], [1], [0, 0, 1, 1], [], []>} : vector<288x8xbf16>, vector<8x128xbf16>, vector<288x128xf32> -> vector<288x128xf32>
    %44 = arith.addf %40, %43 : vector<288x128xf32>
    %c0_48 = arith.constant 0 : index
    %c0_49 = arith.constant 0 : index
    %45 = vector.load %arg8[%c0_48, %c0_49] : memref<288x128xf32, #tpu.memory_space<vmem>>, vector<288x128xf32>
    tpu.vector_store %arg8[%c0_48, %c0_49], %44 {strides = array<i32>} : memref<288x128xf32, #tpu.memory_space<vmem>>, vector<288x128xf32>,
    %c20 = arith.constant 20 : index
    %c0_50 = arith.constant 0 : index
    %46 = vector.load %arg7[%c20, %c0_50] : memref<342x8xf32, #tpu.memory_space<vmem>>, vector<288x8xf32>
    %47 = arith.truncf %46 : vector<288x8xf32> to vector<288x8xbf16>
    %c0_51 = arith.constant 0 : index
    %c0_52 = arith.constant 0 : index
    %48 = vector.load %arg8[%c0_51, %c0_52] : memref<288x128xf32, #tpu.memory_space<vmem>>, vector<288x128xf32>
    %c5 = arith.constant 5 : index
    %c0_53 = arith.constant 0 : index
    %c0_54 = arith.constant 0 : index
    %49 = vector.load %arg2[%c5, %c0_53, %c0_54] : memref<9x8x128xbf16, #tpu.memory_space<vmem>>, vector<1x8x128xbf16>
    %50 = vector.shape_cast %49 : vector<1x8x128xbf16> to vector<8x128xbf16>
    %cst_55 = arith.constant dense<0.000000e+00> : vector<288x128xf32>
    %51 = tpu.matmul %47, %50, %cst_55 {dimension_numbers = #tpu.dot_dimension_numbers<[1], [0], [0], [1], [0, 0, 1, 1], [], []>} : vector<288x8xbf16>, vector<8x128xbf16>, vector<288x128xf32> -> vector<288x128xf32>
    %52 = arith.addf %48, %51 : vector<288x128xf32>
    %c0_56 = arith.constant 0 : index
    %c0_57 = arith.constant 0 : index
    %53 = vector.load %arg8[%c0_56, %c0_57] : memref<288x128xf32, #tpu.memory_space<vmem>>, vector<288x128xf32>
    tpu.vector_store %arg8[%c0_56, %c0_57], %52 {strides = array<i32>} : memref<288x128xf32, #tpu.memory_space<vmem>>, vector<288x128xf32>,
    %c36 = arith.constant 36 : index
    %c0_58 = arith.constant 0 : index
    %54 = vector.load %arg7[%c36, %c0_58] : memref<342x8xf32, #tpu.memory_space<vmem>>, vector<288x8xf32>
    %55 = arith.truncf %54 : vector<288x8xf32> to vector<288x8xbf16>
    %c0_59 = arith.constant 0 : index
    %c0_60 = arith.constant 0 : index
    %56 = vector.load %arg8[%c0_59, %c0_60] : memref<288x128xf32, #tpu.memory_space<vmem>>, vector<288x128xf32>
    %c6 = arith.constant 6 : index
    %c0_61 = arith.constant 0 : index
    %c0_62 = arith.constant 0 : index
    %57 = vector.load %arg2[%c6, %c0_61, %c0_62] : memref<9x8x128xbf16, #tpu.memory_space<vmem>>, vector<1x8x128xbf16>
    %58 = vector.shape_cast %57 : vector<1x8x128xbf16> to vector<8x128xbf16>
    %cst_63 = arith.constant dense<0.000000e+00> : vector<288x128xf32>
    %59 = tpu.matmul %55, %58, %cst_63 {dimension_numbers = #tpu.dot_dimension_numbers<[1], [0], [0], [1], [0, 0, 1, 1], [], []>} : vector<288x8xbf16>, vector<8x128xbf16>, vector<288x128xf32> -> vector<288x128xf32>
    %60 = arith.addf %56, %59 : vector<288x128xf32>
    %c0_64 = arith.constant 0 : index
    %c0_65 = arith.constant 0 : index
    %61 = vector.load %arg8[%c0_64, %c0_65] : memref<288x128xf32, #tpu.memory_space<vmem>>, vector<288x128xf32>
    tpu.vector_store %arg8[%c0_64, %c0_65], %60 {strides = array<i32>} : memref<288x128xf32, #tpu.memory_space<vmem>>, vector<288x128xf32>,
    %c37 = arith.constant 37 : index
    %c0_66 = arith.constant 0 : index
    %62 = vector.load %arg7[%c37, %c0_66] : memref<342x8xf32, #tpu.memory_space<vmem>>, vector<288x8xf32>
    %63 = arith.truncf %62 : vector<288x8xf32> to vector<288x8xbf16>
    %c0_67 = arith.constant 0 : index
    %c0_68 = arith.constant 0 : index
    %64 = vector.load %arg8[%c0_67, %c0_68] : memref<288x128xf32, #tpu.memory_space<vmem>>, vector<288x128xf32>
    %c7 = arith.constant 7 : index
    %c0_69 = arith.constant 0 : index
    %c0_70 = arith.constant 0 : index
    %65 = vector.load %arg2[%c7, %c0_69, %c0_70] : memref<9x8x128xbf16, #tpu.memory_space<vmem>>, vector<1x8x128xbf16>
    %66 = vector.shape_cast %65 : vector<1x8x128xbf16> to vector<8x128xbf16>
    %cst_71 = arith.constant dense<0.000000e+00> : vector<288x128xf32>
    %67 = tpu.matmul %63, %66, %cst_71 {dimension_numbers = #tpu.dot_dimension_numbers<[1], [0], [0], [1], [0, 0, 1, 1], [], []>} : vector<288x8xbf16>, vector<8x128xbf16>, vector<288x128xf32> -> vector<288x128xf32>
    %68 = arith.addf %64, %67 : vector<288x128xf32>
    %c0_72 = arith.constant 0 : index
    %c0_73 = arith.constant 0 : index
    %69 = vector.load %arg8[%c0_72, %c0_73] : memref<288x128xf32, #tpu.memory_space<vmem>>, vector<288x128xf32>
    tpu.vector_store %arg8[%c0_72, %c0_73], %68 {strides = array<i32>} : memref<288x128xf32, #tpu.memory_space<vmem>>, vector<288x128xf32>,
    %c38 = arith.constant 38 : index
    %c0_74 = arith.constant 0 : index
    %70 = vector.load %arg7[%c38, %c0_74] : memref<342x8xf32, #tpu.memory_space<vmem>>, vector<288x8xf32>
    %71 = arith.truncf %70 : vector<288x8xf32> to vector<288x8xbf16>
    %c0_75 = arith.constant 0 : index
    %c0_76 = arith.constant 0 : index
    %72 = vector.load %arg8[%c0_75, %c0_76] : memref<288x128xf32, #tpu.memory_space<vmem>>, vector<288x128xf32>
    %c8 = arith.constant 8 : index
    %c0_77 = arith.constant 0 : index
    %c0_78 = arith.constant 0 : index
    %73 = vector.load %arg2[%c8, %c0_77, %c0_78] : memref<9x8x128xbf16, #tpu.memory_space<vmem>>, vector<1x8x128xbf16>
    %74 = vector.shape_cast %73 : vector<1x8x128xbf16> to vector<8x128xbf16>
    %cst_79 = arith.constant dense<0.000000e+00> : vector<288x128xf32>
    %75 = tpu.matmul %71, %74, %cst_79 {dimension_numbers = #tpu.dot_dimension_numbers<[1], [0], [0], [1], [0, 0, 1, 1], [], []>} : vector<288x8xbf16>, vector<8x128xbf16>, vector<288x128xf32> -> vector<288x128xf32>
    %76 = arith.addf %72, %75 : vector<288x128xf32>
    %c0_80 = arith.constant 0 : index
    %c0_81 = arith.constant 0 : index
    %77 = vector.load %arg8[%c0_80, %c0_81] : memref<288x128xf32, #tpu.memory_space<vmem>>, vector<288x128xf32>
    tpu.vector_store %arg8[%c0_80, %c0_81], %76 {strides = array<i32>} : memref<288x128xf32, #tpu.memory_space<vmem>>, vector<288x128xf32>,
    %c0_82 = arith.constant 0 : index
    %c0_83 = arith.constant 0 : index
    %78 = vector.load %arg8[%c0_82, %c0_83] : memref<288x128xf32, #tpu.memory_space<vmem>>, vector<288x128xf32>
    %79 = arith.truncf %78 : vector<288x128xf32> to vector<288x128xbf16>
    %c0_84 = arith.constant 0 : index
    %c0_85 = arith.constant 0 : index
    %c0_86 = arith.constant 0 : index
    %80 = vector.load %arg4[%c0_84, %c0_85, %c0_86] : memref<1x288x128xbf16, #tpu.memory_space<vmem>>, vector<1x288x128xbf16>
    %81 = vector.shape_cast %80 : vector<1x288x128xbf16> to vector<288x128xbf16>
    %82 = vector.shape_cast %79 : vector<288x128xbf16> to vector<1x288x128xbf16>
    tpu.vector_store %arg4[%c0_84, %c0_85, %c0_86], %82 {strides = array<i32>} : memref<1x288x128xbf16, #tpu.memory_space<vmem>>, vector<1x288x128xbf16>,
    %c0_87 = arith.constant 0 : index
    %c0_88 = arith.constant 0 : index
    %83 = vector.load %arg3[%c0_87, %c0_88] : memref<288x1xf32, #tpu.memory_space<vmem>>, vector<288x1xf32>
    %84 = vector.broadcast %83 : vector<288x1xf32> to vector<288x128xf32>
    %85 = arith.mulf %78, %84 : vector<288x128xf32>
    %cst_89 = arith.constant dense<0.000000e+00> : vector<128xf32>
    %86 = vector.multi_reduction <add>, %85, %cst_89 [0] : vector<288x128xf32> to vector<128xf32>
    %87 = vector.shape_cast %86 : vector<128xf32> to vector<1x128xf32>
    %88 = arith.mulf %85, %78 : vector<288x128xf32>
    %cst_90 = arith.constant dense<0.000000e+00> : vector<128xf32>
    %89 = vector.multi_reduction <add>, %88, %cst_90 [0] : vector<288x128xf32> to vector<128xf32>
    %90 = vector.shape_cast %89 : vector<128xf32> to vector<1x128xf32>
    %cst_91 = arith.constant 0.000000e+00 : f32
    %91 = vector.broadcast %cst_91 : f32 to vector<7x128xf32>
    %92 = tpu.concatenate %87, %91 in 0 : vector<1x128xf32>, vector<7x128xf32> -> vector<8x128xf32>
    %c0_92 = arith.constant 0 : index
    %c0_93 = arith.constant 0 : index
    %93 = vector.load %arg5[%c0_92, %c0_93] : memref<8x128xf32, #tpu.memory_space<vmem>>, vector<8x128xf32>
    tpu.vector_store %arg5[%c0_92, %c0_93], %92 {strides = array<i32>} : memref<8x128xf32, #tpu.memory_space<vmem>>, vector<8x128xf32>,
    %94 = tpu.concatenate %90, %91 in 0 : vector<1x128xf32>, vector<7x128xf32> -> vector<8x128xf32>
    %c0_94 = arith.constant 0 : index
    %c0_95 = arith.constant 0 : index
    %95 = vector.load %arg6[%c0_94, %c0_95] : memref<8x128xf32, #tpu.memory_space<vmem>>, vector<8x128xf32>
    tpu.vector_store %arg6[%c0_94, %c0_95], %94 {strides = array<i32>} : memref<8x128xf32, #tpu.memory_space<vmem>>, vector<8x128xf32>,
    return
  }
  func.func @transform_0(%arg0: i32) -> (i32, i32, i32) {
    %c0_i32 = arith.constant 0 : i32
    %c0_i32_0 = arith.constant 0 : i32
    %c0_i32_1 = arith.constant 0 : i32
    return %arg0, %c0_i32, %c0_i32_0 : i32, i32, i32
  }
  func.func @transform_1(%arg0: i32) -> (i32, i32, i32) {
    %c0_i32 = arith.constant 0 : i32
    %c0_i32_0 = arith.constant 0 : i32
    %c0_i32_1 = arith.constant 0 : i32
    %c0_i32_2 = arith.constant 0 : i32
    return %c0_i32, %c0_i32_0, %c0_i32_1 : i32, i32, i32
  }
  func.func @transform_2(%arg0: i32) -> (i32, i32) {
    %c0_i32 = arith.constant 0 : i32
    %c0_i32_0 = arith.constant 0 : i32
    %c0_i32_1 = arith.constant 0 : i32
    return %c0_i32, %c0_i32_0 : i32, i32
  }
  func.func @transform_3(%arg0: i32) -> (i32, i32, i32) {
    %c0_i32 = arith.constant 0 : i32
    %c0_i32_0 = arith.constant 0 : i32
    %c0_i32_1 = arith.constant 0 : i32
    return %arg0, %c0_i32, %c0_i32_0 : i32, i32, i32
  }
  func.func @transform_4(%arg0: i32) -> (i32, i32) {
    %c0_i32 = arith.constant 0 : i32
    %c0_i32_0 = arith.constant 0 : i32
    return %arg0, %c0_i32 : i32, i32
  }
  func.func @transform_5(%arg0: i32) -> (i32, i32) {
    %c0_i32 = arith.constant 0 : i32
    %c0_i32_0 = arith.constant 0 : i32
    return %arg0, %c0_i32 : i32, i32
  }
}

module attributes {stable_mosaic.version = 11 : i64} {
  func.func @kernel(%arg0: i32, %arg1: memref<1x342x8xbf16, #tpu.memory_space<vmem>>, %arg2: memref<9x8x128xbf16, #tpu.memory_space<vmem>>, %arg3: memref<1x128xf32, #tpu.memory_space<vmem>>, %arg4: memref<1x288x8xf32, #tpu.memory_space<vmem>>, %arg5: memref<342x8xf32, #tpu.memory_space<vmem>>, %arg6: memref<288x128xf32, #tpu.memory_space<vmem>>) attributes {dimension_semantics = [#tpu.dimension_semantics<parallel>], iteration_bounds = array<i64: 2>, scalar_prefetch = 0 : i64, scratch_operands = 2 : i64, tpu.core_type = #tpu.core_type<tc>, window_params = [{transform_indices = @transform_0, window_bounds = array<i64: 1, 342, 8>}, {pipeline_mode = #tpu.pipeline_mode<synchronous>, transform_indices = @transform_1, window_bounds = array<i64: 9, 8, 128>}, {pipeline_mode = #tpu.pipeline_mode<synchronous>, transform_indices = @transform_2, window_bounds = array<i64: 1, 128>}, {transform_indices = @transform_3, window_bounds = array<i64: 1, 288, 8>}]} {
    %c0 = arith.constant 0 : index
    %c0_0 = arith.constant 0 : index
    %c0_1 = arith.constant 0 : index
    %0 = vector.load %arg1[%c0, %c0_0, %c0_1] : memref<1x342x8xbf16, #tpu.memory_space<vmem>>, vector<1x342x8xbf16>
    %1 = vector.shape_cast %0 : vector<1x342x8xbf16> to vector<342x8xbf16>
    %2 = arith.extf %1 : vector<342x8xbf16> to vector<342x8xf32>
    %c0_2 = arith.constant 0 : index
    %c0_3 = arith.constant 0 : index
    %3 = vector.load %arg5[%c0_2, %c0_3] : memref<342x8xf32, #tpu.memory_space<vmem>>, vector<342x8xf32>
    tpu.vector_store %arg5[%c0_2, %c0_3], %2 {strides = array<i32>} : memref<342x8xf32, #tpu.memory_space<vmem>>, vector<342x8xf32>,
    %cst = arith.constant 0.000000e+00 : f32
    %4 = vector.broadcast %cst : f32 to vector<288x128xf32>
    %c0_4 = arith.constant 0 : index
    %c0_5 = arith.constant 0 : index
    %5 = vector.load %arg6[%c0_4, %c0_5] : memref<288x128xf32, #tpu.memory_space<vmem>>, vector<288x128xf32>
    tpu.vector_store %arg6[%c0_4, %c0_5], %4 {strides = array<i32>} : memref<288x128xf32, #tpu.memory_space<vmem>>, vector<288x128xf32>,
    %c0_6 = arith.constant 0 : index
    %c0_7 = arith.constant 0 : index
    %6 = vector.load %arg5[%c0_6, %c0_7] : memref<342x8xf32, #tpu.memory_space<vmem>>, vector<288x8xf32>
    %7 = arith.truncf %6 : vector<288x8xf32> to vector<288x8xbf16>
    %c0_8 = arith.constant 0 : index
    %c0_9 = arith.constant 0 : index
    %8 = vector.load %arg6[%c0_8, %c0_9] : memref<288x128xf32, #tpu.memory_space<vmem>>, vector<288x128xf32>
    %c0_10 = arith.constant 0 : index
    %c0_11 = arith.constant 0 : index
    %c0_12 = arith.constant 0 : index
    %9 = vector.load %arg2[%c0_10, %c0_11, %c0_12] : memref<9x8x128xbf16, #tpu.memory_space<vmem>>, vector<1x8x128xbf16>
    %10 = vector.shape_cast %9 : vector<1x8x128xbf16> to vector<8x128xbf16>
    %cst_13 = arith.constant dense<0.000000e+00> : vector<288x128xf32>
    %11 = tpu.matmul %7, %10, %cst_13 {dimension_numbers = #tpu.dot_dimension_numbers<[1], [0], [0], [1], [0, 0, 1, 1], [], []>} : vector<288x8xbf16>, vector<8x128xbf16>, vector<288x128xf32> -> vector<288x128xf32>
    %12 = arith.addf %8, %11 : vector<288x128xf32>
    %c0_14 = arith.constant 0 : index
    %c0_15 = arith.constant 0 : index
    %13 = vector.load %arg6[%c0_14, %c0_15] : memref<288x128xf32, #tpu.memory_space<vmem>>, vector<288x128xf32>
    tpu.vector_store %arg6[%c0_14, %c0_15], %12 {strides = array<i32>} : memref<288x128xf32, #tpu.memory_space<vmem>>, vector<288x128xf32>,
    %c1 = arith.constant 1 : index
    %c0_16 = arith.constant 0 : index
    %14 = vector.load %arg5[%c1, %c0_16] : memref<342x8xf32, #tpu.memory_space<vmem>>, vector<288x8xf32>
    %15 = arith.truncf %14 : vector<288x8xf32> to vector<288x8xbf16>
    %c0_17 = arith.constant 0 : index
    %c0_18 = arith.constant 0 : index
    %16 = vector.load %arg6[%c0_17, %c0_18] : memref<288x128xf32, #tpu.memory_space<vmem>>, vector<288x128xf32>
    %c1_19 = arith.constant 1 : index
    %c0_20 = arith.constant 0 : index
    %c0_21 = arith.constant 0 : index
    %17 = vector.load %arg2[%c1_19, %c0_20, %c0_21] : memref<9x8x128xbf16, #tpu.memory_space<vmem>>, vector<1x8x128xbf16>
    %18 = vector.shape_cast %17 : vector<1x8x128xbf16> to vector<8x128xbf16>
    %cst_22 = arith.constant dense<0.000000e+00> : vector<288x128xf32>
    %19 = tpu.matmul %15, %18, %cst_22 {dimension_numbers = #tpu.dot_dimension_numbers<[1], [0], [0], [1], [0, 0, 1, 1], [], []>} : vector<288x8xbf16>, vector<8x128xbf16>, vector<288x128xf32> -> vector<288x128xf32>
    %20 = arith.addf %16, %19 : vector<288x128xf32>
    %c0_23 = arith.constant 0 : index
    %c0_24 = arith.constant 0 : index
    %21 = vector.load %arg6[%c0_23, %c0_24] : memref<288x128xf32, #tpu.memory_space<vmem>>, vector<288x128xf32>
    tpu.vector_store %arg6[%c0_23, %c0_24], %20 {strides = array<i32>} : memref<288x128xf32, #tpu.memory_space<vmem>>, vector<288x128xf32>,
    %c2 = arith.constant 2 : index
    %c0_25 = arith.constant 0 : index
    %22 = vector.load %arg5[%c2, %c0_25] : memref<342x8xf32, #tpu.memory_space<vmem>>, vector<288x8xf32>
    %23 = arith.truncf %22 : vector<288x8xf32> to vector<288x8xbf16>
    %c0_26 = arith.constant 0 : index
    %c0_27 = arith.constant 0 : index
    %24 = vector.load %arg6[%c0_26, %c0_27] : memref<288x128xf32, #tpu.memory_space<vmem>>, vector<288x128xf32>
    %c2_28 = arith.constant 2 : index
    %c0_29 = arith.constant 0 : index
    %c0_30 = arith.constant 0 : index
    %25 = vector.load %arg2[%c2_28, %c0_29, %c0_30] : memref<9x8x128xbf16, #tpu.memory_space<vmem>>, vector<1x8x128xbf16>
    %26 = vector.shape_cast %25 : vector<1x8x128xbf16> to vector<8x128xbf16>
    %cst_31 = arith.constant dense<0.000000e+00> : vector<288x128xf32>
    %27 = tpu.matmul %23, %26, %cst_31 {dimension_numbers = #tpu.dot_dimension_numbers<[1], [0], [0], [1], [0, 0, 1, 1], [], []>} : vector<288x8xbf16>, vector<8x128xbf16>, vector<288x128xf32> -> vector<288x128xf32>
    %28 = arith.addf %24, %27 : vector<288x128xf32>
    %c0_32 = arith.constant 0 : index
    %c0_33 = arith.constant 0 : index
    %29 = vector.load %arg6[%c0_32, %c0_33] : memref<288x128xf32, #tpu.memory_space<vmem>>, vector<288x128xf32>
    tpu.vector_store %arg6[%c0_32, %c0_33], %28 {strides = array<i32>} : memref<288x128xf32, #tpu.memory_space<vmem>>, vector<288x128xf32>,
    %c18 = arith.constant 18 : index
    %c0_34 = arith.constant 0 : index
    %30 = vector.load %arg5[%c18, %c0_34] : memref<342x8xf32, #tpu.memory_space<vmem>>, vector<288x8xf32>
    %31 = arith.truncf %30 : vector<288x8xf32> to vector<288x8xbf16>
    %c0_35 = arith.constant 0 : index
    %c0_36 = arith.constant 0 : index
    %32 = vector.load %arg6[%c0_35, %c0_36] : memref<288x128xf32, #tpu.memory_space<vmem>>, vector<288x128xf32>
    %c3 = arith.constant 3 : index
    %c0_37 = arith.constant 0 : index
    %c0_38 = arith.constant 0 : index
    %33 = vector.load %arg2[%c3, %c0_37, %c0_38] : memref<9x8x128xbf16, #tpu.memory_space<vmem>>, vector<1x8x128xbf16>
    %34 = vector.shape_cast %33 : vector<1x8x128xbf16> to vector<8x128xbf16>
    %cst_39 = arith.constant dense<0.000000e+00> : vector<288x128xf32>
    %35 = tpu.matmul %31, %34, %cst_39 {dimension_numbers = #tpu.dot_dimension_numbers<[1], [0], [0], [1], [0, 0, 1, 1], [], []>} : vector<288x8xbf16>, vector<8x128xbf16>, vector<288x128xf32> -> vector<288x128xf32>
    %36 = arith.addf %32, %35 : vector<288x128xf32>
    %c0_40 = arith.constant 0 : index
    %c0_41 = arith.constant 0 : index
    %37 = vector.load %arg6[%c0_40, %c0_41] : memref<288x128xf32, #tpu.memory_space<vmem>>, vector<288x128xf32>
    tpu.vector_store %arg6[%c0_40, %c0_41], %36 {strides = array<i32>} : memref<288x128xf32, #tpu.memory_space<vmem>>, vector<288x128xf32>,
    %c19 = arith.constant 19 : index
    %c0_42 = arith.constant 0 : index
    %38 = vector.load %arg5[%c19, %c0_42] : memref<342x8xf32, #tpu.memory_space<vmem>>, vector<288x8xf32>
    %39 = arith.truncf %38 : vector<288x8xf32> to vector<288x8xbf16>
    %c0_43 = arith.constant 0 : index
    %c0_44 = arith.constant 0 : index
    %40 = vector.load %arg6[%c0_43, %c0_44] : memref<288x128xf32, #tpu.memory_space<vmem>>, vector<288x128xf32>
    %c4 = arith.constant 4 : index
    %c0_45 = arith.constant 0 : index
    %c0_46 = arith.constant 0 : index
    %41 = vector.load %arg2[%c4, %c0_45, %c0_46] : memref<9x8x128xbf16, #tpu.memory_space<vmem>>, vector<1x8x128xbf16>
    %42 = vector.shape_cast %41 : vector<1x8x128xbf16> to vector<8x128xbf16>
    %cst_47 = arith.constant dense<0.000000e+00> : vector<288x128xf32>
    %43 = tpu.matmul %39, %42, %cst_47 {dimension_numbers = #tpu.dot_dimension_numbers<[1], [0], [0], [1], [0, 0, 1, 1], [], []>} : vector<288x8xbf16>, vector<8x128xbf16>, vector<288x128xf32> -> vector<288x128xf32>
    %44 = arith.addf %40, %43 : vector<288x128xf32>
    %c0_48 = arith.constant 0 : index
    %c0_49 = arith.constant 0 : index
    %45 = vector.load %arg6[%c0_48, %c0_49] : memref<288x128xf32, #tpu.memory_space<vmem>>, vector<288x128xf32>
    tpu.vector_store %arg6[%c0_48, %c0_49], %44 {strides = array<i32>} : memref<288x128xf32, #tpu.memory_space<vmem>>, vector<288x128xf32>,
    %c20 = arith.constant 20 : index
    %c0_50 = arith.constant 0 : index
    %46 = vector.load %arg5[%c20, %c0_50] : memref<342x8xf32, #tpu.memory_space<vmem>>, vector<288x8xf32>
    %47 = arith.truncf %46 : vector<288x8xf32> to vector<288x8xbf16>
    %c0_51 = arith.constant 0 : index
    %c0_52 = arith.constant 0 : index
    %48 = vector.load %arg6[%c0_51, %c0_52] : memref<288x128xf32, #tpu.memory_space<vmem>>, vector<288x128xf32>
    %c5 = arith.constant 5 : index
    %c0_53 = arith.constant 0 : index
    %c0_54 = arith.constant 0 : index
    %49 = vector.load %arg2[%c5, %c0_53, %c0_54] : memref<9x8x128xbf16, #tpu.memory_space<vmem>>, vector<1x8x128xbf16>
    %50 = vector.shape_cast %49 : vector<1x8x128xbf16> to vector<8x128xbf16>
    %cst_55 = arith.constant dense<0.000000e+00> : vector<288x128xf32>
    %51 = tpu.matmul %47, %50, %cst_55 {dimension_numbers = #tpu.dot_dimension_numbers<[1], [0], [0], [1], [0, 0, 1, 1], [], []>} : vector<288x8xbf16>, vector<8x128xbf16>, vector<288x128xf32> -> vector<288x128xf32>
    %52 = arith.addf %48, %51 : vector<288x128xf32>
    %c0_56 = arith.constant 0 : index
    %c0_57 = arith.constant 0 : index
    %53 = vector.load %arg6[%c0_56, %c0_57] : memref<288x128xf32, #tpu.memory_space<vmem>>, vector<288x128xf32>
    tpu.vector_store %arg6[%c0_56, %c0_57], %52 {strides = array<i32>} : memref<288x128xf32, #tpu.memory_space<vmem>>, vector<288x128xf32>,
    %c36 = arith.constant 36 : index
    %c0_58 = arith.constant 0 : index
    %54 = vector.load %arg5[%c36, %c0_58] : memref<342x8xf32, #tpu.memory_space<vmem>>, vector<288x8xf32>
    %55 = arith.truncf %54 : vector<288x8xf32> to vector<288x8xbf16>
    %c0_59 = arith.constant 0 : index
    %c0_60 = arith.constant 0 : index
    %56 = vector.load %arg6[%c0_59, %c0_60] : memref<288x128xf32, #tpu.memory_space<vmem>>, vector<288x128xf32>
    %c6 = arith.constant 6 : index
    %c0_61 = arith.constant 0 : index
    %c0_62 = arith.constant 0 : index
    %57 = vector.load %arg2[%c6, %c0_61, %c0_62] : memref<9x8x128xbf16, #tpu.memory_space<vmem>>, vector<1x8x128xbf16>
    %58 = vector.shape_cast %57 : vector<1x8x128xbf16> to vector<8x128xbf16>
    %cst_63 = arith.constant dense<0.000000e+00> : vector<288x128xf32>
    %59 = tpu.matmul %55, %58, %cst_63 {dimension_numbers = #tpu.dot_dimension_numbers<[1], [0], [0], [1], [0, 0, 1, 1], [], []>} : vector<288x8xbf16>, vector<8x128xbf16>, vector<288x128xf32> -> vector<288x128xf32>
    %60 = arith.addf %56, %59 : vector<288x128xf32>
    %c0_64 = arith.constant 0 : index
    %c0_65 = arith.constant 0 : index
    %61 = vector.load %arg6[%c0_64, %c0_65] : memref<288x128xf32, #tpu.memory_space<vmem>>, vector<288x128xf32>
    tpu.vector_store %arg6[%c0_64, %c0_65], %60 {strides = array<i32>} : memref<288x128xf32, #tpu.memory_space<vmem>>, vector<288x128xf32>,
    %c37 = arith.constant 37 : index
    %c0_66 = arith.constant 0 : index
    %62 = vector.load %arg5[%c37, %c0_66] : memref<342x8xf32, #tpu.memory_space<vmem>>, vector<288x8xf32>
    %63 = arith.truncf %62 : vector<288x8xf32> to vector<288x8xbf16>
    %c0_67 = arith.constant 0 : index
    %c0_68 = arith.constant 0 : index
    %64 = vector.load %arg6[%c0_67, %c0_68] : memref<288x128xf32, #tpu.memory_space<vmem>>, vector<288x128xf32>
    %c7 = arith.constant 7 : index
    %c0_69 = arith.constant 0 : index
    %c0_70 = arith.constant 0 : index
    %65 = vector.load %arg2[%c7, %c0_69, %c0_70] : memref<9x8x128xbf16, #tpu.memory_space<vmem>>, vector<1x8x128xbf16>
    %66 = vector.shape_cast %65 : vector<1x8x128xbf16> to vector<8x128xbf16>
    %cst_71 = arith.constant dense<0.000000e+00> : vector<288x128xf32>
    %67 = tpu.matmul %63, %66, %cst_71 {dimension_numbers = #tpu.dot_dimension_numbers<[1], [0], [0], [1], [0, 0, 1, 1], [], []>} : vector<288x8xbf16>, vector<8x128xbf16>, vector<288x128xf32> -> vector<288x128xf32>
    %68 = arith.addf %64, %67 : vector<288x128xf32>
    %c0_72 = arith.constant 0 : index
    %c0_73 = arith.constant 0 : index
    %69 = vector.load %arg6[%c0_72, %c0_73] : memref<288x128xf32, #tpu.memory_space<vmem>>, vector<288x128xf32>
    tpu.vector_store %arg6[%c0_72, %c0_73], %68 {strides = array<i32>} : memref<288x128xf32, #tpu.memory_space<vmem>>, vector<288x128xf32>,
    %c38 = arith.constant 38 : index
    %c0_74 = arith.constant 0 : index
    %70 = vector.load %arg5[%c38, %c0_74] : memref<342x8xf32, #tpu.memory_space<vmem>>, vector<288x8xf32>
    %71 = arith.truncf %70 : vector<288x8xf32> to vector<288x8xbf16>
    %c0_75 = arith.constant 0 : index
    %c0_76 = arith.constant 0 : index
    %72 = vector.load %arg6[%c0_75, %c0_76] : memref<288x128xf32, #tpu.memory_space<vmem>>, vector<288x128xf32>
    %c8 = arith.constant 8 : index
    %c0_77 = arith.constant 0 : index
    %c0_78 = arith.constant 0 : index
    %73 = vector.load %arg2[%c8, %c0_77, %c0_78] : memref<9x8x128xbf16, #tpu.memory_space<vmem>>, vector<1x8x128xbf16>
    %74 = vector.shape_cast %73 : vector<1x8x128xbf16> to vector<8x128xbf16>
    %cst_79 = arith.constant dense<0.000000e+00> : vector<288x128xf32>
    %75 = tpu.matmul %71, %74, %cst_79 {dimension_numbers = #tpu.dot_dimension_numbers<[1], [0], [0], [1], [0, 0, 1, 1], [], []>} : vector<288x8xbf16>, vector<8x128xbf16>, vector<288x128xf32> -> vector<288x128xf32>
    %76 = arith.addf %72, %75 : vector<288x128xf32>
    %c0_80 = arith.constant 0 : index
    %c0_81 = arith.constant 0 : index
    %77 = vector.load %arg6[%c0_80, %c0_81] : memref<288x128xf32, #tpu.memory_space<vmem>>, vector<288x128xf32>
    tpu.vector_store %arg6[%c0_80, %c0_81], %76 {strides = array<i32>} : memref<288x128xf32, #tpu.memory_space<vmem>>, vector<288x128xf32>,
    %c0_82 = arith.constant 0 : index
    %c0_83 = arith.constant 0 : index
    %78 = vector.load %arg6[%c0_82, %c0_83] : memref<288x128xf32, #tpu.memory_space<vmem>>, vector<288x128xf32>
    %c0_84 = arith.constant 0 : index
    %c0_85 = arith.constant 0 : index
    %79 = vector.load %arg3[%c0_84, %c0_85] : memref<1x128xf32, #tpu.memory_space<vmem>>, vector<1x128xf32>
    %80 = vector.broadcast %79 : vector<1x128xf32> to vector<288x128xf32>
    %81 = arith.addf %78, %80 : vector<288x128xf32>
    %82 = vector.extract_strided_slice %81 {offsets = [0, 0], sizes = [288, 8], strides = [1, 1]} : vector<288x128xf32> to vector<288x8xf32>
    %c0_86 = arith.constant 0 : index
    %c0_87 = arith.constant 0 : index
    %c0_88 = arith.constant 0 : index
    %83 = vector.load %arg4[%c0_86, %c0_87, %c0_88] : memref<1x288x8xf32, #tpu.memory_space<vmem>>, vector<1x288x8xf32>
    %84 = vector.shape_cast %83 : vector<1x288x8xf32> to vector<288x8xf32>
    %85 = vector.shape_cast %82 : vector<288x8xf32> to vector<1x288x8xf32>
    tpu.vector_store %arg4[%c0_86, %c0_87, %c0_88], %85 {strides = array<i32>} : memref<1x288x8xf32, #tpu.memory_space<vmem>>, vector<1x288x8xf32>,
    return
  }
  func.func @transform_0(%arg0: i32) -> (i32, i32, i32) {
    %c0_i32 = arith.constant 0 : i32
    %c0_i32_0 = arith.constant 0 : i32
    %c0_i32_1 = arith.constant 0 : i32
    return %arg0, %c0_i32, %c0_i32_0 : i32, i32, i32
  }
  func.func @transform_1(%arg0: i32) -> (i32, i32, i32) {
    %c0_i32 = arith.constant 0 : i32
    %c0_i32_0 = arith.constant 0 : i32
    %c0_i32_1 = arith.constant 0 : i32
    %c0_i32_2 = arith.constant 0 : i32
    return %c0_i32, %c0_i32_0, %c0_i32_1 : i32, i32, i32
  }
  func.func @transform_2(%arg0: i32) -> (i32, i32) {
    %c0_i32 = arith.constant 0 : i32
    %c0_i32_0 = arith.constant 0 : i32
    %c0_i32_1 = arith.constant 0 : i32
    return %c0_i32, %c0_i32_0 : i32, i32
  }
  func.func @transform_3(%arg0: i32) -> (i32, i32, i32) {
    %c0_i32 = arith.constant 0 : i32
    %c0_i32_0 = arith.constant 0 : i32
    %c0_i32_1 = arith.constant 0 : i32
    return %arg0, %c0_i32, %c0_i32_0 : i32, i32, i32
  }
}

</mosaic_0001>

<bundles_post_ra>
// kernel: encoder_forward.6
= control target key start
LH: loop header
LB: loop body
LE: loop exit
PB: predicated region body
PF: predicated region fallthrough
CT: control target
= control target key end

     0   :  { %s902_s18 = smov 0   ;;  %s1242_s0 = inlined_call_operand.vmem [shape: bf16[2,288,128], index: 0, kind: input, shape index: {}]   ;;  %s1243_s1 = inlined_call_operand.vmem [shape: f32[16,128], index: 1, kind: input, shape index: {}]   ;;  %s1244_s2 = inlined_call_operand.vmem [shape: f32[16,128], index: 2, kind: input, shape index: {}]   ;;  %s1245_s3 = inlined_call_operand.vmem [shape: f32[1,128], index: 3, kind: input, shape index: {}]   ;;  %s1246_s4 = inlined_call_operand.vmem [shape: f32[1,128], index: 4, kind: input, shape index: {}]   ;;  %s1247_s5 = inlined_call_operand.vmem [shape: bf16[2,288,8], index: 5, kind: output, shape index: {}]  }
   0x1 LB: > { %s683_s19 = sadd.s32 4294967295, %s870_s18   ;;  %p687_p0 = scmp.ge.s32.totalorder %s870_s18, 1  ;;  %s870_s18 = sphi %s902_s18, %s15_s18  }
   0x2   : > { %p187_p1 = scmp.lt.s32.totalorder %s870_s18, 3 }
   0x4   : > { %p188_p2 = pnand %p687_p0, %p187_p1 }
   0x5   : > { %v225_v0 = vld [vmem:[%s1243_s1] sm:$0xff] (!%p188_p2)  ;;  %v226_v1 = vld [vmem:[%s1243_s1 + $0x8] sm:$0xff] (!%p188_p2)  ;;  %p215_p3 = scmp.lt.s32.totalorder (!%p188_p2), %s683_s19, 1  ;;  %v328_v23 = vlaneseq (!%p188_p2)  ;;  %vm591_vm0 = vcmask (!%p188_p2), 60416  }
   0x6   : > { %191 = sbr.rel (%p188_p2) target bundleno = 89 (0x59), region = 40  ;;  %v234_v2 = vld [vmem:[%s1244_s2] sm:$0xff] (!%p188_p2)  ;;  %v227_v3 = vadd.f32 (!%p188_p2), %v226_v1, %v225_v0  ;;  %v235_v4 = vld [vmem:[%s1244_s2 + $0x8] sm:$0xff] (!%p188_p2) }
   0x7   : > { %v236_v5 = vadd.f32 (!%p188_p2), %v235_v4, %v234_v2  ;;  %v936_v25 = vshrl.u32 (!%p188_p2), %v328_v23, 7  ;;  %v248_v50 = vld [vmem:[%s1245_s3] sm:$0x1] (!%p188_p2) }
   0x8   : > { %v228_v6 = vrot.slane (!%p188_p2), %v227_v3, 4 }
   0x9   : > { %v237_v7 = vrot.slane (!%p188_p2), %v236_v5, 4  ;;  %v330_v33 = vsub.s32 (!%p188_p2), 0, %v936_v25 }
   0xa   : > { %v229_v8 = vadd.f32 (!%p188_p2), %v228_v6, %v227_v3 }
   0xb   : > { %v238_v9 = vadd.f32 (!%p188_p2), %v237_v7, %v236_v5 }
   0xc   : > { %v230_v10 = vrot.slane (!%p188_p2), %v229_v8, 2 }
   0xd   : > { %v239_v11 = vrot.slane %v238_v9, 2  ;;  %s1249_s19 = smov (!%p215_p3, %s683_s19), 1 }
   0xe   : > { %v231_v12 = vadd.f32 %v230_v10, %v229_v8  ;;  %s853_s28 = smul.u32 144, %s1249_s19  ;;  %v252_v10 = vld [vmem:[%s1246_s4] sm:$0x1] }
   0xf   : > { %v240_v13 = vadd.f32 %v239_v11, %v238_v9 }
  0x10   : > { %v232_v14 = vrot.slane %v231_v12, 1  ;;  %s934_s6 = scalar_lea.vmem %s1242_s0, %s853_s28  ;;  %s1071_s13 = scalar_lea.vmem %s1247_s5, %s853_s28 }
  0x11   : > { %v241_v15 = vrot.slane %v240_v13, 1  ;;  %v939_v26 = vld [vmem:[%s934_s6] sm:$0xff]   ;;  %v942_v27 = vld [vmem:[%s934_s6 + $0x8] sm:$0xff]   ;;  %v945_v28 = vld [vmem:[%s934_s6 + $0x10] sm:$0xff]  }
  0x12   : > { %v233_v16 = vadd.f32 %v232_v14, %v231_v12  ;;  %v948_v29 = vld [vmem:[%s934_s6 + $0x18] sm:$0xff]   ;;  %v951_v30 = vld [vmem:[%s934_s6 + $0x20] sm:$0xff]   ;;  %v954_v31 = vld [vmem:[%s934_s6 + $0x28] sm:$0xff]   ;;  %v766_v32 = vunpack.c.l.bf16 %v939_v26  ;;  %v767_v34 = vunpack.c.h.bf16 %v939_v26  ;;  %v770_v35 = vunpack.c.l.bf16 %v942_v27 }
  0x13   : > { %v242_v17 = vadd.f32 %v241_v15, %v240_v13  ;;  %v961_v36 = vld [vmem:[%s934_s6 + $0x30] sm:$0xff]   ;;  %v964_v37 = vld [vmem:[%s934_s6 + $0x38] sm:$0xff]   ;;  %v771_v38 = vunpack.c.h.bf16 %v942_v27  ;;  %v774_v39 = vunpack.c.l.bf16 %v945_v28  ;;  %v775_v40 = vunpack.c.h.bf16 %v945_v28  ;;  %v971_v42 = vld [vmem:[%s934_s6 + $0x40] sm:$0xff]  }
  0x14   : > { %v922_v18 = vmul.f32 0.001953125, %v233_v16  ;;  %v778_v41 = vunpack.c.l.bf16 %v948_v29  ;;  %v974_v43 = vld [vmem:[%s934_s6 + $0x48] sm:$0xff]   ;;  %v779_v44 = vunpack.c.h.bf16 %v948_v29  ;;  %v782_v45 = vunpack.c.l.bf16 %v951_v30  ;;  %v981_v48 = vld [vmem:[%s934_s6 + $0x50] sm:$0xff]   ;;  %v984_v49 = vld [vmem:[%s934_s6 + $0x58] sm:$0xff]  }
  0x15   : > { %v244_v19 = vmul.f32 0.001953125, %v242_v17  ;;  %v783_v46 = vunpack.c.h.bf16 %v951_v30  ;;  %v786_v47 = vunpack.c.l.bf16 %v954_v31  ;;  %v787_v51 = vunpack.c.h.bf16 %v954_v31  ;;  %v994_v55 = vld [vmem:[%s934_s6 + $0x60] sm:$0xff]   ;;  %v1001_v60 = vld [vmem:[%s934_s6 + $0x68] sm:$0xff]   ;;  %v1004_v61 = vld [vmem:[%s934_s6 + $0x70] sm:$0xff]  }
  0x16   : > { %v245_v20 = vmul.f32 %v922_v18, %v922_v18  ;;  %v790_v52 = vunpack.c.l.bf16 %v961_v36  ;;  %v791_v53 = vunpack.c.h.bf16 %v961_v36  ;;  %v794_v54 = vunpack.c.l.bf16 %v964_v37  ;;  %v1011_v3 = vld [vmem:[%s934_s6 + $0x78] sm:$0xff]   ;;  %v1017_v8 = vld [vmem:[%s934_s6 + $0x80] sm:$0xff]   ;;  %v1020_v9 = vld [vmem:[%s934_s6 + $0x88] sm:$0xff]  }
  0x17   : > { %v795_v56 = vunpack.c.h.bf16 %v964_v37  ;;  %v798_v57 = vunpack.c.l.bf16 %v971_v42  ;;  %v799_v58 = vunpack.c.h.bf16 %v971_v42  ;;  %v802_v59 = vunpack.c.l.bf16 %v974_v43 }
  0x18   : > { %v246_v21 = vsub.f32 %v244_v19, %v245_v20  ;;  %v803_v63 = vunpack.c.h.bf16 %v974_v43  ;;  %v806_v0 = vunpack.c.l.bf16 %v981_v48  ;;  %v807_v1 = vunpack.c.h.bf16 %v981_v48 }
  0x19   : > { %v810_v2 = vunpack.c.l.bf16 %v984_v49  ;;  %v811_v5 = vunpack.c.h.bf16 %v984_v49  ;;  %v814_v6 = vunpack.c.l.bf16 %v994_v55  ;;  %v815_v7 = vunpack.c.h.bf16 %v994_v55 }
  0x1a   : > { %v247_v22 = vmax.f32 %v246_v21, 0.0  ;;  %v818_v11 = vunpack.c.l.bf16 %v1001_v60  ;;  %v819_v12 = vunpack.c.h.bf16 %v1001_v60  ;;  %v822_v13 = vunpack.c.l.bf16 %v1004_v61 }
  0x1b   : > { %v823_v14 = vunpack.c.h.bf16 %v1004_v61  ;;  %v826_v17 = vunpack.c.l.bf16 %v1011_v3  ;;  %v827_v19 = vunpack.c.h.bf16 %v1011_v3  ;;  %v830_v20 = vunpack.c.l.bf16 %v1017_v8 }
  0x1c   : > { %v249_v24 = vadd.f32 1e-05, %v247_v22  ;;  %v831_v21 = vunpack.c.h.bf16 %v1017_v8  ;;  %v834_v22 = vunpack.c.l.bf16 %v1020_v9  ;;  %v835_v23 = vunpack.c.h.bf16 %v1020_v9 }
  0x1e   : > { %862 = vrsqrt.f32 %v249_v24 }
  0x28   : > { %v863_v62 = vpop.eup %862 }
  0x29   : > { %v251_v4 = vmul.f32 %v863_v62, %v248_v50 }
  0x2b   : > { %v253_v15 = vmul.f32 %v251_v4, %v922_v18  ;;  %v1032_v16 = vrot.slane %v251_v4, %v330_v33 }
  0x2d   : > { %v254_v24 = vsub.f32 %v252_v10, %v253_v15  ;;  %v333_v18 = vmul.f32 %v766_v32, %v1032_v16  ;;  %v334_v26 = vmul.f32 %v767_v34, %v1032_v16  ;;  %v335_v27 = vmul.f32 %v770_v35, %v1032_v16 }
  0x2e   : > { %v336_v28 = vmul.f32 %v771_v38, %v1032_v16  ;;  %v337_v29 = vmul.f32 %v774_v39, %v1032_v16  ;;  %v338_v30 = vmul.f32 %v775_v40, %v1032_v16  ;;  %v339_v31 = vmul.f32 %v778_v41, %v1032_v16 }
  0x2f   : > { %v1049_v36 = vrot.slane %v254_v24, %v330_v33  ;;  %v340_v50 = vmul.f32 %v779_v44, %v1032_v16  ;;  %v341_v32 = vmul.f32 %v782_v45, %v1032_v16  ;;  %v342_v34 = vmul.f32 %v783_v46, %v1032_v16 }
  0x30   : > { %v343_v35 = vmul.f32 %v786_v47, %v1032_v16  ;;  %v344_v38 = vmul.f32 %v787_v51, %v1032_v16  ;;  %v345_v39 = vmul.f32 %v790_v52, %v1032_v16  ;;  %v346_v40 = vmul.f32 %v791_v53, %v1032_v16 }
  0x31   : > { %v375_v41 = vadd.f32 %v1049_v36, %v333_v18  ;;  %v376_v25 = vadd.f32 %v1049_v36, %v334_v26  ;;  %v377_v33 = vadd.f32 %v1049_v36, %v335_v27  ;;  %v378_v44 = vadd.f32 %v1049_v36, %v336_v28 }
  0x32   : > { %v379_v45 = vadd.f32 %v1049_v36, %v337_v29  ;;  %v380_v46 = vadd.f32 %v1049_v36, %v338_v30  ;;  %v381_v47 = vadd.f32 %v1049_v36, %v339_v31  ;;  %v382_v51 = vadd.f32 %v1049_v36, %v340_v50 }
  0x33   : > { %v411_v62 = vmax.f32 %v375_v41, 0.0  ;;  %v412_v52 = vmax.f32 %v376_v25, 0.0  ;;  %v413_v4 = vmax.f32 %v377_v33, 0.0  ;;  %v414_v53 = vmax.f32 %v378_v44, 0.0 }
  0x34   : > { %v415_v10 = vmax.f32 %v379_v45, 0.0  ;;  %v416_v15 = vmax.f32 %v380_v46, 0.0  ;;  %v417_v24 = vmax.f32 %v381_v47, 0.0  ;;  %v418_v18 = vmax.f32 %v382_v51, 0.0 }
  0x35   : > { %v728_v26 = vpack.c.bf16 %v411_v62, %v411_v62  ;;  %v729_v27 = vpack.c.bf16 %v412_v52, %v412_v52  ;;  %v730_v28 = vpack.c.bf16 %v413_v4, %v413_v4  ;;  %v731_v29 = vpack.c.bf16 %v414_v53, %v414_v53 }
  0x36   : > { %v732_v30 = vpack.c.bf16 %v415_v10, %v415_v10  ;;  %v733_v31 = vpack.c.bf16 %v416_v15, %v416_v15  ;;  %v734_v50 = vpack.c.bf16 %v417_v24, %v417_v24  ;;  %v735_v41 = vpack.c.bf16 %v418_v18, %v418_v18 }
  0x37   : > { %592 = vst.msk [vmem:[%s1071_s13] sm:$0xf] %vm591_vm0, %v728_v26  ;;  %593 = vst.msk [vmem:[%s1071_s13 + $0x4] sm:$0xf] %vm591_vm0, %v729_v27  ;;  %v383_v25 = vadd.f32 %v1049_v36, %v341_v32  ;;  %v384_v33 = vadd.f32 %v1049_v36, %v342_v34  ;;  %v385_v44 = vadd.f32 %v1049_v36, %v343_v35 }
  0x38   : > { %594 = vst.msk [vmem:[%s1071_s13 + $0x8] sm:$0xf] %vm591_vm0, %v730_v28  ;;  %595 = vst.msk [vmem:[%s1071_s13 + $0xc] sm:$0xf] %vm591_vm0, %v731_v29  ;;  %v386_v45 = vadd.f32 %v1049_v36, %v344_v38  ;;  %v387_v46 = vadd.f32 %v1049_v36, %v345_v39  ;;  %v388_v47 = vadd.f32 %v1049_v36, %v346_v40 }
  0x39   : > { %596 = vst.msk [vmem:[%s1071_s13 + $0x10] sm:$0xf] %vm591_vm0, %v732_v30  ;;  %597 = vst.msk [vmem:[%s1071_s13 + $0x14] sm:$0xf] %vm591_vm0, %v733_v31  ;;  %v347_v32 = vmul.f32 %v794_v54, %v1032_v16  ;;  %v348_v34 = vmul.f32 %v795_v56, %v1032_v16  ;;  %v419_v35 = vmax.f32 %v383_v25, 0.0  ;;  %v420_v38 = vmax.f32 %v384_v33, 0.0 }
  0x3a   : > { %598 = vst.msk [vmem:[%s1071_s13 + $0x18] sm:$0xf] %vm591_vm0, %v734_v50  ;;  %599 = vst.msk [vmem:[%s1071_s13 + $0x1c] sm:$0xf] %vm591_vm0, %v735_v41  ;;  %v421_v51 = vmax.f32 %v385_v44, 0.0  ;;  %v422_v62 = vmax.f32 %v386_v45, 0.0  ;;  %v349_v26 = vmul.f32 %v798_v57, %v1032_v16  ;;  %v350_v27 = vmul.f32 %v799_v58, %v1032_v16 }
  0x3b   : > { %v423_v52 = vmax.f32 %v387_v46, 0.0  ;;  %v424_v39 = vmax.f32 %v388_v47, 0.0  ;;  %v389_v40 = vadd.f32 %v1049_v36, %v347_v32  ;;  %v390_v4 = vadd.f32 %v1049_v36, %v348_v34 }
  0x3c   : > { %v736_v53 = vpack.c.bf16 %v419_v35, %v419_v35  ;;  %v737_v54 = vpack.c.bf16 %v420_v38, %v420_v38  ;;  %v738_v37 = vpack.c.bf16 %v421_v51, %v421_v51  ;;  %v739_v56 = vpack.c.bf16 %v422_v62, %v422_v62 }
  0x3d   : > { %v740_v10 = vpack.c.bf16 %v423_v52, %v423_v52  ;;  %v741_v15 = vpack.c.bf16 %v424_v39, %v424_v39  ;;  %v425_v24 = vmax.f32 %v389_v40, 0.0  ;;  %v426_v18 = vmax.f32 %v390_v4, 0.0 }
  0x3e   : > { %600 = vst.msk [vmem:[%s1071_s13 + $0x20] sm:$0xf] %vm591_vm0, %v736_v53  ;;  %601 = vst.msk [vmem:[%s1071_s13 + $0x24] sm:$0xf] %vm591_vm0, %v737_v54  ;;  %v351_v28 = vmul.f32 %v802_v59, %v1032_v16  ;;  %v352_v29 = vmul.f32 %v803_v63, %v1032_v16  ;;  %v353_v57 = vmul.f32 %v806_v0, %v1032_v16 }
  0x3f   : > { %602 = vst.msk [vmem:[%s1071_s13 + $0x28] sm:$0xf] %vm591_vm0, %v738_v37  ;;  %603 = vst.msk [vmem:[%s1071_s13 + $0x2c] sm:$0xf] %vm591_vm0, %v739_v56  ;;  %v742_v30 = vpack.c.bf16 %v425_v24, %v425_v24  ;;  %v743_v31 = vpack.c.bf16 %v426_v18, %v426_v18  ;;  %v354_v42 = vmul.f32 %v807_v1, %v1032_v16 }
  0x40   : > { %604 = vst.msk [vmem:[%s1071_s13 + $0x30] sm:$0xf] %vm591_vm0, %v740_v10  ;;  %605 = vst.msk [vmem:[%s1071_s13 + $0x34] sm:$0xf] %vm591_vm0, %v741_v15  ;;  %v391_v58 = vadd.f32 %v1049_v36, %v349_v26  ;;  %v392_v59 = vadd.f32 %v1049_v36, %v350_v27  ;;  %v393_v43 = vadd.f32 %v1049_v36, %v351_v28 }
  0x41   : > { %v394_v63 = vadd.f32 %v1049_v36, %v352_v29  ;;  %606 = vst.msk [vmem:[%s1071_s13 + $0x38] sm:$0xf] %vm591_vm0, %v742_v30  ;;  %607 = vst.msk [vmem:[%s1071_s13 + $0x3c] sm:$0xf] %vm591_vm0, %v743_v31  ;;  %v395_v50 = vadd.f32 %v1049_v36, %v353_v57  ;;  %v396_v0 = vadd.f32 %v1049_v36, %v354_v42 }
  0x42   : > { %v355_v48 = vmul.f32 %v810_v2, %v1032_v16  ;;  %v356_v1 = vmul.f32 %v811_v5, %v1032_v16  ;;  %v427_v41 = vmax.f32 %v391_v58, 0.0  ;;  %v428_v25 = vmax.f32 %v392_v59, 0.0 }
  0x43   : > { %v429_v33 = vmax.f32 %v393_v43, 0.0  ;;  %v430_v44 = vmax.f32 %v394_v63, 0.0  ;;  %v431_v45 = vmax.f32 %v395_v50, 0.0  ;;  %v432_v46 = vmax.f32 %v396_v0, 0.0 }
  0x44   : > { %v397_v47 = vadd.f32 %v1049_v36, %v355_v48  ;;  %v398_v32 = vadd.f32 %v1049_v36, %v356_v1  ;;  %v744_v34 = vpack.c.bf16 %v427_v41, %v427_v41  ;;  %v745_v2 = vpack.c.bf16 %v428_v25, %v428_v25 }
  0x45   : > { %v746_v49 = vpack.c.bf16 %v429_v33, %v429_v33  ;;  %v747_v5 = vpack.c.bf16 %v430_v44, %v430_v44  ;;  %v748_v35 = vpack.c.bf16 %v431_v45, %v431_v45  ;;  %v749_v38 = vpack.c.bf16 %v432_v46, %v432_v46 }
  0x46   : > { %v433_v51 = vmax.f32 %v397_v47, 0.0  ;;  %v434_v62 = vmax.f32 %v398_v32, 0.0  ;;  %608 = vst.msk [vmem:[%s1071_s13 + $0x40] sm:$0xf] %vm591_vm0, %v744_v34  ;;  %609 = vst.msk [vmem:[%s1071_s13 + $0x44] sm:$0xf] %vm591_vm0, %v745_v2  ;;  %v357_v52 = vmul.f32 %v814_v6, %v1032_v16  ;;  %v358_v39 = vmul.f32 %v815_v7, %v1032_v16 }
  0x47   : > { %610 = vst.msk [vmem:[%s1071_s13 + $0x48] sm:$0xf] %vm591_vm0, %v746_v49  ;;  %611 = vst.msk [vmem:[%s1071_s13 + $0x4c] sm:$0xf] %vm591_vm0, %v747_v5  ;;  %v359_v40 = vmul.f32 %v818_v11, %v1032_v16  ;;  %v360_v4 = vmul.f32 %v819_v12, %v1032_v16  ;;  %v361_v6 = vmul.f32 %v822_v13, %v1032_v16 }
  0x48   : > { %612 = vst.msk [vmem:[%s1071_s13 + $0x50] sm:$0xf] %vm591_vm0, %v748_v35  ;;  %613 = vst.msk [vmem:[%s1071_s13 + $0x54] sm:$0xf] %vm591_vm0, %v749_v38  ;;  %v750_v53 = vpack.c.bf16 %v433_v51, %v433_v51  ;;  %v751_v54 = vpack.c.bf16 %v434_v62, %v434_v62  ;;  %v362_v55 = vmul.f32 %v823_v14, %v1032_v16 }
  0x49   : > { %v399_v7 = vadd.f32 %v1049_v36, %v357_v52  ;;  %v400_v11 = vadd.f32 %v1049_v36, %v358_v39  ;;  %v401_v60 = vadd.f32 %v1049_v36, %v359_v40  ;;  %v402_v12 = vadd.f32 %v1049_v36, %v360_v4 }
  0x4a   : > { %614 = vst.msk [vmem:[%s1071_s13 + $0x58] sm:$0xf] %vm591_vm0, %v750_v53  ;;  %615 = vst.msk [vmem:[%s1071_s13 + $0x5c] sm:$0xf] %vm591_vm0, %v751_v54  ;;  %v403_v37 = vadd.f32 %v1049_v36, %v361_v6  ;;  %v404_v13 = vadd.f32 %v1049_v36, %v362_v55  ;;  %v363_v61 = vmul.f32 %v826_v17, %v1032_v16 }
  0x4b   : > { %v364_v14 = vmul.f32 %v827_v19, %v1032_v16  ;;  %v435_v56 = vmax.f32 %v399_v7, 0.0  ;;  %v436_v10 = vmax.f32 %v400_v11, 0.0  ;;  %v437_v15 = vmax.f32 %v401_v60, 0.0 }
  0x4c   : > { %v438_v24 = vmax.f32 %v402_v12, 0.0  ;;  %v439_v18 = vmax.f32 %v403_v37, 0.0  ;;  %v440_v26 = vmax.f32 %v404_v13, 0.0  ;;  %v405_v27 = vadd.f32 %v1049_v36, %v363_v61 }
  0x4d   : > { %v406_v28 = vadd.f32 %v1049_v36, %v364_v14  ;;  %v752_v29 = vpack.c.bf16 %v435_v56, %v435_v56  ;;  %v753_v17 = vpack.c.bf16 %v436_v10, %v436_v10  ;;  %v754_v3 = vpack.c.bf16 %v437_v15, %v437_v15 }
  0x4e   : > { %v755_v19 = vpack.c.bf16 %v438_v24, %v438_v24  ;;  %v756_v30 = vpack.c.bf16 %v439_v18, %v439_v18  ;;  %v757_v31 = vpack.c.bf16 %v440_v26, %v440_v26  ;;  %v441_v57 = vmax.f32 %v405_v27, 0.0 }
  0x4f   : > { %v442_v42 = vmax.f32 %v406_v28, 0.0  ;;  %616 = vst.msk [vmem:[%s1071_s13 + $0x60] sm:$0xf] %vm591_vm0, %v752_v29  ;;  %617 = vst.msk [vmem:[%s1071_s13 + $0x64] sm:$0xf] %vm591_vm0, %v753_v17  ;;  %v365_v58 = vmul.f32 %v830_v20, %v1032_v16  ;;  %v366_v59 = vmul.f32 %v831_v21, %v1032_v16  ;;  %v367_v43 = vmul.f32 %v834_v22, %v1032_v16 }
  0x50   : > { %618 = vst.msk [vmem:[%s1071_s13 + $0x68] sm:$0xf] %vm591_vm0, %v754_v3  ;;  %619 = vst.msk [vmem:[%s1071_s13 + $0x6c] sm:$0xf] %vm591_vm0, %v755_v19  ;;  %v368_v63 = vmul.f32 %v835_v23, %v1032_v16  ;;  %v758_v50 = vpack.c.bf16 %v441_v57, %v441_v57 }
  0x51   : > { %620 = vst.msk [vmem:[%s1071_s13 + $0x70] sm:$0xf] %vm591_vm0, %v756_v30  ;;  %621 = vst.msk [vmem:[%s1071_s13 + $0x74] sm:$0xf] %vm591_vm0, %v757_v31  ;;  %v759_v0 = vpack.c.bf16 %v442_v42, %v442_v42  ;;  %v407_v20 = vadd.f32 %v1049_v36, %v365_v58  ;;  %v408_v8 = vadd.f32 %v1049_v36, %v366_v59 }
  0x52   : > { %v409_v21 = vadd.f32 %v1049_v36, %v367_v43  ;;  %v410_v22 = vadd.f32 %v1049_v36, %v368_v63  ;;  %622 = vst.msk [vmem:[%s1071_s13 + $0x78] sm:$0xf] %vm591_vm0, %v758_v50 }
  0x53   : > { %623 = vst.msk [vmem:[%s1071_s13 + $0x7c] sm:$0xf] %vm591_vm0, %v759_v0  ;;  %v443_v9 = vmax.f32 %v407_v20, 0.0  ;;  %v444_v16 = vmax.f32 %v408_v8, 0.0 }
  0x54   : > { %v445_v23 = vmax.f32 %v409_v21, 0.0  ;;  %v446_v48 = vmax.f32 %v410_v22, 0.0 }
  0x55   : > { %v760_v1 = vpack.c.bf16 %v443_v9, %v443_v9  ;;  %v761_v41 = vpack.c.bf16 %v444_v16, %v444_v16 }
  0x56   : > { %v762_v25 = vpack.c.bf16 %v445_v23, %v445_v23  ;;  %v763_v33 = vpack.c.bf16 %v446_v48, %v446_v48 }
  0x57   : > { %624 = vst.msk [vmem:[%s1071_s13 + $0x80] sm:$0xf] %vm591_vm0, %v760_v1  ;;  %625 = vst.msk [vmem:[%s1071_s13 + $0x84] sm:$0xf] %vm591_vm0, %v761_v41 }
  0x58   : > { %626 = vst.msk [vmem:[%s1071_s13 + $0x88] sm:$0xf] %vm591_vm0, %v762_v25  ;;  %627 = vst.msk [vmem:[%s1071_s13 + $0x8c] sm:$0xf] %vm591_vm0, %v763_v33 }
  0x59 PF: > { %s15_s18 = sadd.s32 1, %s870_s18  }
  0x5a   : > { %p12_p4 = scmp.ge.s32.totalorder %s15_s18, 4  }
  0x5c   :  { %14 = sbr.rel (!%p12_p4) target bundleno = 1 (0x1), region = 70 }

// kernel: encoder_forward.5
= control target key start
LH: loop header
LB: loop body
LE: loop exit
PB: predicated region body
PF: predicated region fallthrough
CT: control target
= control target key end

     0   :  { %s6033_s18 = smov 0   ;;  %s6740_s0 = inlined_call_operand.vmem [shape: bf16[2,342,4], index: 0, kind: input, shape index: {}]   ;;  %s6741_s1 = inlined_call_operand.vmem [shape: bf16[9,4,128], index: 1, kind: input, shape index: {}]   ;;  %s6742_s2 = inlined_call_operand.vmem [shape: f32[288,1], index: 2, kind: input, shape index: {}]   ;;  %s6743_s3 = inlined_call_operand.vmem [shape: bf16[2,288,128], index: 3, kind: output, shape index: {0}]   ;;  %s6744_s4 = inlined_call_operand.vmem [shape: f32[16,128], index: 4, kind: output, shape index: {1}]   ;;  %s6745_s5 = inlined_call_operand.vmem [shape: f32[16,128], index: 5, kind: output, shape index: {2}]  }
   0x1 LB: > { %s4704_s19 = sadd.s32 4294967295, %s6000_s18   ;;  %p4708_p0 = scmp.ge.s32.totalorder %s6000_s18, 1  ;;  %s6000_s18 = sphi %s6033_s18, %s16_s18  }
   0x2   : > { %p192_p1 = scmp.lt.s32.totalorder %s6000_s18, 3 }
   0x4   : > { %p193_p2 = pnand %p4708_p0, %p192_p1 }
   0x5   : > { %vm559_vm0 = vcmask (!%p193_p2), 1041408   ;;  %v6044_v0 = vld [vmem:[%s6741_s1 + $0x8] sm:$0x3] (!%p193_p2)  ;;  %v504_v1 = vld [vmem:[%s6741_s1] sm:$0x3] (!%p193_p2)  ;;  %p228_p3 = scmp.lt.s32.totalorder (!%p193_p2), %s4704_s19, 1 }
   0x6   : > { %196 = sbr.rel (%p193_p2) target bundleno = 595 (0x253), region = 32  ;;  %5975 = vmatprep.subr.msk.bf16.mxu0 (!%p193_p2), %vm559_vm0, %v6044_v0  ;;  %5971 = vmatprep.subr.msk.bf16.mxu1 (!%p193_p2), %vm559_vm0, %v504_v1  ;;  %v6054_v2 = vsel (!%p193_p2), %vm559_vm0, %v6044_v0, 0  ;;  %v561_v3 = vsel (!%p193_p2), %vm559_vm0, %v504_v1, 0  ;;  %v6060_v4 = vld [vmem:[%s6741_s1 + $0xa] sm:$0x3] (!%p193_p2)  ;;  %vm333_vm1 = vcmask (!%p193_p2), 31744  }
   0x7   : > { %5492 = vmatpush3.bf16.msra.mxu0 (!%p193_p2), %v6054_v2  ;;  %5340 = vmatpush3.bf16.msra.mxu1 (!%p193_p2), %v561_v3  ;;  %v6068_v5 = vld [vmem:[%s6741_s1 + $0x2] sm:$0x3] (!%p193_p2)  ;;  %vm4582_vm2 = vcmask (!%p193_p2), 1040384  }
   0x8   : > { %5977 = vmatprep.subr.msk.bf16.mxu0 (!%p193_p2), %vm559_vm0, %v6060_v4  ;;  %5972 = vmatprep.subr.msk.bf16.mxu1 (!%p193_p2), %vm559_vm0, %v6068_v5 }
   0xd   : > { %s6747_s19 = smov (!%p228_p3, %s4704_s19), 1 }
   0xe   : > { %s5981_s28 = smul.u32 172, %s6747_s19  ;;  %s4711_s26 = sshll.u32 %s6747_s19, 3 }
   0xf   : > { %s5982_s22 = smul.u32 144, %s6747_s19  ;;  %s241_s29 = scalar_lea.vmem %s6744_s4, %s4711_s26 }
  0x10   : > { %s6078_s6 = scalar_lea.vmem %s6740_s0, %s5981_s28  ;;  %s245_s7 = scalar_lea.vmem %s6745_s5, %s4711_s26 }
  0x11   : > { %v4958_v6 = vld [vmem:[%s6078_s6] sm:$0xff]   ;;  %v5131_v7 = vld [vmem:[%s6078_s6 + $0x8] sm:$0xff]   ;;  %v5132_v11 = vld [vmem:[%s6078_s6 + $0x10] sm:$0xff]   ;;  %s6652_s25 = scalar_lea.vmem %s6743_s3, %s5982_s22 }
  0x12   : > { %v4959_v8 = vunpack.c.l.bf16 %v4958_v6  ;;  %v4960_v9 = vunpack.c.h.bf16 %v4958_v6  ;;  %v4963_v10 = vunpack.c.l.bf16 %v5131_v7  ;;  %v5133_v12 = vld [vmem:[%s6078_s6 + $0x18] sm:$0xff]   ;;  %v5134_v13 = vld [vmem:[%s6078_s6 + $0x20] sm:$0xff]   ;;  %v4964_v14 = vunpack.c.h.bf16 %v5131_v7  ;;  %v5135_v18 = vld [vmem:[%s6078_s6 + $0x28] sm:$0xff]  }
  0x13   : > { %v4967_v15 = vunpack.c.l.bf16 %v5132_v11  ;;  %v4968_v16 = vunpack.c.h.bf16 %v5132_v11  ;;  %v4971_v17 = vunpack.c.l.bf16 %v5133_v12  ;;  %v5136_v19 = vld [vmem:[%s6078_s6 + $0x30] sm:$0xff]   ;;  %v5137_v20 = vld [vmem:[%s6078_s6 + $0x38] sm:$0xff]   ;;  %v4972_v21 = vunpack.c.h.bf16 %v5133_v12  ;;  %v5138_v25 = vld [vmem:[%s6078_s6 + $0x40] sm:$0xff]  }
  0x14   : > { %334 = vst.msk [vmem:[#allocation2] sm:$0xff] %vm333_vm1, %v4959_v8  ;;  %335 = vst.msk [vmem:[#allocation2 + $0x8] sm:$0xff] %vm333_vm1, %v4960_v9  ;;  %v4975_v22 = vunpack.c.l.bf16 %v5134_v13  ;;  %v4976_v23 = vunpack.c.h.bf16 %v5134_v13  ;;  %v4979_v24 = vunpack.c.l.bf16 %v5135_v18  ;;  %v5139_v26 = vld [vmem:[%s6078_s6 + $0x48] sm:$0xff]   ;;  %v5140_v27 = vld [vmem:[%s6078_s6 + $0x50] sm:$0xff]   ;;  %v4980_v28 = vunpack.c.h.bf16 %v5135_v18 }
  0x15   : > { %336 = vst.msk [vmem:[#allocation2 + $0x10] sm:$0xff] %vm333_vm1, %v4963_v10  ;;  %337 = vst.msk [vmem:[#allocation2 + $0x18] sm:$0xff] %vm333_vm1, %v4964_v14  ;;  %v4983_v29 = vunpack.c.l.bf16 %v5136_v19  ;;  %v4984_v30 = vunpack.c.h.bf16 %v5136_v19  ;;  %v4987_v31 = vunpack.c.l.bf16 %v5137_v20  ;;  %v5141_v32 = vld [vmem:[%s6078_s6 + $0x58] sm:$0xff]   ;;  %v5142_v33 = vld [vmem:[%s6078_s6 + $0x60] sm:$0xff]   ;;  %v4988_v35 = vunpack.c.h.bf16 %v5137_v20 }
  0x16   : > { %338 = vst.msk [vmem:[#allocation2 + $0x20] sm:$0xff] %vm333_vm1, %v4967_v15  ;;  %339 = vst.msk [vmem:[#allocation2 + $0x28] sm:$0xff] %vm333_vm1, %v4968_v16  ;;  %v5143_v34 = vld [vmem:[%s6078_s6 + $0x68] sm:$0xff]   ;;  %v4991_v36 = vunpack.c.l.bf16 %v5138_v25  ;;  %v4992_v37 = vunpack.c.h.bf16 %v5138_v25  ;;  %v4995_v38 = vunpack.c.l.bf16 %v5139_v26  ;;  %v5144_v39 = vld [vmem:[%s6078_s6 + $0x70] sm:$0xff]   ;;  %v4996_v41 = vunpack.c.h.bf16 %v5139_v26 }
  0x17   : > { %340 = vst.msk [vmem:[#allocation2 + $0x30] sm:$0xff] %vm333_vm1, %v4971_v17  ;;  %341 = vst.msk [vmem:[#allocation2 + $0x38] sm:$0xff] %vm333_vm1, %v4972_v21  ;;  %v5145_v40 = vld [vmem:[%s6078_s6 + $0x78] sm:$0xff]   ;;  %v4999_v42 = vunpack.c.l.bf16 %v5140_v27  ;;  %v5000_v43 = vunpack.c.h.bf16 %v5140_v27  ;;  %v5003_v44 = vunpack.c.l.bf16 %v5141_v32  ;;  %v5146_v45 = vld [vmem:[%s6078_s6 + $0x80] sm:$0xff]   ;;  %v5004_v47 = vunpack.c.h.bf16 %v5141_v32 }
  0x18   : > { %342 = vst.msk [vmem:[#allocation2 + $0x40] sm:$0xff] %vm333_vm1, %v4975_v22  ;;  %343 = vst.msk [vmem:[#allocation2 + $0x48] sm:$0xff] %vm333_vm1, %v4976_v23  ;;  %v5147_v46 = vld [vmem:[%s6078_s6 + $0x88] sm:$0xff]   ;;  %v5007_v48 = vunpack.c.l.bf16 %v5142_v33  ;;  %v5008_v49 = vunpack.c.h.bf16 %v5142_v33  ;;  %v5011_v50 = vunpack.c.l.bf16 %v5143_v34  ;;  %v5148_v51 = vld [vmem:[%s6078_s6 + $0x90] sm:$0xff]   ;;  %v5012_v53 = vunpack.c.h.bf16 %v5143_v34 }
  0x19   : > { %344 = vst.msk [vmem:[#allocation2 + $0x50] sm:$0xff] %vm333_vm1, %v4979_v24  ;;  %345 = vst.msk [vmem:[#allocation2 + $0x58] sm:$0xff] %vm333_vm1, %v4980_v28  ;;  %v6119_v52 = vld [vmem:[%s6078_s6 + $0x98] sm:$0xff]   ;;  %v5015_v54 = vunpack.c.l.bf16 %v5144_v39  ;;  %v5016_v55 = vunpack.c.h.bf16 %v5144_v39  ;;  %v5019_v56 = vunpack.c.l.bf16 %v5145_v40  ;;  %v5020_v57 = vunpack.c.h.bf16 %v5145_v40  ;;  %v6152_v24 = vld [vmem:[%s6741_s1 + $0xc] sm:$0x3] }
  0x1a   : > { %346 = vst.msk [vmem:[#allocation2 + $0x60] sm:$0xff] %vm333_vm1, %v4983_v29  ;;  %347 = vst.msk [vmem:[#allocation2 + $0x68] sm:$0xff] %vm333_vm1, %v4984_v30  ;;  %v5023_v58 = vunpack.c.l.bf16 %v5146_v45  ;;  %v5024_v59 = vunpack.c.h.bf16 %v5146_v45  ;;  %v5027_v60 = vunpack.c.l.bf16 %v5147_v46  ;;  %v5028_v1 = vunpack.c.h.bf16 %v5147_v46  ;;  %v6157_v25 = vld [vmem:[%s6741_s1 + $0x4] sm:$0x3] }
  0x1b   : > { %348 = vst.msk [vmem:[#allocation2 + $0x70] sm:$0xff] %vm333_vm1, %v4987_v31  ;;  %349 = vst.msk [vmem:[#allocation2 + $0x78] sm:$0xff] %vm333_vm1, %v4988_v35  ;;  %v414_v61 = vld [vmem:[#allocation2] sm:$0xff]  ;;  %v415_v62 = vld [vmem:[#allocation2 + $0x8] sm:$0xff]  ;;  %v5031_v3 = vunpack.c.l.bf16 %v5148_v51  ;;  %v5032_v6 = vunpack.c.h.bf16 %v5148_v51  ;;  %v5035_v7 = vunpack.c.l.bf16 %v6119_v52  ;;  %v959_v17 = vsel %vm559_vm0, %v6068_v5, 0 }
  0x1c   : > { %350 = vst.msk [vmem:[#allocation2 + $0x80] sm:$0xff] %vm333_vm1, %v4991_v36  ;;  %351 = vst.msk [vmem:[#allocation2 + $0x88] sm:$0xff] %vm333_vm1, %v4992_v37  ;;  %v416_v63 = vld [vmem:[#allocation2 + $0x10] sm:$0xff]  ;;  %v450_v8 = vpack.c.bf16 %v415_v62, %v414_v61  ;;  %v417_v11 = vld [vmem:[#allocation2 + $0x18] sm:$0xff]  ;;  %v2551_v19 = vsel %vm559_vm0, %v6060_v4, 0 }
  0x1d   : > { %352 = vst.msk [vmem:[#allocation2 + $0x90] sm:$0xff] %vm333_vm1, %v4995_v38  ;;  %353 = vst.msk [vmem:[#allocation2 + $0x98] sm:$0xff] %vm333_vm1, %v4996_v41  ;;  %v2006_v9 = vld [vmem:[#allocation2 + $0x13] sm:$0xff]  ;;  %v2007_v10 = vld [vmem:[#allocation2 + $0x1b] sm:$0xff]  ;;  %v451_v13 = vpack.c.bf16 %v417_v11, %v416_v63 }
  0x1e   : > { %354 = vst.msk [vmem:[#allocation2 + $0xa0] sm:$0xff] %vm333_vm1, %v4999_v42  ;;  %355 = vst.msk [vmem:[#allocation2 + $0xa8] sm:$0xff] %vm333_vm1, %v5000_v43  ;;  %v2042_v12 = vpack.c.bf16 %v2007_v10, %v2006_v9  ;;  %v2008_v14 = vld [vmem:[#allocation2 + $0x23] sm:$0xff]  ;;  %v2009_v15 = vld [vmem:[#allocation2 + $0x2b] sm:$0xff]  ;;  %5341 = vmatprep.mubr.msk.bf16.mxu1 %vm333_vm1, %v450_v8 }
  0x1f   : > { %356 = vst.msk [vmem:[#allocation2 + $0xb0] sm:$0xff] %vm333_vm1, %v5003_v44  ;;  %357 = vst.msk [vmem:[#allocation2 + $0xb8] sm:$0xff] %vm333_vm1, %v5004_v47  ;;  %v418_v16 = vld [vmem:[#allocation2 + $0x20] sm:$0xff]  ;;  %v2043_v18 = vpack.c.bf16 %v2009_v15, %v2008_v14  ;;  %v419_v20 = vld [vmem:[#allocation2 + $0x28] sm:$0xff]  ;;  %5342 = vmatmul.mubr.msk.bf16.vlgmr.msra.gmra.mrb[0].mxu1 %vm333_vm1, %v451_v13 }
  0x20   : > { %358 = vst.msk [vmem:[#allocation2 + $0xc0] sm:$0xff] %vm333_vm1, %v5007_v48  ;;  %359 = vst.msk [vmem:[#allocation2 + $0xc8] sm:$0xff] %vm333_vm1, %v5008_v49  ;;  %v2010_v21 = vld [vmem:[#allocation2 + $0x33] sm:$0xff]  ;;  %v2011_v22 = vld [vmem:[#allocation2 + $0x3b] sm:$0xff]  ;;  %5493 = vmatprep.mubr.msk.bf16.mxu0 %vm333_vm1, %v2042_v12  ;;  %v452_v5 = vpack.c.bf16 %v419_v20, %v418_v16  ;;  %5378 = vmatpush3.bf16.msra.mxu1 %v959_v17 }
  0x21   : > { %360 = vst.msk [vmem:[#allocation2 + $0xd0] sm:$0xff] %vm333_vm1, %v5011_v50  ;;  %361 = vst.msk [vmem:[#allocation2 + $0xd8] sm:$0xff] %vm333_vm1, %v5012_v53  ;;  %v2044_v23 = vpack.c.bf16 %v2011_v22, %v2010_v21  ;;  %5494 = vmatmul.mubr.msk.bf16.vlgmr.msra.gmra.mrb[0].mxu0 %vm333_vm1, %v2043_v18  ;;  %v420_v4 = vld [vmem:[#allocation2 + $0x30] sm:$0xff]  ;;  %v421_v26 = vld [vmem:[#allocation2 + $0x38] sm:$0xff]  ;;  %5973 = vmatprep.subr.msk.bf16.mxu1 %vm559_vm0, %v6157_v25 }
  0x22   : > { %362 = vst.msk [vmem:[#allocation2 + $0xe0] sm:$0xff] %vm333_vm1, %v5015_v54  ;;  %363 = vst.msk [vmem:[#allocation2 + $0xe8] sm:$0xff] %vm333_vm1, %v5016_v55  ;;  %v2012_v27 = vld [vmem:[#allocation2 + $0x43] sm:$0xff]  ;;  %5530 = vmatpush3.bf16.msra.mxu0 %v2551_v19  ;;  %5345 = vmatprep.mubr.msk.bf16.mxu1 %vm333_vm1, %v452_v5  ;;  %v2013_v28 = vld [vmem:[#allocation2 + $0x4b] sm:$0xff]  ;;  %v453_v33 = vpack.c.bf16 %v421_v26, %v420_v4  ;;  %v5036_v4 = vunpack.c.h.bf16 %v6119_v52 }
  0x23   : > { %364 = vst.msk [vmem:[#allocation2 + $0xf0] sm:$0xff] %vm333_vm1, %v5019_v56  ;;  %365 = vst.msk [vmem:[#allocation2 + $0xf8] sm:$0xff] %vm333_vm1, %v5020_v57  ;;  %v422_v29 = vld [vmem:[#allocation2 + $0x40] sm:$0xff]  ;;  %v423_v30 = vld [vmem:[#allocation2 + $0x48] sm:$0xff]  ;;  %5497 = vmatprep.mubr.msk.bf16.mxu0 %vm333_vm1, %v2044_v23  ;;  %5978 = vmatprep.subr.msk.bf16.mxu0 %vm559_vm0, %v6152_v24  ;;  %v2045_v34 = vpack.c.bf16 %v2013_v28, %v2012_v27  ;;  %v2949_v27 = vsel %vm559_vm0, %v6152_v24, 0 }
  0x24   : > { %366 = vst.msk [vmem:[#allocation2 + $0x100] sm:$0xff] %vm333_vm1, %v5023_v58  ;;  %367 = vst.msk [vmem:[#allocation2 + $0x108] sm:$0xff] %vm333_vm1, %v5024_v59  ;;  %v2014_v31 = vld [vmem:[#allocation2 + $0x53] sm:$0xff]  ;;  %v2015_v32 = vld [vmem:[#allocation2 + $0x5b] sm:$0xff]  ;;  %v454_v35 = vpack.c.bf16 %v423_v30, %v422_v29 }
  0x25   : > { %368 = vst.msk [vmem:[#allocation2 + $0x110] sm:$0xff] %vm333_vm1, %v5027_v60  ;;  %369 = vst.msk [vmem:[#allocation2 + $0x118] sm:$0xff] %vm333_vm1, %v5028_v1  ;;  %v2046_v36 = vpack.c.bf16 %v2015_v32, %v2014_v31  ;;  %v424_v37 = vld [vmem:[#allocation2 + $0x50] sm:$0xff]  ;;  %v425_v38 = vld [vmem:[#allocation2 + $0x58] sm:$0xff] }
  0x26   : > { %370 = vst.msk [vmem:[#allocation2 + $0x120] sm:$0xff] %vm333_vm1, %v5031_v3  ;;  %371 = vst.msk [vmem:[#allocation2 + $0x128] sm:$0xff] %vm333_vm1, %v5032_v6  ;;  %v2016_v39 = vld [vmem:[#allocation2 + $0x63] sm:$0xff]  ;;  %v2017_v40 = vld [vmem:[#allocation2 + $0x6b] sm:$0xff]  ;;  %v455_v45 = vpack.c.bf16 %v425_v38, %v424_v37 }
  0x27   : > { %372 = vst.msk [vmem:[#allocation2 + $0x130] sm:$0xff] %vm333_vm1, %v5035_v7  ;;  %5346 = vmatmul.mubr.msk.bf16.gmra.mrb[4].mxu1 %vm333_vm1, %v453_v33  ;;  %v426_v41 = vld [vmem:[#allocation2 + $0x60] sm:$0xff]  ;;  %v427_v42 = vld [vmem:[#allocation2 + $0x68] sm:$0xff]  ;;  %v2018_v43 = vld [vmem:[#allocation2 + $0x73] sm:$0xff]  ;;  %v2047_v46 = vpack.c.bf16 %v2017_v40, %v2016_v39 }
  0x28   : > { %5349 = vmatprep.mubr.msk.bf16.mxu1 %vm333_vm1, %v454_v35  ;;  %v2019_v44 = vld [vmem:[#allocation2 + $0x7b] sm:$0xff]  ;;  %v456_v47 = vpack.c.bf16 %v427_v42, %v426_v41  ;;  %v428_v49 = vld [vmem:[#allocation2 + $0x70] sm:$0xff]  ;;  %v2020_v51 = vld [vmem:[#allocation2 + $0x83] sm:$0xff]  ;;  %373 = vst.msk [vmem:[#allocation2 + $0x138] sm:$0xff] %vm333_vm1, %v5036_v4 }
  0x29   : > { %5498 = vmatmul.mubr.msk.bf16.gmra.mrb[4].mxu0 %vm333_vm1, %v2045_v34  ;;  %v2048_v48 = vpack.c.bf16 %v2019_v44, %v2018_v43  ;;  %v429_v50 = vld [vmem:[#allocation2 + $0x78] sm:$0xff]  ;;  %v2021_v53 = vld [vmem:[#allocation2 + $0x8b] sm:$0xff]  ;;  %v430_v54 = vld [vmem:[#allocation2 + $0x80] sm:$0xff] }
  0x2a   : > { %5501 = vmatprep.mubr.msk.bf16.mxu0 %vm333_vm1, %v2046_v36  ;;  %v431_v55 = vld [vmem:[#allocation2 + $0x88] sm:$0xff]  ;;  %v2022_v56 = vld [vmem:[#allocation2 + $0x93] sm:$0xff]  ;;  %v2023_v57 = vld [vmem:[#allocation2 + $0x9b] sm:$0xff]  ;;  %v457_v58 = vpack.c.bf16 %v429_v50, %v428_v49  ;;  %v2049_v59 = vpack.c.bf16 %v2021_v53, %v2020_v51 }
  0x2b   : > { %v458_v60 = vpack.c.bf16 %v431_v55, %v430_v54  ;;  %v2050_v61 = vpack.c.bf16 %v2023_v57, %v2022_v56  ;;  %v432_v62 = vld [vmem:[#allocation2 + $0x90] sm:$0xff]  ;;  %v433_v63 = vld [vmem:[#allocation2 + $0x98] sm:$0xff]  ;;  %v2024_v1 = vld [vmem:[#allocation2 + $0xa3] sm:$0xff] }
  0x2c   : > { %v2025_v3 = vld [vmem:[#allocation2 + $0xab] sm:$0xff]  ;;  %v434_v6 = vld [vmem:[#allocation2 + $0xa0] sm:$0xff]  ;;  %v2404_v8 = vld [vmem:[#allocation2 + $0x14] sm:$0xff]  ;;  %v459_v10 = vpack.c.bf16 %v433_v63, %v432_v62 }
  0x2d   : > { %v435_v7 = vld [vmem:[#allocation2 + $0xa8] sm:$0xff]  ;;  %v2405_v9 = vld [vmem:[#allocation2 + $0x1c] sm:$0xff]  ;;  %v2051_v11 = vpack.c.bf16 %v2025_v3, %v2024_v1  ;;  %v436_v14 = vld [vmem:[#allocation2 + $0xb0] sm:$0xff] }
  0x2e   : > { %v460_v12 = vpack.c.bf16 %v435_v7, %v434_v6  ;;  %v2440_v13 = vpack.c.bf16 %v2405_v9, %v2404_v8  ;;  %v437_v15 = vld [vmem:[#allocation2 + $0xb8] sm:$0xff]  ;;  %v2406_v16 = vld [vmem:[#allocation2 + $0x24] sm:$0xff]  ;;  %v2407_v17 = vld [vmem:[#allocation2 + $0x2c] sm:$0xff] }
  0x2f   : > { %5350 = vmatmul.mubr.msk.bf16.gmra.mrb[8].mxu1 %vm333_vm1, %v455_v45  ;;  %v438_v18 = vld [vmem:[#allocation2 + $0xc0] sm:$0xff]  ;;  %v439_v19 = vld [vmem:[#allocation2 + $0xc8] sm:$0xff]  ;;  %v2408_v20 = vld [vmem:[#allocation2 + $0x34] sm:$0xff]  ;;  %v461_v22 = vpack.c.bf16 %v437_v15, %v436_v14  ;;  %v6182_v5 = vpack.c.bf16 %v2407_v17, %v2406_v16 }
  0x30   : > { %5353 = vmatprep.mubr.msk.bf16.mxu1 %vm333_vm1, %v456_v47  ;;  %v2409_v21 = vld [vmem:[#allocation2 + $0x3c] sm:$0xff]  ;;  %v462_v23 = vpack.c.bf16 %v439_v19, %v438_v18  ;;  %v6194_v28 = vld [vmem:[%s6741_s1 + $0xe] sm:$0x3]  ;;  %v440_v52 = vld [vmem:[#allocation2 + $0xd0] sm:$0xff]  ;;  %v1357_v18 = vsel %vm559_vm0, %v6157_v25, 0 }
  0x31   : > { %5502 = vmatmul.mubr.msk.bf16.gmra.mrb[8].mxu0 %vm333_vm1, %v2047_v46  ;;  %v6185_v26 = vpack.c.bf16 %v2409_v21, %v2408_v20  ;;  %v441_v29 = vld [vmem:[#allocation2 + $0xd8] sm:$0xff]  ;;  %v2410_v30 = vld [vmem:[#allocation2 + $0x44] sm:$0xff]  ;;  %v2411_v24 = vld [vmem:[#allocation2 + $0x4c] sm:$0xff] }
  0x32   : > { %5505 = vmatprep.mubr.msk.bf16.mxu0 %vm333_vm1, %v2048_v48  ;;  %v442_v31 = vld [vmem:[#allocation2 + $0xe0] sm:$0xff]  ;;  %v443_v32 = vld [vmem:[#allocation2 + $0xe8] sm:$0xff]  ;;  %v2412_v33 = vld [vmem:[#allocation2 + $0x54] sm:$0xff]  ;;  %v463_v35 = vpack.c.bf16 %v441_v29, %v440_v52  ;;  %v6203_v36 = vpack.c.bf16 %v2411_v24, %v2410_v30 }
  0x33   : > { %v2413_v34 = vld [vmem:[#allocation2 + $0x5c] sm:$0xff]  ;;  %v464_v37 = vpack.c.bf16 %v443_v32, %v442_v31  ;;  %v444_v41 = vld [vmem:[#allocation2 + $0xf0] sm:$0xff]  ;;  %v2414_v43 = vld [vmem:[#allocation2 + $0x64] sm:$0xff] }
  0x34   : > { %v5150_v38 = vld [vmem:[%s6078_s6 + $0xa0] sm:$0xff]   ;;  %v6206_v39 = vpack.c.bf16 %v2413_v34, %v2412_v33  ;;  %v445_v42 = vld [vmem:[#allocation2 + $0xf8] sm:$0xff]  ;;  %v2415_v44 = vld [vmem:[#allocation2 + $0x6c] sm:$0xff] }
  0x35   : > { %v5039_v40 = vunpack.c.l.bf16 %v5150_v38  ;;  %v446_v45 = vld [vmem:[#allocation2 + $0x100] sm:$0xff]  ;;  %v447_v46 = vld [vmem:[#allocation2 + $0x108] sm:$0xff]  ;;  %v2416_v47 = vld [vmem:[#allocation2 + $0x74] sm:$0xff]  ;;  %v465_v49 = vpack.c.bf16 %v445_v42, %v444_v41  ;;  %v6215_v50 = vpack.c.bf16 %v2415_v44, %v2414_v43 }
  0x36   : > { %v2417_v48 = vld [vmem:[#allocation2 + $0x7c] sm:$0xff]  ;;  %v466_v51 = vpack.c.bf16 %v447_v46, %v446_v45  ;;  %v448_v54 = vld [vmem:[#allocation2 + $0x110] sm:$0xff]  ;;  %v2418_v56 = vld [vmem:[#allocation2 + $0x84] sm:$0xff] }
  0x37   : > { %5354 = vmatmul.mubr.msk.bf16.gmra.mrb[12].mxu1 %vm333_vm1, %v457_v58  ;;  %374 = vst.msk [vmem:[#allocation2 + $0x140] sm:$0xff] %vm333_vm1, %v5039_v40  ;;  %v6217_v53 = vpack.c.bf16 %v2417_v48, %v2416_v47  ;;  %v449_v55 = vld [vmem:[#allocation2 + $0x118] sm:$0xff]  ;;  %v2419_v57 = vld [vmem:[#allocation2 + $0x8c] sm:$0xff]  ;;  %v812_v58 = vld [vmem:[#allocation2 + $0x1] sm:$0xff] }
  0x38   : > { %5357 = vmatprep.mubr.msk.bf16.mxu1 %vm333_vm1, %v458_v60  ;;  %v2420_v60 = vld [vmem:[#allocation2 + $0x94] sm:$0xff]  ;;  %v467_v62 = vpack.c.bf16 %v449_v55, %v448_v54  ;;  %v6225_v63 = vpack.c.bf16 %v2419_v57, %v2418_v56  ;;  %v2422_v8 = vld [vmem:[#allocation2 + $0xa4] sm:$0xff]  ;;  %v2423_v9 = vld [vmem:[#allocation2 + $0xac] sm:$0xff] }
  0x39   : > { %5506 = vmatmul.mubr.msk.bf16.gmra.mrb[12].mxu0 %vm333_vm1, %v2049_v59  ;;  %v813_v59 = vld [vmem:[#allocation2 + $0x9] sm:$0xff]  ;;  %v814_v6 = vld [vmem:[#allocation2 + $0x11] sm:$0xff]  ;;  %v815_v7 = vld [vmem:[#allocation2 + $0x19] sm:$0xff]  ;;  %v6235_v15 = vpack.c.bf16 %v2423_v9, %v2422_v8 }
  0x3a   : > { %5509 = vmatprep.mubr.msk.bf16.mxu0 %vm333_vm1, %v2050_v61  ;;  %v2421_v61 = vld [vmem:[#allocation2 + $0x9c] sm:$0xff]  ;;  %v848_v1 = vpack.c.bf16 %v813_v59, %v812_v58  ;;  %v849_v14 = vpack.c.bf16 %v815_v7, %v814_v6  ;;  %v6245_v19 = vld [vmem:[%s6741_s1 + $0x6] sm:$0x3]  ;;  %v818_v20 = vld [vmem:[#allocation2 + $0x31] sm:$0xff] }
  0x3b   : > { %v6227_v3 = vpack.c.bf16 %v2421_v61, %v2420_v60  ;;  %v819_v21 = vld [vmem:[#allocation2 + $0x39] sm:$0xff]  ;;  %v2427_v25 = vld [vmem:[#allocation2 + $0xcc] sm:$0xff]  ;;  %v2430_v34 = vld [vmem:[#allocation2 + $0xe4] sm:$0xff] }
  0x3c   : > { %v821_v4 = vld [vmem:[#allocation2 + $0x49] sm:$0xff]  ;;  %v2429_v52 = vld [vmem:[#allocation2 + $0xdc] sm:$0xff]  ;;  %v851_v29 = vpack.c.bf16 %v819_v21, %v818_v20  ;;  %v822_v32 = vld [vmem:[#allocation2 + $0x51] sm:$0xff]  ;;  %v3347_v21 = vsel %vm559_vm0, %v6194_v28, 0 }
  0x3d   : > { %v823_v33 = vld [vmem:[#allocation2 + $0x59] sm:$0xff]  ;;  %v825_v38 = vld [vmem:[#allocation2 + $0x69] sm:$0xff]  ;;  %v826_v46 = vld [vmem:[#allocation2 + $0x71] sm:$0xff] }
  0x3e   : > { %v2432_v40 = vld [vmem:[#allocation2 + $0xf4] sm:$0xff]  ;;  %v2433_v41 = vld [vmem:[#allocation2 + $0xfc] sm:$0xff]  ;;  %v853_v42 = vpack.c.bf16 %v823_v33, %v822_v32  ;;  %v2434_v48 = vld [vmem:[#allocation2 + $0x104] sm:$0xff] }
  0x3f   : > { %5358 = vmatmul.mubr.msk.bf16.gmra.mrb[16].mxu1 %vm333_vm1, %v459_v10  ;;  %v816_v10 = vld [vmem:[#allocation2 + $0x21] sm:$0xff]  ;;  %v6266_v45 = vpack.c.bf16 %v2433_v41, %v2432_v40  ;;  %v827_v47 = vld [vmem:[#allocation2 + $0x79] sm:$0xff]  ;;  %v829_v54 = vld [vmem:[#allocation2 + $0x89] sm:$0xff] }
  0x40   : > { %5361 = vmatprep.mubr.msk.bf16.mxu1 %vm333_vm1, %v460_v12  ;;  %v2424_v12 = vld [vmem:[#allocation2 + $0xb4] sm:$0xff]  ;;  %v2437_v56 = vld [vmem:[#allocation2 + $0x11c] sm:$0xff]  ;;  %v855_v57 = vpack.c.bf16 %v827_v47, %v826_v46  ;;  %v2439_v6 = vld [vmem:[#allocation2 + $0x12c] sm:$0xff]  ;;  %v1755_v46 = vsel %vm559_vm0, %v6245_v19, 0 }
  0x41   : > { %5510 = vmatmul.mubr.msk.bf16.gmra.mrb[16].mxu0 %vm333_vm1, %v2051_v11  ;;  %v817_v11 = vld [vmem:[#allocation2 + $0x29] sm:$0xff]  ;;  %v2436_v55 = vld [vmem:[#allocation2 + $0x114] sm:$0xff]  ;;  %v832_v7 = vld [vmem:[#allocation2 + $0xa1] sm:$0xff] }
  0x42   : > { %5531 = vmatprep.mubr.msk.bf16.mxu0 %vm333_vm1, %v2440_v13  ;;  %v2425_v13 = vld [vmem:[#allocation2 + $0xbc] sm:$0xff]  ;;  %v850_v16 = vpack.c.bf16 %v817_v11, %v816_v10  ;;  %v6276_v60 = vpack.c.bf16 %v2437_v56, %v2436_v55  ;;  %v830_v61 = vld [vmem:[#allocation2 + $0x91] sm:$0xff]  ;;  %v833_v8 = vld [vmem:[#allocation2 + $0xa9] sm:$0xff] }
  0x43   : > { %v6237_v17 = vpack.c.bf16 %v2425_v13, %v2424_v12  ;;  %v858_v11 = vpack.c.bf16 %v833_v8, %v832_v7  ;;  %v834_v12 = vld [vmem:[#allocation2 + $0xb1] sm:$0xff]  ;;  %v835_v13 = vld [vmem:[#allocation2 + $0xb9] sm:$0xff]  ;;  %v1214_v40 = vld [vmem:[#allocation2 + $0x22] sm:$0xff] }
  0x44   : > { %v846_v33 = vld [vmem:[#allocation2 + $0x111] sm:$0xff]  ;;  %v4212_v47 = vld [vmem:[%s6742_s2] sm:$0xff] }
  0x45   : > { %v1215_v41 = vld [vmem:[#allocation2 + $0x2a] sm:$0xff]  ;;  %v4215_v55 = vld [vmem:[%s6742_s2 + $0x18] sm:$0xff]  ;;  %v4216_v56 = vld [vmem:[%s6742_s2 + $0x20] sm:$0xff] }
  0x46   : > { %v4219_v7 = vld [vmem:[%s6742_s2 + $0x38] sm:$0xff]  ;;  %v4220_v8 = vld [vmem:[%s6742_s2 + $0x40] sm:$0xff] }
  0x47   : > { %5362 = vmatmul.mubr.msk.bf16.gmra.mrb[20].mxu1 %vm333_vm1, %v461_v22  ;;  %v2426_v22 = vld [vmem:[#allocation2 + $0xc4] sm:$0xff] }
  0x48   : > { %5365 = vmatprep.mubr.msk.bf16.mxu1 %vm333_vm1, %v462_v23  ;;  %v820_v23 = vld [vmem:[#allocation2 + $0x41] sm:$0xff]  ;;  %v6254_v30 = vpack.c.bf16 %v2427_v25, %v2426_v22  ;;  %v6298_v22 = vld [vmem:[%s6741_s1 + $0x10] sm:$0x3]  ;;  %v839_v25 = vld [vmem:[#allocation2 + $0xd9] sm:$0xff] }
  0x49   : > { %5532 = vmatmul.mubr.msk.bf16.vlgmr.msra.gmra.mrb[0].mxu0 %vm333_vm1, %v6182_v5  ;;  %v852_v24 = vpack.c.bf16 %v821_v4, %v820_v23  ;;  %v840_v23 = vld [vmem:[#allocation2 + $0xe1] sm:$0xff] }
  0x4a   : > { %5568 = vmatpush3.bf16.msra.mxu0 %v2949_v27  ;;  %5535 = vmatprep.mubr.msk.bf16.mxu0 %vm333_vm1, %v6185_v26  ;;  %v2428_v27 = vld [vmem:[#allocation2 + $0xd4] sm:$0xff] }
  0x4b   : > { %5979 = vmatprep.subr.msk.bf16.mxu0 %vm559_vm0, %v6194_v28  ;;  %v6256_v31 = vpack.c.bf16 %v2429_v52, %v2428_v27  ;;  %v841_v28 = vld [vmem:[#allocation2 + $0xe9] sm:$0xff]  ;;  %v843_v52 = vld [vmem:[#allocation2 + $0xf9] sm:$0xff] }
  0x4c   : > { %v862_v27 = vpack.c.bf16 %v841_v28, %v840_v23  ;;  %v1231_v23 = vld [vmem:[#allocation2 + $0xaa] sm:$0xff] }
  0x4d   : > { %v3201_v28 = vld [vmem:[#allocation2 + $0x2d] sm:$0xff] }
  0x4f   : > { %5366 = vmatmul.mubr.msk.bf16.gmra.mrb[24].mxu1 %vm333_vm1, %v463_v35  ;;  %v2431_v35 = vld [vmem:[#allocation2 + $0xec] sm:$0xff] }
  0x50   : > { %5369 = vmatprep.mubr.msk.bf16.mxu1 %vm333_vm1, %v464_v37  ;;  %v824_v37 = vld [vmem:[#allocation2 + $0x61] sm:$0xff]  ;;  %v6264_v43 = vpack.c.bf16 %v2431_v35, %v2430_v34  ;;  %v1211_v35 = vld [vmem:[#allocation2 + $0xa] sm:$0xff] }
  0x51   : > { %5536 = vmatmul.mubr.msk.bf16.gmra.mrb[4].mxu0 %vm333_vm1, %v6203_v36  ;;  %v854_v44 = vpack.c.bf16 %v825_v38, %v824_v37  ;;  %v1210_v34 = vld [vmem:[#allocation2 + $0x2] sm:$0xff]  ;;  %v1212_v38 = vld [vmem:[#allocation2 + $0x12] sm:$0xff] }
  0x52   : > { %5539 = vmatprep.mubr.msk.bf16.mxu0 %vm333_vm1, %v6206_v39 }
  0x57   : > { %5370 = vmatmul.mubr.msk.bf16.gmra.mrb[28].mxu1 %vm333_vm1, %v465_v49  ;;  %v2435_v49 = vld [vmem:[#allocation2 + $0x10c] sm:$0xff] }
  0x58   : > { %5373 = vmatprep.mubr.msk.bf16.mxu1 %vm333_vm1, %v466_v51  ;;  %v828_v51 = vld [vmem:[#allocation2 + $0x81] sm:$0xff]  ;;  %v6274_v58 = vpack.c.bf16 %v2435_v49, %v2434_v48  ;;  %v4214_v48 = vld [vmem:[%s6742_s2 + $0x10] sm:$0xff] }
  0x59   : > { %5540 = vmatmul.mubr.msk.bf16.gmra.mrb[8].mxu0 %vm333_vm1, %v6215_v50  ;;  %v856_v59 = vpack.c.bf16 %v829_v54, %v828_v51  ;;  %v1219_v49 = vld [vmem:[#allocation2 + $0x4a] sm:$0xff] }
  0x5a   : > { %5543 = vmatprep.mubr.msk.bf16.mxu0 %vm333_vm1, %v6217_v53  ;;  %v4213_v51 = vld [vmem:[%s6742_s2 + $0x8] sm:$0xff] }
  0x5f   : > { %5374 = vmatmul.mubr.msk.bf16.gmra.mrb[32].mxu1 %vm333_vm1, %v467_v62  ;;  %v831_v62 = vld [vmem:[#allocation2 + $0x99] sm:$0xff] }
  0x60   : > { %5379 = vmatprep.mubr.msk.bf16.mxu1 %vm333_vm1, %v848_v1  ;;  %v2438_v1 = vld [vmem:[#allocation2 + $0x124] sm:$0xff]  ;;  %v857_v9 = vpack.c.bf16 %v831_v62, %v830_v61  ;;  %v4218_v62 = vld [vmem:[%s6742_s2 + $0x30] sm:$0xff] }
  0x61   : > { %5544 = vmatmul.mubr.msk.bf16.gmra.mrb[12].mxu0 %vm333_vm1, %v6225_v63  ;;  %v6284_v10 = vpack.c.bf16 %v2439_v6, %v2438_v1  ;;  %v1225_v6 = vld [vmem:[#allocation2 + $0x7a] sm:$0xff] }
  0x62   : > { %5547 = vmatprep.mubr.msk.bf16.mxu0 %vm333_vm1, %v6227_v3 }
  0x67   : > { %5380 = vmatmul.mubr.msk.bf16.vlgmr.msra.gmra.mrb[0].mxu1 %vm333_vm1, %v849_v14  ;;  %v836_v14 = vld [vmem:[#allocation2 + $0xc1] sm:$0xff] }
  0x68   : > { %5383 = vmatprep.mubr.msk.bf16.mxu1 %vm333_vm1, %v850_v16  ;;  %5416 = vmatpush3.bf16.msra.mxu1 %v1357_v18  ;;  %v837_v16 = vld [vmem:[#allocation2 + $0xc9] sm:$0xff]  ;;  %v859_v18 = vpack.c.bf16 %v835_v13, %v834_v12 }
  0x69   : > { %5548 = vmatmul.mubr.msk.bf16.gmra.mrb[16].mxu0 %vm333_vm1, %v6235_v15  ;;  %5974 = vmatprep.subr.msk.bf16.mxu1 %vm559_vm0, %v6245_v19  ;;  %v860_v20 = vpack.c.bf16 %v837_v16, %v836_v14  ;;  %v1218_v19 = vld [vmem:[#allocation2 + $0x42] sm:$0xff]  ;;  %v4222_v13 = vld [vmem:[%s6742_s2 + $0x50] sm:$0xff]  ;;  %v1229_v16 = vld [vmem:[#allocation2 + $0x9a] sm:$0xff] }
  0x6a   : > { %5551 = vmatprep.mubr.msk.bf16.mxu0 %vm333_vm1, %v6237_v17  ;;  %v6352_v54 = vpack.c.bf16 %v1219_v49, %v1218_v19  ;;  %v3206_v19 = vld [vmem:[#allocation2 + $0x55] sm:$0xff] }
  0x6b   : > { %v4231_v49 = vld [vmem:[%s6742_s2 + $0x98] sm:$0xff] }
  0x6f   : > { %5384 = vmatmul.mubr.msk.bf16.gmra.mrb[4].mxu1 %vm333_vm1, %v851_v29  ;;  %v845_v29 = vld [vmem:[#allocation2 + $0x109] sm:$0xff] }
  0x70   : > { %5387 = vmatprep.mubr.msk.bf16.mxu1 %vm333_vm1, %v852_v24 }
  0x71   : > { %5552 = vmatmul.mubr.msk.bf16.gmra.mrb[20].mxu0 %vm333_vm1, %v6254_v30 }
  0x72   : > { %5555 = vmatprep.mubr.msk.bf16.mxu0 %vm333_vm1, %v6256_v31 }
  0x77   : > { %5388 = vmatmul.mubr.msk.bf16.gmra.mrb[8].mxu1 %vm333_vm1, %v853_v42  ;;  %v6002_v42 = vmov 0  }
  0x78   : > { %5391 = vmatprep.mubr.msk.bf16.mxu1 %vm333_vm1, %v854_v44  ;;  %5992 = vset.pattern.permute.xlu0 %v6002_v42  ;;  %v6327_v44 = vpack.c.bf16 %v1215_v41, %v1214_v40  ;;  %v4230_v41 = vld [vmem:[%s6742_s2 + $0x90] sm:$0xff] }
  0x79   : > { %5556 = vmatmul.mubr.msk.bf16.gmra.mrb[24].mxu0 %vm333_vm1, %v6264_v43  ;;  %5993 = vset.pattern.permute.xlu1 %v6002_v42 }
  0x7a   : > { %5559 = vmatprep.mubr.msk.bf16.mxu0 %vm333_vm1, %v6266_v45  ;;  %4250 = vperm.xlu0 %5992, %v4212_v47   ;;  %v1236_v47 = vld [vmem:[#allocation2 + $0xd2] sm:$0xff] }
  0x7b   : > { %4260 = vperm.xlu1 %5993, %v4214_v48   ;;  %v1237_v48 = vld [vmem:[#allocation2 + $0xda] sm:$0xff] }
  0x7e   : > { %4255 = vperm.xlu0 %5992, %v4213_v51   ;;  %v3207_v51 = vld [vmem:[#allocation2 + $0x5d] sm:$0xff] }
  0x7f   : > { %5392 = vmatmul.mubr.msk.bf16.gmra.mrb[12].mxu1 %vm333_vm1, %v855_v57  ;;  %v1222_v57 = vld [vmem:[#allocation2 + $0x62] sm:$0xff]  ;;  %4265 = vperm.xlu1 %5993, %v4215_v55  }
  0x80   : > { %5395 = vmatprep.mubr.msk.bf16.mxu1 %vm333_vm1, %v856_v59  ;;  %v1223_v59 = vld [vmem:[#allocation2 + $0x6a] sm:$0xff] }
  0x81   : > { %5560 = vmatmul.mubr.msk.bf16.gmra.mrb[28].mxu0 %vm333_vm1, %v6274_v58  ;;  %v6376_v1 = vpack.c.bf16 %v1223_v59, %v1222_v57  ;;  %v3208_v55 = vld [vmem:[#allocation2 + $0x65] sm:$0xff]  ;;  %v6462_v57 = vpack.c.bf16 %v1237_v48, %v1236_v47  ;;  %v4246_v48 = vld [vmem:[%s6742_s2 + $0x110] sm:$0xff] }
  0x82   : > { %5563 = vmatprep.mubr.msk.bf16.mxu0 %vm333_vm1, %v6276_v60  ;;  %4270 = vperm.xlu0 %5992, %v4216_v56   ;;  %v3209_v56 = vld [vmem:[#allocation2 + $0x6d] sm:$0xff] }
  0x83   : > { %v4233_v59 = vld [vmem:[%s6742_s2 + $0xa8] sm:$0xff] }
  0x84   : > { %v4245_v47 = vld [vmem:[%s6742_s2 + $0x108] sm:$0xff] }
  0x86   : > { %4280 = vperm.xlu0 %5992, %v4218_v62   ;;  %v3239_v62 = vpack.c.bf16 %v3207_v51, %v3206_v19  ;;  %v3223_v51 = vld [vmem:[#allocation2 + $0xdd] sm:$0xff] }
  0x87   : > { %5396 = vmatmul.mubr.msk.bf16.gmra.mrb[16].mxu1 %vm333_vm1, %v857_v9  ;;  %v1226_v9 = vld [vmem:[#allocation2 + $0x82] sm:$0xff] }
  0x88   : > { %5399 = vmatprep.mubr.msk.bf16.mxu1 %vm333_vm1, %v858_v11  ;;  %v1227_v11 = vld [vmem:[#allocation2 + $0x8a] sm:$0xff] }
  0x89   : > { %5564 = vmatmul.mubr.msk.bf16.gmra.mrb[32].mxu0 %vm333_vm1, %v6284_v10  ;;  %v6400_v14 = vpack.c.bf16 %v1227_v11, %v1226_v9  ;;  %v3210_v9 = vld [vmem:[#allocation2 + $0x75] sm:$0xff] }
  0x8a   : > { %5569 = vmatprep.mubr.msk.bf16.mxu0 %vm333_vm1, %v6182_v5  ;;  %v838_v5 = vld [vmem:[#allocation2 + $0xd1] sm:$0xff]  ;;  %4290 = vperm.xlu0 %5992, %v4220_v8   ;;  %v1241_v8 = vld [vmem:[#allocation2 + $0xfa] sm:$0xff] }
  0x8b   : > { %v861_v4 = vpack.c.bf16 %v839_v25, %v838_v5  ;;  %v2837_v5 = vld [vmem:[#allocation2 + $0x13c] sm:$0xff] }
  0x8c   : > { %v1230_v25 = vld [vmem:[#allocation2 + $0xa2] sm:$0xff]  ;;  %v4235_v11 = vld [vmem:[%s6742_s2 + $0xb8] sm:$0xff] }
  0x8e   : > { %4300 = vperm.xlu0 %5992, %v4222_v13   ;;  %v3211_v13 = vld [vmem:[#allocation2 + $0x7d] sm:$0xff] }
  0x8f   : > { %5400 = vmatmul.mubr.msk.bf16.gmra.mrb[20].mxu1 %vm333_vm1, %v859_v18  ;;  %v2836_v18 = vld [vmem:[#allocation2 + $0x134] sm:$0xff] }
  0x90   : > { %5403 = vmatprep.mubr.msk.bf16.mxu1 %vm333_vm1, %v860_v20  ;;  %v4223_v20 = vld [vmem:[%s6742_s2 + $0x58] sm:$0xff] }
  0x91   : > { %5570 = vmatmul.mubr.msk.bf16.vlgmr.msra.gmra.mrb[0].mxu0 %vm333_vm1, %v6185_v26  ;;  %v842_v26 = vld [vmem:[#allocation2 + $0xf1] sm:$0xff] }
  0x92   : > { %5606 = vmatpush3.bf16.msra.mxu0 %v3347_v21  ;;  %5573 = vmatprep.mubr.msk.bf16.mxu0 %vm333_vm1, %v6203_v36  ;;  %v844_v36 = vld [vmem:[#allocation2 + $0x101] sm:$0xff]  ;;  %v863_v24 = vpack.c.bf16 %v843_v52, %v842_v26  ;;  %v4226_v26 = vld [vmem:[%s6742_s2 + $0x70] sm:$0xff]  ;;  %v2855_v52 = vpack.c.bf16 %v2837_v5, %v2836_v18 }
  0x93   : > { %5980 = vmatprep.subr.msk.bf16.mxu0 %vm559_vm0, %v6298_v22  ;;  %v864_v32 = vpack.c.bf16 %v845_v29, %v844_v36  ;;  %v4224_v21 = vld [vmem:[%s6742_s2 + $0x60] sm:$0xff]  ;;  %v6424_v36 = vpack.c.bf16 %v1231_v23, %v1230_v25  ;;  %v1232_v29 = vld [vmem:[#allocation2 + $0xb2] sm:$0xff]  ;;  %v4237_v5 = vld [vmem:[%s6742_s2 + $0xc8] sm:$0xff]  ;;  %v3241_v23 = vpack.c.bf16 %v3211_v13, %v3210_v9 }
  0x94   : > { %4310 = vperm.xlu0 %5992, %v4224_v21   ;;  %v3212_v18 = vld [vmem:[#allocation2 + $0x85] sm:$0xff]  ;;  %v4238_v25 = vld [vmem:[%s6742_s2 + $0xd0] sm:$0xff] }
  0x97   : > { %5404 = vmatmul.mubr.msk.bf16.gmra.mrb[24].mxu1 %vm333_vm1, %v861_v4  ;;  %v4225_v4 = vld [vmem:[%s6742_s2 + $0x68] sm:$0xff] }
  0x98   : > { %5407 = vmatprep.mubr.msk.bf16.mxu1 %vm333_vm1, %v862_v27  ;;  %4320 = vperm.xlu0 %5992, %v4226_v26   ;;  %v4240_v26 = vld [vmem:[%s6742_s2 + $0xe0] sm:$0xff] }
  0x99   : > { %5574 = vmatmul.mubr.msk.bf16.gmra.mrb[4].mxu0 %vm333_vm1, %v6206_v39  ;;  %v847_v39 = vld [vmem:[#allocation2 + $0x119] sm:$0xff] }
  0x9a   : > { %5577 = vmatprep.mubr.msk.bf16.mxu0 %vm333_vm1, %v6215_v50  ;;  %v865_v37 = vpack.c.bf16 %v847_v39, %v846_v33  ;;  %v1246_v50 = vpack.c.bf16 %v1211_v35, %v1210_v34  ;;  %v4227_v33 = vld [vmem:[%s6742_s2 + $0x78] sm:$0xff]  ;;  %v4228_v39 = vld [vmem:[%s6742_s2 + $0x80] sm:$0xff] }
  0x9b   : > { %v3203_v34 = vld [vmem:[#allocation2 + $0x3d] sm:$0xff] }
  0x9c   : > { %v1234_v35 = vld [vmem:[#allocation2 + $0xc2] sm:$0xff]  ;;  %4330 = vperm.xlu0 %5992, %v4228_v39  }
  0x9f   : > { %5408 = vmatmul.mubr.msk.bf16.gmra.mrb[28].mxu1 %vm333_vm1, %v863_v24  ;;  %v1233_v24 = vld [vmem:[#allocation2 + $0xba] sm:$0xff] }
  0xa0   : > { %5411 = vmatprep.mubr.msk.bf16.mxu1 %vm333_vm1, %v864_v32  ;;  %v3202_v32 = vld [vmem:[#allocation2 + $0x35] sm:$0xff]  ;;  %v6441_v40 = vpack.c.bf16 %v1233_v24, %v1232_v29  ;;  %4340 = vperm.xlu0 %5992, %v4230_v41   ;;  %v3215_v24 = vld [vmem:[#allocation2 + $0x9d] sm:$0xff] }
  0xa1   : > { %5578 = vmatmul.mubr.msk.bf16.gmra.mrb[8].mxu0 %vm333_vm1, %v6217_v53  ;;  %v1213_v53 = vld [vmem:[#allocation2 + $0x1a] sm:$0xff]  ;;  %v3237_v42 = vpack.c.bf16 %v3203_v34, %v3202_v32  ;;  %v3216_v32 = vld [vmem:[#allocation2 + $0xa5] sm:$0xff] }
  0xa2   : > { %5581 = vmatprep.mubr.msk.bf16.mxu0 %vm333_vm1, %v6225_v63  ;;  %v6325_v63 = vpack.c.bf16 %v1213_v53, %v1212_v38  ;;  %v3205_v38 = vld [vmem:[#allocation2 + $0x4d] sm:$0xff]  ;;  %v3214_v29 = vld [vmem:[#allocation2 + $0x95] sm:$0xff] }
  0xa3   : > { %v4229_v53 = vld [vmem:[%s6742_s2 + $0x88] sm:$0xff]  ;;  %v3218_v41 = vld [vmem:[#allocation2 + $0xb5] sm:$0xff] }
  0xa4   : > { %v4241_v34 = vld [vmem:[%s6742_s2 + $0xe8] sm:$0xff] }
  0xa7   : > { %5412 = vmatmul.mubr.msk.bf16.gmra.mrb[32].mxu1 %vm333_vm1, %v865_v37  ;;  %v1235_v37 = vld [vmem:[#allocation2 + $0xca] sm:$0xff] }
  0xa8   : > { %5417 = vmatprep.mubr.msk.bf16.mxu1 %vm333_vm1, %v1246_v50  ;;  %v3204_v50 = vld [vmem:[#allocation2 + $0x45] sm:$0xff] }
  0xa9   : > { %5582 = vmatmul.mubr.msk.bf16.gmra.mrb[12].mxu0 %vm333_vm1, %v6227_v3  ;;  %v1216_v3 = vld [vmem:[#allocation2 + $0x32] sm:$0xff] }
  0xaa   : > { %5585 = vmatprep.mubr.msk.bf16.mxu0 %vm333_vm1, %v6235_v15  ;;  %v1217_v15 = vld [vmem:[#allocation2 + $0x3a] sm:$0xff] }
  0xaf   : > { %5418 = vmatmul.mubr.msk.bf16.vlgmr.msra.gmra.mrb[0].mxu1 %vm333_vm1, %v6325_v63 }
  0xb0   : > { %5421 = vmatprep.mubr.msk.bf16.mxu1 %vm333_vm1, %v6327_v44  ;;  %5454 = vmatpush3.bf16.msra.mxu1 %v1755_v46  ;;  %v6446_v46 = vpack.c.bf16 %v1235_v37, %v1234_v35  ;;  %v4242_v35 = vld [vmem:[%s6742_s2 + $0xf0] sm:$0xff]  ;;  %v3243_v37 = vpack.c.bf16 %v3215_v24, %v3214_v29 }
  0xb1   : > { %5586 = vmatmul.mubr.msk.bf16.gmra.mrb[16].mxu0 %vm333_vm1, %v6237_v17  ;;  %5976 = vmatprep.subr.msk.bf16.mxu1 %vm559_vm0, %v6044_v0  ;;  %v6347_v17 = vpack.c.bf16 %v1217_v15, %v1216_v3  ;;  %v1221_v0 = vld [vmem:[#allocation2 + $0x5a] sm:$0xff]  ;;  %v3238_v3 = vpack.c.bf16 %v3205_v38, %v3204_v50  ;;  %v3745_v15 = vsel %vm559_vm0, %v6298_v22, 0  ;;  %v1643_v24 = vld [vmem:[#allocation2 + $0x12a] sm:$0xff] }
  0xb2   : > { %5589 = vmatprep.mubr.msk.bf16.mxu0 %vm333_vm1, %v6254_v30  ;;  %v1220_v30 = vld [vmem:[#allocation2 + $0x52] sm:$0xff]  ;;  %v4232_v22 = vld [vmem:[%s6742_s2 + $0xa0] sm:$0xff] }
  0xb3   : > { %v6371_v61 = vpack.c.bf16 %v1221_v0, %v1220_v30  ;;  %v1238_v30 = vld [vmem:[#allocation2 + $0xe2] sm:$0xff]  ;;  %v1239_v0 = vld [vmem:[#allocation2 + $0xea] sm:$0xff]  ;;  %4350 = vperm.xlu0 %5992, %v4232_v22   ;;  %v4243_v38 = vld [vmem:[%s6742_s2 + $0xf8] sm:$0xff] }
  0xb4   : > { %v3222_v22 = vld [vmem:[#allocation2 + $0xd5] sm:$0xff] }
  0xb7   : > { %5422 = vmatmul.mubr.msk.bf16.gmra.mrb[4].mxu1 %vm333_vm1, %v6347_v17 }
  0xb8   : > { %5425 = vmatprep.mubr.msk.bf16.mxu1 %vm333_vm1, %v6352_v54 }
  0xb9   : > { %5590 = vmatmul.mubr.msk.bf16.gmra.mrb[20].mxu0 %vm333_vm1, %v6256_v31  ;;  %v4217_v31 = vld [vmem:[%s6742_s2 + $0x28] sm:$0xff] }
  0xba   : > { %5593 = vmatprep.mubr.msk.bf16.mxu0 %vm333_vm1, %v6264_v43  ;;  %4275 = vperm.xlu1 %5993, %v4217_v31   ;;  %v1224_v43 = vld [vmem:[#allocation2 + $0x72] sm:$0xff] }
  0xbb   : > { %v6395_v12 = vpack.c.bf16 %v1225_v6, %v1224_v43  ;;  %v4234_v31 = vld [vmem:[%s6742_s2 + $0xb0] sm:$0xff]  ;;  %v6470_v43 = vpack.c.bf16 %v1239_v0, %v1238_v30  ;;  %v3240_v6 = vpack.c.bf16 %v3209_v56, %v3208_v55  ;;  %v3224_v30 = vld [vmem:[#allocation2 + $0xe5] sm:$0xff]  ;;  %v3247_v55 = vpack.c.bf16 %v3223_v51, %v3222_v22  ;;  %v3227_v56 = vld [vmem:[#allocation2 + $0xfd] sm:$0xff] }
  0xbc   : > { %4360 = vperm.xlu0 %5992, %v4234_v31   ;;  %v3225_v0 = vld [vmem:[#allocation2 + $0xed] sm:$0xff] }
  0xbe   : > { %4285 = vperm.xlu1 %5993, %v4219_v7   ;;  %v1240_v7 = vld [vmem:[#allocation2 + $0xf2] sm:$0xff] }
  0xbf   : > { %5426 = vmatmul.mubr.msk.bf16.gmra.mrb[8].mxu1 %vm333_vm1, %v6371_v61  ;;  %v6484_v21 = vpack.c.bf16 %v1241_v8, %v1240_v7  ;;  %v3233_v7 = vld [vmem:[#allocation2 + $0x12d] sm:$0xff] }
  0xc0   : > { %5429 = vmatprep.mubr.msk.bf16.mxu1 %vm333_vm1, %v6376_v1 }
  0xc1   : > { %5594 = vmatmul.mubr.msk.bf16.gmra.mrb[24].mxu0 %vm333_vm1, %v6266_v45  ;;  %v4221_v45 = vld [vmem:[%s6742_s2 + $0x48] sm:$0xff] }
  0xc2   : > { %5597 = vmatprep.mubr.msk.bf16.mxu0 %vm333_vm1, %v6274_v58  ;;  %4295 = vperm.xlu1 %5993, %v4221_v45   ;;  %v1228_v58 = vld [vmem:[#allocation2 + $0x92] sm:$0xff]  ;;  %v4236_v45 = vld [vmem:[%s6742_s2 + $0xc0] sm:$0xff] }
  0xc3   : > { %v6419_v27 = vpack.c.bf16 %v1229_v16, %v1228_v58  ;;  %v1242_v58 = vld [vmem:[#allocation2 + $0x102] sm:$0xff]  ;;  %v1243_v16 = vld [vmem:[#allocation2 + $0x10a] sm:$0xff]  ;;  %4370 = vperm.xlu0 %5992, %v4236_v45  }
  0xc4   : > { %v3599_v45 = vld [vmem:[#allocation2 + $0x2e] sm:$0xff] }
  0xc6   : > { %4305 = vperm.xlu1 %5993, %v4223_v20   ;;  %v3213_v20 = vld [vmem:[#allocation2 + $0x8d] sm:$0xff] }
  0xc7   : > { %5430 = vmatmul.mubr.msk.bf16.gmra.mrb[12].mxu1 %vm333_vm1, %v6395_v12  ;;  %4380 = vperm.xlu0 %5992, %v4238_v25   ;;  %v3606_v25 = vld [vmem:[#allocation2 + $0x66] sm:$0xff] }
  0xc8   : > { %5433 = vmatprep.mubr.msk.bf16.mxu1 %vm333_vm1, %v6400_v14 }
  0xc9   : > { %5598 = vmatmul.mubr.msk.bf16.gmra.mrb[28].mxu0 %vm333_vm1, %v6276_v60  ;;  %v3200_v60 = vld [vmem:[#allocation2 + $0x25] sm:$0xff] }
  0xca   : > { %5601 = vmatprep.mubr.msk.bf16.mxu0 %vm333_vm1, %v6284_v10  ;;  %v3236_v10 = vpack.c.bf16 %v3201_v28, %v3200_v60  ;;  %4315 = vperm.xlu1 %5993, %v4225_v4   ;;  %v6492_v60 = vpack.c.bf16 %v1243_v16, %v1242_v58  ;;  %v3242_v28 = vpack.c.bf16 %v3213_v20, %v3212_v18  ;;  %v4239_v4 = vld [vmem:[%s6742_s2 + $0xd8] sm:$0xff]  ;;  %v3602_v16 = vld [vmem:[#allocation2 + $0x46] sm:$0xff]  ;;  %v3603_v18 = vld [vmem:[#allocation2 + $0x4e] sm:$0xff] }
  0xcb   : > { %4390 = vperm.xlu0 %5992, %v4240_v26   ;;  %v3610_v26 = vld [vmem:[#allocation2 + $0x86] sm:$0xff] }
  0xce   : > { %4325 = vperm.xlu1 %5993, %v4227_v33   ;;  %v3217_v33 = vld [vmem:[#allocation2 + $0xad] sm:$0xff] }
  0xcf   : > { %5434 = vmatmul.mubr.msk.bf16.gmra.mrb[16].mxu1 %vm333_vm1, %v6419_v27  ;;  %v3244_v50 = vpack.c.bf16 %v3217_v33, %v3216_v32  ;;  %4400 = vperm.xlu0 %5992, %v4242_v35   ;;  %v3612_v32 = vld [vmem:[#allocation2 + $0x96] sm:$0xff]  ;;  %v3614_v35 = vld [vmem:[#allocation2 + $0xa6] sm:$0xff] }
  0xd0   : > { %5437 = vmatprep.mubr.msk.bf16.mxu1 %vm333_vm1, %v6424_v36  ;;  %v2026_v33 = vld [vmem:[#allocation2 + $0xb3] sm:$0xff] }
  0xd1   : > { %5602 = vmatmul.mubr.msk.bf16.gmra.mrb[32].mxu0 %vm333_vm1, %v2855_v52  ;;  %v1244_v52 = vld [vmem:[#allocation2 + $0x112] sm:$0xff] }
  0xd2   : > { %5607 = vmatprep.mubr.msk.bf16.mxu0 %vm333_vm1, %v3236_v10  ;;  %4335 = vperm.xlu1 %5993, %v4229_v53   ;;  %v1245_v10 = vld [vmem:[#allocation2 + $0x11a] sm:$0xff] }
  0xd3   : > { %v6506_v39 = vpack.c.bf16 %v1245_v10, %v1244_v52  ;;  %v4244_v53 = vld [vmem:[%s6742_s2 + $0x100] sm:$0xff]  ;;  %v3611_v52 = vld [vmem:[#allocation2 + $0x8e] sm:$0xff] }
  0xd4   : > { %4410 = vperm.xlu0 %5992, %v4244_v53   ;;  %v3640_v29 = vpack.c.bf16 %v3611_v52, %v3610_v26 }
  0xd6   : > { %4345 = vperm.xlu1 %5993, %v4231_v49  }
  0xd7   : > { %5438 = vmatmul.mubr.msk.bf16.gmra.mrb[20].mxu1 %vm333_vm1, %v6441_v40 }
  0xd8   : > { %5441 = vmatprep.mubr.msk.bf16.mxu1 %vm333_vm1, %v6446_v46  ;;  %4420 = vperm.xlu0 %5992, %v4246_v48   ;;  %v3618_v48 = vld [vmem:[#allocation2 + $0xc6] sm:$0xff] }
  0xd9   : > { %5608 = vmatmul.mubr.msk.bf16.vlgmr.msra.gmra.mrb[0].mxu0 %vm333_vm1, %v3237_v42  ;;  %v3219_v42 = vld [vmem:[#allocation2 + $0xbd] sm:$0xff] }
  0xda   : > { %5644 = vmatpush3.bf16.msra.mxu0 %v3745_v15  ;;  %5611 = vmatprep.mubr.msk.bf16.mxu0 %vm333_vm1, %v3238_v3  ;;  %v3220_v3 = vld [vmem:[#allocation2 + $0xc5] sm:$0xff]  ;;  %v3221_v15 = vld [vmem:[#allocation2 + $0xcd] sm:$0xff]  ;;  %v3245_v19 = vpack.c.bf16 %v3219_v42, %v3218_v41  ;;  %v3616_v42 = vld [vmem:[#allocation2 + $0xb6] sm:$0xff] }
  0xdb   : > { %4355 = vperm.xlu1 %5993, %v4233_v59   ;;  %v3246_v49 = vpack.c.bf16 %v3221_v15, %v3220_v3  ;;  %v3229_v59 = vld [vmem:[#allocation2 + $0x10d] sm:$0xff]  ;;  %v3617_v3 = vld [vmem:[#allocation2 + $0xbe] sm:$0xff] }
  0xdc   : > { %v2030_v15 = vld [vmem:[#allocation2 + $0xd3] sm:$0xff] }
  0xdf   : > { %5442 = vmatmul.mubr.msk.bf16.gmra.mrb[24].mxu1 %vm333_vm1, %v6462_v57  ;;  %4365 = vperm.xlu1 %5993, %v4235_v11   ;;  %v3598_v11 = vld [vmem:[#allocation2 + $0x26] sm:$0xff] }
  0xe0   : > { %5445 = vmatprep.mubr.msk.bf16.mxu1 %vm333_vm1, %v6470_v43  ;;  %v3634_v58 = vpack.c.bf16 %v3599_v45, %v3598_v11  ;;  %v3626_v11 = vld [vmem:[#allocation2 + $0x106] sm:$0xff]  ;;  %v3627_v45 = vld [vmem:[#allocation2 + $0x10e] sm:$0xff] }
  0xe1   : > { %5612 = vmatmul.mubr.msk.bf16.gmra.mrb[4].mxu0 %vm333_vm1, %v3239_v62 }
  0xe2   : > { %5615 = vmatprep.mubr.msk.bf16.mxu0 %vm333_vm1, %v3240_v6  ;;  %v3232_v6 = vld [vmem:[#allocation2 + $0x125] sm:$0xff] }
  0xe3   : > { %4375 = vperm.xlu1 %5993, %v4237_v5   ;;  %v3252_v9 = vpack.c.bf16 %v3233_v7, %v3232_v6  ;;  %v3636_v5 = vpack.c.bf16 %v3603_v18, %v3602_v16  ;;  %v2036_v6 = vld [vmem:[#allocation2 + $0x103] sm:$0xff]  ;;  %v2037_v7 = vld [vmem:[#allocation2 + $0x10b] sm:$0xff] }
  0xe4   : > { %v2040_v16 = vld [vmem:[#allocation2 + $0x123] sm:$0xff]  ;;  %v2041_v18 = vld [vmem:[#allocation2 + $0x12b] sm:$0xff] }
  0xe7   : > { %5446 = vmatmul.mubr.msk.bf16.gmra.mrb[28].mxu1 %vm333_vm1, %v6484_v21  ;;  %4385 = vperm.xlu1 %5993, %v4239_v4  }
  0xe8   : > { %5449 = vmatprep.mubr.msk.bf16.mxu1 %vm333_vm1, %v6492_v60 }
  0xe9   : > { %5616 = vmatmul.mubr.msk.bf16.gmra.mrb[8].mxu0 %vm333_vm1, %v3241_v23  ;;  %v3607_v23 = vld [vmem:[#allocation2 + $0x6e] sm:$0xff] }
  0xea   : > { %5619 = vmatprep.mubr.msk.bf16.mxu0 %vm333_vm1, %v3242_v28  ;;  %v3638_v4 = vpack.c.bf16 %v3607_v23, %v3606_v25  ;;  %v2059_v25 = vpack.c.bf16 %v2041_v18, %v2040_v16 }
  0xeb   : > { %4395 = vperm.xlu1 %5993, %v4241_v34   ;;  %v2027_v34 = vld [vmem:[#allocation2 + $0xbb] sm:$0xff] }
  0xec   : > { %v2052_v53 = vpack.c.bf16 %v2027_v34, %v2026_v33 }
  0xef   : > { %5450 = vmatmul.mubr.msk.bf16.gmra.mrb[32].mxu1 %vm333_vm1, %v6506_v39  ;;  %4405 = vperm.xlu1 %5993, %v4243_v38  }
  0xf0   : > { %5455 = vmatprep.mubr.msk.bf16.mxu1 %vm333_vm1, %v6325_v63  ;;  %v4247_v63 = vld [vmem:[%s6742_s2 + $0x118] sm:$0xff] }
  0xf1   : > { %5620 = vmatmul.mubr.msk.bf16.gmra.mrb[12].mxu0 %vm333_vm1, %v3243_v37  ;;  %v3615_v37 = vld [vmem:[#allocation2 + $0xae] sm:$0xff] }
  0xf2   : > { %5623 = vmatprep.mubr.msk.bf16.mxu0 %vm333_vm1, %v3244_v50  ;;  %v3642_v41 = vpack.c.bf16 %v3615_v37, %v3614_v35 }
  0xf3   : > { %4415 = vperm.xlu1 %5993, %v4245_v47   ;;  %v2031_v47 = vld [vmem:[#allocation2 + $0xdb] sm:$0xff] }
  0xf4   : > { %v2054_v22 = vpack.c.bf16 %v2031_v47, %v2030_v15 }
  0xf7   : > { %5456 = vmatmul.mubr.msk.bf16.vlgmr.msra.gmra.mrb[0].mxu1 %vm333_vm1, %v6327_v44  ;;  %4425 = vperm.xlu1 %5993, %v4247_v63   ;;  %v3248_v44 = vpack.c.bf16 %v3225_v0, %v3224_v30  ;;  %v3643_v63 = vpack.c.bf16 %v3617_v3, %v3616_v42  ;;  %v2032_v30 = vld [vmem:[#allocation2 + $0xe3] sm:$0xff]  ;;  %v2033_v0 = vld [vmem:[#allocation2 + $0xeb] sm:$0xff] }
  0xf8   : > { %5459 = vmatprep.mubr.msk.bf16.mxu1 %vm333_vm1, %v6347_v17  ;;  %5682 = vmatpush3.bf16.msra.mxu1 %v6054_v2  ;;  %v3226_v17 = vld [vmem:[#allocation2 + $0xf5] sm:$0xff]  ;;  %v3228_v2 = vld [vmem:[#allocation2 + $0x105] sm:$0xff] }
  0xf9   : > { %5624 = vmatmul.mubr.msk.bf16.gmra.mrb[16].mxu0 %vm333_vm1, %v3245_v19  ;;  %v3249_v31 = vpack.c.bf16 %v3227_v56, %v3226_v17  ;;  %v3250_v62 = vpack.c.bf16 %v3229_v59, %v3228_v2  ;;  %v3619_v19 = vld [vmem:[#allocation2 + $0xce] sm:$0xff]  ;;  %v2035_v56 = vld [vmem:[#allocation2 + $0xfb] sm:$0xff]  ;;  %v3622_v2 = vld [vmem:[#allocation2 + $0xe6] sm:$0xff]  ;;  %v4251_v26 = vpop.permute.xlu0 %4250 }
  0xfa   : > { %5627 = vmatprep.mubr.msk.bf16.mxu0 %vm333_vm1, %v3246_v49  ;;  %v3644_v51 = vpack.c.bf16 %v3619_v19, %v3618_v48  ;;  %v2034_v17 = vld [vmem:[#allocation2 + $0xf3] sm:$0xff] }
  0xfb   : > { %v3623_v59 = vld [vmem:[#allocation2 + $0xee] sm:$0xff] }
  0xff   : > { %5460 = vmatmul.mubr.msk.bf16.gmra.mrb[4].mxu1 %vm333_vm1, %v6352_v54  ;;  %v3230_v54 = vld [vmem:[#allocation2 + $0x115] sm:$0xff] }
 0x100   : > { %5463 = vmatprep.mubr.msk.bf16.mxu1 %vm333_vm1, %v6371_v61  ;;  %v3231_v61 = vld [vmem:[#allocation2 + $0x11d] sm:$0xff] }
 0x101   : > { %5628 = vmatmul.mubr.msk.bf16.gmra.mrb[20].mxu0 %vm333_vm1, %v3247_v55  ;;  %v3251_v8 = vpack.c.bf16 %v3231_v61, %v3230_v54  ;;  %v3620_v55 = vld [vmem:[#allocation2 + $0xd6] sm:$0xff]  ;;  %v2056_v54 = vpack.c.bf16 %v2035_v56, %v2034_v17  ;;  %v3646_v61 = vpack.c.bf16 %v3623_v59, %v3622_v2 }
 0x102   : > { %5631 = vmatprep.mubr.msk.bf16.mxu0 %vm333_vm1, %v3248_v44  ;;  %v3621_v44 = vld [vmem:[#allocation2 + $0xde] sm:$0xff] }
 0x107   : > { %5464 = vmatmul.mubr.msk.bf16.gmra.mrb[8].mxu1 %vm333_vm1, %v6376_v1  ;;  %v3234_v1 = vld [vmem:[#allocation2 + $0x135] sm:$0xff] }
 0x108   : > { %5467 = vmatprep.mubr.msk.bf16.mxu1 %vm333_vm1, %v6395_v12  ;;  %v3235_v12 = vld [vmem:[#allocation2 + $0x13d] sm:$0xff] }
 0x109   : > { %5632 = vmatmul.mubr.msk.bf16.gmra.mrb[24].mxu0 %vm333_vm1, %v3249_v31  ;;  %v3253_v13 = vpack.c.bf16 %v3235_v12, %v3234_v1  ;;  %v2055_v31 = vpack.c.bf16 %v2033_v0, %v2032_v30  ;;  %v2038_v1 = vld [vmem:[#allocation2 + $0x113] sm:$0xff]  ;;  %v2039_v12 = vld [vmem:[#allocation2 + $0x11b] sm:$0xff] }
 0x10a   : > { %5635 = vmatprep.mubr.msk.bf16.mxu0 %vm333_vm1, %v3250_v62  ;;  %v3645_v62 = vpack.c.bf16 %v3621_v44, %v3620_v55 }
 0x10f   : > { %5468 = vmatmul.mubr.msk.bf16.gmra.mrb[12].mxu1 %vm333_vm1, %v6400_v14  ;;  %v3600_v14 = vld [vmem:[#allocation2 + $0x36] sm:$0xff] }
 0x110   : > { %5471 = vmatprep.mubr.msk.bf16.mxu1 %vm333_vm1, %v6419_v27  ;;  %v3601_v27 = vld [vmem:[#allocation2 + $0x3e] sm:$0xff] }
 0x111   : > { %5636 = vmatmul.mubr.msk.bf16.gmra.mrb[28].mxu0 %vm333_vm1, %v3251_v8  ;;  %v3635_v20 = vpack.c.bf16 %v3601_v27, %v3600_v14  ;;  %v3624_v8 = vld [vmem:[#allocation2 + $0xf6] sm:$0xff]  ;;  %v2058_v14 = vpack.c.bf16 %v2039_v12, %v2038_v1  ;;  %v3648_v27 = vpack.c.bf16 %v3627_v45, %v3626_v11 }
 0x112   : > { %5639 = vmatprep.mubr.msk.bf16.mxu0 %vm333_vm1, %v3252_v9  ;;  %v3625_v9 = vld [vmem:[#allocation2 + $0xfe] sm:$0xff] }
 0x117   : > { %5472 = vmatmul.mubr.msk.bf16.gmra.mrb[16].mxu1 %vm333_vm1, %v6424_v36  ;;  %v3604_v36 = vld [vmem:[#allocation2 + $0x56] sm:$0xff] }
 0x118   : > { %5475 = vmatprep.mubr.msk.bf16.mxu1 %vm333_vm1, %v6441_v40  ;;  %v3605_v40 = vld [vmem:[#allocation2 + $0x5e] sm:$0xff] }
 0x119   : > { %5640 = vmatmul.mubr.msk.bf16.gmra.mrb[32].mxu0 %vm333_vm1, %v3253_v13  ;;  %v3637_v28 = vpack.c.bf16 %v3605_v40, %v3604_v36  ;;  %v2057_v13 = vpack.c.bf16 %v2037_v7, %v2036_v6  ;;  %v3630_v36 = vld [vmem:[#allocation2 + $0x126] sm:$0xff]  ;;  %v3631_v40 = vld [vmem:[#allocation2 + $0x12e] sm:$0xff] }
 0x11a   : > { %5645 = vmatprep.mubr.msk.bf16.mxu0 %vm333_vm1, %v3634_v58  ;;  %v3647_v58 = vpack.c.bf16 %v3625_v9, %v3624_v8 }
 0x11f   : > { %5476 = vmatmul.mubr.msk.bf16.gmra.mrb[20].mxu1 %vm333_vm1, %v6446_v46  ;;  %v3608_v46 = vld [vmem:[#allocation2 + $0x76] sm:$0xff] }
 0x120   : > { %5479 = vmatprep.mubr.msk.bf16.mxu1 %vm333_vm1, %v6462_v57  ;;  %v3609_v57 = vld [vmem:[#allocation2 + $0x7e] sm:$0xff] }
 0x121   : > { %5646 = vmatmul.mubr.msk.bf16.vlgmr.msra.gmra.mrb[0].mxu0 %vm333_vm1, %v3635_v20  ;;  %v3639_v10 = vpack.c.bf16 %v3609_v57, %v3608_v46  ;;  %v3628_v20 = vld [vmem:[#allocation2 + $0x116] sm:$0xff]  ;;  %v3633_v46 = vld [vmem:[#allocation2 + $0x13e] sm:$0xff] }
 0x122   : > { %5649 = vmatprep.mubr.msk.bf16.mxu0 %vm333_vm1, %v3636_v5  ;;  %v3629_v5 = vld [vmem:[#allocation2 + $0x11e] sm:$0xff] }
 0x123   : > { %v3649_v23 = vpack.c.bf16 %v3629_v5, %v3628_v20 }
 0x127   : > { %5480 = vmatmul.mubr.msk.bf16.gmra.mrb[24].mxu1 %vm333_vm1, %v6470_v43  ;;  %v1642_v43 = vld [vmem:[#allocation2 + $0x122] sm:$0xff] }
 0x128   : > { %5483 = vmatprep.mubr.msk.bf16.mxu1 %vm333_vm1, %v6484_v21  ;;  %v3613_v21 = vld [vmem:[#allocation2 + $0x9e] sm:$0xff]  ;;  %v1661_v50 = vpack.c.bf16 %v1643_v24, %v1642_v43  ;;  %v4261_v24 = vpop.permute.xlu1 %4260 }
 0x129   : > { %5650 = vmatmul.mubr.msk.bf16.gmra.mrb[4].mxu0 %vm333_vm1, %v3637_v28  ;;  %v3641_v38 = vpack.c.bf16 %v3613_v21, %v3612_v32  ;;  %v3650_v28 = vpack.c.bf16 %v3631_v40, %v3630_v36  ;;  %v4256_v32 = vpop.permute.xlu0 %4255 }
 0x12a   : > { %5653 = vmatprep.mubr.msk.bf16.mxu0 %vm333_vm1, %v3638_v4  ;;  %v3632_v4 = vld [vmem:[#allocation2 + $0x136] sm:$0xff] }
 0x12b   : > { %v3651_v57 = vpack.c.bf16 %v3633_v46, %v3632_v4 }
 0x12c   : > { %v4266_v35 = vpop.permute.xlu1 %4265 }
 0x12f   : > { %5484 = vmatmul.mubr.msk.bf16.gmra.mrb[28].mxu1 %vm333_vm1, %v6492_v60  ;;  %v2028_v60 = vld [vmem:[#allocation2 + $0xc3] sm:$0xff] }
 0x130   : > { %5487 = vmatprep.mubr.msk.bf16.mxu1 %vm333_vm1, %v6506_v39  ;;  %v2029_v39 = vld [vmem:[#allocation2 + $0xcb] sm:$0xff] }
 0x131   : > { %5654 = vmatmul.mubr.msk.bf16.gmra.mrb[8].mxu0 %vm333_vm1, %v3639_v10  ;;  %v2053_v49 = vpack.c.bf16 %v2029_v39, %v2028_v60 }
 0x132   : > { %5657 = vmatprep.mubr.msk.bf16.mxu0 %vm333_vm1, %v3640_v29 }
 0x137   : > { %5488 = vmatmul.mubr.msk.bf16.gmra.mrb[32].mxu1 %vm333_vm1, %v1661_v50  ;;  %v4271_v50 = vpop.permute.xlu0 %4270 }
 0x138   : > { %5513 = vmatprep.mubr.msk.bf16.mxu1 %vm333_vm1, %v2052_v53 }
 0x139   : > { %5658 = vmatmul.mubr.msk.bf16.gmra.mrb[12].mxu0 %vm333_vm1, %v3641_v38  ;;  %v6606_v53 = vpop.permute.xlu1 %4275 }
 0x13a   : > { %5661 = vmatprep.mubr.msk.bf16.mxu0 %vm333_vm1, %v3642_v41 }
 0x13b   : > { %v6610_v60 = vpop.permute.xlu0 %4280 }
 0x13d   : > { %v6616_v3 = vpop.permute.xlu1 %4285 }
 0x13f   : > { %5514 = vmatmul.mubr.msk.bf16.vlgmr.msra.gmra.mrb[20].mxu1 %vm333_vm1, %v2053_v49  ;;  %v6618_v15 = vpop.permute.xlu0 %4290 }
 0x140   : > { %5517 = vmatprep.mubr.msk.bf16.mxu1 %vm333_vm1, %v2054_v22 }
 0x141   : > { %5662 = vmatmul.mubr.msk.bf16.gmra.mrb[16].mxu0 %vm333_vm1, %v3643_v63  ;;  %v6628_v63 = vpop.permute.xlu1 %4295 }
 0x142   : > { %5665 = vmatprep.mubr.msk.bf16.mxu0 %vm333_vm1, %v3644_v51 }
 0x143   : > { %v6630_v22 = vpop.permute.xlu0 %4300 }
 0x145   : > { %v6638_v55 = vpop.permute.xlu1 %4305 }
 0x147   : > { %5518 = vmatmul.mubr.msk.bf16.gmra.mrb[24].mxu1 %vm333_vm1, %v2055_v31  ;;  %v6642_v17 = vpop.permute.xlu0 %4310 }
 0x148   : > { %5521 = vmatprep.mubr.msk.bf16.mxu1 %vm333_vm1, %v2056_v54 }
 0x149   : > { %5666 = vmatmul.mubr.msk.bf16.gmra.mrb[20].mxu0 %vm333_vm1, %v3645_v62  ;;  %v6644_v56 = vpop.permute.xlu1 %4315 }
 0x14a   : > { %5669 = vmatprep.mubr.msk.bf16.mxu0 %vm333_vm1, %v3646_v61 }
 0x14b   : > { %v6647_v59 = vpop.permute.xlu0 %4320 }
 0x14d   : > { %v6654_v12 = vpop.permute.xlu1 %4325 }
 0x14f   : > { %5522 = vmatmul.mubr.msk.bf16.gmra.mrb[28].mxu1 %vm333_vm1, %v2057_v13 }
 0x150   : > { %5525 = vmatprep.mubr.msk.bf16.mxu1 %vm333_vm1, %v2058_v14 }
 0x151   : > { %5670 = vmatmul.mubr.msk.bf16.gmra.mrb[24].mxu0 %vm333_vm1, %v3647_v58  ;;  %v6656_v58 = vpop.permute.xlu0 %4330 }
 0x152   : > { %5673 = vmatprep.mubr.msk.bf16.mxu0 %vm333_vm1, %v3648_v27 }
 0x157   : > { %5526 = vmatmul.mubr.msk.bf16.gmra.mrb[32].mxu1 %vm333_vm1, %v2059_v25 }
 0x159   : > { %5674 = vmatmul.mubr.msk.bf16.gmra.mrb[28].mxu0 %vm333_vm1, %v3649_v23 }
 0x15a   : > { %5677 = vmatprep.mubr.msk.bf16.mxu0 %vm333_vm1, %v3650_v28 }
 0x161   : > { %5678 = vmatmul.mubr.msk.bf16.gmra.mrb[32].mxu0 %vm333_vm1, %v3651_v57 }
 0x1ca   : > { %v5457_v52 = vpop.f32.mrb[0].mxu1 }
 0x1cb   : > { %v1791_v10 = vpop.f32.mrb[1].mxu1 }
 0x1cc   : > { %v5458_v29 = vpop.f32.mrb[2].mxu1 }
 0x1cd   : > { %v1794_v43 = vpop.f32.mrb[3].mxu1 }
 0x1d2   : > { %v5461_v21 = vpop.f32.mrb[4].mxu1 }
 0x1d3   : > { %v1807_v33 = vpop.f32.mrb[5].mxu1 }
 0x1d4   : > { %v5462_v34 = vpop.f32.mrb[6].mxu1 }
 0x1d5   : > { %v1810_v37 = vpop.f32.mrb[7].mxu1 }
 0x1da   : > { %v6604_v38 = vpop.f32.mrb[8].mxu1 }
 0x1db   : > { %v6608_v41 = vpop.f32.mrb[9].mxu1 }
 0x1dc   : > { %v6612_v39 = vpop.f32.mrb[10].mxu1 }
 0x1dd   : > { %v6614_v42 = vpop.f32.mrb[11].mxu1 }
 0x1e2   : > { %v6620_v47 = vpop.f32.mrb[12].mxu1 }
 0x1e3   : > { %v6622_v48 = vpop.f32.mrb[13].mxu1 }
 0x1e4   : > { %v6624_v19 = vpop.f32.mrb[14].mxu1 }
 0x1e5   : > { %v6626_v49 = vpop.f32.mrb[15].mxu1 }
 0x1ea   : > { %v6632_v51 = vpop.f32.mrb[16].mxu1 }
 0x1eb   : > { %v6634_v30 = vpop.f32.mrb[17].mxu1 }
 0x1ec   : > { %v6636_v0 = vpop.f32.mrb[18].mxu1 }
 0x1ed   : > { %v6640_v44 = vpop.f32.mrb[19].mxu1 }
 0x1f4   : > { %v5647_v2 = vpop.f32.mrb[0].mxu0 }
 0x1f5   : > { %v5683_v31 = vadd.f32 %v5647_v2, %v5457_v52  ;;  %v3781_v62 = vpop.f32.mrb[1].mxu0  ;;  %v6660_v52 = vpop.permute.xlu1 %4335 }
 0x1f6   : > { %v5684_v54 = vadd.f32 %v3781_v62, %v1791_v10  ;;  %v5648_v61 = vpop.f32.mrb[2].mxu0 }
 0x1f7   : > { %v5685_v6 = vadd.f32 %v5648_v61, %v5458_v29  ;;  %v3784_v7 = vpop.f32.mrb[3].mxu0  ;;  %v4430_v11 = vmul.f32 %v5683_v31, %v4261_v24 }
 0x1f8   : > { %v4428_v8 = vmul.f32 %v5684_v54, %v4251_v26  ;;  %v5686_v9 = vadd.f32 %v3784_v7, %v1794_v43 }
 0x1f9   : > { %v5049_v1 = vpack.c.bf16 %v5685_v6, %v5683_v31  ;;  %v4431_v14 = vmul.f32 %v5685_v6, %v4266_v35  ;;  %v4507_v40 = vmul.f32 %v5683_v31, %v4430_v11 }
 0x1fa   : > { %v5044_v45 = vpack.c.bf16 %v5686_v9, %v5684_v54  ;;  %v4429_v13 = vmul.f32 %v5686_v9, %v4256_v32  ;;  %v4505_v27 = vmul.f32 %v5684_v54, %v4428_v8  ;;  %v6662_v32 = vpop.permute.xlu0 %4340 }
 0x1fb   : > { %5151 = vst [vmem:[%s6652_s25 + $0x8] sm:$0xff] %v5049_v1   ;;  %v4508_v46 = vmul.f32 %v5685_v6, %v4431_v14 }
 0x1fc   : > { %5045 = vst [vmem:[%s6652_s25] sm:$0xff] %v5044_v45   ;;  %v4464_v16 = vadd.f32 %v4429_v13, %v4428_v8  ;;  %v4506_v18 = vmul.f32 %v5686_v9, %v4429_v13  ;;  %v5651_v20 = vpop.f32.mrb[4].mxu0  ;;  %v6670_v9 = vpop.permute.xlu1 %4345 }
 0x1fd   : > { %v5687_v5 = vadd.f32 %v5651_v20, %v5461_v21  ;;  %v3797_v36 = vpop.f32.mrb[5].mxu0 }
 0x1fe   : > { %v4465_v25 = vadd.f32 %v4464_v16, %v4430_v11  ;;  %v4541_v23 = vadd.f32 %v4506_v18, %v4505_v27  ;;  %v5688_v28 = vadd.f32 %v3797_v36, %v1807_v33  ;;  %v5652_v4 = vpop.f32.mrb[6].mxu0  ;;  %v6673_v45 = vpop.permute.xlu0 %4350 }
 0x1ff   : > { %v5689_v57 = vadd.f32 %v5652_v4, %v5462_v34  ;;  %v3800_v26 = vpop.f32.mrb[7].mxu0  ;;  %v4434_v33 = vmul.f32 %v5687_v5, %v6610_v60 }
 0x200   : > { %v4542_v10 = vadd.f32 %v4541_v23, %v4507_v40  ;;  %v4432_v29 = vmul.f32 %v5688_v28, %v4271_v50  ;;  %v4466_v43 = vadd.f32 %v4465_v25, %v4431_v14  ;;  %v5690_v24 = vadd.f32 %v3800_v26, %v1810_v37 }
 0x201   : > { %v5059_v21 = vpack.c.bf16 %v5689_v57, %v5687_v5  ;;  %v4435_v6 = vmul.f32 %v5689_v57, %v6616_v3  ;;  %v4511_v60 = vmul.f32 %v5687_v5, %v4434_v33 }
 0x202   : > { %v4467_v35 = vadd.f32 %v4466_v43, %v4432_v29  ;;  %v4509_v2 = vmul.f32 %v5688_v28, %v4432_v29  ;;  %v4543_v31 = vadd.f32 %v4542_v10, %v4508_v46  ;;  %v5054_v62 = vpack.c.bf16 %v5690_v24, %v5688_v28  ;;  %v6684_v46 = vpop.permute.xlu0 %4360 }
 0x203   : > { %5153 = vst [vmem:[%s6652_s25 + $0x18] sm:$0xff] %v5059_v21   ;;  %v4433_v34 = vmul.f32 %v5690_v24, %v6606_v53  ;;  %v4512_v16 = vmul.f32 %v5689_v57, %v4435_v6 }
 0x204   : > { %v4544_v54 = vadd.f32 %v4543_v31, %v4509_v2  ;;  %5152 = vst [vmem:[%s6652_s25 + $0x10] sm:$0xff] %v5054_v62   ;;  %v5655_v61 = vpop.f32.mrb[8].mxu0 }
 0x205   : > { %v4468_v50 = vadd.f32 %v4467_v35, %v4433_v34  ;;  %v4510_v7 = vmul.f32 %v5690_v24, %v4433_v34  ;;  %v5691_v37 = vadd.f32 %v5655_v61, %v6604_v38  ;;  %v3813_v8 = vpop.f32.mrb[9].mxu0 }
 0x206   : > { %v5692_v1 = vadd.f32 %v3813_v8, %v6608_v41  ;;  %v5656_v11 = vpop.f32.mrb[10].mxu0 }
 0x207   : > { %v4469_v13 = vadd.f32 %v4468_v50, %v4434_v33  ;;  %v4545_v53 = vadd.f32 %v4544_v54, %v4510_v7  ;;  %v5693_v14 = vadd.f32 %v5656_v11, %v6612_v39  ;;  %v3816_v3 = vpop.f32.mrb[11].mxu0  ;;  %v4438_v5 = vmul.f32 %v5691_v37, %v6630_v22  ;;  %v6681_v39 = vpop.permute.xlu1 %4355 }
 0x208   : > { %v4436_v27 = vmul.f32 %v5692_v1, %v6618_v15  ;;  %v5694_v38 = vadd.f32 %v3816_v3, %v6614_v42  ;;  %v6695_v50 = vpop.permute.xlu0 %4370 }
 0x209   : > { %v4546_v18 = vadd.f32 %v4545_v53, %v4511_v60  ;;  %v4470_v20 = vadd.f32 %v4469_v13, %v4435_v6  ;;  %v5069_v36 = vpack.c.bf16 %v5693_v14, %v5691_v37  ;;  %v4439_v57 = vmul.f32 %v5693_v14, %v6638_v55 }
 0x20a   : > { %v4513_v41 = vmul.f32 %v5692_v1, %v4436_v27  ;;  %v5064_v40 = vpack.c.bf16 %v5694_v38, %v5692_v1  ;;  %v4437_v25 = vmul.f32 %v5694_v38, %v6628_v63  ;;  %v4515_v43 = vmul.f32 %v5691_v37, %v4438_v5 }
 0x20b   : > { %v4471_v23 = vadd.f32 %v4470_v20, %v4436_v27  ;;  %v4547_v28 = vadd.f32 %v4546_v18, %v4512_v16  ;;  %5155 = vst [vmem:[%s6652_s25 + $0x28] sm:$0xff] %v5069_v36   ;;  %v4516_v55 = vmul.f32 %v5693_v14, %v4439_v57  ;;  %v6692_v54 = vpop.permute.xlu1 %4365 }
 0x20c   : > { %5154 = vst [vmem:[%s6652_s25 + $0x20] sm:$0xff] %v5064_v40   ;;  %v4514_v4 = vmul.f32 %v5694_v38, %v4437_v25  ;;  %v5659_v15 = vpop.f32.mrb[12].mxu0 }
 0x20d   : > { %v4548_v42 = vadd.f32 %v4547_v28, %v4513_v41  ;;  %v4472_v26 = vadd.f32 %v4471_v23, %v4437_v25  ;;  %v5695_v10 = vadd.f32 %v5659_v15, %v6620_v47  ;;  %v3829_v29 = vpop.f32.mrb[13].mxu0  ;;  %v6709_v15 = vpop.permute.xlu0 %4380 }
 0x20e   : > { %v5696_v63 = vadd.f32 %v3829_v29, %v6622_v48  ;;  %v5660_v22 = vpop.f32.mrb[14].mxu0 }
 0x20f   : > { %v4473_v24 = vadd.f32 %v4472_v26, %v4438_v5  ;;  %v4549_v21 = vadd.f32 %v4548_v42, %v4514_v4  ;;  %v5697_v35 = vadd.f32 %v5660_v22, %v6624_v19  ;;  %v3832_v2 = vpop.f32.mrb[15].mxu0  ;;  %v4442_v19 = vmul.f32 %v5695_v10, %v6647_v59  ;;  %v6706_v23 = vpop.permute.xlu1 %4375 }
 0x210   : > { %v4440_v31 = vmul.f32 %v5696_v63, %v6642_v17  ;;  %v5698_v62 = vadd.f32 %v3832_v2, %v6626_v49 }
 0x211   : > { %v4550_v33 = vadd.f32 %v4549_v21, %v4515_v43  ;;  %v4474_v34 = vadd.f32 %v4473_v24, %v4439_v57  ;;  %v5079_v47 = vpack.c.bf16 %v5697_v35, %v5695_v10  ;;  %v4443_v60 = vmul.f32 %v5697_v35, %v6654_v12 }
 0x212   : > { %v4517_v48 = vmul.f32 %v5696_v63, %v4440_v31  ;;  %v5074_v61 = vpack.c.bf16 %v5698_v62, %v5696_v63  ;;  %v4441_v6 = vmul.f32 %v5698_v62, %v6644_v56  ;;  %v5515_v17 = vpop.f32.mrb[20].mxu1  ;;  %v4519_v38 = vmul.f32 %v5695_v10, %v4442_v19 }
 0x213   : > { %v4475_v7 = vadd.f32 %v4474_v34, %v4440_v31  ;;  %v4551_v37 = vadd.f32 %v4550_v33, %v4516_v55  ;;  %5157 = vst [vmem:[%s6652_s25 + $0x38] sm:$0xff] %v5079_v47   ;;  %v2269_v1 = vpop.f32.mrb[21].mxu1  ;;  %v4520_v40 = vmul.f32 %v5697_v35, %v4443_v60 }
 0x214   : > { %5156 = vst [vmem:[%s6652_s25 + $0x30] sm:$0xff] %v5074_v61   ;;  %v4518_v49 = vmul.f32 %v5698_v62, %v4441_v6  ;;  %v5663_v8 = vpop.f32.mrb[16].mxu0  ;;  %v5516_v56 = vpop.f32.mrb[22].mxu1 }
 0x215   : > { %v4552_v11 = vadd.f32 %v4551_v37, %v4517_v48  ;;  %v4476_v13 = vadd.f32 %v4475_v7, %v4441_v6  ;;  %v5699_v53 = vadd.f32 %v5663_v8, %v6632_v51  ;;  %v3845_v14 = vpop.f32.mrb[17].mxu0  ;;  %v2272_v59 = vpop.f32.mrb[23].mxu1 }
 0x216   : > { %v5700_v3 = vadd.f32 %v3845_v14, %v6634_v30  ;;  %v5664_v27 = vpop.f32.mrb[18].mxu0 }
 0x217   : > { %v4477_v16 = vadd.f32 %v4476_v13, %v4442_v19  ;;  %v4553_v18 = vadd.f32 %v4552_v11, %v4518_v49  ;;  %v5701_v20 = vadd.f32 %v5664_v27, %v6636_v0  ;;  %v3848_v36 = vpop.f32.mrb[19].mxu0  ;;  %v4446_v0 = vmul.f32 %v5699_v53, %v6662_v32  ;;  %v4386_v19 = vpop.permute.xlu1 %4385 }
 0x218   : > { %v4444_v41 = vmul.f32 %v5700_v3, %v6656_v58  ;;  %v5702_v12 = vadd.f32 %v3848_v36, %v6640_v44  ;;  %v4391_v49 = vpop.permute.xlu0 %4390 }
 0x219   : > { %v4554_v51 = vadd.f32 %v4553_v18, %v4519_v38  ;;  %v4478_v25 = vadd.f32 %v4477_v16, %v4443_v60  ;;  %v5089_v5 = vpack.c.bf16 %v5701_v20, %v5699_v53  ;;  %v4447_v63 = vmul.f32 %v5701_v20, %v6670_v9 }
 0x21a   : > { %v4521_v30 = vmul.f32 %v5700_v3, %v4444_v41  ;;  %v5084_v28 = vpack.c.bf16 %v5702_v12, %v5700_v3  ;;  %v4445_v4 = vmul.f32 %v5702_v12, %v6660_v52  ;;  %v5519_v58 = vpop.f32.mrb[24].mxu1  ;;  %v4523_v31 = vmul.f32 %v5699_v53, %v4446_v0 }
 0x21b   : > { %v4479_v42 = vadd.f32 %v4478_v25, %v4444_v41  ;;  %v4555_v57 = vadd.f32 %v4554_v51, %v4520_v40  ;;  %5159 = vst [vmem:[%s6652_s25 + $0x48] sm:$0xff] %v5089_v5   ;;  %v2285_v10 = vpop.f32.mrb[25].mxu1  ;;  %v4524_v48 = vmul.f32 %v5701_v20, %v4447_v63 }
 0x21c   : > { %5158 = vst [vmem:[%s6652_s25 + $0x40] sm:$0xff] %v5084_v28   ;;  %v4522_v44 = vmul.f32 %v5702_v12, %v4445_v4  ;;  %v5667_v26 = vpop.f32.mrb[20].mxu0  ;;  %v5520_v21 = vpop.f32.mrb[26].mxu1 }
 0x21d   : > { %v4556_v29 = vadd.f32 %v4555_v57, %v4521_v30  ;;  %v4480_v22 = vadd.f32 %v4479_v42, %v4445_v4  ;;  %v5703_v43 = vadd.f32 %v5667_v26, %v5515_v17  ;;  %v3861_v24 = vpop.f32.mrb[21].mxu0  ;;  %v2288_v2 = vpop.f32.mrb[27].mxu1 }
 0x21e   : > { %v5704_v52 = vadd.f32 %v3861_v24, %v2269_v1  ;;  %v5668_v35 = vpop.f32.mrb[22].mxu0  ;;  %v4396_v28 = vpop.permute.xlu1 %4395 }
 0x21f   : > { %v4481_v32 = vadd.f32 %v4480_v22, %v4446_v0  ;;  %v4557_v62 = vadd.f32 %v4556_v29, %v4522_v44  ;;  %v5705_v55 = vadd.f32 %v5668_v35, %v5516_v56  ;;  %v3864_v33 = vpop.f32.mrb[23].mxu0  ;;  %v4450_v8 = vmul.f32 %v5703_v43, %v6684_v46  ;;  %v4401_v57 = vpop.permute.xlu0 %4400 }
 0x220   : > { %v4448_v34 = vmul.f32 %v5704_v52, %v6673_v45  ;;  %v5706_v47 = vadd.f32 %v3864_v33, %v2272_v59 }
 0x221   : > { %v4558_v61 = vadd.f32 %v4557_v62, %v4523_v31  ;;  %v4482_v9 = vadd.f32 %v4481_v32, %v4447_v63  ;;  %v5099_v6 = vpack.c.bf16 %v5705_v55, %v5703_v43  ;;  %v4451_v56 = vmul.f32 %v5705_v55, %v6692_v54 }
 0x222   : > { %v4525_v7 = vmul.f32 %v5704_v52, %v4448_v34  ;;  %v5094_v37 = vpack.c.bf16 %v5706_v47, %v5704_v52  ;;  %v4449_v17 = vmul.f32 %v5706_v47, %v6681_v39  ;;  %v5523_v60 = vpop.f32.mrb[28].mxu1  ;;  %v4527_v20 = vmul.f32 %v5703_v43, %v4450_v8 }
 0x223   : > { %v4483_v1 = vadd.f32 %v4482_v9, %v4448_v34  ;;  %v4559_v11 = vadd.f32 %v4558_v61, %v4524_v48  ;;  %5161 = vst [vmem:[%s6652_s25 + $0x58] sm:$0xff] %v5099_v6   ;;  %v2301_v53 = vpop.f32.mrb[29].mxu1  ;;  %v4528_v25 = vmul.f32 %v5705_v55, %v4451_v56  ;;  %v4406_v34 = vpop.permute.xlu1 %4405 }
 0x224   : > { %5160 = vst [vmem:[%s6652_s25 + $0x50] sm:$0xff] %v5094_v37   ;;  %v4526_v45 = vmul.f32 %v5706_v47, %v4449_v17  ;;  %v5671_v13 = vpop.f32.mrb[24].mxu0  ;;  %v5524_v38 = vpop.f32.mrb[30].mxu1 }
 0x225   : > { %v4560_v14 = vadd.f32 %v4559_v11, %v4525_v7  ;;  %v4484_v3 = vadd.f32 %v4483_v1, %v4449_v17  ;;  %v5707_v27 = vadd.f32 %v5671_v13, %v5519_v58  ;;  %v3877_v59 = vpop.f32.mrb[25].mxu0  ;;  %v2304_v18 = vpop.f32.mrb[31].mxu1 }
 0x226   : > { %v5708_v16 = vadd.f32 %v3877_v59, %v2285_v10  ;;  %v5672_v39 = vpop.f32.mrb[26].mxu0 }
 0x227   : > { %v4485_v46 = vadd.f32 %v4484_v3, %v4450_v8  ;;  %v4561_v36 = vadd.f32 %v4560_v14, %v4526_v45  ;;  %v5709_v41 = vadd.f32 %v5672_v39, %v5520_v21  ;;  %v3880_v12 = vpop.f32.mrb[27].mxu0  ;;  %v4454_v58 = vmul.f32 %v5707_v27, %v6709_v15 }
 0x228   : > { %v4452_v40 = vmul.f32 %v5708_v16, %v6695_v50  ;;  %v5710_v51 = vadd.f32 %v3880_v12, %v2288_v2 }
 0x229   : > { %v4562_v5 = vadd.f32 %v4561_v36, %v4527_v20  ;;  %v4486_v54 = vadd.f32 %v4485_v46, %v4451_v56  ;;  %v5109_v30 = vpack.c.bf16 %v5709_v41, %v5707_v27  ;;  %v4455_v43 = vmul.f32 %v5709_v41, %v4386_v19 }
 0x22a   : > { %v4529_v4 = vmul.f32 %v5708_v16, %v4452_v40  ;;  %v5104_v0 = vpack.c.bf16 %v5710_v51, %v5708_v16  ;;  %v4453_v42 = vmul.f32 %v5710_v51, %v6706_v23  ;;  %v5527_v10 = vpop.f32.mrb[32].mxu1  ;;  %v4531_v32 = vmul.f32 %v5707_v27, %v4454_v58  ;;  %v4416_v27 = vpop.permute.xlu1 %4415 }
 0x22b   : > { %v4487_v44 = vadd.f32 %v4486_v54, %v4452_v40  ;;  %v4563_v26 = vadd.f32 %v4562_v5, %v4528_v25  ;;  %5163 = vst [vmem:[%s6652_s25 + $0x68] sm:$0xff] %v5109_v30   ;;  %v2317_v63 = vpop.f32.mrb[33].mxu1  ;;  %v4532_v61 = vmul.f32 %v5709_v41, %v4455_v43 }
 0x22c   : > { %5162 = vst [vmem:[%s6652_s25 + $0x60] sm:$0xff] %v5104_v0   ;;  %v4530_v50 = vmul.f32 %v5710_v51, %v4453_v42  ;;  %v5675_v29 = vpop.f32.mrb[28].mxu0  ;;  %v5528_v35 = vpop.f32.mrb[34].mxu1 }
 0x22d   : > { %v4564_v22 = vadd.f32 %v4563_v26, %v4529_v4  ;;  %v4488_v24 = vadd.f32 %v4487_v44, %v4453_v42  ;;  %v5711_v21 = vadd.f32 %v5675_v29, %v5523_v60  ;;  %v3893_v52 = vpop.f32.mrb[29].mxu0  ;;  %v2320_v23 = vpop.f32.mrb[35].mxu1 }
 0x22e   : > { %v5712_v2 = vadd.f32 %v3893_v52, %v2301_v53  ;;  %v5676_v31 = vpop.f32.mrb[30].mxu0  ;;  %v4411_v60 = vpop.permute.xlu0 %4410 }
 0x22f   : > { %v4489_v62 = vadd.f32 %v4488_v24, %v4454_v58  ;;  %v4565_v15 = vadd.f32 %v4564_v22, %v4530_v50  ;;  %v5713_v55 = vadd.f32 %v5676_v31, %v5524_v38  ;;  %v3896_v33 = vpop.f32.mrb[31].mxu0  ;;  %v4458_v8 = vmul.f32 %v5711_v21, %v4401_v57  ;;  %v4426_v57 = vpop.permute.xlu1 %4425 }
 0x230   : > { %v4456_v47 = vmul.f32 %v5712_v2, %v4391_v49  ;;  %v5714_v48 = vadd.f32 %v3896_v33, %v2304_v18 }
 0x231   : > { %v4566_v9 = vadd.f32 %v4565_v15, %v4531_v32  ;;  %v4490_v6 = vadd.f32 %v4489_v62, %v4455_v43  ;;  %v5119_v19 = vpack.c.bf16 %v5713_v55, %v5711_v21  ;;  %v4459_v14 = vmul.f32 %v5713_v55, %v4406_v34 }
 0x232   : > { %v4533_v7 = vmul.f32 %v5712_v2, %v4456_v47  ;;  %v5114_v37 = vpack.c.bf16 %v5714_v48, %v5712_v2  ;;  %v4457_v17 = vmul.f32 %v5714_v48, %v4396_v28  ;;  %v4535_v16 = vmul.f32 %v5711_v21, %v4458_v8  ;;  %v4421_v5 = vpop.permute.xlu0 %4420 }
 0x233   : > { %v4491_v1 = vadd.f32 %v4490_v6, %v4456_v47  ;;  %v4567_v11 = vadd.f32 %v4566_v9, %v4532_v61  ;;  %5165 = vst [vmem:[%s6652_s25 + $0x78] sm:$0xff] %v5119_v19   ;;  %v4536_v12 = vmul.f32 %v5713_v55, %v4459_v14 }
 0x234   : > { %5164 = vst [vmem:[%s6652_s25 + $0x70] sm:$0xff] %v5114_v37   ;;  %v4534_v45 = vmul.f32 %v5714_v48, %v4457_v17  ;;  %v5679_v13 = vpop.f32.mrb[32].mxu0 }
 0x235   : > { %v4568_v53 = vadd.f32 %v4567_v11, %v4533_v7  ;;  %v4492_v56 = vadd.f32 %v4491_v1, %v4457_v17  ;;  %v5715_v49 = vadd.f32 %v5679_v13, %v5527_v10  ;;  %v3909_v3 = vpop.f32.mrb[33].mxu0 }
 0x236   : > { %v5716_v59 = vadd.f32 %v3909_v3, %v2317_v63  ;;  %v5680_v38 = vpop.f32.mrb[34].mxu0 }
 0x237   : > { %v4493_v39 = vadd.f32 %v4492_v56, %v4458_v8  ;;  %v4569_v18 = vadd.f32 %v4568_v53, %v4534_v45  ;;  %v5717_v20 = vadd.f32 %v5680_v38, %v5528_v35  ;;  %v3912_v46 = vpop.f32.mrb[35].mxu0  ;;  %v4462_v4 = vmul.f32 %v5715_v49, %v4421_v5 }
 0x238   : > { %v4460_v36 = vmul.f32 %v5716_v59, %v4411_v60  ;;  %v5718_v41 = vadd.f32 %v3912_v46, %v2320_v23 }
 0x239   : > { %v4570_v40 = vadd.f32 %v4569_v18, %v4535_v16  ;;  %v4494_v51 = vadd.f32 %v4493_v39, %v4459_v14  ;;  %v5129_v25 = vpack.c.bf16 %v5717_v20, %v5715_v49  ;;  %v4463_v26 = vmul.f32 %v5717_v20, %v4426_v57 }
 0x23a   : > { %v4537_v54 = vmul.f32 %v5716_v59, %v4460_v36  ;;  %v5124_v30 = vpack.c.bf16 %v5718_v41, %v5716_v59  ;;  %v4461_v28 = vmul.f32 %v5718_v41, %v4416_v27  ;;  %v4539_v50 = vmul.f32 %v5715_v49, %v4462_v4 }
 0x23b   : > { %v4495_v0 = vadd.f32 %v4494_v51, %v4460_v36  ;;  %v4571_v42 = vadd.f32 %v4570_v40, %v4536_v12  ;;  %5167 = vst [vmem:[%s6652_s25 + $0x88] sm:$0xff] %v5129_v25   ;;  %v4540_v22 = vmul.f32 %v5717_v20, %v4463_v26 }
 0x23c   : > { %5166 = vst [vmem:[%s6652_s25 + $0x80] sm:$0xff] %v5124_v30   ;;  %v4538_v58 = vmul.f32 %v5718_v41, %v4461_v28 }
 0x23d   : > { %v4572_v44 = vadd.f32 %v4571_v42, %v4537_v54  ;;  %v4496_v10 = vadd.f32 %v4495_v0, %v4461_v28 }
 0x23f   : > { %v4497_v29 = vadd.f32 %v4496_v10, %v4462_v4  ;;  %v4573_v63 = vadd.f32 %v4572_v44, %v4538_v58 }
 0x241   : > { %v4498_v43 = vadd.f32 %v4497_v29, %v4463_v26  ;;  %v4574_v24 = vadd.f32 %v4573_v63, %v4539_v50 }
 0x243   : > { %v4499_v21 = vrot.slane %v4498_v43, 4  ;;  %v4575_v52 = vadd.f32 %v4574_v24, %v4540_v22 }
 0x245   : > { %v4500_v35 = vadd.f32 %v4499_v21, %v4498_v43  ;;  %v4576_v2 = vrot.slane %v4575_v52, 4 }
 0x247   : > { %v4501_v31 = vrot.slane %v4500_v35, 2  ;;  %v4577_v23 = vadd.f32 %v4576_v2, %v4575_v52 }
 0x249   : > { %v4502_v32 = vadd.f32 %v4501_v31, %v4500_v35  ;;  %v4578_v62 = vrot.slane %v4577_v23, 2 }
 0x24b   : > { %v4503_v15 = vrot.slane %v4502_v32, 1  ;;  %v4579_v55 = vadd.f32 %v4578_v62, %v4577_v23 }
 0x24d   : > { %v4504_v33 = vadd.f32 %v4503_v15, %v4502_v32  ;;  %v4580_v34 = vrot.slane %v4579_v55, 1 }
 0x24f   : > { %v4581_v47 = vadd.f32 %v4580_v34, %v4579_v55  ;;  %v4583_v48 = vsel %vm4582_vm2, %v4504_v33, 0.0 }
 0x250   : > { %4584 = vst [vmem:[%s241_s29] sm:$0xff] %v4583_v48 }
 0x251   : > { %v4585_v61 = vsel %vm4582_vm2, %v4581_v47, 0.0 }
 0x252   : > { %4586 = vst [vmem:[%s245_s7] sm:$0xff] %v4585_v61 }
 0x253 PF: > { %s16_s18 = sadd.s32 1, %s6000_s18  }
 0x254   : > { %p13_p4 = scmp.ge.s32.totalorder %s16_s18, 4  }
 0x256   :  { %15 = sbr.rel (!%p13_p4) target bundleno = 1 (0x1), region = 94 }

// kernel: encoder_forward.9
= control target key start
LH: loop header
LB: loop body
LE: loop exit
PB: predicated region body
PF: predicated region fallthrough
CT: control target
= control target key end

     0   :  { %s5226_s12 = smov 0   ;;  %s5829_s0 = inlined_call_operand.vmem [shape: bf16[2,342,8], index: 0, kind: input, shape index: {}]   ;;  %s5830_s1 = inlined_call_operand.vmem [shape: bf16[9,8,128], index: 1, kind: input, shape index: {}]   ;;  %s5831_s2 = inlined_call_operand.vmem [shape: f32[1,128], index: 2, kind: input, shape index: {}]   ;;  %s5832_s3 = inlined_call_operand.vmem [shape: f32[2,288,8], index: 3, kind: output, shape index: {}]  }
   0x1 LB: > { %s4091_s13 = sadd.s32 4294967295, %s5204_s12   ;;  %p4095_p0 = scmp.ge.s32.totalorder %s5204_s12, 1  ;;  %s5204_s12 = sphi %s5226_s12, %s13_s12  }
   0x2   : > { %p137_p1 = scmp.lt.s32.totalorder %s5204_s12, 3 }
   0x4   : > { %p138_p2 = pnand %p4095_p0, %p137_p1 }
   0x5   : > { %vm484_vm0 = vcmask (!%p138_p2), 1043456   ;;  %v5237_v0 = vld [vmem:[%s5830_s1 + $0x10] sm:$0xf] (!%p138_p2)  ;;  %v429_v1 = vld [vmem:[%s5830_s1] sm:$0xf] (!%p138_p2)  ;;  %p161_p3 = scmp.lt.s32.totalorder (!%p138_p2), %s4091_s13, 1 }
   0x6   : > { %141 = sbr.rel (%p138_p2) target bundleno = 573 (0x23d), region = 32  ;;  %5182 = vmatprep.subr.msk.bf16.mxu0 (!%p138_p2), %vm484_vm0, %v5237_v0  ;;  %5178 = vmatprep.subr.msk.bf16.mxu1 (!%p138_p2), %vm484_vm0, %v429_v1  ;;  %v5247_v2 = vsel (!%p138_p2), %vm484_vm0, %v5237_v0, 0  ;;  %v486_v3 = vsel (!%p138_p2), %vm484_vm0, %v429_v1, 0  ;;  %v5253_v4 = vld [vmem:[%s5830_s1 + $0x14] sm:$0xf] (!%p138_p2)  ;;  %vm258_vm1 = vcmask (!%p138_p2), 64512  }
   0x7   : > { %4699 = vmatpush3.bf16.msra.mxu0 (!%p138_p2), %v5247_v2  ;;  %4547 = vmatpush3.bf16.msra.mxu1 (!%p138_p2), %v486_v3  ;;  %v5261_v5 = vld [vmem:[%s5830_s1 + $0x4] sm:$0xf] (!%p138_p2) }
   0x8   : > { %5184 = vmatprep.subr.msk.bf16.mxu0 (!%p138_p2), %vm484_vm0, %v5253_v4  ;;  %5179 = vmatprep.subr.msk.bf16.mxu1 (!%p138_p2), %vm484_vm0, %v5261_v5 }
   0xd   : > { %s5834_s13 = smov (!%p161_p3, %s4091_s13), 1 }
   0xe   : > { %s5188_s22 = smul.u32 172, %s5834_s13 }
   0xf   : > { %s5189_s9 = smul.u32 288, %s5834_s13 }
  0x10   : > { %s5271_s25 = scalar_lea.vmem %s5829_s0, %s5188_s22 }
  0x11   : > { %v4272_v6 = vld [vmem:[%s5271_s25] sm:$0xff]   ;;  %v4355_v7 = vld [vmem:[%s5271_s25 + $0x8] sm:$0xff]   ;;  %v4356_v11 = vld [vmem:[%s5271_s25 + $0x10] sm:$0xff]   ;;  %s5710_s16 = scalar_lea.vmem %s5832_s3, %s5189_s9 }
  0x12   : > { %v4273_v8 = vunpack.c.l.bf16 %v4272_v6  ;;  %v4274_v9 = vunpack.c.h.bf16 %v4272_v6  ;;  %v4277_v10 = vunpack.c.l.bf16 %v4355_v7  ;;  %v4357_v12 = vld [vmem:[%s5271_s25 + $0x18] sm:$0xff]   ;;  %v4358_v13 = vld [vmem:[%s5271_s25 + $0x20] sm:$0xff]   ;;  %v4278_v14 = vunpack.c.h.bf16 %v4355_v7  ;;  %v4359_v18 = vld [vmem:[%s5271_s25 + $0x28] sm:$0xff]  }
  0x13   : > { %v4281_v15 = vunpack.c.l.bf16 %v4356_v11  ;;  %v4282_v16 = vunpack.c.h.bf16 %v4356_v11  ;;  %v4285_v17 = vunpack.c.l.bf16 %v4357_v12  ;;  %v4360_v19 = vld [vmem:[%s5271_s25 + $0x30] sm:$0xff]   ;;  %v4361_v20 = vld [vmem:[%s5271_s25 + $0x38] sm:$0xff]   ;;  %v4286_v21 = vunpack.c.h.bf16 %v4357_v12  ;;  %v4362_v25 = vld [vmem:[%s5271_s25 + $0x40] sm:$0xff]  }
  0x14   : > { %259 = vst.msk [vmem:[#allocation2] sm:$0xff] %vm258_vm1, %v4273_v8  ;;  %260 = vst.msk [vmem:[#allocation2 + $0x8] sm:$0xff] %vm258_vm1, %v4274_v9  ;;  %v4289_v22 = vunpack.c.l.bf16 %v4358_v13  ;;  %v4290_v23 = vunpack.c.h.bf16 %v4358_v13  ;;  %v4293_v24 = vunpack.c.l.bf16 %v4359_v18  ;;  %v4363_v26 = vld [vmem:[%s5271_s25 + $0x48] sm:$0xff]   ;;  %v4364_v27 = vld [vmem:[%s5271_s25 + $0x50] sm:$0xff]   ;;  %v4294_v28 = vunpack.c.h.bf16 %v4359_v18 }
  0x15   : > { %261 = vst.msk [vmem:[#allocation2 + $0x10] sm:$0xff] %vm258_vm1, %v4277_v10  ;;  %262 = vst.msk [vmem:[#allocation2 + $0x18] sm:$0xff] %vm258_vm1, %v4278_v14  ;;  %v4297_v29 = vunpack.c.l.bf16 %v4360_v19  ;;  %v4298_v30 = vunpack.c.h.bf16 %v4360_v19  ;;  %v4301_v31 = vunpack.c.l.bf16 %v4361_v20  ;;  %v4365_v32 = vld [vmem:[%s5271_s25 + $0x58] sm:$0xff]   ;;  %v4366_v33 = vld [vmem:[%s5271_s25 + $0x60] sm:$0xff]   ;;  %v4302_v35 = vunpack.c.h.bf16 %v4361_v20 }
  0x16   : > { %263 = vst.msk [vmem:[#allocation2 + $0x20] sm:$0xff] %vm258_vm1, %v4281_v15  ;;  %264 = vst.msk [vmem:[#allocation2 + $0x28] sm:$0xff] %vm258_vm1, %v4282_v16  ;;  %v4367_v34 = vld [vmem:[%s5271_s25 + $0x68] sm:$0xff]   ;;  %v4305_v36 = vunpack.c.l.bf16 %v4362_v25  ;;  %v4306_v37 = vunpack.c.h.bf16 %v4362_v25  ;;  %v4309_v38 = vunpack.c.l.bf16 %v4363_v26  ;;  %v4368_v39 = vld [vmem:[%s5271_s25 + $0x70] sm:$0xff]   ;;  %v4310_v41 = vunpack.c.h.bf16 %v4363_v26 }
  0x17   : > { %265 = vst.msk [vmem:[#allocation2 + $0x30] sm:$0xff] %vm258_vm1, %v4285_v17  ;;  %266 = vst.msk [vmem:[#allocation2 + $0x38] sm:$0xff] %vm258_vm1, %v4286_v21  ;;  %v4369_v40 = vld [vmem:[%s5271_s25 + $0x78] sm:$0xff]   ;;  %v4313_v42 = vunpack.c.l.bf16 %v4364_v27  ;;  %v4314_v43 = vunpack.c.h.bf16 %v4364_v27  ;;  %v4317_v44 = vunpack.c.l.bf16 %v4365_v32  ;;  %v4370_v45 = vld [vmem:[%s5271_s25 + $0x80] sm:$0xff]   ;;  %v4318_v47 = vunpack.c.h.bf16 %v4365_v32 }
  0x18   : > { %267 = vst.msk [vmem:[#allocation2 + $0x40] sm:$0xff] %vm258_vm1, %v4289_v22  ;;  %268 = vst.msk [vmem:[#allocation2 + $0x48] sm:$0xff] %vm258_vm1, %v4290_v23  ;;  %v4371_v46 = vld [vmem:[%s5271_s25 + $0x88] sm:$0xff]   ;;  %v4321_v48 = vunpack.c.l.bf16 %v4366_v33  ;;  %v4322_v49 = vunpack.c.h.bf16 %v4366_v33  ;;  %v4325_v50 = vunpack.c.l.bf16 %v4367_v34  ;;  %v4372_v51 = vld [vmem:[%s5271_s25 + $0x90] sm:$0xff]   ;;  %v4326_v53 = vunpack.c.h.bf16 %v4367_v34 }
  0x19   : > { %269 = vst.msk [vmem:[#allocation2 + $0x50] sm:$0xff] %vm258_vm1, %v4293_v24  ;;  %270 = vst.msk [vmem:[#allocation2 + $0x58] sm:$0xff] %vm258_vm1, %v4294_v28  ;;  %v5312_v52 = vld [vmem:[%s5271_s25 + $0x98] sm:$0xff]   ;;  %v4329_v54 = vunpack.c.l.bf16 %v4368_v39  ;;  %v4330_v55 = vunpack.c.h.bf16 %v4368_v39  ;;  %v4333_v56 = vunpack.c.l.bf16 %v4369_v40  ;;  %v4334_v57 = vunpack.c.h.bf16 %v4369_v40  ;;  %v5350_v25 = vld [vmem:[%s5830_s1 + $0x8] sm:$0xf] }
  0x1a   : > { %271 = vst.msk [vmem:[#allocation2 + $0x60] sm:$0xff] %vm258_vm1, %v4297_v29  ;;  %272 = vst.msk [vmem:[#allocation2 + $0x68] sm:$0xff] %vm258_vm1, %v4298_v30  ;;  %v4337_v58 = vunpack.c.l.bf16 %v4370_v45  ;;  %v4338_v59 = vunpack.c.h.bf16 %v4370_v45  ;;  %v4341_v60 = vunpack.c.l.bf16 %v4371_v46  ;;  %v4342_v1 = vunpack.c.h.bf16 %v4371_v46  ;;  %v5345_v24 = vld [vmem:[%s5830_s1 + $0x18] sm:$0xf] }
  0x1b   : > { %273 = vst.msk [vmem:[#allocation2 + $0x70] sm:$0xff] %vm258_vm1, %v4301_v31  ;;  %274 = vst.msk [vmem:[#allocation2 + $0x78] sm:$0xff] %vm258_vm1, %v4302_v35  ;;  %v339_v61 = vld [vmem:[#allocation2] sm:$0xff]  ;;  %v340_v62 = vld [vmem:[#allocation2 + $0x8] sm:$0xff]  ;;  %v4345_v3 = vunpack.c.l.bf16 %v4372_v51  ;;  %v4346_v6 = vunpack.c.h.bf16 %v4372_v51  ;;  %v4349_v7 = vunpack.c.l.bf16 %v5312_v52  ;;  %v884_v17 = vsel %vm484_vm0, %v5261_v5, 0 }
  0x1c   : > { %275 = vst.msk [vmem:[#allocation2 + $0x80] sm:$0xff] %vm258_vm1, %v4305_v36  ;;  %276 = vst.msk [vmem:[#allocation2 + $0x88] sm:$0xff] %vm258_vm1, %v4306_v37  ;;  %v341_v63 = vld [vmem:[#allocation2 + $0x10] sm:$0xff]  ;;  %v375_v8 = vpack.c.bf16 %v340_v62, %v339_v61  ;;  %v342_v11 = vld [vmem:[#allocation2 + $0x18] sm:$0xff]  ;;  %v2476_v19 = vsel %vm484_vm0, %v5253_v4, 0 }
  0x1d   : > { %277 = vst.msk [vmem:[#allocation2 + $0x90] sm:$0xff] %vm258_vm1, %v4309_v38  ;;  %278 = vst.msk [vmem:[#allocation2 + $0x98] sm:$0xff] %vm258_vm1, %v4310_v41  ;;  %v1931_v9 = vld [vmem:[#allocation2 + $0x13] sm:$0xff]  ;;  %v1932_v10 = vld [vmem:[#allocation2 + $0x1b] sm:$0xff]  ;;  %v376_v13 = vpack.c.bf16 %v342_v11, %v341_v63 }
  0x1e   : > { %279 = vst.msk [vmem:[#allocation2 + $0xa0] sm:$0xff] %vm258_vm1, %v4313_v42  ;;  %280 = vst.msk [vmem:[#allocation2 + $0xa8] sm:$0xff] %vm258_vm1, %v4314_v43  ;;  %v1967_v12 = vpack.c.bf16 %v1932_v10, %v1931_v9  ;;  %v1933_v14 = vld [vmem:[#allocation2 + $0x23] sm:$0xff]  ;;  %v1934_v15 = vld [vmem:[#allocation2 + $0x2b] sm:$0xff]  ;;  %4548 = vmatprep.mubr.msk.bf16.mxu1 %vm258_vm1, %v375_v8 }
  0x1f   : > { %281 = vst.msk [vmem:[#allocation2 + $0xb0] sm:$0xff] %vm258_vm1, %v4317_v44  ;;  %282 = vst.msk [vmem:[#allocation2 + $0xb8] sm:$0xff] %vm258_vm1, %v4318_v47  ;;  %v343_v16 = vld [vmem:[#allocation2 + $0x20] sm:$0xff]  ;;  %v1968_v18 = vpack.c.bf16 %v1934_v15, %v1933_v14  ;;  %v344_v20 = vld [vmem:[#allocation2 + $0x28] sm:$0xff]  ;;  %4549 = vmatmul.mubr.msk.bf16.vlgmr.msra.gmra.mrb[0].mxu1 %vm258_vm1, %v376_v13 }
  0x20   : > { %283 = vst.msk [vmem:[#allocation2 + $0xc0] sm:$0xff] %vm258_vm1, %v4321_v48  ;;  %284 = vst.msk [vmem:[#allocation2 + $0xc8] sm:$0xff] %vm258_vm1, %v4322_v49  ;;  %v1935_v21 = vld [vmem:[#allocation2 + $0x33] sm:$0xff]  ;;  %v1936_v22 = vld [vmem:[#allocation2 + $0x3b] sm:$0xff]  ;;  %4700 = vmatprep.mubr.msk.bf16.mxu0 %vm258_vm1, %v1967_v12  ;;  %v377_v5 = vpack.c.bf16 %v344_v20, %v343_v16  ;;  %4585 = vmatpush3.bf16.msra.mxu1 %v884_v17 }
  0x21   : > { %285 = vst.msk [vmem:[#allocation2 + $0xd0] sm:$0xff] %vm258_vm1, %v4325_v50  ;;  %286 = vst.msk [vmem:[#allocation2 + $0xd8] sm:$0xff] %vm258_vm1, %v4326_v53  ;;  %v1969_v23 = vpack.c.bf16 %v1936_v22, %v1935_v21  ;;  %4701 = vmatmul.mubr.msk.bf16.vlgmr.msra.gmra.mrb[0].mxu0 %vm258_vm1, %v1968_v18  ;;  %v345_v4 = vld [vmem:[#allocation2 + $0x30] sm:$0xff]  ;;  %v346_v26 = vld [vmem:[#allocation2 + $0x38] sm:$0xff]  ;;  %5180 = vmatprep.subr.msk.bf16.mxu1 %vm484_vm0, %v5350_v25 }
  0x22   : > { %287 = vst.msk [vmem:[#allocation2 + $0xe0] sm:$0xff] %vm258_vm1, %v4329_v54  ;;  %288 = vst.msk [vmem:[#allocation2 + $0xe8] sm:$0xff] %vm258_vm1, %v4330_v55  ;;  %v1937_v27 = vld [vmem:[#allocation2 + $0x43] sm:$0xff]  ;;  %4737 = vmatpush3.bf16.msra.mxu0 %v2476_v19  ;;  %4552 = vmatprep.mubr.msk.bf16.mxu1 %vm258_vm1, %v377_v5  ;;  %v1938_v28 = vld [vmem:[#allocation2 + $0x4b] sm:$0xff]  ;;  %v378_v33 = vpack.c.bf16 %v346_v26, %v345_v4  ;;  %v4350_v4 = vunpack.c.h.bf16 %v5312_v52 }
  0x23   : > { %289 = vst.msk [vmem:[#allocation2 + $0xf0] sm:$0xff] %vm258_vm1, %v4333_v56  ;;  %290 = vst.msk [vmem:[#allocation2 + $0xf8] sm:$0xff] %vm258_vm1, %v4334_v57  ;;  %v347_v29 = vld [vmem:[#allocation2 + $0x40] sm:$0xff]  ;;  %v348_v30 = vld [vmem:[#allocation2 + $0x48] sm:$0xff]  ;;  %4704 = vmatprep.mubr.msk.bf16.mxu0 %vm258_vm1, %v1969_v23  ;;  %5185 = vmatprep.subr.msk.bf16.mxu0 %vm484_vm0, %v5345_v24  ;;  %v1970_v34 = vpack.c.bf16 %v1938_v28, %v1937_v27  ;;  %v2874_v27 = vsel %vm484_vm0, %v5345_v24, 0 }
  0x24   : > { %291 = vst.msk [vmem:[#allocation2 + $0x100] sm:$0xff] %vm258_vm1, %v4337_v58  ;;  %292 = vst.msk [vmem:[#allocation2 + $0x108] sm:$0xff] %vm258_vm1, %v4338_v59  ;;  %v1939_v31 = vld [vmem:[#allocation2 + $0x53] sm:$0xff]  ;;  %v1940_v32 = vld [vmem:[#allocation2 + $0x5b] sm:$0xff]  ;;  %v379_v35 = vpack.c.bf16 %v348_v30, %v347_v29 }
  0x25   : > { %293 = vst.msk [vmem:[#allocation2 + $0x110] sm:$0xff] %vm258_vm1, %v4341_v60  ;;  %294 = vst.msk [vmem:[#allocation2 + $0x118] sm:$0xff] %vm258_vm1, %v4342_v1  ;;  %v1971_v36 = vpack.c.bf16 %v1940_v32, %v1939_v31  ;;  %v349_v37 = vld [vmem:[#allocation2 + $0x50] sm:$0xff]  ;;  %v350_v38 = vld [vmem:[#allocation2 + $0x58] sm:$0xff] }
  0x26   : > { %295 = vst.msk [vmem:[#allocation2 + $0x120] sm:$0xff] %vm258_vm1, %v4345_v3  ;;  %296 = vst.msk [vmem:[#allocation2 + $0x128] sm:$0xff] %vm258_vm1, %v4346_v6  ;;  %v1941_v39 = vld [vmem:[#allocation2 + $0x63] sm:$0xff]  ;;  %v1942_v40 = vld [vmem:[#allocation2 + $0x6b] sm:$0xff]  ;;  %v380_v45 = vpack.c.bf16 %v350_v38, %v349_v37 }
  0x27   : > { %297 = vst.msk [vmem:[#allocation2 + $0x130] sm:$0xff] %vm258_vm1, %v4349_v7  ;;  %4553 = vmatmul.mubr.msk.bf16.gmra.mrb[4].mxu1 %vm258_vm1, %v378_v33  ;;  %v351_v41 = vld [vmem:[#allocation2 + $0x60] sm:$0xff]  ;;  %v352_v42 = vld [vmem:[#allocation2 + $0x68] sm:$0xff]  ;;  %v1943_v43 = vld [vmem:[#allocation2 + $0x73] sm:$0xff]  ;;  %v1972_v46 = vpack.c.bf16 %v1942_v40, %v1941_v39 }
  0x28   : > { %4556 = vmatprep.mubr.msk.bf16.mxu1 %vm258_vm1, %v379_v35  ;;  %v1944_v44 = vld [vmem:[#allocation2 + $0x7b] sm:$0xff]  ;;  %v381_v47 = vpack.c.bf16 %v352_v42, %v351_v41  ;;  %v353_v49 = vld [vmem:[#allocation2 + $0x70] sm:$0xff]  ;;  %v1945_v51 = vld [vmem:[#allocation2 + $0x83] sm:$0xff]  ;;  %298 = vst.msk [vmem:[#allocation2 + $0x138] sm:$0xff] %vm258_vm1, %v4350_v4 }
  0x29   : > { %4705 = vmatmul.mubr.msk.bf16.gmra.mrb[4].mxu0 %vm258_vm1, %v1970_v34  ;;  %v1973_v48 = vpack.c.bf16 %v1944_v44, %v1943_v43  ;;  %v354_v50 = vld [vmem:[#allocation2 + $0x78] sm:$0xff]  ;;  %v1946_v53 = vld [vmem:[#allocation2 + $0x8b] sm:$0xff]  ;;  %v355_v54 = vld [vmem:[#allocation2 + $0x80] sm:$0xff] }
  0x2a   : > { %4708 = vmatprep.mubr.msk.bf16.mxu0 %vm258_vm1, %v1971_v36  ;;  %v356_v55 = vld [vmem:[#allocation2 + $0x88] sm:$0xff]  ;;  %v1947_v56 = vld [vmem:[#allocation2 + $0x93] sm:$0xff]  ;;  %v1948_v57 = vld [vmem:[#allocation2 + $0x9b] sm:$0xff]  ;;  %v382_v58 = vpack.c.bf16 %v354_v50, %v353_v49  ;;  %v1974_v59 = vpack.c.bf16 %v1946_v53, %v1945_v51 }
  0x2b   : > { %v383_v60 = vpack.c.bf16 %v356_v55, %v355_v54  ;;  %v1975_v61 = vpack.c.bf16 %v1948_v57, %v1947_v56  ;;  %v357_v62 = vld [vmem:[#allocation2 + $0x90] sm:$0xff]  ;;  %v358_v63 = vld [vmem:[#allocation2 + $0x98] sm:$0xff]  ;;  %v1949_v1 = vld [vmem:[#allocation2 + $0xa3] sm:$0xff] }
  0x2c   : > { %v1950_v3 = vld [vmem:[#allocation2 + $0xab] sm:$0xff]  ;;  %v359_v6 = vld [vmem:[#allocation2 + $0xa0] sm:$0xff]  ;;  %v2329_v8 = vld [vmem:[#allocation2 + $0x14] sm:$0xff]  ;;  %v384_v10 = vpack.c.bf16 %v358_v63, %v357_v62 }
  0x2d   : > { %v360_v7 = vld [vmem:[#allocation2 + $0xa8] sm:$0xff]  ;;  %v2330_v9 = vld [vmem:[#allocation2 + $0x1c] sm:$0xff]  ;;  %v1976_v11 = vpack.c.bf16 %v1950_v3, %v1949_v1  ;;  %v361_v14 = vld [vmem:[#allocation2 + $0xb0] sm:$0xff] }
  0x2e   : > { %v385_v12 = vpack.c.bf16 %v360_v7, %v359_v6  ;;  %v2365_v13 = vpack.c.bf16 %v2330_v9, %v2329_v8  ;;  %v362_v15 = vld [vmem:[#allocation2 + $0xb8] sm:$0xff]  ;;  %v2331_v16 = vld [vmem:[#allocation2 + $0x24] sm:$0xff]  ;;  %v2332_v17 = vld [vmem:[#allocation2 + $0x2c] sm:$0xff] }
  0x2f   : > { %4557 = vmatmul.mubr.msk.bf16.gmra.mrb[8].mxu1 %vm258_vm1, %v380_v45  ;;  %v363_v18 = vld [vmem:[#allocation2 + $0xc0] sm:$0xff]  ;;  %v364_v19 = vld [vmem:[#allocation2 + $0xc8] sm:$0xff]  ;;  %v2333_v20 = vld [vmem:[#allocation2 + $0x34] sm:$0xff]  ;;  %v386_v22 = vpack.c.bf16 %v362_v15, %v361_v14  ;;  %v5375_v5 = vpack.c.bf16 %v2332_v17, %v2331_v16 }
  0x30   : > { %4560 = vmatprep.mubr.msk.bf16.mxu1 %vm258_vm1, %v381_v47  ;;  %v2334_v21 = vld [vmem:[#allocation2 + $0x3c] sm:$0xff]  ;;  %v387_v23 = vpack.c.bf16 %v364_v19, %v363_v18  ;;  %v365_v52 = vld [vmem:[#allocation2 + $0xd0] sm:$0xff]  ;;  %v2335_v30 = vld [vmem:[#allocation2 + $0x44] sm:$0xff]  ;;  %v1282_v18 = vsel %vm484_vm0, %v5350_v25, 0 }
  0x31   : > { %4709 = vmatmul.mubr.msk.bf16.gmra.mrb[8].mxu0 %vm258_vm1, %v1972_v46  ;;  %v5378_v26 = vpack.c.bf16 %v2334_v21, %v2333_v20  ;;  %v5387_v28 = vld [vmem:[%s5830_s1 + $0x1c] sm:$0xf]  ;;  %v2336_v24 = vld [vmem:[#allocation2 + $0x4c] sm:$0xff]  ;;  %v367_v31 = vld [vmem:[#allocation2 + $0xe0] sm:$0xff] }
  0x32   : > { %4712 = vmatprep.mubr.msk.bf16.mxu0 %vm258_vm1, %v1973_v48  ;;  %v366_v29 = vld [vmem:[#allocation2 + $0xd8] sm:$0xff]  ;;  %v368_v32 = vld [vmem:[#allocation2 + $0xe8] sm:$0xff]  ;;  %v5396_v36 = vpack.c.bf16 %v2336_v24, %v2335_v30  ;;  %v4374_v38 = vld [vmem:[%s5271_s25 + $0xa0] sm:$0xff]  }
  0x33   : > { %v2337_v33 = vld [vmem:[#allocation2 + $0x54] sm:$0xff]  ;;  %v2338_v34 = vld [vmem:[#allocation2 + $0x5c] sm:$0xff]  ;;  %v388_v35 = vpack.c.bf16 %v366_v29, %v365_v52  ;;  %v389_v37 = vpack.c.bf16 %v368_v32, %v367_v31  ;;  %v4353_v40 = vunpack.c.l.bf16 %v4374_v38  ;;  %v2339_v43 = vld [vmem:[#allocation2 + $0x64] sm:$0xff] }
  0x34   : > { %v5399_v39 = vpack.c.bf16 %v2338_v34, %v2337_v33  ;;  %v369_v41 = vld [vmem:[#allocation2 + $0xf0] sm:$0xff]  ;;  %v370_v42 = vld [vmem:[#allocation2 + $0xf8] sm:$0xff]  ;;  %v371_v45 = vld [vmem:[#allocation2 + $0x100] sm:$0xff] }
  0x35   : > { %299 = vst.msk [vmem:[#allocation2 + $0x140] sm:$0xff] %vm258_vm1, %v4353_v40  ;;  %v2340_v44 = vld [vmem:[#allocation2 + $0x6c] sm:$0xff]  ;;  %v2341_v47 = vld [vmem:[#allocation2 + $0x74] sm:$0xff]  ;;  %v2342_v48 = vld [vmem:[#allocation2 + $0x7c] sm:$0xff]  ;;  %v390_v49 = vpack.c.bf16 %v370_v42, %v369_v41 }
  0x36   : > { %v372_v46 = vld [vmem:[#allocation2 + $0x108] sm:$0xff]  ;;  %v5408_v50 = vpack.c.bf16 %v2340_v44, %v2339_v43  ;;  %v5410_v53 = vpack.c.bf16 %v2342_v48, %v2341_v47  ;;  %v373_v54 = vld [vmem:[#allocation2 + $0x110] sm:$0xff]  ;;  %v374_v55 = vld [vmem:[#allocation2 + $0x118] sm:$0xff] }
  0x37   : > { %4561 = vmatmul.mubr.msk.bf16.gmra.mrb[12].mxu1 %vm258_vm1, %v382_v58  ;;  %v391_v51 = vpack.c.bf16 %v372_v46, %v371_v45  ;;  %v2343_v56 = vld [vmem:[#allocation2 + $0x84] sm:$0xff]  ;;  %v2344_v57 = vld [vmem:[#allocation2 + $0x8c] sm:$0xff]  ;;  %v392_v62 = vpack.c.bf16 %v374_v55, %v373_v54  ;;  %v740_v7 = vld [vmem:[#allocation2 + $0x19] sm:$0xff] }
  0x38   : > { %4564 = vmatprep.mubr.msk.bf16.mxu1 %vm258_vm1, %v383_v60  ;;  %v737_v58 = vld [vmem:[#allocation2 + $0x1] sm:$0xff]  ;;  %v2345_v60 = vld [vmem:[#allocation2 + $0x94] sm:$0xff]  ;;  %v5418_v63 = vpack.c.bf16 %v2344_v57, %v2343_v56  ;;  %v2348_v9 = vld [vmem:[#allocation2 + $0xac] sm:$0xff] }
  0x39   : > { %4713 = vmatmul.mubr.msk.bf16.gmra.mrb[12].mxu0 %vm258_vm1, %v1974_v59  ;;  %v738_v59 = vld [vmem:[#allocation2 + $0x9] sm:$0xff]  ;;  %v739_v6 = vld [vmem:[#allocation2 + $0x11] sm:$0xff]  ;;  %v744_v21 = vld [vmem:[#allocation2 + $0x39] sm:$0xff] }
  0x3a   : > { %4716 = vmatprep.mubr.msk.bf16.mxu0 %vm258_vm1, %v1975_v61  ;;  %v2346_v61 = vld [vmem:[#allocation2 + $0x9c] sm:$0xff]  ;;  %v773_v1 = vpack.c.bf16 %v738_v59, %v737_v58  ;;  %v2347_v8 = vld [vmem:[#allocation2 + $0xa4] sm:$0xff]  ;;  %v774_v14 = vpack.c.bf16 %v740_v7, %v739_v6  ;;  %v5438_v19 = vld [vmem:[%s5830_s1 + $0xc] sm:$0xf] }
  0x3b   : > { %v5420_v3 = vpack.c.bf16 %v2346_v61, %v2345_v60  ;;  %v5428_v15 = vpack.c.bf16 %v2348_v9, %v2347_v8  ;;  %v743_v20 = vld [vmem:[#allocation2 + $0x31] sm:$0xff]  ;;  %v746_v4 = vld [vmem:[#allocation2 + $0x49] sm:$0xff]  ;;  %v2354_v52 = vld [vmem:[#allocation2 + $0xdc] sm:$0xff] }
  0x3c   : > { %v2352_v25 = vld [vmem:[#allocation2 + $0xcc] sm:$0xff]  ;;  %v776_v29 = vpack.c.bf16 %v744_v21, %v743_v20  ;;  %v748_v33 = vld [vmem:[#allocation2 + $0x59] sm:$0xff]  ;;  %v2355_v34 = vld [vmem:[#allocation2 + $0xe4] sm:$0xff]  ;;  %v3272_v21 = vsel %vm484_vm0, %v5387_v28, 0 }
  0x3d   : > { %v747_v32 = vld [vmem:[#allocation2 + $0x51] sm:$0xff]  ;;  %v750_v38 = vld [vmem:[#allocation2 + $0x69] sm:$0xff]  ;;  %v2358_v41 = vld [vmem:[#allocation2 + $0xfc] sm:$0xff] }
  0x3e   : > { %v2357_v40 = vld [vmem:[#allocation2 + $0xf4] sm:$0xff]  ;;  %v778_v42 = vpack.c.bf16 %v748_v33, %v747_v32  ;;  %v2359_v48 = vld [vmem:[#allocation2 + $0x104] sm:$0xff]  ;;  %v2362_v56 = vld [vmem:[#allocation2 + $0x11c] sm:$0xff] }
  0x3f   : > { %4565 = vmatmul.mubr.msk.bf16.gmra.mrb[16].mxu1 %vm258_vm1, %v384_v10  ;;  %v741_v10 = vld [vmem:[#allocation2 + $0x21] sm:$0xff]  ;;  %v5459_v45 = vpack.c.bf16 %v2358_v41, %v2357_v40  ;;  %v751_v46 = vld [vmem:[#allocation2 + $0x71] sm:$0xff]  ;;  %v752_v47 = vld [vmem:[#allocation2 + $0x79] sm:$0xff] }
  0x40   : > { %4568 = vmatprep.mubr.msk.bf16.mxu1 %vm258_vm1, %v385_v12  ;;  %v2349_v12 = vld [vmem:[#allocation2 + $0xb4] sm:$0xff]  ;;  %v754_v54 = vld [vmem:[#allocation2 + $0x89] sm:$0xff]  ;;  %v780_v57 = vpack.c.bf16 %v752_v47, %v751_v46  ;;  %v757_v7 = vld [vmem:[#allocation2 + $0xa1] sm:$0xff] }
  0x41   : > { %4717 = vmatmul.mubr.msk.bf16.gmra.mrb[16].mxu0 %vm258_vm1, %v1976_v11  ;;  %v742_v11 = vld [vmem:[#allocation2 + $0x29] sm:$0xff]  ;;  %v2361_v55 = vld [vmem:[#allocation2 + $0x114] sm:$0xff] }
  0x42   : > { %4738 = vmatprep.mubr.msk.bf16.mxu0 %vm258_vm1, %v2365_v13  ;;  %v2350_v13 = vld [vmem:[#allocation2 + $0xbc] sm:$0xff]  ;;  %v775_v16 = vpack.c.bf16 %v742_v11, %v741_v10  ;;  %v5469_v60 = vpack.c.bf16 %v2362_v56, %v2361_v55  ;;  %v755_v61 = vld [vmem:[#allocation2 + $0x91] sm:$0xff]  ;;  %v758_v8 = vld [vmem:[#allocation2 + $0xa9] sm:$0xff] }
  0x43   : > { %v5430_v17 = vpack.c.bf16 %v2350_v13, %v2349_v12  ;;  %v2364_v6 = vld [vmem:[#allocation2 + $0x12c] sm:$0xff]  ;;  %v783_v11 = vpack.c.bf16 %v758_v8, %v757_v7  ;;  %v760_v13 = vld [vmem:[#allocation2 + $0xb9] sm:$0xff]  ;;  %v1139_v40 = vld [vmem:[#allocation2 + $0x22] sm:$0xff] }
  0x44   : > { %v759_v12 = vld [vmem:[#allocation2 + $0xb1] sm:$0xff]  ;;  %v1143_v46 = vld [vmem:[#allocation2 + $0x42] sm:$0xff]  ;;  %v1150_v55 = vld [vmem:[#allocation2 + $0x7a] sm:$0xff] }
  0x45   : > { %v771_v33 = vld [vmem:[#allocation2 + $0x111] sm:$0xff]  ;;  %v3125_v7 = vld [vmem:[#allocation2 + $0x25] sm:$0xff] }
  0x46   : > { %v1140_v41 = vld [vmem:[#allocation2 + $0x2a] sm:$0xff] }
  0x47   : > { %4569 = vmatmul.mubr.msk.bf16.gmra.mrb[20].mxu1 %vm258_vm1, %v386_v22  ;;  %v2351_v22 = vld [vmem:[#allocation2 + $0xc4] sm:$0xff]  ;;  %v3126_v8 = vld [vmem:[#allocation2 + $0x2d] sm:$0xff] }
  0x48   : > { %4572 = vmatprep.mubr.msk.bf16.mxu1 %vm258_vm1, %v387_v23  ;;  %v745_v23 = vld [vmem:[#allocation2 + $0x41] sm:$0xff]  ;;  %v5447_v30 = vpack.c.bf16 %v2352_v25, %v2351_v22  ;;  %v764_v25 = vld [vmem:[#allocation2 + $0xd9] sm:$0xff]  ;;  %v1144_v47 = vld [vmem:[#allocation2 + $0x4a] sm:$0xff] }
  0x49   : > { %4739 = vmatmul.mubr.msk.bf16.vlgmr.msra.gmra.mrb[0].mxu0 %vm258_vm1, %v5375_v5  ;;  %v777_v24 = vpack.c.bf16 %v746_v4, %v745_v23  ;;  %v5491_v22 = vld [vmem:[%s5830_s1 + $0x20] sm:$0xf]  ;;  %v1152_v56 = vld [vmem:[#allocation2 + $0x8a] sm:$0xff] }
  0x4a   : > { %4775 = vmatpush3.bf16.msra.mxu0 %v2874_v27  ;;  %4742 = vmatprep.mubr.msk.bf16.mxu0 %vm258_vm1, %v5378_v26  ;;  %v2353_v27 = vld [vmem:[#allocation2 + $0xd4] sm:$0xff]  ;;  %v765_v23 = vld [vmem:[#allocation2 + $0xe1] sm:$0xff] }
  0x4b   : > { %5186 = vmatprep.subr.msk.bf16.mxu0 %vm484_vm0, %v5387_v28  ;;  %v5449_v31 = vpack.c.bf16 %v2354_v52, %v2353_v27  ;;  %v766_v28 = vld [vmem:[#allocation2 + $0xe9] sm:$0xff]  ;;  %v768_v52 = vld [vmem:[#allocation2 + $0xf9] sm:$0xff] }
  0x4c   : > { %v787_v27 = vpack.c.bf16 %v766_v28, %v765_v23 }
  0x4f   : > { %4573 = vmatmul.mubr.msk.bf16.gmra.mrb[24].mxu1 %vm258_vm1, %v388_v35  ;;  %v2356_v35 = vld [vmem:[#allocation2 + $0xec] sm:$0xff] }
  0x50   : > { %4576 = vmatprep.mubr.msk.bf16.mxu1 %vm258_vm1, %v389_v37  ;;  %v749_v37 = vld [vmem:[#allocation2 + $0x61] sm:$0xff]  ;;  %v5457_v43 = vpack.c.bf16 %v2356_v35, %v2355_v34  ;;  %v1136_v35 = vld [vmem:[#allocation2 + $0xa] sm:$0xff] }
  0x51   : > { %4743 = vmatmul.mubr.msk.bf16.gmra.mrb[4].mxu0 %vm258_vm1, %v5396_v36  ;;  %v779_v44 = vpack.c.bf16 %v750_v38, %v749_v37  ;;  %v1135_v34 = vld [vmem:[#allocation2 + $0x2] sm:$0xff]  ;;  %v1137_v38 = vld [vmem:[#allocation2 + $0x12] sm:$0xff] }
  0x52   : > { %4746 = vmatprep.mubr.msk.bf16.mxu0 %vm258_vm1, %v5399_v39 }
  0x57   : > { %4577 = vmatmul.mubr.msk.bf16.gmra.mrb[28].mxu1 %vm258_vm1, %v390_v49  ;;  %v2360_v49 = vld [vmem:[#allocation2 + $0x10c] sm:$0xff] }
  0x58   : > { %4580 = vmatprep.mubr.msk.bf16.mxu1 %vm258_vm1, %v391_v51  ;;  %v753_v51 = vld [vmem:[#allocation2 + $0x81] sm:$0xff]  ;;  %v5467_v58 = vpack.c.bf16 %v2360_v49, %v2359_v48  ;;  %v5536_v48 = vpack.c.bf16 %v1144_v47, %v1143_v46 }
  0x59   : > { %4747 = vmatmul.mubr.msk.bf16.gmra.mrb[8].mxu0 %vm258_vm1, %v5408_v50  ;;  %v781_v59 = vpack.c.bf16 %v754_v54, %v753_v51  ;;  %v1147_v49 = vld [vmem:[#allocation2 + $0x62] sm:$0xff] }
  0x5a   : > { %4750 = vmatprep.mubr.msk.bf16.mxu0 %vm258_vm1, %v5410_v53 }
  0x5f   : > { %4581 = vmatmul.mubr.msk.bf16.gmra.mrb[32].mxu1 %vm258_vm1, %v392_v62  ;;  %v756_v62 = vld [vmem:[#allocation2 + $0x99] sm:$0xff] }
  0x60   : > { %4586 = vmatprep.mubr.msk.bf16.mxu1 %vm258_vm1, %v773_v1  ;;  %v2363_v1 = vld [vmem:[#allocation2 + $0x124] sm:$0xff]  ;;  %v782_v9 = vpack.c.bf16 %v756_v62, %v755_v61  ;;  %v1154_v61 = vld [vmem:[#allocation2 + $0x9a] sm:$0xff] }
  0x61   : > { %4751 = vmatmul.mubr.msk.bf16.gmra.mrb[12].mxu0 %vm258_vm1, %v5418_v63  ;;  %v5477_v10 = vpack.c.bf16 %v2364_v6, %v2363_v1  ;;  %v2761_v62 = vld [vmem:[#allocation2 + $0x134] sm:$0xff]  ;;  %v1155_v1 = vld [vmem:[#allocation2 + $0xa2] sm:$0xff]  ;;  %v1156_v6 = vld [vmem:[#allocation2 + $0xaa] sm:$0xff] }
  0x62   : > { %4754 = vmatprep.mubr.msk.bf16.mxu0 %vm258_vm1, %v5420_v3 }
  0x67   : > { %4587 = vmatmul.mubr.msk.bf16.vlgmr.msra.gmra.mrb[0].mxu1 %vm258_vm1, %v774_v14  ;;  %v761_v14 = vld [vmem:[#allocation2 + $0xc1] sm:$0xff] }
  0x68   : > { %4590 = vmatprep.mubr.msk.bf16.mxu1 %vm258_vm1, %v775_v16  ;;  %4623 = vmatpush3.bf16.msra.mxu1 %v1282_v18  ;;  %v762_v16 = vld [vmem:[#allocation2 + $0xc9] sm:$0xff]  ;;  %v784_v18 = vpack.c.bf16 %v760_v13, %v759_v12  ;;  %v5572_v12 = vpack.c.bf16 %v1156_v6, %v1155_v1  ;;  %v1158_v13 = vld [vmem:[#allocation2 + $0xba] sm:$0xff] }
  0x69   : > { %4755 = vmatmul.mubr.msk.bf16.gmra.mrb[16].mxu0 %vm258_vm1, %v5428_v15  ;;  %5181 = vmatprep.subr.msk.bf16.mxu1 %vm484_vm0, %v5438_v19  ;;  %v785_v20 = vpack.c.bf16 %v762_v16, %v761_v14  ;;  %v3127_v14 = vld [vmem:[#allocation2 + $0x35] sm:$0xff]  ;;  %v3128_v16 = vld [vmem:[#allocation2 + $0x3d] sm:$0xff]  ;;  %v3145_v6 = vld [vmem:[#allocation2 + $0xc5] sm:$0xff] }
  0x6a   : > { %4758 = vmatprep.mubr.msk.bf16.mxu0 %vm258_vm1, %v5430_v17  ;;  %v3162_v23 = vpack.c.bf16 %v3128_v16, %v3127_v14  ;;  %v3144_v1 = vld [vmem:[#allocation2 + $0xbd] sm:$0xff] }
  0x6f   : > { %4591 = vmatmul.mubr.msk.bf16.gmra.mrb[4].mxu1 %vm258_vm1, %v776_v29  ;;  %v770_v29 = vld [vmem:[#allocation2 + $0x109] sm:$0xff] }
  0x70   : > { %4594 = vmatprep.mubr.msk.bf16.mxu1 %vm258_vm1, %v777_v24 }
  0x71   : > { %4759 = vmatmul.mubr.msk.bf16.gmra.mrb[20].mxu0 %vm258_vm1, %v5447_v30 }
  0x72   : > { %4762 = vmatprep.mubr.msk.bf16.mxu0 %vm258_vm1, %v5449_v31 }
  0x77   : > { %4595 = vmatmul.mubr.msk.bf16.gmra.mrb[8].mxu1 %vm258_vm1, %v778_v42 }
  0x78   : > { %4598 = vmatprep.mubr.msk.bf16.mxu1 %vm258_vm1, %v779_v44  ;;  %v1680_v44 = vsel %vm484_vm0, %v5438_v19, 0 }
  0x79   : > { %4763 = vmatmul.mubr.msk.bf16.gmra.mrb[24].mxu0 %vm258_vm1, %v5457_v43 }
  0x7a   : > { %4766 = vmatprep.mubr.msk.bf16.mxu0 %vm258_vm1, %v5459_v45 }
  0x7f   : > { %4599 = vmatmul.mubr.msk.bf16.gmra.mrb[12].mxu1 %vm258_vm1, %v780_v57 }
  0x80   : > { %4602 = vmatprep.mubr.msk.bf16.mxu1 %vm258_vm1, %v781_v59 }
  0x81   : > { %4767 = vmatmul.mubr.msk.bf16.gmra.mrb[28].mxu0 %vm258_vm1, %v5467_v58 }
  0x82   : > { %4770 = vmatprep.mubr.msk.bf16.mxu0 %vm258_vm1, %v5469_v60 }
  0x87   : > { %4603 = vmatmul.mubr.msk.bf16.gmra.mrb[16].mxu1 %vm258_vm1, %v782_v9 }
  0x88   : > { %4606 = vmatprep.mubr.msk.bf16.mxu1 %vm258_vm1, %v783_v11 }
  0x89   : > { %4771 = vmatmul.mubr.msk.bf16.gmra.mrb[32].mxu0 %vm258_vm1, %v5477_v10 }
  0x8a   : > { %4776 = vmatprep.mubr.msk.bf16.mxu0 %vm258_vm1, %v5375_v5  ;;  %v763_v5 = vld [vmem:[#allocation2 + $0xd1] sm:$0xff] }
  0x8b   : > { %v786_v4 = vpack.c.bf16 %v764_v25, %v763_v5  ;;  %v3130_v5 = vld [vmem:[#allocation2 + $0x4d] sm:$0xff] }
  0x8f   : > { %4607 = vmatmul.mubr.msk.bf16.gmra.mrb[20].mxu1 %vm258_vm1, %v784_v18  ;;  %v1159_v18 = vld [vmem:[#allocation2 + $0xc2] sm:$0xff] }
  0x90   : > { %4610 = vmatprep.mubr.msk.bf16.mxu1 %vm258_vm1, %v785_v20  ;;  %v1160_v20 = vld [vmem:[#allocation2 + $0xca] sm:$0xff] }
  0x91   : > { %4777 = vmatmul.mubr.msk.bf16.vlgmr.msra.gmra.mrb[0].mxu0 %vm258_vm1, %v5378_v26  ;;  %v767_v26 = vld [vmem:[#allocation2 + $0xf1] sm:$0xff]  ;;  %v5582_v28 = vpack.c.bf16 %v1160_v20, %v1159_v18  ;;  %v3153_v18 = vld [vmem:[#allocation2 + $0x105] sm:$0xff] }
  0x92   : > { %4813 = vmatpush3.bf16.msra.mxu0 %v3272_v21  ;;  %4780 = vmatprep.mubr.msk.bf16.mxu0 %vm258_vm1, %v5396_v36  ;;  %v769_v36 = vld [vmem:[#allocation2 + $0x101] sm:$0xff]  ;;  %v788_v24 = vpack.c.bf16 %v768_v52, %v767_v26  ;;  %v1161_v26 = vld [vmem:[#allocation2 + $0xd2] sm:$0xff] }
  0x93   : > { %5187 = vmatprep.subr.msk.bf16.mxu0 %vm484_vm0, %v5491_v22  ;;  %v789_v32 = vpack.c.bf16 %v770_v29, %v769_v36  ;;  %v3129_v21 = vld [vmem:[#allocation2 + $0x45] sm:$0xff]  ;;  %v1162_v52 = vld [vmem:[#allocation2 + $0xda] sm:$0xff] }
  0x94   : > { %v3131_v36 = vld [vmem:[#allocation2 + $0x55] sm:$0xff]  ;;  %v3132_v29 = vld [vmem:[#allocation2 + $0x5d] sm:$0xff] }
  0x97   : > { %4611 = vmatmul.mubr.msk.bf16.gmra.mrb[24].mxu1 %vm258_vm1, %v786_v4  ;;  %v3163_v4 = vpack.c.bf16 %v3130_v5, %v3129_v21  ;;  %v3157_v5 = vld [vmem:[#allocation2 + $0x125] sm:$0xff] }
  0x98   : > { %4614 = vmatprep.mubr.msk.bf16.mxu1 %vm258_vm1, %v787_v27  ;;  %v3670_v27 = vsel %vm484_vm0, %v5491_v22, 0  ;;  %v5592_v22 = vpack.c.bf16 %v1162_v52, %v1161_v26  ;;  %v3523_v26 = vld [vmem:[#allocation2 + $0x26] sm:$0xff]  ;;  %v3524_v52 = vld [vmem:[#allocation2 + $0x2e] sm:$0xff] }
  0x99   : > { %4781 = vmatmul.mubr.msk.bf16.gmra.mrb[4].mxu0 %vm258_vm1, %v5399_v39  ;;  %v772_v39 = vld [vmem:[#allocation2 + $0x119] sm:$0xff] }
  0x9a   : > { %4784 = vmatprep.mubr.msk.bf16.mxu0 %vm258_vm1, %v5408_v50  ;;  %v790_v37 = vpack.c.bf16 %v772_v39, %v771_v33  ;;  %v1171_v50 = vpack.c.bf16 %v1136_v35, %v1135_v34  ;;  %v3133_v33 = vld [vmem:[#allocation2 + $0x65] sm:$0xff]  ;;  %v3134_v39 = vld [vmem:[#allocation2 + $0x6d] sm:$0xff]  ;;  %v3164_v34 = vpack.c.bf16 %v3132_v29, %v3131_v36  ;;  %v3559_v29 = vpack.c.bf16 %v3524_v52, %v3523_v26 }
  0x9b   : > { %v3551_v26 = vld [vmem:[#allocation2 + $0x106] sm:$0xff]  ;;  %v3552_v52 = vld [vmem:[#allocation2 + $0x10e] sm:$0xff] }
  0x9f   : > { %4615 = vmatmul.mubr.msk.bf16.gmra.mrb[28].mxu1 %vm258_vm1, %v788_v24  ;;  %v1163_v24 = vld [vmem:[#allocation2 + $0xe2] sm:$0xff] }
  0xa0   : > { %4618 = vmatprep.mubr.msk.bf16.mxu1 %vm258_vm1, %v789_v32  ;;  %v1164_v32 = vld [vmem:[#allocation2 + $0xea] sm:$0xff] }
  0xa1   : > { %4785 = vmatmul.mubr.msk.bf16.gmra.mrb[8].mxu0 %vm258_vm1, %v5410_v53  ;;  %v1138_v53 = vld [vmem:[#allocation2 + $0x1a] sm:$0xff]  ;;  %v5594_v35 = vpack.c.bf16 %v1164_v32, %v1163_v24  ;;  %v3527_v24 = vld [vmem:[#allocation2 + $0x46] sm:$0xff]  ;;  %v3528_v32 = vld [vmem:[#allocation2 + $0x4e] sm:$0xff] }
  0xa2   : > { %4788 = vmatprep.mubr.msk.bf16.mxu0 %vm258_vm1, %v5418_v63  ;;  %v5518_v42 = vpack.c.bf16 %v1138_v53, %v1137_v38  ;;  %v5520_v63 = vpack.c.bf16 %v1140_v41, %v1139_v40  ;;  %v1166_v38 = vld [vmem:[#allocation2 + $0xfa] sm:$0xff]  ;;  %v1167_v41 = vld [vmem:[#allocation2 + $0x102] sm:$0xff] }
  0xa3   : > { %v3135_v53 = vld [vmem:[#allocation2 + $0x75] sm:$0xff]  ;;  %v3136_v40 = vld [vmem:[#allocation2 + $0x7d] sm:$0xff] }
  0xa4   : > { %v3166_v47 = vpack.c.bf16 %v3136_v40, %v3135_v53  ;;  %v3535_v53 = vld [vmem:[#allocation2 + $0x86] sm:$0xff]  ;;  %v3536_v40 = vld [vmem:[#allocation2 + $0x8e] sm:$0xff] }
  0xa7   : > { %4619 = vmatmul.mubr.msk.bf16.gmra.mrb[32].mxu1 %vm258_vm1, %v790_v37  ;;  %v3165_v37 = vpack.c.bf16 %v3134_v39, %v3133_v33  ;;  %v3561_v39 = vpack.c.bf16 %v3528_v32, %v3527_v24  ;;  %v1965_v24 = vld [vmem:[#allocation2 + $0x123] sm:$0xff]  ;;  %v1966_v32 = vld [vmem:[#allocation2 + $0x12b] sm:$0xff] }
  0xa8   : > { %4624 = vmatprep.mubr.msk.bf16.mxu1 %vm258_vm1, %v1171_v50  ;;  %v1165_v50 = vld [vmem:[#allocation2 + $0xf2] sm:$0xff] }
  0xa9   : > { %4789 = vmatmul.mubr.msk.bf16.gmra.mrb[12].mxu0 %vm258_vm1, %v5420_v3  ;;  %v1141_v3 = vld [vmem:[#allocation2 + $0x32] sm:$0xff]  ;;  %v5602_v46 = vpack.c.bf16 %v1166_v38, %v1165_v50 }
  0xaa   : > { %4792 = vmatprep.mubr.msk.bf16.mxu0 %vm258_vm1, %v5428_v15  ;;  %v1142_v15 = vld [vmem:[#allocation2 + $0x3a] sm:$0xff] }
  0xab   : > { %v5534_v19 = vpack.c.bf16 %v1142_v15, %v1141_v3  ;;  %v3137_v3 = vld [vmem:[#allocation2 + $0x85] sm:$0xff]  ;;  %v3138_v15 = vld [vmem:[#allocation2 + $0x8d] sm:$0xff] }
  0xaf   : > { %4625 = vmatmul.mubr.msk.bf16.vlgmr.msra.gmra.mrb[0].mxu1 %vm258_vm1, %v5518_v42 }
  0xb0   : > { %4628 = vmatprep.mubr.msk.bf16.mxu1 %vm258_vm1, %v5520_v63  ;;  %4661 = vmatpush3.bf16.msra.mxu1 %v1680_v44  ;;  %v1168_v44 = vld [vmem:[#allocation2 + $0x10a] sm:$0xff] }
  0xb1   : > { %4793 = vmatmul.mubr.msk.bf16.gmra.mrb[16].mxu0 %vm258_vm1, %v5430_v17  ;;  %5183 = vmatprep.subr.msk.bf16.mxu1 %vm484_vm0, %v5237_v0  ;;  %v1145_v17 = vld [vmem:[#allocation2 + $0x52] sm:$0xff]  ;;  %v1148_v0 = vld [vmem:[#allocation2 + $0x6a] sm:$0xff] }
  0xb2   : > { %4796 = vmatprep.mubr.msk.bf16.mxu0 %vm258_vm1, %v5447_v30  ;;  %v1146_v30 = vld [vmem:[#allocation2 + $0x5a] sm:$0xff]  ;;  %v5548_v54 = vpack.c.bf16 %v1148_v0, %v1147_v49  ;;  %v1169_v49 = vld [vmem:[#allocation2 + $0x112] sm:$0xff] }
  0xb3   : > { %v5546_v51 = vpack.c.bf16 %v1146_v30, %v1145_v17  ;;  %v5604_v17 = vpack.c.bf16 %v1168_v44, %v1167_v41  ;;  %v3167_v30 = vpack.c.bf16 %v3138_v15, %v3137_v3  ;;  %v1170_v0 = vld [vmem:[#allocation2 + $0x11a] sm:$0xff]  ;;  %v3565_v44 = vpack.c.bf16 %v3536_v40, %v3535_v53  ;;  %v1568_v3 = vld [vmem:[#allocation2 + $0x12a] sm:$0xff] }
  0xb4   : > { %v3537_v15 = vld [vmem:[#allocation2 + $0x96] sm:$0xff] }
  0xb7   : > { %4629 = vmatmul.mubr.msk.bf16.gmra.mrb[4].mxu1 %vm258_vm1, %v5534_v19 }
  0xb8   : > { %4632 = vmatprep.mubr.msk.bf16.mxu1 %vm258_vm1, %v5536_v48 }
  0xb9   : > { %4797 = vmatmul.mubr.msk.bf16.gmra.mrb[20].mxu0 %vm258_vm1, %v5449_v31  ;;  %v1149_v31 = vld [vmem:[#allocation2 + $0x72] sm:$0xff] }
  0xba   : > { %4800 = vmatprep.mubr.msk.bf16.mxu0 %vm258_vm1, %v5457_v43  ;;  %v1151_v43 = vld [vmem:[#allocation2 + $0x82] sm:$0xff]  ;;  %v5558_v57 = vpack.c.bf16 %v1150_v55, %v1149_v31  ;;  %v3139_v31 = vld [vmem:[#allocation2 + $0x95] sm:$0xff] }
  0xbb   : > { %v5560_v59 = vpack.c.bf16 %v1152_v56, %v1151_v43  ;;  %v3140_v55 = vld [vmem:[#allocation2 + $0x9d] sm:$0xff]  ;;  %v3141_v43 = vld [vmem:[#allocation2 + $0xa5] sm:$0xff]  ;;  %v3142_v56 = vld [vmem:[#allocation2 + $0xad] sm:$0xff] }
  0xbf   : > { %4633 = vmatmul.mubr.msk.bf16.gmra.mrb[8].mxu1 %vm258_vm1, %v5546_v51 }
  0xc0   : > { %4636 = vmatprep.mubr.msk.bf16.mxu1 %vm258_vm1, %v5548_v54 }
  0xc1   : > { %4801 = vmatmul.mubr.msk.bf16.gmra.mrb[24].mxu0 %vm258_vm1, %v5459_v45  ;;  %v1153_v45 = vld [vmem:[#allocation2 + $0x92] sm:$0xff] }
  0xc2   : > { %4804 = vmatprep.mubr.msk.bf16.mxu0 %vm258_vm1, %v5467_v58  ;;  %v2762_v58 = vld [vmem:[#allocation2 + $0x13c] sm:$0xff]  ;;  %v5570_v9 = vpack.c.bf16 %v1154_v61, %v1153_v45  ;;  %v5612_v45 = vpack.c.bf16 %v1170_v0, %v1169_v49  ;;  %v3168_v61 = vpack.c.bf16 %v3140_v55, %v3139_v31  ;;  %v3539_v49 = vld [vmem:[#allocation2 + $0xa6] sm:$0xff]  ;;  %v3540_v0 = vld [vmem:[#allocation2 + $0xae] sm:$0xff] }
  0xc3   : > { %v2780_v11 = vpack.c.bf16 %v2762_v58, %v2761_v62  ;;  %v3169_v62 = vpack.c.bf16 %v3142_v56, %v3141_v43  ;;  %v3143_v58 = vld [vmem:[#allocation2 + $0xb5] sm:$0xff]  ;;  %v3567_v56 = vpack.c.bf16 %v3540_v0, %v3539_v49 }
  0xc7   : > { %4637 = vmatmul.mubr.msk.bf16.gmra.mrb[12].mxu1 %vm258_vm1, %v5558_v57 }
  0xc8   : > { %4640 = vmatprep.mubr.msk.bf16.mxu1 %vm258_vm1, %v5560_v59 }
  0xc9   : > { %4805 = vmatmul.mubr.msk.bf16.gmra.mrb[28].mxu0 %vm258_vm1, %v5469_v60  ;;  %v3161_v60 = vpack.c.bf16 %v3126_v8, %v3125_v7  ;;  %v3146_v7 = vld [vmem:[#allocation2 + $0xcd] sm:$0xff]  ;;  %v3170_v8 = vpack.c.bf16 %v3144_v1, %v3143_v58  ;;  %v1956_v1 = vld [vmem:[#allocation2 + $0xdb] sm:$0xff] }
  0xca   : > { %4808 = vmatprep.mubr.msk.bf16.mxu0 %vm258_vm1, %v5477_v10  ;;  %v1157_v10 = vld [vmem:[#allocation2 + $0xb2] sm:$0xff] }
  0xcb   : > { %v5580_v25 = vpack.c.bf16 %v1158_v13, %v1157_v10  ;;  %v3149_v10 = vld [vmem:[#allocation2 + $0xe5] sm:$0xff]  ;;  %v3150_v13 = vld [vmem:[#allocation2 + $0xed] sm:$0xff] }
  0xcc   : > { %v3173_v16 = vpack.c.bf16 %v3150_v13, %v3149_v10  ;;  %v1955_v58 = vld [vmem:[#allocation2 + $0xd3] sm:$0xff]  ;;  %v1957_v10 = vld [vmem:[#allocation2 + $0xe3] sm:$0xff]  ;;  %v1958_v13 = vld [vmem:[#allocation2 + $0xeb] sm:$0xff] }
  0xcf   : > { %4641 = vmatmul.mubr.msk.bf16.gmra.mrb[16].mxu1 %vm258_vm1, %v5570_v9 }
  0xd0   : > { %4644 = vmatprep.mubr.msk.bf16.mxu1 %vm258_vm1, %v5572_v12 }
  0xd1   : > { %4809 = vmatmul.mubr.msk.bf16.gmra.mrb[32].mxu0 %vm258_vm1, %v2780_v11  ;;  %v3171_v11 = vpack.c.bf16 %v3146_v7, %v3145_v6  ;;  %v3543_v6 = vld [vmem:[#allocation2 + $0xc6] sm:$0xff]  ;;  %v3544_v7 = vld [vmem:[#allocation2 + $0xce] sm:$0xff] }
  0xd2   : > { %4814 = vmatprep.mubr.msk.bf16.mxu0 %vm258_vm1, %v3161_v60  ;;  %v3148_v60 = vld [vmem:[#allocation2 + $0xdd] sm:$0xff] }
  0xd7   : > { %4645 = vmatmul.mubr.msk.bf16.gmra.mrb[20].mxu1 %vm258_vm1, %v5580_v25 }
  0xd8   : > { %4648 = vmatprep.mubr.msk.bf16.mxu1 %vm258_vm1, %v5582_v28 }
  0xd9   : > { %4815 = vmatmul.mubr.msk.bf16.vlgmr.msra.gmra.mrb[0].mxu0 %vm258_vm1, %v3162_v23  ;;  %v3158_v23 = vld [vmem:[#allocation2 + $0x12d] sm:$0xff] }
  0xda   : > { %4851 = vmatpush3.bf16.msra.mxu0 %v3670_v27  ;;  %4818 = vmatprep.mubr.msk.bf16.mxu0 %vm258_vm1, %v3163_v4  ;;  %v3177_v27 = vpack.c.bf16 %v3158_v23, %v3157_v5  ;;  %v1961_v5 = vld [vmem:[#allocation2 + $0x103] sm:$0xff]  ;;  %v1962_v23 = vld [vmem:[#allocation2 + $0x10b] sm:$0xff] }
  0xdf   : > { %4649 = vmatmul.mubr.msk.bf16.gmra.mrb[24].mxu1 %vm258_vm1, %v5592_v22 }
  0xe0   : > { %4652 = vmatprep.mubr.msk.bf16.mxu1 %vm258_vm1, %v5594_v35 }
  0xe1   : > { %4819 = vmatmul.mubr.msk.bf16.gmra.mrb[4].mxu0 %vm258_vm1, %v3164_v34  ;;  %v3531_v34 = vld [vmem:[#allocation2 + $0x66] sm:$0xff] }
  0xe2   : > { %4822 = vmatprep.mubr.msk.bf16.mxu0 %vm258_vm1, %v3165_v37  ;;  %v3532_v37 = vld [vmem:[#allocation2 + $0x6e] sm:$0xff] }
  0xe3   : > { %v3563_v38 = vpack.c.bf16 %v3532_v37, %v3531_v34  ;;  %v1984_v34 = vpack.c.bf16 %v1966_v32, %v1965_v24 }
  0xe7   : > { %4653 = vmatmul.mubr.msk.bf16.gmra.mrb[28].mxu1 %vm258_vm1, %v5602_v46 }
  0xe8   : > { %4656 = vmatprep.mubr.msk.bf16.mxu1 %vm258_vm1, %v5604_v17 }
  0xe9   : > { %4823 = vmatmul.mubr.msk.bf16.gmra.mrb[8].mxu0 %vm258_vm1, %v3166_v47  ;;  %v1951_v47 = vld [vmem:[#allocation2 + $0xb3] sm:$0xff] }
  0xea   : > { %4826 = vmatprep.mubr.msk.bf16.mxu0 %vm258_vm1, %v3167_v30  ;;  %v1952_v30 = vld [vmem:[#allocation2 + $0xbb] sm:$0xff] }
  0xeb   : > { %v1977_v43 = vpack.c.bf16 %v1952_v30, %v1951_v47 }
  0xef   : > { %4657 = vmatmul.mubr.msk.bf16.gmra.mrb[32].mxu1 %vm258_vm1, %v5612_v45 }
  0xf0   : > { %4662 = vmatprep.mubr.msk.bf16.mxu1 %vm258_vm1, %v5518_v42  ;;  %v3147_v42 = vld [vmem:[#allocation2 + $0xd5] sm:$0xff] }
  0xf1   : > { %4827 = vmatmul.mubr.msk.bf16.gmra.mrb[12].mxu0 %vm258_vm1, %v3168_v61  ;;  %v3172_v14 = vpack.c.bf16 %v3148_v60, %v3147_v42  ;;  %v3541_v61 = vld [vmem:[#allocation2 + $0xb6] sm:$0xff]  ;;  %v1979_v42 = vpack.c.bf16 %v1956_v1, %v1955_v58  ;;  %v3569_v60 = vpack.c.bf16 %v3544_v7, %v3543_v6  ;;  %v5705_v1 = vld [vmem:[%s5831_s2] ss:$0 sm:$0xff] }
  0xf2   : > { %4830 = vmatprep.mubr.msk.bf16.mxu0 %vm258_vm1, %v3169_v62  ;;  %v3542_v62 = vld [vmem:[#allocation2 + $0xbe] sm:$0xff] }
  0xf7   : > { %4663 = vmatmul.mubr.msk.bf16.vlgmr.msra.gmra.mrb[0].mxu1 %vm258_vm1, %v5520_v63  ;;  %v3151_v63 = vld [vmem:[#allocation2 + $0xf5] sm:$0xff] }
  0xf8   : > { %4666 = vmatprep.mubr.msk.bf16.mxu1 %vm258_vm1, %v5534_v19  ;;  %4889 = vmatpush3.bf16.msra.mxu1 %v5247_v2  ;;  %v3152_v19 = vld [vmem:[#allocation2 + $0xfd] sm:$0xff]  ;;  %v3154_v2 = vld [vmem:[#allocation2 + $0x10d] sm:$0xff] }
  0xf9   : > { %4831 = vmatmul.mubr.msk.bf16.gmra.mrb[16].mxu0 %vm258_vm1, %v3170_v8  ;;  %v3174_v20 = vpack.c.bf16 %v3152_v19, %v3151_v63  ;;  %v3175_v21 = vpack.c.bf16 %v3154_v2, %v3153_v18  ;;  %v1959_v63 = vld [vmem:[#allocation2 + $0xf3] sm:$0xff]  ;;  %v1960_v19 = vld [vmem:[#allocation2 + $0xfb] sm:$0xff]  ;;  %v3547_v18 = vld [vmem:[#allocation2 + $0xe6] sm:$0xff] }
  0xfa   : > { %4834 = vmatprep.mubr.msk.bf16.mxu0 %vm258_vm1, %v3171_v11  ;;  %v3568_v11 = vpack.c.bf16 %v3542_v62, %v3541_v61  ;;  %v3548_v2 = vld [vmem:[#allocation2 + $0xee] sm:$0xff] }
  0xff   : > { %4667 = vmatmul.mubr.msk.bf16.gmra.mrb[4].mxu1 %vm258_vm1, %v5536_v48  ;;  %v3155_v48 = vld [vmem:[#allocation2 + $0x115] sm:$0xff] }
 0x100   : > { %4670 = vmatprep.mubr.msk.bf16.mxu1 %vm258_vm1, %v5546_v51  ;;  %v3156_v51 = vld [vmem:[#allocation2 + $0x11d] sm:$0xff] }
 0x101   : > { %4835 = vmatmul.mubr.msk.bf16.gmra.mrb[20].mxu0 %vm258_vm1, %v3172_v14  ;;  %v3176_v4 = vpack.c.bf16 %v3156_v51, %v3155_v48  ;;  %v3545_v14 = vld [vmem:[#allocation2 + $0xd6] sm:$0xff]  ;;  %v1981_v48 = vpack.c.bf16 %v1960_v19, %v1959_v63  ;;  %v3571_v51 = vpack.c.bf16 %v3548_v2, %v3547_v18 }
 0x102   : > { %4838 = vmatprep.mubr.msk.bf16.mxu0 %vm258_vm1, %v3173_v16  ;;  %v3546_v16 = vld [vmem:[#allocation2 + $0xde] sm:$0xff] }
 0x107   : > { %4671 = vmatmul.mubr.msk.bf16.gmra.mrb[8].mxu1 %vm258_vm1, %v5548_v54  ;;  %v3159_v54 = vld [vmem:[#allocation2 + $0x135] sm:$0xff] }
 0x108   : > { %4674 = vmatprep.mubr.msk.bf16.mxu1 %vm258_vm1, %v5558_v57  ;;  %v3160_v57 = vld [vmem:[#allocation2 + $0x13d] sm:$0xff] }
 0x109   : > { %4839 = vmatmul.mubr.msk.bf16.gmra.mrb[24].mxu0 %vm258_vm1, %v3174_v20  ;;  %v3178_v36 = vpack.c.bf16 %v3160_v57, %v3159_v54  ;;  %v1980_v20 = vpack.c.bf16 %v1958_v13, %v1957_v10  ;;  %v1963_v54 = vld [vmem:[#allocation2 + $0x113] sm:$0xff]  ;;  %v1964_v57 = vld [vmem:[#allocation2 + $0x11b] sm:$0xff] }
 0x10a   : > { %4842 = vmatprep.mubr.msk.bf16.mxu0 %vm258_vm1, %v3175_v21  ;;  %v3570_v21 = vpack.c.bf16 %v3546_v16, %v3545_v14 }
 0x10f   : > { %4675 = vmatmul.mubr.msk.bf16.gmra.mrb[12].mxu1 %vm258_vm1, %v5560_v59  ;;  %v3525_v59 = vld [vmem:[#allocation2 + $0x36] sm:$0xff] }
 0x110   : > { %4678 = vmatprep.mubr.msk.bf16.mxu1 %vm258_vm1, %v5570_v9  ;;  %v3526_v9 = vld [vmem:[#allocation2 + $0x3e] sm:$0xff] }
 0x111   : > { %4843 = vmatmul.mubr.msk.bf16.gmra.mrb[28].mxu0 %vm258_vm1, %v3176_v4  ;;  %v3560_v33 = vpack.c.bf16 %v3526_v9, %v3525_v59  ;;  %v3549_v4 = vld [vmem:[#allocation2 + $0xf6] sm:$0xff]  ;;  %v1983_v59 = vpack.c.bf16 %v1964_v57, %v1963_v54  ;;  %v3573_v9 = vpack.c.bf16 %v3552_v52, %v3551_v26 }
 0x112   : > { %4846 = vmatprep.mubr.msk.bf16.mxu0 %vm258_vm1, %v3177_v27  ;;  %v3550_v27 = vld [vmem:[#allocation2 + $0xfe] sm:$0xff] }
 0x117   : > { %4679 = vmatmul.mubr.msk.bf16.gmra.mrb[16].mxu1 %vm258_vm1, %v5572_v12  ;;  %v3529_v12 = vld [vmem:[#allocation2 + $0x56] sm:$0xff] }
 0x118   : > { %4682 = vmatprep.mubr.msk.bf16.mxu1 %vm258_vm1, %v5580_v25  ;;  %v3530_v25 = vld [vmem:[#allocation2 + $0x5e] sm:$0xff] }
 0x119   : > { %4847 = vmatmul.mubr.msk.bf16.gmra.mrb[32].mxu0 %vm258_vm1, %v3178_v36  ;;  %v3562_v50 = vpack.c.bf16 %v3530_v25, %v3529_v12  ;;  %v1982_v36 = vpack.c.bf16 %v1962_v23, %v1961_v5  ;;  %v3555_v12 = vld [vmem:[#allocation2 + $0x126] sm:$0xff]  ;;  %v3556_v25 = vld [vmem:[#allocation2 + $0x12e] sm:$0xff] }
 0x11a   : > { %4852 = vmatprep.mubr.msk.bf16.mxu0 %vm258_vm1, %v3559_v29  ;;  %v3572_v29 = vpack.c.bf16 %v3550_v27, %v3549_v4 }
 0x11f   : > { %4683 = vmatmul.mubr.msk.bf16.gmra.mrb[20].mxu1 %vm258_vm1, %v5582_v28  ;;  %v3533_v28 = vld [vmem:[#allocation2 + $0x76] sm:$0xff] }
 0x120   : > { %4686 = vmatprep.mubr.msk.bf16.mxu1 %vm258_vm1, %v5592_v22  ;;  %v3534_v22 = vld [vmem:[#allocation2 + $0x7e] sm:$0xff] }
 0x121   : > { %4853 = vmatmul.mubr.msk.bf16.vlgmr.msra.gmra.mrb[0].mxu0 %vm258_vm1, %v3560_v33  ;;  %v3564_v41 = vpack.c.bf16 %v3534_v22, %v3533_v28  ;;  %v3553_v33 = vld [vmem:[#allocation2 + $0x116] sm:$0xff]  ;;  %v3558_v28 = vld [vmem:[#allocation2 + $0x13e] sm:$0xff] }
 0x122   : > { %4856 = vmatprep.mubr.msk.bf16.mxu0 %vm258_vm1, %v3561_v39  ;;  %v3554_v39 = vld [vmem:[#allocation2 + $0x11e] sm:$0xff] }
 0x123   : > { %v3574_v37 = vpack.c.bf16 %v3554_v39, %v3553_v33 }
 0x127   : > { %4687 = vmatmul.mubr.msk.bf16.gmra.mrb[24].mxu1 %vm258_vm1, %v5594_v35  ;;  %v1567_v35 = vld [vmem:[#allocation2 + $0x122] sm:$0xff] }
 0x128   : > { %4690 = vmatprep.mubr.msk.bf16.mxu1 %vm258_vm1, %v5602_v46  ;;  %v3538_v46 = vld [vmem:[#allocation2 + $0x9e] sm:$0xff]  ;;  %v1586_v31 = vpack.c.bf16 %v1568_v3, %v1567_v35 }
 0x129   : > { %4857 = vmatmul.mubr.msk.bf16.gmra.mrb[4].mxu0 %vm258_vm1, %v3562_v50  ;;  %v3566_v55 = vpack.c.bf16 %v3538_v46, %v3537_v15  ;;  %v3575_v50 = vpack.c.bf16 %v3556_v25, %v3555_v12 }
 0x12a   : > { %4860 = vmatprep.mubr.msk.bf16.mxu0 %vm258_vm1, %v3563_v38  ;;  %v3557_v38 = vld [vmem:[#allocation2 + $0x136] sm:$0xff] }
 0x12b   : > { %v3576_v22 = vpack.c.bf16 %v3558_v28, %v3557_v38 }
 0x12f   : > { %4691 = vmatmul.mubr.msk.bf16.gmra.mrb[28].mxu1 %vm258_vm1, %v5604_v17  ;;  %v1953_v17 = vld [vmem:[#allocation2 + $0xc3] sm:$0xff] }
 0x130   : > { %4694 = vmatprep.mubr.msk.bf16.mxu1 %vm258_vm1, %v5612_v45  ;;  %v1954_v45 = vld [vmem:[#allocation2 + $0xcb] sm:$0xff] }
 0x131   : > { %4861 = vmatmul.mubr.msk.bf16.gmra.mrb[8].mxu0 %vm258_vm1, %v3564_v41  ;;  %v1978_v8 = vpack.c.bf16 %v1954_v45, %v1953_v17 }
 0x132   : > { %4864 = vmatprep.mubr.msk.bf16.mxu0 %vm258_vm1, %v3565_v44 }
 0x137   : > { %4695 = vmatmul.mubr.msk.bf16.gmra.mrb[32].mxu1 %vm258_vm1, %v1586_v31 }
 0x138   : > { %4720 = vmatprep.mubr.msk.bf16.mxu1 %vm258_vm1, %v1977_v43 }
 0x139   : > { %4865 = vmatmul.mubr.msk.bf16.gmra.mrb[12].mxu0 %vm258_vm1, %v3566_v55 }
 0x13a   : > { %4868 = vmatprep.mubr.msk.bf16.mxu0 %vm258_vm1, %v3567_v56 }
 0x13f   : > { %4721 = vmatmul.mubr.msk.bf16.vlgmr.msra.gmra.mrb[20].mxu1 %vm258_vm1, %v1978_v8 }
 0x140   : > { %4724 = vmatprep.mubr.msk.bf16.mxu1 %vm258_vm1, %v1979_v42 }
 0x141   : > { %4869 = vmatmul.mubr.msk.bf16.gmra.mrb[16].mxu0 %vm258_vm1, %v3568_v11 }
 0x142   : > { %4872 = vmatprep.mubr.msk.bf16.mxu0 %vm258_vm1, %v3569_v60 }
 0x147   : > { %4725 = vmatmul.mubr.msk.bf16.gmra.mrb[24].mxu1 %vm258_vm1, %v1980_v20 }
 0x148   : > { %4728 = vmatprep.mubr.msk.bf16.mxu1 %vm258_vm1, %v1981_v48 }
 0x149   : > { %4873 = vmatmul.mubr.msk.bf16.gmra.mrb[20].mxu0 %vm258_vm1, %v3570_v21 }
 0x14a   : > { %4876 = vmatprep.mubr.msk.bf16.mxu0 %vm258_vm1, %v3571_v51 }
 0x14f   : > { %4729 = vmatmul.mubr.msk.bf16.gmra.mrb[28].mxu1 %vm258_vm1, %v1982_v36 }
 0x150   : > { %4732 = vmatprep.mubr.msk.bf16.mxu1 %vm258_vm1, %v1983_v59 }
 0x151   : > { %4877 = vmatmul.mubr.msk.bf16.gmra.mrb[24].mxu0 %vm258_vm1, %v3572_v29 }
 0x152   : > { %4880 = vmatprep.mubr.msk.bf16.mxu0 %vm258_vm1, %v3573_v9 }
 0x157   : > { %4733 = vmatmul.mubr.msk.bf16.gmra.mrb[32].mxu1 %vm258_vm1, %v1984_v34 }
 0x159   : > { %4881 = vmatmul.mubr.msk.bf16.gmra.mrb[28].mxu0 %vm258_vm1, %v3574_v37 }
 0x15a   : > { %4884 = vmatprep.mubr.msk.bf16.mxu0 %vm258_vm1, %v3575_v50 }
 0x161   : > { %4885 = vmatmul.mubr.msk.bf16.gmra.mrb[32].mxu0 %vm258_vm1, %v3576_v22 }
 0x1ca   : > { %v4664_v53 = vpop.f32.mrb[0].mxu1 }
 0x1cb   : > { %v1716_v40 = vpop.f32.mrb[1].mxu1 }
 0x1cc   : > { %v4665_v41 = vpop.f32.mrb[2].mxu1 }
 0x1cd   : > { %v1719_v44 = vpop.f32.mrb[3].mxu1 }
 0x1d2   : > { %v4668_v35 = vpop.f32.mrb[4].mxu1 }
 0x1d3   : > { %v1732_v3 = vpop.f32.mrb[5].mxu1 }
 0x1d4   : > { %v4669_v15 = vpop.f32.mrb[6].mxu1 }
 0x1d5   : > { %v1735_v46 = vpop.f32.mrb[7].mxu1 }
 0x1da   : > { %v4672_v47 = vpop.f32.mrb[8].mxu1 }
 0x1db   : > { %v1748_v30 = vpop.f32.mrb[9].mxu1 }
 0x1dc   : > { %v4673_v49 = vpop.f32.mrb[10].mxu1 }
 0x1dd   : > { %v1751_v0 = vpop.f32.mrb[11].mxu1 }
 0x1e2   : > { %v4676_v31 = vpop.f32.mrb[12].mxu1 }
 0x1e3   : > { %v1764_v55 = vpop.f32.mrb[13].mxu1 }
 0x1e4   : > { %v5689_v43 = vpop.f32.mrb[14].mxu1 }
 0x1e5   : > { %v5691_v56 = vpop.f32.mrb[15].mxu1 }
 0x1ea   : > { %v5693_v17 = vpop.f32.mrb[16].mxu1 }
 0x1eb   : > { %v5695_v45 = vpop.f32.mrb[17].mxu1 }
 0x1ec   : > { %v5697_v61 = vpop.f32.mrb[18].mxu1 }
 0x1ed   : > { %v5699_v62 = vpop.f32.mrb[19].mxu1 }
 0x1f4   : > { %v4854_v58 = vpop.f32.mrb[0].mxu0 }
 0x1f5   : > { %v4890_v6 = vadd.f32 %v4854_v58, %v4664_v53  ;;  %v3706_v7 = vpop.f32.mrb[1].mxu0 }
 0x1f6   : > { %v4891_v8 = vadd.f32 %v3706_v7, %v1716_v40  ;;  %v4855_v11 = vpop.f32.mrb[2].mxu0 }
 0x1f7   : > { %v3966_v42 = vadd.f32 %v4890_v6, %v5705_v1  ;;  %v4892_v60 = vadd.f32 %v4855_v11, %v4665_v41  ;;  %v3709_v10 = vpop.f32.mrb[3].mxu0 }
 0x1f8   : > { %v3964_v13 = vadd.f32 %v4891_v8, %v5705_v1  ;;  %v4893_v14 = vadd.f32 %v3709_v10, %v1719_v44 }
 0x1f9   : > { %4002 = vst.msk [vmem:[%s5710_s16 + $0x10] sm:$0xff] %vm258_vm1, %v3966_v42  ;;  %v3967_v16 = vadd.f32 %v4892_v60, %v5705_v1 }
 0x1fa   : > { %4000 = vst.msk [vmem:[%s5710_s16] sm:$0xff] %vm258_vm1, %v3964_v13  ;;  %v3965_v63 = vadd.f32 %v4893_v14, %v5705_v1 }
 0x1fb   : > { %4003 = vst.msk [vmem:[%s5710_s16 + $0x18] sm:$0xff] %vm258_vm1, %v3967_v16 }
 0x1fc   : > { %4001 = vst.msk [vmem:[%s5710_s16 + $0x8] sm:$0xff] %vm258_vm1, %v3965_v63  ;;  %v4858_v19 = vpop.f32.mrb[4].mxu0 }
 0x1fd   : > { %v4894_v18 = vadd.f32 %v4858_v19, %v4668_v35  ;;  %v3722_v2 = vpop.f32.mrb[5].mxu0 }
 0x1fe   : > { %v4895_v20 = vadd.f32 %v3722_v2, %v1732_v3  ;;  %v4859_v21 = vpop.f32.mrb[6].mxu0 }
 0x1ff   : > { %v3970_v48 = vadd.f32 %v4894_v18, %v5705_v1  ;;  %v4896_v51 = vadd.f32 %v4859_v21, %v4669_v15  ;;  %v3725_v5 = vpop.f32.mrb[7].mxu0 }
 0x200   : > { %v3968_v23 = vadd.f32 %v4895_v20, %v5705_v1  ;;  %v4897_v4 = vadd.f32 %v3725_v5, %v1735_v46 }
 0x201   : > { %4006 = vst.msk [vmem:[%s5710_s16 + $0x30] sm:$0xff] %vm258_vm1, %v3970_v48  ;;  %v3971_v27 = vadd.f32 %v4896_v51, %v5705_v1 }
 0x202   : > { %4004 = vst.msk [vmem:[%s5710_s16 + $0x20] sm:$0xff] %vm258_vm1, %v3968_v23  ;;  %v3969_v54 = vadd.f32 %v4897_v4, %v5705_v1 }
 0x203   : > { %4007 = vst.msk [vmem:[%s5710_s16 + $0x38] sm:$0xff] %vm258_vm1, %v3971_v27 }
 0x204   : > { %4005 = vst.msk [vmem:[%s5710_s16 + $0x28] sm:$0xff] %vm258_vm1, %v3969_v54  ;;  %v4862_v57 = vpop.f32.mrb[8].mxu0 }
 0x205   : > { %v4898_v26 = vadd.f32 %v4862_v57, %v4672_v47  ;;  %v3738_v52 = vpop.f32.mrb[9].mxu0 }
 0x206   : > { %v4899_v36 = vadd.f32 %v3738_v52, %v1748_v30  ;;  %v4863_v29 = vpop.f32.mrb[10].mxu0 }
 0x207   : > { %v3974_v59 = vadd.f32 %v4898_v26, %v5705_v1  ;;  %v4900_v9 = vadd.f32 %v4863_v29, %v4673_v49  ;;  %v3741_v24 = vpop.f32.mrb[11].mxu0 }
 0x208   : > { %v3972_v32 = vadd.f32 %v4899_v36, %v5705_v1  ;;  %v4901_v33 = vadd.f32 %v3741_v24, %v1751_v0 }
 0x209   : > { %4010 = vst.msk [vmem:[%s5710_s16 + $0x50] sm:$0xff] %vm258_vm1, %v3974_v59  ;;  %v3975_v39 = vadd.f32 %v4900_v9, %v5705_v1 }
 0x20a   : > { %4008 = vst.msk [vmem:[%s5710_s16 + $0x40] sm:$0xff] %vm258_vm1, %v3972_v32  ;;  %v3973_v12 = vadd.f32 %v4901_v33, %v5705_v1 }
 0x20b   : > { %4011 = vst.msk [vmem:[%s5710_s16 + $0x58] sm:$0xff] %vm258_vm1, %v3975_v39 }
 0x20c   : > { %4009 = vst.msk [vmem:[%s5710_s16 + $0x48] sm:$0xff] %vm258_vm1, %v3973_v12  ;;  %v4866_v25 = vpop.f32.mrb[12].mxu0 }
 0x20d   : > { %v4902_v34 = vadd.f32 %v4866_v25, %v4676_v31  ;;  %v3754_v37 = vpop.f32.mrb[13].mxu0 }
 0x20e   : > { %v4903_v50 = vadd.f32 %v3754_v37, %v1764_v55  ;;  %v4867_v38 = vpop.f32.mrb[14].mxu0 }
 0x20f   : > { %v3978_v28 = vadd.f32 %v4902_v34, %v5705_v1  ;;  %v4904_v22 = vadd.f32 %v4867_v38, %v5689_v43  ;;  %v3757_v53 = vpop.f32.mrb[15].mxu0 }
 0x210   : > { %v3976_v40 = vadd.f32 %v4903_v50, %v5705_v1  ;;  %v4905_v41 = vadd.f32 %v3757_v53, %v5691_v56 }
 0x211   : > { %4014 = vst.msk [vmem:[%s5710_s16 + $0x70] sm:$0xff] %vm258_vm1, %v3978_v28  ;;  %v3979_v44 = vadd.f32 %v4904_v22, %v5705_v1 }
 0x212   : > { %4012 = vst.msk [vmem:[%s5710_s16 + $0x60] sm:$0xff] %vm258_vm1, %v3976_v40  ;;  %v3977_v35 = vadd.f32 %v4905_v41, %v5705_v1  ;;  %v4722_v3 = vpop.f32.mrb[20].mxu1 }
 0x213   : > { %4015 = vst.msk [vmem:[%s5710_s16 + $0x78] sm:$0xff] %vm258_vm1, %v3979_v44  ;;  %v2194_v46 = vpop.f32.mrb[21].mxu1 }
 0x214   : > { %4013 = vst.msk [vmem:[%s5710_s16 + $0x68] sm:$0xff] %vm258_vm1, %v3977_v35  ;;  %v4870_v15 = vpop.f32.mrb[16].mxu0  ;;  %v4723_v49 = vpop.f32.mrb[22].mxu1 }
 0x215   : > { %v4906_v47 = vadd.f32 %v4870_v15, %v5693_v17  ;;  %v3770_v30 = vpop.f32.mrb[17].mxu0  ;;  %v2197_v55 = vpop.f32.mrb[23].mxu1 }
 0x216   : > { %v4907_v0 = vadd.f32 %v3770_v30, %v5695_v45  ;;  %v4871_v31 = vpop.f32.mrb[18].mxu0 }
 0x217   : > { %v3982_v43 = vadd.f32 %v4906_v47, %v5705_v1  ;;  %v4908_v56 = vadd.f32 %v4871_v31, %v5697_v61  ;;  %v3773_v58 = vpop.f32.mrb[19].mxu0 }
 0x218   : > { %v3980_v6 = vadd.f32 %v4907_v0, %v5705_v1  ;;  %v4909_v7 = vadd.f32 %v3773_v58, %v5699_v62 }
 0x219   : > { %4018 = vst.msk [vmem:[%s5710_s16 + $0x90] sm:$0xff] %vm258_vm1, %v3982_v43  ;;  %v3983_v17 = vadd.f32 %v4908_v56, %v5705_v1 }
 0x21a   : > { %4016 = vst.msk [vmem:[%s5710_s16 + $0x80] sm:$0xff] %vm258_vm1, %v3980_v6  ;;  %v3981_v8 = vadd.f32 %v4909_v7, %v5705_v1  ;;  %v4726_v45 = vpop.f32.mrb[24].mxu1 }
 0x21b   : > { %4019 = vst.msk [vmem:[%s5710_s16 + $0x98] sm:$0xff] %vm258_vm1, %v3983_v17  ;;  %v2210_v11 = vpop.f32.mrb[25].mxu1 }
 0x21c   : > { %4017 = vst.msk [vmem:[%s5710_s16 + $0x88] sm:$0xff] %vm258_vm1, %v3981_v8  ;;  %v4874_v61 = vpop.f32.mrb[20].mxu0  ;;  %v4727_v60 = vpop.f32.mrb[26].mxu1 }
 0x21d   : > { %v4910_v42 = vadd.f32 %v4874_v61, %v4722_v3  ;;  %v3786_v62 = vpop.f32.mrb[21].mxu0  ;;  %v2213_v14 = vpop.f32.mrb[27].mxu1 }
 0x21e   : > { %v4911_v10 = vadd.f32 %v3786_v62, %v2194_v46  ;;  %v4875_v13 = vpop.f32.mrb[22].mxu0 }
 0x21f   : > { %v3986_v16 = vadd.f32 %v4910_v42, %v5705_v1  ;;  %v4912_v63 = vadd.f32 %v4875_v13, %v4723_v49  ;;  %v3789_v19 = vpop.f32.mrb[23].mxu0 }
 0x220   : > { %v3984_v18 = vadd.f32 %v4911_v10, %v5705_v1  ;;  %v4913_v2 = vadd.f32 %v3789_v19, %v2197_v55 }
 0x221   : > { %4022 = vst.msk [vmem:[%s5710_s16 + $0xb0] sm:$0xff] %vm258_vm1, %v3986_v16  ;;  %v3987_v20 = vadd.f32 %v4912_v63, %v5705_v1 }
 0x222   : > { %4020 = vst.msk [vmem:[%s5710_s16 + $0xa0] sm:$0xff] %vm258_vm1, %v3984_v18  ;;  %v3985_v21 = vadd.f32 %v4913_v2, %v5705_v1  ;;  %v4730_v48 = vpop.f32.mrb[28].mxu1 }
 0x223   : > { %4023 = vst.msk [vmem:[%s5710_s16 + $0xb8] sm:$0xff] %vm258_vm1, %v3987_v20  ;;  %v2226_v5 = vpop.f32.mrb[29].mxu1 }
 0x224   : > { %4021 = vst.msk [vmem:[%s5710_s16 + $0xa8] sm:$0xff] %vm258_vm1, %v3985_v21  ;;  %v4878_v51 = vpop.f32.mrb[24].mxu0  ;;  %v4731_v27 = vpop.f32.mrb[30].mxu1 }
 0x225   : > { %v4914_v23 = vadd.f32 %v4878_v51, %v4726_v45  ;;  %v3802_v4 = vpop.f32.mrb[25].mxu0  ;;  %v2229_v26 = vpop.f32.mrb[31].mxu1 }
 0x226   : > { %v4915_v54 = vadd.f32 %v3802_v4, %v2210_v11  ;;  %v4879_v57 = vpop.f32.mrb[26].mxu0 }
 0x227   : > { %v3990_v52 = vadd.f32 %v4914_v23, %v5705_v1  ;;  %v4916_v36 = vadd.f32 %v4879_v57, %v4727_v60  ;;  %v3805_v29 = vpop.f32.mrb[27].mxu0 }
 0x228   : > { %v3988_v59 = vadd.f32 %v4915_v54, %v5705_v1  ;;  %v4917_v9 = vadd.f32 %v3805_v29, %v2213_v14 }
 0x229   : > { %4026 = vst.msk [vmem:[%s5710_s16 + $0xd0] sm:$0xff] %vm258_vm1, %v3990_v52  ;;  %v3991_v24 = vadd.f32 %v4916_v36, %v5705_v1 }
 0x22a   : > { %4024 = vst.msk [vmem:[%s5710_s16 + $0xc0] sm:$0xff] %vm258_vm1, %v3988_v59  ;;  %v3989_v32 = vadd.f32 %v4917_v9, %v5705_v1  ;;  %v4734_v33 = vpop.f32.mrb[32].mxu1 }
 0x22b   : > { %4027 = vst.msk [vmem:[%s5710_s16 + $0xd8] sm:$0xff] %vm258_vm1, %v3991_v24  ;;  %v2242_v12 = vpop.f32.mrb[33].mxu1 }
 0x22c   : > { %4025 = vst.msk [vmem:[%s5710_s16 + $0xc8] sm:$0xff] %vm258_vm1, %v3989_v32  ;;  %v4882_v39 = vpop.f32.mrb[28].mxu0  ;;  %v4735_v37 = vpop.f32.mrb[34].mxu1 }
 0x22d   : > { %v4918_v25 = vadd.f32 %v4882_v39, %v4730_v48  ;;  %v3818_v34 = vpop.f32.mrb[29].mxu0  ;;  %v2245_v28 = vpop.f32.mrb[35].mxu1 }
 0x22e   : > { %v4919_v50 = vadd.f32 %v3818_v34, %v2226_v5  ;;  %v4883_v38 = vpop.f32.mrb[30].mxu0 }
 0x22f   : > { %v3994_v22 = vadd.f32 %v4918_v25, %v5705_v1  ;;  %v4920_v53 = vadd.f32 %v4883_v38, %v4731_v27  ;;  %v3821_v40 = vpop.f32.mrb[31].mxu0 }
 0x230   : > { %v3992_v41 = vadd.f32 %v4919_v50, %v5705_v1  ;;  %v4921_v44 = vadd.f32 %v3821_v40, %v2229_v26 }
 0x231   : > { %4030 = vst.msk [vmem:[%s5710_s16 + $0xf0] sm:$0xff] %vm258_vm1, %v3994_v22  ;;  %v3995_v35 = vadd.f32 %v4920_v53, %v5705_v1 }
 0x232   : > { %4028 = vst.msk [vmem:[%s5710_s16 + $0xe0] sm:$0xff] %vm258_vm1, %v3992_v41  ;;  %v3993_v3 = vadd.f32 %v4921_v44, %v5705_v1 }
 0x233   : > { %4031 = vst.msk [vmem:[%s5710_s16 + $0xf8] sm:$0xff] %vm258_vm1, %v3995_v35 }
 0x234   : > { %4029 = vst.msk [vmem:[%s5710_s16 + $0xe8] sm:$0xff] %vm258_vm1, %v3993_v3  ;;  %v4886_v15 = vpop.f32.mrb[32].mxu0 }
 0x235   : > { %v4922_v46 = vadd.f32 %v4886_v15, %v4734_v33  ;;  %v3834_v47 = vpop.f32.mrb[33].mxu0 }
 0x236   : > { %v4923_v30 = vadd.f32 %v3834_v47, %v2242_v12  ;;  %v4887_v49 = vpop.f32.mrb[34].mxu0 }
 0x237   : > { %v3998_v0 = vadd.f32 %v4922_v46, %v5705_v1  ;;  %v4924_v31 = vadd.f32 %v4887_v49, %v4735_v37  ;;  %v3837_v55 = vpop.f32.mrb[35].mxu0 }
 0x238   : > { %v3996_v43 = vadd.f32 %v4923_v30, %v5705_v1  ;;  %v4925_v56 = vadd.f32 %v3837_v55, %v2245_v28 }
 0x239   : > { %4034 = vst.msk [vmem:[%s5710_s16 + $0x110] sm:$0xff] %vm258_vm1, %v3998_v0  ;;  %v3999_v58 = vadd.f32 %v4924_v31, %v5705_v1 }
 0x23a   : > { %4032 = vst.msk [vmem:[%s5710_s16 + $0x100] sm:$0xff] %vm258_vm1, %v3996_v43  ;;  %v3997_v6 = vadd.f32 %v4925_v56, %v5705_v1 }
 0x23b   : > { %4035 = vst.msk [vmem:[%s5710_s16 + $0x118] sm:$0xff] %vm258_vm1, %v3999_v58 }
 0x23c   : > { %4033 = vst.msk [vmem:[%s5710_s16 + $0x108] sm:$0xff] %vm258_vm1, %v3997_v6 }
 0x23d PF: > { %s13_s12 = sadd.s32 1, %s5204_s12  }
 0x23e   : > { %p10_p4 = scmp.ge.s32.totalorder %s13_s12, 4  }
 0x240   :  { %12 = sbr.rel (!%p10_p4) target bundleno = 1 (0x1), region = 70 }

// kernel: encoder_forward.7
= control target key start
LH: loop header
LB: loop body
LE: loop exit
PB: predicated region body
PF: predicated region fallthrough
CT: control target
= control target key end

     0   :  { %s6033_s18 = smov 0   ;;  %s6740_s0 = inlined_call_operand.vmem [shape: bf16[2,342,8], index: 0, kind: input, shape index: {}]   ;;  %s6741_s1 = inlined_call_operand.vmem [shape: bf16[9,8,128], index: 1, kind: input, shape index: {}]   ;;  %s6742_s2 = inlined_call_operand.vmem [shape: f32[288,1], index: 2, kind: input, shape index: {}]   ;;  %s6743_s3 = inlined_call_operand.vmem [shape: bf16[2,288,128], index: 3, kind: output, shape index: {0}]   ;;  %s6744_s4 = inlined_call_operand.vmem [shape: f32[16,128], index: 4, kind: output, shape index: {1}]   ;;  %s6745_s5 = inlined_call_operand.vmem [shape: f32[16,128], index: 5, kind: output, shape index: {2}]  }
   0x1 LB: > { %s4704_s19 = sadd.s32 4294967295, %s6000_s18   ;;  %p4708_p0 = scmp.ge.s32.totalorder %s6000_s18, 1  ;;  %s6000_s18 = sphi %s6033_s18, %s16_s18  }
   0x2   : > { %p192_p1 = scmp.lt.s32.totalorder %s6000_s18, 3 }
   0x4   : > { %p193_p2 = pnand %p4708_p0, %p192_p1 }
   0x5   : > { %vm559_vm0 = vcmask (!%p193_p2), 1043456   ;;  %v6044_v0 = vld [vmem:[%s6741_s1 + $0x10] sm:$0xf] (!%p193_p2)  ;;  %v504_v1 = vld [vmem:[%s6741_s1] sm:$0xf] (!%p193_p2)  ;;  %p228_p3 = scmp.lt.s32.totalorder (!%p193_p2), %s4704_s19, 1 }
   0x6   : > { %196 = sbr.rel (%p193_p2) target bundleno = 595 (0x253), region = 32  ;;  %5975 = vmatprep.subr.msk.bf16.mxu0 (!%p193_p2), %vm559_vm0, %v6044_v0  ;;  %5971 = vmatprep.subr.msk.bf16.mxu1 (!%p193_p2), %vm559_vm0, %v504_v1  ;;  %v6054_v2 = vsel (!%p193_p2), %vm559_vm0, %v6044_v0, 0  ;;  %v561_v3 = vsel (!%p193_p2), %vm559_vm0, %v504_v1, 0  ;;  %v6060_v4 = vld [vmem:[%s6741_s1 + $0x14] sm:$0xf] (!%p193_p2)  ;;  %vm333_vm1 = vcmask (!%p193_p2), 64512  }
   0x7   : > { %5492 = vmatpush3.bf16.msra.mxu0 (!%p193_p2), %v6054_v2  ;;  %5340 = vmatpush3.bf16.msra.mxu1 (!%p193_p2), %v561_v3  ;;  %v6068_v5 = vld [vmem:[%s6741_s1 + $0x4] sm:$0xf] (!%p193_p2)  ;;  %vm4582_vm2 = vcmask (!%p193_p2), 1040384  }
   0x8   : > { %5977 = vmatprep.subr.msk.bf16.mxu0 (!%p193_p2), %vm559_vm0, %v6060_v4  ;;  %5972 = vmatprep.subr.msk.bf16.mxu1 (!%p193_p2), %vm559_vm0, %v6068_v5 }
   0xd   : > { %s6747_s19 = smov (!%p228_p3, %s4704_s19), 1 }
   0xe   : > { %s5981_s28 = smul.u32 172, %s6747_s19  ;;  %s4711_s26 = sshll.u32 %s6747_s19, 3 }
   0xf   : > { %s5982_s22 = smul.u32 144, %s6747_s19  ;;  %s241_s29 = scalar_lea.vmem %s6744_s4, %s4711_s26 }
  0x10   : > { %s6078_s6 = scalar_lea.vmem %s6740_s0, %s5981_s28  ;;  %s245_s7 = scalar_lea.vmem %s6745_s5, %s4711_s26 }
  0x11   : > { %v4958_v6 = vld [vmem:[%s6078_s6] sm:$0xff]   ;;  %v5131_v7 = vld [vmem:[%s6078_s6 + $0x8] sm:$0xff]   ;;  %v5132_v11 = vld [vmem:[%s6078_s6 + $0x10] sm:$0xff]   ;;  %s6652_s25 = scalar_lea.vmem %s6743_s3, %s5982_s22 }
  0x12   : > { %v4959_v8 = vunpack.c.l.bf16 %v4958_v6  ;;  %v4960_v9 = vunpack.c.h.bf16 %v4958_v6  ;;  %v4963_v10 = vunpack.c.l.bf16 %v5131_v7  ;;  %v5133_v12 = vld [vmem:[%s6078_s6 + $0x18] sm:$0xff]   ;;  %v5134_v13 = vld [vmem:[%s6078_s6 + $0x20] sm:$0xff]   ;;  %v4964_v14 = vunpack.c.h.bf16 %v5131_v7  ;;  %v5135_v18 = vld [vmem:[%s6078_s6 + $0x28] sm:$0xff]  }
  0x13   : > { %v4967_v15 = vunpack.c.l.bf16 %v5132_v11  ;;  %v4968_v16 = vunpack.c.h.bf16 %v5132_v11  ;;  %v4971_v17 = vunpack.c.l.bf16 %v5133_v12  ;;  %v5136_v19 = vld [vmem:[%s6078_s6 + $0x30] sm:$0xff]   ;;  %v5137_v20 = vld [vmem:[%s6078_s6 + $0x38] sm:$0xff]   ;;  %v4972_v21 = vunpack.c.h.bf16 %v5133_v12  ;;  %v5138_v25 = vld [vmem:[%s6078_s6 + $0x40] sm:$0xff]  }
  0x14   : > { %334 = vst.msk [vmem:[#allocation2] sm:$0xff] %vm333_vm1, %v4959_v8  ;;  %335 = vst.msk [vmem:[#allocation2 + $0x8] sm:$0xff] %vm333_vm1, %v4960_v9  ;;  %v4975_v22 = vunpack.c.l.bf16 %v5134_v13  ;;  %v4976_v23 = vunpack.c.h.bf16 %v5134_v13  ;;  %v4979_v24 = vunpack.c.l.bf16 %v5135_v18  ;;  %v5139_v26 = vld [vmem:[%s6078_s6 + $0x48] sm:$0xff]   ;;  %v5140_v27 = vld [vmem:[%s6078_s6 + $0x50] sm:$0xff]   ;;  %v4980_v28 = vunpack.c.h.bf16 %v5135_v18 }
  0x15   : > { %336 = vst.msk [vmem:[#allocation2 + $0x10] sm:$0xff] %vm333_vm1, %v4963_v10  ;;  %337 = vst.msk [vmem:[#allocation2 + $0x18] sm:$0xff] %vm333_vm1, %v4964_v14  ;;  %v4983_v29 = vunpack.c.l.bf16 %v5136_v19  ;;  %v4984_v30 = vunpack.c.h.bf16 %v5136_v19  ;;  %v4987_v31 = vunpack.c.l.bf16 %v5137_v20  ;;  %v5141_v32 = vld [vmem:[%s6078_s6 + $0x58] sm:$0xff]   ;;  %v5142_v33 = vld [vmem:[%s6078_s6 + $0x60] sm:$0xff]   ;;  %v4988_v35 = vunpack.c.h.bf16 %v5137_v20 }
  0x16   : > { %338 = vst.msk [vmem:[#allocation2 + $0x20] sm:$0xff] %vm333_vm1, %v4967_v15  ;;  %339 = vst.msk [vmem:[#allocation2 + $0x28] sm:$0xff] %vm333_vm1, %v4968_v16  ;;  %v5143_v34 = vld [vmem:[%s6078_s6 + $0x68] sm:$0xff]   ;;  %v4991_v36 = vunpack.c.l.bf16 %v5138_v25  ;;  %v4992_v37 = vunpack.c.h.bf16 %v5138_v25  ;;  %v4995_v38 = vunpack.c.l.bf16 %v5139_v26  ;;  %v5144_v39 = vld [vmem:[%s6078_s6 + $0x70] sm:$0xff]   ;;  %v4996_v41 = vunpack.c.h.bf16 %v5139_v26 }
  0x17   : > { %340 = vst.msk [vmem:[#allocation2 + $0x30] sm:$0xff] %vm333_vm1, %v4971_v17  ;;  %341 = vst.msk [vmem:[#allocation2 + $0x38] sm:$0xff] %vm333_vm1, %v4972_v21  ;;  %v5145_v40 = vld [vmem:[%s6078_s6 + $0x78] sm:$0xff]   ;;  %v4999_v42 = vunpack.c.l.bf16 %v5140_v27  ;;  %v5000_v43 = vunpack.c.h.bf16 %v5140_v27  ;;  %v5003_v44 = vunpack.c.l.bf16 %v5141_v32  ;;  %v5146_v45 = vld [vmem:[%s6078_s6 + $0x80] sm:$0xff]   ;;  %v5004_v47 = vunpack.c.h.bf16 %v5141_v32 }
  0x18   : > { %342 = vst.msk [vmem:[#allocation2 + $0x40] sm:$0xff] %vm333_vm1, %v4975_v22  ;;  %343 = vst.msk [vmem:[#allocation2 + $0x48] sm:$0xff] %vm333_vm1, %v4976_v23  ;;  %v5147_v46 = vld [vmem:[%s6078_s6 + $0x88] sm:$0xff]   ;;  %v5007_v48 = vunpack.c.l.bf16 %v5142_v33  ;;  %v5008_v49 = vunpack.c.h.bf16 %v5142_v33  ;;  %v5011_v50 = vunpack.c.l.bf16 %v5143_v34  ;;  %v5148_v51 = vld [vmem:[%s6078_s6 + $0x90] sm:$0xff]   ;;  %v5012_v53 = vunpack.c.h.bf16 %v5143_v34 }
  0x19   : > { %344 = vst.msk [vmem:[#allocation2 + $0x50] sm:$0xff] %vm333_vm1, %v4979_v24  ;;  %345 = vst.msk [vmem:[#allocation2 + $0x58] sm:$0xff] %vm333_vm1, %v4980_v28  ;;  %v6119_v52 = vld [vmem:[%s6078_s6 + $0x98] sm:$0xff]   ;;  %v5015_v54 = vunpack.c.l.bf16 %v5144_v39  ;;  %v5016_v55 = vunpack.c.h.bf16 %v5144_v39  ;;  %v5019_v56 = vunpack.c.l.bf16 %v5145_v40  ;;  %v5020_v57 = vunpack.c.h.bf16 %v5145_v40  ;;  %v6157_v25 = vld [vmem:[%s6741_s1 + $0x8] sm:$0xf] }
  0x1a   : > { %346 = vst.msk [vmem:[#allocation2 + $0x60] sm:$0xff] %vm333_vm1, %v4983_v29  ;;  %347 = vst.msk [vmem:[#allocation2 + $0x68] sm:$0xff] %vm333_vm1, %v4984_v30  ;;  %v5023_v58 = vunpack.c.l.bf16 %v5146_v45  ;;  %v5024_v59 = vunpack.c.h.bf16 %v5146_v45  ;;  %v5027_v60 = vunpack.c.l.bf16 %v5147_v46  ;;  %v5028_v1 = vunpack.c.h.bf16 %v5147_v46  ;;  %v6152_v24 = vld [vmem:[%s6741_s1 + $0x18] sm:$0xf] }
  0x1b   : > { %348 = vst.msk [vmem:[#allocation2 + $0x70] sm:$0xff] %vm333_vm1, %v4987_v31  ;;  %349 = vst.msk [vmem:[#allocation2 + $0x78] sm:$0xff] %vm333_vm1, %v4988_v35  ;;  %v414_v61 = vld [vmem:[#allocation2] sm:$0xff]  ;;  %v415_v62 = vld [vmem:[#allocation2 + $0x8] sm:$0xff]  ;;  %v5031_v3 = vunpack.c.l.bf16 %v5148_v51  ;;  %v5032_v6 = vunpack.c.h.bf16 %v5148_v51  ;;  %v5035_v7 = vunpack.c.l.bf16 %v6119_v52  ;;  %v959_v17 = vsel %vm559_vm0, %v6068_v5, 0 }
  0x1c   : > { %350 = vst.msk [vmem:[#allocation2 + $0x80] sm:$0xff] %vm333_vm1, %v4991_v36  ;;  %351 = vst.msk [vmem:[#allocation2 + $0x88] sm:$0xff] %vm333_vm1, %v4992_v37  ;;  %v416_v63 = vld [vmem:[#allocation2 + $0x10] sm:$0xff]  ;;  %v450_v8 = vpack.c.bf16 %v415_v62, %v414_v61  ;;  %v417_v11 = vld [vmem:[#allocation2 + $0x18] sm:$0xff]  ;;  %v2551_v19 = vsel %vm559_vm0, %v6060_v4, 0 }
  0x1d   : > { %352 = vst.msk [vmem:[#allocation2 + $0x90] sm:$0xff] %vm333_vm1, %v4995_v38  ;;  %353 = vst.msk [vmem:[#allocation2 + $0x98] sm:$0xff] %vm333_vm1, %v4996_v41  ;;  %v2006_v9 = vld [vmem:[#allocation2 + $0x13] sm:$0xff]  ;;  %v2007_v10 = vld [vmem:[#allocation2 + $0x1b] sm:$0xff]  ;;  %v451_v13 = vpack.c.bf16 %v417_v11, %v416_v63 }
  0x1e   : > { %354 = vst.msk [vmem:[#allocation2 + $0xa0] sm:$0xff] %vm333_vm1, %v4999_v42  ;;  %355 = vst.msk [vmem:[#allocation2 + $0xa8] sm:$0xff] %vm333_vm1, %v5000_v43  ;;  %v2042_v12 = vpack.c.bf16 %v2007_v10, %v2006_v9  ;;  %v2008_v14 = vld [vmem:[#allocation2 + $0x23] sm:$0xff]  ;;  %v2009_v15 = vld [vmem:[#allocation2 + $0x2b] sm:$0xff]  ;;  %5341 = vmatprep.mubr.msk.bf16.mxu1 %vm333_vm1, %v450_v8 }
  0x1f   : > { %356 = vst.msk [vmem:[#allocation2 + $0xb0] sm:$0xff] %vm333_vm1, %v5003_v44  ;;  %357 = vst.msk [vmem:[#allocation2 + $0xb8] sm:$0xff] %vm333_vm1, %v5004_v47  ;;  %v418_v16 = vld [vmem:[#allocation2 + $0x20] sm:$0xff]  ;;  %v2043_v18 = vpack.c.bf16 %v2009_v15, %v2008_v14  ;;  %v419_v20 = vld [vmem:[#allocation2 + $0x28] sm:$0xff]  ;;  %5342 = vmatmul.mubr.msk.bf16.vlgmr.msra.gmra.mrb[0].mxu1 %vm333_vm1, %v451_v13 }
  0x20   : > { %358 = vst.msk [vmem:[#allocation2 + $0xc0] sm:$0xff] %vm333_vm1, %v5007_v48  ;;  %359 = vst.msk [vmem:[#allocation2 + $0xc8] sm:$0xff] %vm333_vm1, %v5008_v49  ;;  %v2010_v21 = vld [vmem:[#allocation2 + $0x33] sm:$0xff]  ;;  %v2011_v22 = vld [vmem:[#allocation2 + $0x3b] sm:$0xff]  ;;  %5493 = vmatprep.mubr.msk.bf16.mxu0 %vm333_vm1, %v2042_v12  ;;  %v452_v5 = vpack.c.bf16 %v419_v20, %v418_v16  ;;  %5378 = vmatpush3.bf16.msra.mxu1 %v959_v17 }
  0x21   : > { %360 = vst.msk [vmem:[#allocation2 + $0xd0] sm:$0xff] %vm333_vm1, %v5011_v50  ;;  %361 = vst.msk [vmem:[#allocation2 + $0xd8] sm:$0xff] %vm333_vm1, %v5012_v53  ;;  %v2044_v23 = vpack.c.bf16 %v2011_v22, %v2010_v21  ;;  %5494 = vmatmul.mubr.msk.bf16.vlgmr.msra.gmra.mrb[0].mxu0 %vm333_vm1, %v2043_v18  ;;  %v420_v4 = vld [vmem:[#allocation2 + $0x30] sm:$0xff]  ;;  %v421_v26 = vld [vmem:[#allocation2 + $0x38] sm:$0xff]  ;;  %5973 = vmatprep.subr.msk.bf16.mxu1 %vm559_vm0, %v6157_v25 }
  0x22   : > { %362 = vst.msk [vmem:[#allocation2 + $0xe0] sm:$0xff] %vm333_vm1, %v5015_v54  ;;  %363 = vst.msk [vmem:[#allocation2 + $0xe8] sm:$0xff] %vm333_vm1, %v5016_v55  ;;  %v2012_v27 = vld [vmem:[#allocation2 + $0x43] sm:$0xff]  ;;  %5530 = vmatpush3.bf16.msra.mxu0 %v2551_v19  ;;  %5345 = vmatprep.mubr.msk.bf16.mxu1 %vm333_vm1, %v452_v5  ;;  %v2013_v28 = vld [vmem:[#allocation2 + $0x4b] sm:$0xff]  ;;  %v453_v33 = vpack.c.bf16 %v421_v26, %v420_v4  ;;  %v5036_v4 = vunpack.c.h.bf16 %v6119_v52 }
  0x23   : > { %364 = vst.msk [vmem:[#allocation2 + $0xf0] sm:$0xff] %vm333_vm1, %v5019_v56  ;;  %365 = vst.msk [vmem:[#allocation2 + $0xf8] sm:$0xff] %vm333_vm1, %v5020_v57  ;;  %v422_v29 = vld [vmem:[#allocation2 + $0x40] sm:$0xff]  ;;  %v423_v30 = vld [vmem:[#allocation2 + $0x48] sm:$0xff]  ;;  %5497 = vmatprep.mubr.msk.bf16.mxu0 %vm333_vm1, %v2044_v23  ;;  %5978 = vmatprep.subr.msk.bf16.mxu0 %vm559_vm0, %v6152_v24  ;;  %v2045_v34 = vpack.c.bf16 %v2013_v28, %v2012_v27  ;;  %v2949_v27 = vsel %vm559_vm0, %v6152_v24, 0 }
  0x24   : > { %366 = vst.msk [vmem:[#allocation2 + $0x100] sm:$0xff] %vm333_vm1, %v5023_v58  ;;  %367 = vst.msk [vmem:[#allocation2 + $0x108] sm:$0xff] %vm333_vm1, %v5024_v59  ;;  %v2014_v31 = vld [vmem:[#allocation2 + $0x53] sm:$0xff]  ;;  %v2015_v32 = vld [vmem:[#allocation2 + $0x5b] sm:$0xff]  ;;  %v454_v35 = vpack.c.bf16 %v423_v30, %v422_v29 }
  0x25   : > { %368 = vst.msk [vmem:[#allocation2 + $0x110] sm:$0xff] %vm333_vm1, %v5027_v60  ;;  %369 = vst.msk [vmem:[#allocation2 + $0x118] sm:$0xff] %vm333_vm1, %v5028_v1  ;;  %v2046_v36 = vpack.c.bf16 %v2015_v32, %v2014_v31  ;;  %v424_v37 = vld [vmem:[#allocation2 + $0x50] sm:$0xff]  ;;  %v425_v38 = vld [vmem:[#allocation2 + $0x58] sm:$0xff] }
  0x26   : > { %370 = vst.msk [vmem:[#allocation2 + $0x120] sm:$0xff] %vm333_vm1, %v5031_v3  ;;  %371 = vst.msk [vmem:[#allocation2 + $0x128] sm:$0xff] %vm333_vm1, %v5032_v6  ;;  %v2016_v39 = vld [vmem:[#allocation2 + $0x63] sm:$0xff]  ;;  %v2017_v40 = vld [vmem:[#allocation2 + $0x6b] sm:$0xff]  ;;  %v455_v45 = vpack.c.bf16 %v425_v38, %v424_v37 }
  0x27   : > { %372 = vst.msk [vmem:[#allocation2 + $0x130] sm:$0xff] %vm333_vm1, %v5035_v7  ;;  %5346 = vmatmul.mubr.msk.bf16.gmra.mrb[4].mxu1 %vm333_vm1, %v453_v33  ;;  %v426_v41 = vld [vmem:[#allocation2 + $0x60] sm:$0xff]  ;;  %v427_v42 = vld [vmem:[#allocation2 + $0x68] sm:$0xff]  ;;  %v2018_v43 = vld [vmem:[#allocation2 + $0x73] sm:$0xff]  ;;  %v2047_v46 = vpack.c.bf16 %v2017_v40, %v2016_v39 }
  0x28   : > { %5349 = vmatprep.mubr.msk.bf16.mxu1 %vm333_vm1, %v454_v35  ;;  %v2019_v44 = vld [vmem:[#allocation2 + $0x7b] sm:$0xff]  ;;  %v456_v47 = vpack.c.bf16 %v427_v42, %v426_v41  ;;  %v428_v49 = vld [vmem:[#allocation2 + $0x70] sm:$0xff]  ;;  %v2020_v51 = vld [vmem:[#allocation2 + $0x83] sm:$0xff]  ;;  %373 = vst.msk [vmem:[#allocation2 + $0x138] sm:$0xff] %vm333_vm1, %v5036_v4 }
  0x29   : > { %5498 = vmatmul.mubr.msk.bf16.gmra.mrb[4].mxu0 %vm333_vm1, %v2045_v34  ;;  %v2048_v48 = vpack.c.bf16 %v2019_v44, %v2018_v43  ;;  %v429_v50 = vld [vmem:[#allocation2 + $0x78] sm:$0xff]  ;;  %v2021_v53 = vld [vmem:[#allocation2 + $0x8b] sm:$0xff]  ;;  %v430_v54 = vld [vmem:[#allocation2 + $0x80] sm:$0xff] }
  0x2a   : > { %5501 = vmatprep.mubr.msk.bf16.mxu0 %vm333_vm1, %v2046_v36  ;;  %v431_v55 = vld [vmem:[#allocation2 + $0x88] sm:$0xff]  ;;  %v2022_v56 = vld [vmem:[#allocation2 + $0x93] sm:$0xff]  ;;  %v2023_v57 = vld [vmem:[#allocation2 + $0x9b] sm:$0xff]  ;;  %v457_v58 = vpack.c.bf16 %v429_v50, %v428_v49  ;;  %v2049_v59 = vpack.c.bf16 %v2021_v53, %v2020_v51 }
  0x2b   : > { %v458_v60 = vpack.c.bf16 %v431_v55, %v430_v54  ;;  %v2050_v61 = vpack.c.bf16 %v2023_v57, %v2022_v56  ;;  %v432_v62 = vld [vmem:[#allocation2 + $0x90] sm:$0xff]  ;;  %v433_v63 = vld [vmem:[#allocation2 + $0x98] sm:$0xff]  ;;  %v2024_v1 = vld [vmem:[#allocation2 + $0xa3] sm:$0xff] }
  0x2c   : > { %v2025_v3 = vld [vmem:[#allocation2 + $0xab] sm:$0xff]  ;;  %v434_v6 = vld [vmem:[#allocation2 + $0xa0] sm:$0xff]  ;;  %v2404_v8 = vld [vmem:[#allocation2 + $0x14] sm:$0xff]  ;;  %v459_v10 = vpack.c.bf16 %v433_v63, %v432_v62 }
  0x2d   : > { %v435_v7 = vld [vmem:[#allocation2 + $0xa8] sm:$0xff]  ;;  %v2405_v9 = vld [vmem:[#allocation2 + $0x1c] sm:$0xff]  ;;  %v2051_v11 = vpack.c.bf16 %v2025_v3, %v2024_v1  ;;  %v436_v14 = vld [vmem:[#allocation2 + $0xb0] sm:$0xff] }
  0x2e   : > { %v460_v12 = vpack.c.bf16 %v435_v7, %v434_v6  ;;  %v2440_v13 = vpack.c.bf16 %v2405_v9, %v2404_v8  ;;  %v437_v15 = vld [vmem:[#allocation2 + $0xb8] sm:$0xff]  ;;  %v2406_v16 = vld [vmem:[#allocation2 + $0x24] sm:$0xff]  ;;  %v2407_v17 = vld [vmem:[#allocation2 + $0x2c] sm:$0xff] }
  0x2f   : > { %5350 = vmatmul.mubr.msk.bf16.gmra.mrb[8].mxu1 %vm333_vm1, %v455_v45  ;;  %v438_v18 = vld [vmem:[#allocation2 + $0xc0] sm:$0xff]  ;;  %v439_v19 = vld [vmem:[#allocation2 + $0xc8] sm:$0xff]  ;;  %v2408_v20 = vld [vmem:[#allocation2 + $0x34] sm:$0xff]  ;;  %v461_v22 = vpack.c.bf16 %v437_v15, %v436_v14  ;;  %v6182_v5 = vpack.c.bf16 %v2407_v17, %v2406_v16 }
  0x30   : > { %5353 = vmatprep.mubr.msk.bf16.mxu1 %vm333_vm1, %v456_v47  ;;  %v2409_v21 = vld [vmem:[#allocation2 + $0x3c] sm:$0xff]  ;;  %v462_v23 = vpack.c.bf16 %v439_v19, %v438_v18  ;;  %v440_v52 = vld [vmem:[#allocation2 + $0xd0] sm:$0xff]  ;;  %v2410_v30 = vld [vmem:[#allocation2 + $0x44] sm:$0xff]  ;;  %v1357_v18 = vsel %vm559_vm0, %v6157_v25, 0 }
  0x31   : > { %5502 = vmatmul.mubr.msk.bf16.gmra.mrb[8].mxu0 %vm333_vm1, %v2047_v46  ;;  %v6185_v26 = vpack.c.bf16 %v2409_v21, %v2408_v20  ;;  %v6194_v28 = vld [vmem:[%s6741_s1 + $0x1c] sm:$0xf]  ;;  %v2411_v24 = vld [vmem:[#allocation2 + $0x4c] sm:$0xff]  ;;  %v442_v31 = vld [vmem:[#allocation2 + $0xe0] sm:$0xff] }
  0x32   : > { %5505 = vmatprep.mubr.msk.bf16.mxu0 %vm333_vm1, %v2048_v48  ;;  %v441_v29 = vld [vmem:[#allocation2 + $0xd8] sm:$0xff]  ;;  %v443_v32 = vld [vmem:[#allocation2 + $0xe8] sm:$0xff]  ;;  %v6203_v36 = vpack.c.bf16 %v2411_v24, %v2410_v30  ;;  %v5150_v38 = vld [vmem:[%s6078_s6 + $0xa0] sm:$0xff]  }
  0x33   : > { %v2412_v33 = vld [vmem:[#allocation2 + $0x54] sm:$0xff]  ;;  %v2413_v34 = vld [vmem:[#allocation2 + $0x5c] sm:$0xff]  ;;  %v463_v35 = vpack.c.bf16 %v441_v29, %v440_v52  ;;  %v464_v37 = vpack.c.bf16 %v443_v32, %v442_v31  ;;  %v5039_v40 = vunpack.c.l.bf16 %v5150_v38  ;;  %v2414_v43 = vld [vmem:[#allocation2 + $0x64] sm:$0xff] }
  0x34   : > { %v6206_v39 = vpack.c.bf16 %v2413_v34, %v2412_v33  ;;  %v444_v41 = vld [vmem:[#allocation2 + $0xf0] sm:$0xff]  ;;  %v445_v42 = vld [vmem:[#allocation2 + $0xf8] sm:$0xff]  ;;  %v446_v45 = vld [vmem:[#allocation2 + $0x100] sm:$0xff] }
  0x35   : > { %374 = vst.msk [vmem:[#allocation2 + $0x140] sm:$0xff] %vm333_vm1, %v5039_v40  ;;  %v2415_v44 = vld [vmem:[#allocation2 + $0x6c] sm:$0xff]  ;;  %v2416_v47 = vld [vmem:[#allocation2 + $0x74] sm:$0xff]  ;;  %v2417_v48 = vld [vmem:[#allocation2 + $0x7c] sm:$0xff]  ;;  %v465_v49 = vpack.c.bf16 %v445_v42, %v444_v41 }
  0x36   : > { %v447_v46 = vld [vmem:[#allocation2 + $0x108] sm:$0xff]  ;;  %v6215_v50 = vpack.c.bf16 %v2415_v44, %v2414_v43  ;;  %v6217_v53 = vpack.c.bf16 %v2417_v48, %v2416_v47  ;;  %v448_v54 = vld [vmem:[#allocation2 + $0x110] sm:$0xff]  ;;  %v449_v55 = vld [vmem:[#allocation2 + $0x118] sm:$0xff] }
  0x37   : > { %5354 = vmatmul.mubr.msk.bf16.gmra.mrb[12].mxu1 %vm333_vm1, %v457_v58  ;;  %v466_v51 = vpack.c.bf16 %v447_v46, %v446_v45  ;;  %v2418_v56 = vld [vmem:[#allocation2 + $0x84] sm:$0xff]  ;;  %v2419_v57 = vld [vmem:[#allocation2 + $0x8c] sm:$0xff]  ;;  %v467_v62 = vpack.c.bf16 %v449_v55, %v448_v54  ;;  %v815_v7 = vld [vmem:[#allocation2 + $0x19] sm:$0xff] }
  0x38   : > { %5357 = vmatprep.mubr.msk.bf16.mxu1 %vm333_vm1, %v458_v60  ;;  %v812_v58 = vld [vmem:[#allocation2 + $0x1] sm:$0xff]  ;;  %v2420_v60 = vld [vmem:[#allocation2 + $0x94] sm:$0xff]  ;;  %v6225_v63 = vpack.c.bf16 %v2419_v57, %v2418_v56  ;;  %v2423_v9 = vld [vmem:[#allocation2 + $0xac] sm:$0xff] }
  0x39   : > { %5506 = vmatmul.mubr.msk.bf16.gmra.mrb[12].mxu0 %vm333_vm1, %v2049_v59  ;;  %v813_v59 = vld [vmem:[#allocation2 + $0x9] sm:$0xff]  ;;  %v814_v6 = vld [vmem:[#allocation2 + $0x11] sm:$0xff]  ;;  %v819_v21 = vld [vmem:[#allocation2 + $0x39] sm:$0xff] }
  0x3a   : > { %5509 = vmatprep.mubr.msk.bf16.mxu0 %vm333_vm1, %v2050_v61  ;;  %v2421_v61 = vld [vmem:[#allocation2 + $0x9c] sm:$0xff]  ;;  %v848_v1 = vpack.c.bf16 %v813_v59, %v812_v58  ;;  %v2422_v8 = vld [vmem:[#allocation2 + $0xa4] sm:$0xff]  ;;  %v849_v14 = vpack.c.bf16 %v815_v7, %v814_v6  ;;  %v6245_v19 = vld [vmem:[%s6741_s1 + $0xc] sm:$0xf] }
  0x3b   : > { %v6227_v3 = vpack.c.bf16 %v2421_v61, %v2420_v60  ;;  %v6235_v15 = vpack.c.bf16 %v2423_v9, %v2422_v8  ;;  %v818_v20 = vld [vmem:[#allocation2 + $0x31] sm:$0xff]  ;;  %v821_v4 = vld [vmem:[#allocation2 + $0x49] sm:$0xff]  ;;  %v2429_v52 = vld [vmem:[#allocation2 + $0xdc] sm:$0xff] }
  0x3c   : > { %v2427_v25 = vld [vmem:[#allocation2 + $0xcc] sm:$0xff]  ;;  %v851_v29 = vpack.c.bf16 %v819_v21, %v818_v20  ;;  %v823_v33 = vld [vmem:[#allocation2 + $0x59] sm:$0xff]  ;;  %v2430_v34 = vld [vmem:[#allocation2 + $0xe4] sm:$0xff]  ;;  %v3347_v21 = vsel %vm559_vm0, %v6194_v28, 0 }
  0x3d   : > { %v822_v32 = vld [vmem:[#allocation2 + $0x51] sm:$0xff]  ;;  %v825_v38 = vld [vmem:[#allocation2 + $0x69] sm:$0xff]  ;;  %v2433_v41 = vld [vmem:[#allocation2 + $0xfc] sm:$0xff] }
  0x3e   : > { %v2432_v40 = vld [vmem:[#allocation2 + $0xf4] sm:$0xff]  ;;  %v853_v42 = vpack.c.bf16 %v823_v33, %v822_v32  ;;  %v2434_v48 = vld [vmem:[#allocation2 + $0x104] sm:$0xff]  ;;  %v2437_v56 = vld [vmem:[#allocation2 + $0x11c] sm:$0xff] }
  0x3f   : > { %5358 = vmatmul.mubr.msk.bf16.gmra.mrb[16].mxu1 %vm333_vm1, %v459_v10  ;;  %v816_v10 = vld [vmem:[#allocation2 + $0x21] sm:$0xff]  ;;  %v6266_v45 = vpack.c.bf16 %v2433_v41, %v2432_v40  ;;  %v826_v46 = vld [vmem:[#allocation2 + $0x71] sm:$0xff]  ;;  %v827_v47 = vld [vmem:[#allocation2 + $0x79] sm:$0xff] }
  0x40   : > { %5361 = vmatprep.mubr.msk.bf16.mxu1 %vm333_vm1, %v460_v12  ;;  %v2424_v12 = vld [vmem:[#allocation2 + $0xb4] sm:$0xff]  ;;  %v829_v54 = vld [vmem:[#allocation2 + $0x89] sm:$0xff]  ;;  %v855_v57 = vpack.c.bf16 %v827_v47, %v826_v46  ;;  %v832_v7 = vld [vmem:[#allocation2 + $0xa1] sm:$0xff]  ;;  %v1755_v46 = vsel %vm559_vm0, %v6245_v19, 0 }
  0x41   : > { %5510 = vmatmul.mubr.msk.bf16.gmra.mrb[16].mxu0 %vm333_vm1, %v2051_v11  ;;  %v817_v11 = vld [vmem:[#allocation2 + $0x29] sm:$0xff]  ;;  %v2436_v55 = vld [vmem:[#allocation2 + $0x114] sm:$0xff]  ;;  %v4212_v47 = vld [vmem:[%s6742_s2] sm:$0xff] }
  0x42   : > { %5531 = vmatprep.mubr.msk.bf16.mxu0 %vm333_vm1, %v2440_v13  ;;  %v2425_v13 = vld [vmem:[#allocation2 + $0xbc] sm:$0xff]  ;;  %v850_v16 = vpack.c.bf16 %v817_v11, %v816_v10  ;;  %v6276_v60 = vpack.c.bf16 %v2437_v56, %v2436_v55  ;;  %v830_v61 = vld [vmem:[#allocation2 + $0x91] sm:$0xff]  ;;  %v833_v8 = vld [vmem:[#allocation2 + $0xa9] sm:$0xff] }
  0x43   : > { %v6237_v17 = vpack.c.bf16 %v2425_v13, %v2424_v12  ;;  %v2439_v6 = vld [vmem:[#allocation2 + $0x12c] sm:$0xff]  ;;  %v858_v11 = vpack.c.bf16 %v833_v8, %v832_v7  ;;  %v835_v13 = vld [vmem:[#allocation2 + $0xb9] sm:$0xff]  ;;  %v1214_v40 = vld [vmem:[#allocation2 + $0x22] sm:$0xff] }
  0x44   : > { %v834_v12 = vld [vmem:[#allocation2 + $0xb1] sm:$0xff]  ;;  %v4216_v56 = vld [vmem:[%s6742_s2 + $0x20] sm:$0xff] }
  0x45   : > { %v846_v33 = vld [vmem:[#allocation2 + $0x111] sm:$0xff]  ;;  %v4220_v8 = vld [vmem:[%s6742_s2 + $0x40] sm:$0xff] }
  0x46   : > { %v1215_v41 = vld [vmem:[#allocation2 + $0x2a] sm:$0xff]  ;;  %v4215_v55 = vld [vmem:[%s6742_s2 + $0x18] sm:$0xff] }
  0x47   : > { %5362 = vmatmul.mubr.msk.bf16.gmra.mrb[20].mxu1 %vm333_vm1, %v461_v22  ;;  %v2426_v22 = vld [vmem:[#allocation2 + $0xc4] sm:$0xff]  ;;  %v4219_v7 = vld [vmem:[%s6742_s2 + $0x38] sm:$0xff] }
  0x48   : > { %5365 = vmatprep.mubr.msk.bf16.mxu1 %vm333_vm1, %v462_v23  ;;  %v820_v23 = vld [vmem:[#allocation2 + $0x41] sm:$0xff]  ;;  %v6254_v30 = vpack.c.bf16 %v2427_v25, %v2426_v22  ;;  %v839_v25 = vld [vmem:[#allocation2 + $0xd9] sm:$0xff] }
  0x49   : > { %5532 = vmatmul.mubr.msk.bf16.vlgmr.msra.gmra.mrb[0].mxu0 %vm333_vm1, %v6182_v5  ;;  %v852_v24 = vpack.c.bf16 %v821_v4, %v820_v23  ;;  %v6298_v22 = vld [vmem:[%s6741_s1 + $0x20] sm:$0xf] }
  0x4a   : > { %5568 = vmatpush3.bf16.msra.mxu0 %v2949_v27  ;;  %5535 = vmatprep.mubr.msk.bf16.mxu0 %vm333_vm1, %v6185_v26  ;;  %v2428_v27 = vld [vmem:[#allocation2 + $0xd4] sm:$0xff]  ;;  %v840_v23 = vld [vmem:[#allocation2 + $0xe1] sm:$0xff] }
  0x4b   : > { %5979 = vmatprep.subr.msk.bf16.mxu0 %vm559_vm0, %v6194_v28  ;;  %v6256_v31 = vpack.c.bf16 %v2429_v52, %v2428_v27  ;;  %v841_v28 = vld [vmem:[#allocation2 + $0xe9] sm:$0xff]  ;;  %v843_v52 = vld [vmem:[#allocation2 + $0xf9] sm:$0xff] }
  0x4c   : > { %v862_v27 = vpack.c.bf16 %v841_v28, %v840_v23  ;;  %v1231_v23 = vld [vmem:[#allocation2 + $0xaa] sm:$0xff] }
  0x4d   : > { %v3201_v28 = vld [vmem:[#allocation2 + $0x2d] sm:$0xff] }
  0x4f   : > { %5366 = vmatmul.mubr.msk.bf16.gmra.mrb[24].mxu1 %vm333_vm1, %v463_v35  ;;  %v2431_v35 = vld [vmem:[#allocation2 + $0xec] sm:$0xff] }
  0x50   : > { %5369 = vmatprep.mubr.msk.bf16.mxu1 %vm333_vm1, %v464_v37  ;;  %v824_v37 = vld [vmem:[#allocation2 + $0x61] sm:$0xff]  ;;  %v6264_v43 = vpack.c.bf16 %v2431_v35, %v2430_v34  ;;  %v1211_v35 = vld [vmem:[#allocation2 + $0xa] sm:$0xff] }
  0x51   : > { %5536 = vmatmul.mubr.msk.bf16.gmra.mrb[4].mxu0 %vm333_vm1, %v6203_v36  ;;  %v854_v44 = vpack.c.bf16 %v825_v38, %v824_v37  ;;  %v1210_v34 = vld [vmem:[#allocation2 + $0x2] sm:$0xff]  ;;  %v1212_v38 = vld [vmem:[#allocation2 + $0x12] sm:$0xff] }
  0x52   : > { %5539 = vmatprep.mubr.msk.bf16.mxu0 %vm333_vm1, %v6206_v39 }
  0x57   : > { %5370 = vmatmul.mubr.msk.bf16.gmra.mrb[28].mxu1 %vm333_vm1, %v465_v49  ;;  %v2435_v49 = vld [vmem:[#allocation2 + $0x10c] sm:$0xff] }
  0x58   : > { %5373 = vmatprep.mubr.msk.bf16.mxu1 %vm333_vm1, %v466_v51  ;;  %v828_v51 = vld [vmem:[#allocation2 + $0x81] sm:$0xff]  ;;  %v6274_v58 = vpack.c.bf16 %v2435_v49, %v2434_v48  ;;  %v4214_v48 = vld [vmem:[%s6742_s2 + $0x10] sm:$0xff] }
  0x59   : > { %5540 = vmatmul.mubr.msk.bf16.gmra.mrb[8].mxu0 %vm333_vm1, %v6215_v50  ;;  %v856_v59 = vpack.c.bf16 %v829_v54, %v828_v51  ;;  %v1219_v49 = vld [vmem:[#allocation2 + $0x4a] sm:$0xff] }
  0x5a   : > { %5543 = vmatprep.mubr.msk.bf16.mxu0 %vm333_vm1, %v6217_v53  ;;  %v4213_v51 = vld [vmem:[%s6742_s2 + $0x8] sm:$0xff] }
  0x5f   : > { %5374 = vmatmul.mubr.msk.bf16.gmra.mrb[32].mxu1 %vm333_vm1, %v467_v62  ;;  %v831_v62 = vld [vmem:[#allocation2 + $0x99] sm:$0xff] }
  0x60   : > { %5379 = vmatprep.mubr.msk.bf16.mxu1 %vm333_vm1, %v848_v1  ;;  %v2438_v1 = vld [vmem:[#allocation2 + $0x124] sm:$0xff]  ;;  %v857_v9 = vpack.c.bf16 %v831_v62, %v830_v61  ;;  %v4218_v62 = vld [vmem:[%s6742_s2 + $0x30] sm:$0xff] }
  0x61   : > { %5544 = vmatmul.mubr.msk.bf16.gmra.mrb[12].mxu0 %vm333_vm1, %v6225_v63  ;;  %v6284_v10 = vpack.c.bf16 %v2439_v6, %v2438_v1  ;;  %v1225_v6 = vld [vmem:[#allocation2 + $0x7a] sm:$0xff] }
  0x62   : > { %5547 = vmatprep.mubr.msk.bf16.mxu0 %vm333_vm1, %v6227_v3 }
  0x67   : > { %5380 = vmatmul.mubr.msk.bf16.vlgmr.msra.gmra.mrb[0].mxu1 %vm333_vm1, %v849_v14  ;;  %v836_v14 = vld [vmem:[#allocation2 + $0xc1] sm:$0xff] }
  0x68   : > { %5383 = vmatprep.mubr.msk.bf16.mxu1 %vm333_vm1, %v850_v16  ;;  %5416 = vmatpush3.bf16.msra.mxu1 %v1357_v18  ;;  %v837_v16 = vld [vmem:[#allocation2 + $0xc9] sm:$0xff]  ;;  %v859_v18 = vpack.c.bf16 %v835_v13, %v834_v12 }
  0x69   : > { %5548 = vmatmul.mubr.msk.bf16.gmra.mrb[16].mxu0 %vm333_vm1, %v6235_v15  ;;  %5974 = vmatprep.subr.msk.bf16.mxu1 %vm559_vm0, %v6245_v19  ;;  %v860_v20 = vpack.c.bf16 %v837_v16, %v836_v14  ;;  %v1218_v19 = vld [vmem:[#allocation2 + $0x42] sm:$0xff]  ;;  %v4222_v13 = vld [vmem:[%s6742_s2 + $0x50] sm:$0xff]  ;;  %v1229_v16 = vld [vmem:[#allocation2 + $0x9a] sm:$0xff] }
  0x6a   : > { %5551 = vmatprep.mubr.msk.bf16.mxu0 %vm333_vm1, %v6237_v17  ;;  %v6352_v54 = vpack.c.bf16 %v1219_v49, %v1218_v19  ;;  %v3206_v19 = vld [vmem:[#allocation2 + $0x55] sm:$0xff] }
  0x6b   : > { %v4231_v49 = vld [vmem:[%s6742_s2 + $0x98] sm:$0xff] }
  0x6f   : > { %5384 = vmatmul.mubr.msk.bf16.gmra.mrb[4].mxu1 %vm333_vm1, %v851_v29  ;;  %v845_v29 = vld [vmem:[#allocation2 + $0x109] sm:$0xff] }
  0x70   : > { %5387 = vmatprep.mubr.msk.bf16.mxu1 %vm333_vm1, %v852_v24 }
  0x71   : > { %5552 = vmatmul.mubr.msk.bf16.gmra.mrb[20].mxu0 %vm333_vm1, %v6254_v30 }
  0x72   : > { %5555 = vmatprep.mubr.msk.bf16.mxu0 %vm333_vm1, %v6256_v31 }
  0x77   : > { %5388 = vmatmul.mubr.msk.bf16.gmra.mrb[8].mxu1 %vm333_vm1, %v853_v42  ;;  %v6002_v42 = vmov 0  }
  0x78   : > { %5391 = vmatprep.mubr.msk.bf16.mxu1 %vm333_vm1, %v854_v44  ;;  %5992 = vset.pattern.permute.xlu0 %v6002_v42  ;;  %v6327_v44 = vpack.c.bf16 %v1215_v41, %v1214_v40  ;;  %v4230_v41 = vld [vmem:[%s6742_s2 + $0x90] sm:$0xff] }
  0x79   : > { %5556 = vmatmul.mubr.msk.bf16.gmra.mrb[24].mxu0 %vm333_vm1, %v6264_v43  ;;  %5993 = vset.pattern.permute.xlu1 %v6002_v42 }
  0x7a   : > { %5559 = vmatprep.mubr.msk.bf16.mxu0 %vm333_vm1, %v6266_v45  ;;  %4250 = vperm.xlu0 %5992, %v4212_v47   ;;  %v1236_v47 = vld [vmem:[#allocation2 + $0xd2] sm:$0xff] }
  0x7b   : > { %4260 = vperm.xlu1 %5993, %v4214_v48   ;;  %v1237_v48 = vld [vmem:[#allocation2 + $0xda] sm:$0xff] }
  0x7e   : > { %4255 = vperm.xlu0 %5992, %v4213_v51   ;;  %v3207_v51 = vld [vmem:[#allocation2 + $0x5d] sm:$0xff] }
  0x7f   : > { %5392 = vmatmul.mubr.msk.bf16.gmra.mrb[12].mxu1 %vm333_vm1, %v855_v57  ;;  %v1222_v57 = vld [vmem:[#allocation2 + $0x62] sm:$0xff]  ;;  %4265 = vperm.xlu1 %5993, %v4215_v55  }
  0x80   : > { %5395 = vmatprep.mubr.msk.bf16.mxu1 %vm333_vm1, %v856_v59  ;;  %v1223_v59 = vld [vmem:[#allocation2 + $0x6a] sm:$0xff] }
  0x81   : > { %5560 = vmatmul.mubr.msk.bf16.gmra.mrb[28].mxu0 %vm333_vm1, %v6274_v58  ;;  %v6376_v1 = vpack.c.bf16 %v1223_v59, %v1222_v57  ;;  %v3208_v55 = vld [vmem:[#allocation2 + $0x65] sm:$0xff]  ;;  %v6462_v57 = vpack.c.bf16 %v1237_v48, %v1236_v47  ;;  %v4246_v48 = vld [vmem:[%s6742_s2 + $0x110] sm:$0xff] }
  0x82   : > { %5563 = vmatprep.mubr.msk.bf16.mxu0 %vm333_vm1, %v6276_v60  ;;  %4270 = vperm.xlu0 %5992, %v4216_v56   ;;  %v3209_v56 = vld [vmem:[#allocation2 + $0x6d] sm:$0xff] }
  0x83   : > { %v4233_v59 = vld [vmem:[%s6742_s2 + $0xa8] sm:$0xff] }
  0x84   : > { %v4245_v47 = vld [vmem:[%s6742_s2 + $0x108] sm:$0xff] }
  0x86   : > { %4280 = vperm.xlu0 %5992, %v4218_v62   ;;  %v3239_v62 = vpack.c.bf16 %v3207_v51, %v3206_v19  ;;  %v3223_v51 = vld [vmem:[#allocation2 + $0xdd] sm:$0xff] }
  0x87   : > { %5396 = vmatmul.mubr.msk.bf16.gmra.mrb[16].mxu1 %vm333_vm1, %v857_v9  ;;  %v1226_v9 = vld [vmem:[#allocation2 + $0x82] sm:$0xff] }
  0x88   : > { %5399 = vmatprep.mubr.msk.bf16.mxu1 %vm333_vm1, %v858_v11  ;;  %v1227_v11 = vld [vmem:[#allocation2 + $0x8a] sm:$0xff] }
  0x89   : > { %5564 = vmatmul.mubr.msk.bf16.gmra.mrb[32].mxu0 %vm333_vm1, %v6284_v10  ;;  %v6400_v14 = vpack.c.bf16 %v1227_v11, %v1226_v9  ;;  %v3210_v9 = vld [vmem:[#allocation2 + $0x75] sm:$0xff] }
  0x8a   : > { %5569 = vmatprep.mubr.msk.bf16.mxu0 %vm333_vm1, %v6182_v5  ;;  %v838_v5 = vld [vmem:[#allocation2 + $0xd1] sm:$0xff]  ;;  %4290 = vperm.xlu0 %5992, %v4220_v8   ;;  %v1241_v8 = vld [vmem:[#allocation2 + $0xfa] sm:$0xff] }
  0x8b   : > { %v861_v4 = vpack.c.bf16 %v839_v25, %v838_v5  ;;  %v2837_v5 = vld [vmem:[#allocation2 + $0x13c] sm:$0xff] }
  0x8c   : > { %v1230_v25 = vld [vmem:[#allocation2 + $0xa2] sm:$0xff]  ;;  %v4235_v11 = vld [vmem:[%s6742_s2 + $0xb8] sm:$0xff] }
  0x8e   : > { %4300 = vperm.xlu0 %5992, %v4222_v13   ;;  %v3211_v13 = vld [vmem:[#allocation2 + $0x7d] sm:$0xff] }
  0x8f   : > { %5400 = vmatmul.mubr.msk.bf16.gmra.mrb[20].mxu1 %vm333_vm1, %v859_v18  ;;  %v2836_v18 = vld [vmem:[#allocation2 + $0x134] sm:$0xff] }
  0x90   : > { %5403 = vmatprep.mubr.msk.bf16.mxu1 %vm333_vm1, %v860_v20  ;;  %v4223_v20 = vld [vmem:[%s6742_s2 + $0x58] sm:$0xff] }
  0x91   : > { %5570 = vmatmul.mubr.msk.bf16.vlgmr.msra.gmra.mrb[0].mxu0 %vm333_vm1, %v6185_v26  ;;  %v842_v26 = vld [vmem:[#allocation2 + $0xf1] sm:$0xff] }
  0x92   : > { %5606 = vmatpush3.bf16.msra.mxu0 %v3347_v21  ;;  %5573 = vmatprep.mubr.msk.bf16.mxu0 %vm333_vm1, %v6203_v36  ;;  %v844_v36 = vld [vmem:[#allocation2 + $0x101] sm:$0xff]  ;;  %v863_v24 = vpack.c.bf16 %v843_v52, %v842_v26  ;;  %v4226_v26 = vld [vmem:[%s6742_s2 + $0x70] sm:$0xff]  ;;  %v2855_v52 = vpack.c.bf16 %v2837_v5, %v2836_v18 }
  0x93   : > { %5980 = vmatprep.subr.msk.bf16.mxu0 %vm559_vm0, %v6298_v22  ;;  %v864_v32 = vpack.c.bf16 %v845_v29, %v844_v36  ;;  %v4224_v21 = vld [vmem:[%s6742_s2 + $0x60] sm:$0xff]  ;;  %v6424_v36 = vpack.c.bf16 %v1231_v23, %v1230_v25  ;;  %v1232_v29 = vld [vmem:[#allocation2 + $0xb2] sm:$0xff]  ;;  %v4237_v5 = vld [vmem:[%s6742_s2 + $0xc8] sm:$0xff]  ;;  %v3241_v23 = vpack.c.bf16 %v3211_v13, %v3210_v9 }
  0x94   : > { %4310 = vperm.xlu0 %5992, %v4224_v21   ;;  %v3212_v18 = vld [vmem:[#allocation2 + $0x85] sm:$0xff]  ;;  %v4238_v25 = vld [vmem:[%s6742_s2 + $0xd0] sm:$0xff] }
  0x97   : > { %5404 = vmatmul.mubr.msk.bf16.gmra.mrb[24].mxu1 %vm333_vm1, %v861_v4  ;;  %v4225_v4 = vld [vmem:[%s6742_s2 + $0x68] sm:$0xff] }
  0x98   : > { %5407 = vmatprep.mubr.msk.bf16.mxu1 %vm333_vm1, %v862_v27  ;;  %4320 = vperm.xlu0 %5992, %v4226_v26   ;;  %v4240_v26 = vld [vmem:[%s6742_s2 + $0xe0] sm:$0xff] }
  0x99   : > { %5574 = vmatmul.mubr.msk.bf16.gmra.mrb[4].mxu0 %vm333_vm1, %v6206_v39  ;;  %v847_v39 = vld [vmem:[#allocation2 + $0x119] sm:$0xff] }
  0x9a   : > { %5577 = vmatprep.mubr.msk.bf16.mxu0 %vm333_vm1, %v6215_v50  ;;  %v865_v37 = vpack.c.bf16 %v847_v39, %v846_v33  ;;  %v1246_v50 = vpack.c.bf16 %v1211_v35, %v1210_v34  ;;  %v4227_v33 = vld [vmem:[%s6742_s2 + $0x78] sm:$0xff]  ;;  %v4228_v39 = vld [vmem:[%s6742_s2 + $0x80] sm:$0xff] }
  0x9b   : > { %v3203_v34 = vld [vmem:[#allocation2 + $0x3d] sm:$0xff] }
  0x9c   : > { %v1234_v35 = vld [vmem:[#allocation2 + $0xc2] sm:$0xff]  ;;  %4330 = vperm.xlu0 %5992, %v4228_v39  }
  0x9f   : > { %5408 = vmatmul.mubr.msk.bf16.gmra.mrb[28].mxu1 %vm333_vm1, %v863_v24  ;;  %v1233_v24 = vld [vmem:[#allocation2 + $0xba] sm:$0xff] }
  0xa0   : > { %5411 = vmatprep.mubr.msk.bf16.mxu1 %vm333_vm1, %v864_v32  ;;  %v3202_v32 = vld [vmem:[#allocation2 + $0x35] sm:$0xff]  ;;  %v6441_v40 = vpack.c.bf16 %v1233_v24, %v1232_v29  ;;  %4340 = vperm.xlu0 %5992, %v4230_v41   ;;  %v3215_v24 = vld [vmem:[#allocation2 + $0x9d] sm:$0xff] }
  0xa1   : > { %5578 = vmatmul.mubr.msk.bf16.gmra.mrb[8].mxu0 %vm333_vm1, %v6217_v53  ;;  %v1213_v53 = vld [vmem:[#allocation2 + $0x1a] sm:$0xff]  ;;  %v3237_v42 = vpack.c.bf16 %v3203_v34, %v3202_v32  ;;  %v3216_v32 = vld [vmem:[#allocation2 + $0xa5] sm:$0xff] }
  0xa2   : > { %5581 = vmatprep.mubr.msk.bf16.mxu0 %vm333_vm1, %v6225_v63  ;;  %v6325_v63 = vpack.c.bf16 %v1213_v53, %v1212_v38  ;;  %v3205_v38 = vld [vmem:[#allocation2 + $0x4d] sm:$0xff]  ;;  %v3214_v29 = vld [vmem:[#allocation2 + $0x95] sm:$0xff] }
  0xa3   : > { %v4229_v53 = vld [vmem:[%s6742_s2 + $0x88] sm:$0xff]  ;;  %v3218_v41 = vld [vmem:[#allocation2 + $0xb5] sm:$0xff] }
  0xa4   : > { %v4241_v34 = vld [vmem:[%s6742_s2 + $0xe8] sm:$0xff] }
  0xa7   : > { %5412 = vmatmul.mubr.msk.bf16.gmra.mrb[32].mxu1 %vm333_vm1, %v865_v37  ;;  %v1235_v37 = vld [vmem:[#allocation2 + $0xca] sm:$0xff] }
  0xa8   : > { %5417 = vmatprep.mubr.msk.bf16.mxu1 %vm333_vm1, %v1246_v50  ;;  %v3204_v50 = vld [vmem:[#allocation2 + $0x45] sm:$0xff] }
  0xa9   : > { %5582 = vmatmul.mubr.msk.bf16.gmra.mrb[12].mxu0 %vm333_vm1, %v6227_v3  ;;  %v1216_v3 = vld [vmem:[#allocation2 + $0x32] sm:$0xff] }
  0xaa   : > { %5585 = vmatprep.mubr.msk.bf16.mxu0 %vm333_vm1, %v6235_v15  ;;  %v1217_v15 = vld [vmem:[#allocation2 + $0x3a] sm:$0xff] }
  0xaf   : > { %5418 = vmatmul.mubr.msk.bf16.vlgmr.msra.gmra.mrb[0].mxu1 %vm333_vm1, %v6325_v63 }
  0xb0   : > { %5421 = vmatprep.mubr.msk.bf16.mxu1 %vm333_vm1, %v6327_v44  ;;  %5454 = vmatpush3.bf16.msra.mxu1 %v1755_v46  ;;  %v6446_v46 = vpack.c.bf16 %v1235_v37, %v1234_v35  ;;  %v4242_v35 = vld [vmem:[%s6742_s2 + $0xf0] sm:$0xff]  ;;  %v3243_v37 = vpack.c.bf16 %v3215_v24, %v3214_v29 }
  0xb1   : > { %5586 = vmatmul.mubr.msk.bf16.gmra.mrb[16].mxu0 %vm333_vm1, %v6237_v17  ;;  %5976 = vmatprep.subr.msk.bf16.mxu1 %vm559_vm0, %v6044_v0  ;;  %v6347_v17 = vpack.c.bf16 %v1217_v15, %v1216_v3  ;;  %v1221_v0 = vld [vmem:[#allocation2 + $0x5a] sm:$0xff]  ;;  %v3238_v3 = vpack.c.bf16 %v3205_v38, %v3204_v50  ;;  %v3745_v15 = vsel %vm559_vm0, %v6298_v22, 0  ;;  %v1643_v24 = vld [vmem:[#allocation2 + $0x12a] sm:$0xff] }
  0xb2   : > { %5589 = vmatprep.mubr.msk.bf16.mxu0 %vm333_vm1, %v6254_v30  ;;  %v1220_v30 = vld [vmem:[#allocation2 + $0x52] sm:$0xff]  ;;  %v4232_v22 = vld [vmem:[%s6742_s2 + $0xa0] sm:$0xff] }
  0xb3   : > { %v6371_v61 = vpack.c.bf16 %v1221_v0, %v1220_v30  ;;  %v1238_v30 = vld [vmem:[#allocation2 + $0xe2] sm:$0xff]  ;;  %v1239_v0 = vld [vmem:[#allocation2 + $0xea] sm:$0xff]  ;;  %4350 = vperm.xlu0 %5992, %v4232_v22   ;;  %v4243_v38 = vld [vmem:[%s6742_s2 + $0xf8] sm:$0xff] }
  0xb4   : > { %v3222_v22 = vld [vmem:[#allocation2 + $0xd5] sm:$0xff] }
  0xb7   : > { %5422 = vmatmul.mubr.msk.bf16.gmra.mrb[4].mxu1 %vm333_vm1, %v6347_v17 }
  0xb8   : > { %5425 = vmatprep.mubr.msk.bf16.mxu1 %vm333_vm1, %v6352_v54 }
  0xb9   : > { %5590 = vmatmul.mubr.msk.bf16.gmra.mrb[20].mxu0 %vm333_vm1, %v6256_v31  ;;  %v4217_v31 = vld [vmem:[%s6742_s2 + $0x28] sm:$0xff] }
  0xba   : > { %5593 = vmatprep.mubr.msk.bf16.mxu0 %vm333_vm1, %v6264_v43  ;;  %4275 = vperm.xlu1 %5993, %v4217_v31   ;;  %v1224_v43 = vld [vmem:[#allocation2 + $0x72] sm:$0xff] }
  0xbb   : > { %v6395_v12 = vpack.c.bf16 %v1225_v6, %v1224_v43  ;;  %v4234_v31 = vld [vmem:[%s6742_s2 + $0xb0] sm:$0xff]  ;;  %v6470_v43 = vpack.c.bf16 %v1239_v0, %v1238_v30  ;;  %v3240_v6 = vpack.c.bf16 %v3209_v56, %v3208_v55  ;;  %v3224_v30 = vld [vmem:[#allocation2 + $0xe5] sm:$0xff]  ;;  %v3247_v55 = vpack.c.bf16 %v3223_v51, %v3222_v22  ;;  %v3227_v56 = vld [vmem:[#allocation2 + $0xfd] sm:$0xff] }
  0xbc   : > { %4360 = vperm.xlu0 %5992, %v4234_v31   ;;  %v3225_v0 = vld [vmem:[#allocation2 + $0xed] sm:$0xff] }
  0xbe   : > { %4285 = vperm.xlu1 %5993, %v4219_v7   ;;  %v1240_v7 = vld [vmem:[#allocation2 + $0xf2] sm:$0xff] }
  0xbf   : > { %5426 = vmatmul.mubr.msk.bf16.gmra.mrb[8].mxu1 %vm333_vm1, %v6371_v61  ;;  %v6484_v21 = vpack.c.bf16 %v1241_v8, %v1240_v7  ;;  %v3233_v7 = vld [vmem:[#allocation2 + $0x12d] sm:$0xff] }
  0xc0   : > { %5429 = vmatprep.mubr.msk.bf16.mxu1 %vm333_vm1, %v6376_v1 }
  0xc1   : > { %5594 = vmatmul.mubr.msk.bf16.gmra.mrb[24].mxu0 %vm333_vm1, %v6266_v45  ;;  %v4221_v45 = vld [vmem:[%s6742_s2 + $0x48] sm:$0xff] }
  0xc2   : > { %5597 = vmatprep.mubr.msk.bf16.mxu0 %vm333_vm1, %v6274_v58  ;;  %4295 = vperm.xlu1 %5993, %v4221_v45   ;;  %v1228_v58 = vld [vmem:[#allocation2 + $0x92] sm:$0xff]  ;;  %v4236_v45 = vld [vmem:[%s6742_s2 + $0xc0] sm:$0xff] }
  0xc3   : > { %v6419_v27 = vpack.c.bf16 %v1229_v16, %v1228_v58  ;;  %v1242_v58 = vld [vmem:[#allocation2 + $0x102] sm:$0xff]  ;;  %v1243_v16 = vld [vmem:[#allocation2 + $0x10a] sm:$0xff]  ;;  %4370 = vperm.xlu0 %5992, %v4236_v45  }
  0xc4   : > { %v3599_v45 = vld [vmem:[#allocation2 + $0x2e] sm:$0xff] }
  0xc6   : > { %4305 = vperm.xlu1 %5993, %v4223_v20   ;;  %v3213_v20 = vld [vmem:[#allocation2 + $0x8d] sm:$0xff] }
  0xc7   : > { %5430 = vmatmul.mubr.msk.bf16.gmra.mrb[12].mxu1 %vm333_vm1, %v6395_v12  ;;  %4380 = vperm.xlu0 %5992, %v4238_v25   ;;  %v3606_v25 = vld [vmem:[#allocation2 + $0x66] sm:$0xff] }
  0xc8   : > { %5433 = vmatprep.mubr.msk.bf16.mxu1 %vm333_vm1, %v6400_v14 }
  0xc9   : > { %5598 = vmatmul.mubr.msk.bf16.gmra.mrb[28].mxu0 %vm333_vm1, %v6276_v60  ;;  %v3200_v60 = vld [vmem:[#allocation2 + $0x25] sm:$0xff] }
  0xca   : > { %5601 = vmatprep.mubr.msk.bf16.mxu0 %vm333_vm1, %v6284_v10  ;;  %v3236_v10 = vpack.c.bf16 %v3201_v28, %v3200_v60  ;;  %4315 = vperm.xlu1 %5993, %v4225_v4   ;;  %v6492_v60 = vpack.c.bf16 %v1243_v16, %v1242_v58  ;;  %v3242_v28 = vpack.c.bf16 %v3213_v20, %v3212_v18  ;;  %v4239_v4 = vld [vmem:[%s6742_s2 + $0xd8] sm:$0xff]  ;;  %v3602_v16 = vld [vmem:[#allocation2 + $0x46] sm:$0xff]  ;;  %v3603_v18 = vld [vmem:[#allocation2 + $0x4e] sm:$0xff] }
  0xcb   : > { %4390 = vperm.xlu0 %5992, %v4240_v26   ;;  %v3610_v26 = vld [vmem:[#allocation2 + $0x86] sm:$0xff] }
  0xce   : > { %4325 = vperm.xlu1 %5993, %v4227_v33   ;;  %v3217_v33 = vld [vmem:[#allocation2 + $0xad] sm:$0xff] }
  0xcf   : > { %5434 = vmatmul.mubr.msk.bf16.gmra.mrb[16].mxu1 %vm333_vm1, %v6419_v27  ;;  %v3244_v50 = vpack.c.bf16 %v3217_v33, %v3216_v32  ;;  %4400 = vperm.xlu0 %5992, %v4242_v35   ;;  %v3612_v32 = vld [vmem:[#allocation2 + $0x96] sm:$0xff]  ;;  %v3614_v35 = vld [vmem:[#allocation2 + $0xa6] sm:$0xff] }
  0xd0   : > { %5437 = vmatprep.mubr.msk.bf16.mxu1 %vm333_vm1, %v6424_v36  ;;  %v2026_v33 = vld [vmem:[#allocation2 + $0xb3] sm:$0xff] }
  0xd1   : > { %5602 = vmatmul.mubr.msk.bf16.gmra.mrb[32].mxu0 %vm333_vm1, %v2855_v52  ;;  %v1244_v52 = vld [vmem:[#allocation2 + $0x112] sm:$0xff] }
  0xd2   : > { %5607 = vmatprep.mubr.msk.bf16.mxu0 %vm333_vm1, %v3236_v10  ;;  %4335 = vperm.xlu1 %5993, %v4229_v53   ;;  %v1245_v10 = vld [vmem:[#allocation2 + $0x11a] sm:$0xff] }
  0xd3   : > { %v6506_v39 = vpack.c.bf16 %v1245_v10, %v1244_v52  ;;  %v4244_v53 = vld [vmem:[%s6742_s2 + $0x100] sm:$0xff]  ;;  %v3611_v52 = vld [vmem:[#allocation2 + $0x8e] sm:$0xff] }
  0xd4   : > { %4410 = vperm.xlu0 %5992, %v4244_v53   ;;  %v3640_v29 = vpack.c.bf16 %v3611_v52, %v3610_v26 }
  0xd6   : > { %4345 = vperm.xlu1 %5993, %v4231_v49  }
  0xd7   : > { %5438 = vmatmul.mubr.msk.bf16.gmra.mrb[20].mxu1 %vm333_vm1, %v6441_v40 }
  0xd8   : > { %5441 = vmatprep.mubr.msk.bf16.mxu1 %vm333_vm1, %v6446_v46  ;;  %4420 = vperm.xlu0 %5992, %v4246_v48   ;;  %v3618_v48 = vld [vmem:[#allocation2 + $0xc6] sm:$0xff] }
  0xd9   : > { %5608 = vmatmul.mubr.msk.bf16.vlgmr.msra.gmra.mrb[0].mxu0 %vm333_vm1, %v3237_v42  ;;  %v3219_v42 = vld [vmem:[#allocation2 + $0xbd] sm:$0xff] }
  0xda   : > { %5644 = vmatpush3.bf16.msra.mxu0 %v3745_v15  ;;  %5611 = vmatprep.mubr.msk.bf16.mxu0 %vm333_vm1, %v3238_v3  ;;  %v3220_v3 = vld [vmem:[#allocation2 + $0xc5] sm:$0xff]  ;;  %v3221_v15 = vld [vmem:[#allocation2 + $0xcd] sm:$0xff]  ;;  %v3245_v19 = vpack.c.bf16 %v3219_v42, %v3218_v41  ;;  %v3616_v42 = vld [vmem:[#allocation2 + $0xb6] sm:$0xff] }
  0xdb   : > { %4355 = vperm.xlu1 %5993, %v4233_v59   ;;  %v3246_v49 = vpack.c.bf16 %v3221_v15, %v3220_v3  ;;  %v3229_v59 = vld [vmem:[#allocation2 + $0x10d] sm:$0xff]  ;;  %v3617_v3 = vld [vmem:[#allocation2 + $0xbe] sm:$0xff] }
  0xdc   : > { %v2030_v15 = vld [vmem:[#allocation2 + $0xd3] sm:$0xff] }
  0xdf   : > { %5442 = vmatmul.mubr.msk.bf16.gmra.mrb[24].mxu1 %vm333_vm1, %v6462_v57  ;;  %4365 = vperm.xlu1 %5993, %v4235_v11   ;;  %v3598_v11 = vld [vmem:[#allocation2 + $0x26] sm:$0xff] }
  0xe0   : > { %5445 = vmatprep.mubr.msk.bf16.mxu1 %vm333_vm1, %v6470_v43  ;;  %v3634_v58 = vpack.c.bf16 %v3599_v45, %v3598_v11  ;;  %v3626_v11 = vld [vmem:[#allocation2 + $0x106] sm:$0xff]  ;;  %v3627_v45 = vld [vmem:[#allocation2 + $0x10e] sm:$0xff] }
  0xe1   : > { %5612 = vmatmul.mubr.msk.bf16.gmra.mrb[4].mxu0 %vm333_vm1, %v3239_v62 }
  0xe2   : > { %5615 = vmatprep.mubr.msk.bf16.mxu0 %vm333_vm1, %v3240_v6  ;;  %v3232_v6 = vld [vmem:[#allocation2 + $0x125] sm:$0xff] }
  0xe3   : > { %4375 = vperm.xlu1 %5993, %v4237_v5   ;;  %v3252_v9 = vpack.c.bf16 %v3233_v7, %v3232_v6  ;;  %v3636_v5 = vpack.c.bf16 %v3603_v18, %v3602_v16  ;;  %v2036_v6 = vld [vmem:[#allocation2 + $0x103] sm:$0xff]  ;;  %v2037_v7 = vld [vmem:[#allocation2 + $0x10b] sm:$0xff] }
  0xe4   : > { %v2040_v16 = vld [vmem:[#allocation2 + $0x123] sm:$0xff]  ;;  %v2041_v18 = vld [vmem:[#allocation2 + $0x12b] sm:$0xff] }
  0xe7   : > { %5446 = vmatmul.mubr.msk.bf16.gmra.mrb[28].mxu1 %vm333_vm1, %v6484_v21  ;;  %4385 = vperm.xlu1 %5993, %v4239_v4  }
  0xe8   : > { %5449 = vmatprep.mubr.msk.bf16.mxu1 %vm333_vm1, %v6492_v60 }
  0xe9   : > { %5616 = vmatmul.mubr.msk.bf16.gmra.mrb[8].mxu0 %vm333_vm1, %v3241_v23  ;;  %v3607_v23 = vld [vmem:[#allocation2 + $0x6e] sm:$0xff] }
  0xea   : > { %5619 = vmatprep.mubr.msk.bf16.mxu0 %vm333_vm1, %v3242_v28  ;;  %v3638_v4 = vpack.c.bf16 %v3607_v23, %v3606_v25  ;;  %v2059_v25 = vpack.c.bf16 %v2041_v18, %v2040_v16 }
  0xeb   : > { %4395 = vperm.xlu1 %5993, %v4241_v34   ;;  %v2027_v34 = vld [vmem:[#allocation2 + $0xbb] sm:$0xff] }
  0xec   : > { %v2052_v53 = vpack.c.bf16 %v2027_v34, %v2026_v33 }
  0xef   : > { %5450 = vmatmul.mubr.msk.bf16.gmra.mrb[32].mxu1 %vm333_vm1, %v6506_v39  ;;  %4405 = vperm.xlu1 %5993, %v4243_v38  }
  0xf0   : > { %5455 = vmatprep.mubr.msk.bf16.mxu1 %vm333_vm1, %v6325_v63  ;;  %v4247_v63 = vld [vmem:[%s6742_s2 + $0x118] sm:$0xff] }
  0xf1   : > { %5620 = vmatmul.mubr.msk.bf16.gmra.mrb[12].mxu0 %vm333_vm1, %v3243_v37  ;;  %v3615_v37 = vld [vmem:[#allocation2 + $0xae] sm:$0xff] }
  0xf2   : > { %5623 = vmatprep.mubr.msk.bf16.mxu0 %vm333_vm1, %v3244_v50  ;;  %v3642_v41 = vpack.c.bf16 %v3615_v37, %v3614_v35 }
  0xf3   : > { %4415 = vperm.xlu1 %5993, %v4245_v47   ;;  %v2031_v47 = vld [vmem:[#allocation2 + $0xdb] sm:$0xff] }
  0xf4   : > { %v2054_v22 = vpack.c.bf16 %v2031_v47, %v2030_v15 }
  0xf7   : > { %5456 = vmatmul.mubr.msk.bf16.vlgmr.msra.gmra.mrb[0].mxu1 %vm333_vm1, %v6327_v44  ;;  %4425 = vperm.xlu1 %5993, %v4247_v63   ;;  %v3248_v44 = vpack.c.bf16 %v3225_v0, %v3224_v30  ;;  %v3643_v63 = vpack.c.bf16 %v3617_v3, %v3616_v42  ;;  %v2032_v30 = vld [vmem:[#allocation2 + $0xe3] sm:$0xff]  ;;  %v2033_v0 = vld [vmem:[#allocation2 + $0xeb] sm:$0xff] }
  0xf8   : > { %5459 = vmatprep.mubr.msk.bf16.mxu1 %vm333_vm1, %v6347_v17  ;;  %5682 = vmatpush3.bf16.msra.mxu1 %v6054_v2  ;;  %v3226_v17 = vld [vmem:[#allocation2 + $0xf5] sm:$0xff]  ;;  %v3228_v2 = vld [vmem:[#allocation2 + $0x105] sm:$0xff] }
  0xf9   : > { %5624 = vmatmul.mubr.msk.bf16.gmra.mrb[16].mxu0 %vm333_vm1, %v3245_v19  ;;  %v3249_v31 = vpack.c.bf16 %v3227_v56, %v3226_v17  ;;  %v3250_v62 = vpack.c.bf16 %v3229_v59, %v3228_v2  ;;  %v3619_v19 = vld [vmem:[#allocation2 + $0xce] sm:$0xff]  ;;  %v2035_v56 = vld [vmem:[#allocation2 + $0xfb] sm:$0xff]  ;;  %v3622_v2 = vld [vmem:[#allocation2 + $0xe6] sm:$0xff]  ;;  %v4251_v26 = vpop.permute.xlu0 %4250 }
  0xfa   : > { %5627 = vmatprep.mubr.msk.bf16.mxu0 %vm333_vm1, %v3246_v49  ;;  %v3644_v51 = vpack.c.bf16 %v3619_v19, %v3618_v48  ;;  %v2034_v17 = vld [vmem:[#allocation2 + $0xf3] sm:$0xff] }
  0xfb   : > { %v3623_v59 = vld [vmem:[#allocation2 + $0xee] sm:$0xff] }
  0xff   : > { %5460 = vmatmul.mubr.msk.bf16.gmra.mrb[4].mxu1 %vm333_vm1, %v6352_v54  ;;  %v3230_v54 = vld [vmem:[#allocation2 + $0x115] sm:$0xff] }
 0x100   : > { %5463 = vmatprep.mubr.msk.bf16.mxu1 %vm333_vm1, %v6371_v61  ;;  %v3231_v61 = vld [vmem:[#allocation2 + $0x11d] sm:$0xff] }
 0x101   : > { %5628 = vmatmul.mubr.msk.bf16.gmra.mrb[20].mxu0 %vm333_vm1, %v3247_v55  ;;  %v3251_v8 = vpack.c.bf16 %v3231_v61, %v3230_v54  ;;  %v3620_v55 = vld [vmem:[#allocation2 + $0xd6] sm:$0xff]  ;;  %v2056_v54 = vpack.c.bf16 %v2035_v56, %v2034_v17  ;;  %v3646_v61 = vpack.c.bf16 %v3623_v59, %v3622_v2 }
 0x102   : > { %5631 = vmatprep.mubr.msk.bf16.mxu0 %vm333_vm1, %v3248_v44  ;;  %v3621_v44 = vld [vmem:[#allocation2 + $0xde] sm:$0xff] }
 0x107   : > { %5464 = vmatmul.mubr.msk.bf16.gmra.mrb[8].mxu1 %vm333_vm1, %v6376_v1  ;;  %v3234_v1 = vld [vmem:[#allocation2 + $0x135] sm:$0xff] }
 0x108   : > { %5467 = vmatprep.mubr.msk.bf16.mxu1 %vm333_vm1, %v6395_v12  ;;  %v3235_v12 = vld [vmem:[#allocation2 + $0x13d] sm:$0xff] }
 0x109   : > { %5632 = vmatmul.mubr.msk.bf16.gmra.mrb[24].mxu0 %vm333_vm1, %v3249_v31  ;;  %v3253_v13 = vpack.c.bf16 %v3235_v12, %v3234_v1  ;;  %v2055_v31 = vpack.c.bf16 %v2033_v0, %v2032_v30  ;;  %v2038_v1 = vld [vmem:[#allocation2 + $0x113] sm:$0xff]  ;;  %v2039_v12 = vld [vmem:[#allocation2 + $0x11b] sm:$0xff] }
 0x10a   : > { %5635 = vmatprep.mubr.msk.bf16.mxu0 %vm333_vm1, %v3250_v62  ;;  %v3645_v62 = vpack.c.bf16 %v3621_v44, %v3620_v55 }
 0x10f   : > { %5468 = vmatmul.mubr.msk.bf16.gmra.mrb[12].mxu1 %vm333_vm1, %v6400_v14  ;;  %v3600_v14 = vld [vmem:[#allocation2 + $0x36] sm:$0xff] }
 0x110   : > { %5471 = vmatprep.mubr.msk.bf16.mxu1 %vm333_vm1, %v6419_v27  ;;  %v3601_v27 = vld [vmem:[#allocation2 + $0x3e] sm:$0xff] }
 0x111   : > { %5636 = vmatmul.mubr.msk.bf16.gmra.mrb[28].mxu0 %vm333_vm1, %v3251_v8  ;;  %v3635_v20 = vpack.c.bf16 %v3601_v27, %v3600_v14  ;;  %v3624_v8 = vld [vmem:[#allocation2 + $0xf6] sm:$0xff]  ;;  %v2058_v14 = vpack.c.bf16 %v2039_v12, %v2038_v1  ;;  %v3648_v27 = vpack.c.bf16 %v3627_v45, %v3626_v11 }
 0x112   : > { %5639 = vmatprep.mubr.msk.bf16.mxu0 %vm333_vm1, %v3252_v9  ;;  %v3625_v9 = vld [vmem:[#allocation2 + $0xfe] sm:$0xff] }
 0x117   : > { %5472 = vmatmul.mubr.msk.bf16.gmra.mrb[16].mxu1 %vm333_vm1, %v6424_v36  ;;  %v3604_v36 = vld [vmem:[#allocation2 + $0x56] sm:$0xff] }
 0x118   : > { %5475 = vmatprep.mubr.msk.bf16.mxu1 %vm333_vm1, %v6441_v40  ;;  %v3605_v40 = vld [vmem:[#allocation2 + $0x5e] sm:$0xff] }
 0x119   : > { %5640 = vmatmul.mubr.msk.bf16.gmra.mrb[32].mxu0 %vm333_vm1, %v3253_v13  ;;  %v3637_v28 = vpack.c.bf16 %v3605_v40, %v3604_v36  ;;  %v2057_v13 = vpack.c.bf16 %v2037_v7, %v2036_v6  ;;  %v3630_v36 = vld [vmem:[#allocation2 + $0x126] sm:$0xff]  ;;  %v3631_v40 = vld [vmem:[#allocation2 + $0x12e] sm:$0xff] }
 0x11a   : > { %5645 = vmatprep.mubr.msk.bf16.mxu0 %vm333_vm1, %v3634_v58  ;;  %v3647_v58 = vpack.c.bf16 %v3625_v9, %v3624_v8 }
 0x11f   : > { %5476 = vmatmul.mubr.msk.bf16.gmra.mrb[20].mxu1 %vm333_vm1, %v6446_v46  ;;  %v3608_v46 = vld [vmem:[#allocation2 + $0x76] sm:$0xff] }
 0x120   : > { %5479 = vmatprep.mubr.msk.bf16.mxu1 %vm333_vm1, %v6462_v57  ;;  %v3609_v57 = vld [vmem:[#allocation2 + $0x7e] sm:$0xff] }
 0x121   : > { %5646 = vmatmul.mubr.msk.bf16.vlgmr.msra.gmra.mrb[0].mxu0 %vm333_vm1, %v3635_v20  ;;  %v3639_v10 = vpack.c.bf16 %v3609_v57, %v3608_v46  ;;  %v3628_v20 = vld [vmem:[#allocation2 + $0x116] sm:$0xff]  ;;  %v3633_v46 = vld [vmem:[#allocation2 + $0x13e] sm:$0xff] }
 0x122   : > { %5649 = vmatprep.mubr.msk.bf16.mxu0 %vm333_vm1, %v3636_v5  ;;  %v3629_v5 = vld [vmem:[#allocation2 + $0x11e] sm:$0xff] }
 0x123   : > { %v3649_v23 = vpack.c.bf16 %v3629_v5, %v3628_v20 }
 0x127   : > { %5480 = vmatmul.mubr.msk.bf16.gmra.mrb[24].mxu1 %vm333_vm1, %v6470_v43  ;;  %v1642_v43 = vld [vmem:[#allocation2 + $0x122] sm:$0xff] }
 0x128   : > { %5483 = vmatprep.mubr.msk.bf16.mxu1 %vm333_vm1, %v6484_v21  ;;  %v3613_v21 = vld [vmem:[#allocation2 + $0x9e] sm:$0xff]  ;;  %v1661_v50 = vpack.c.bf16 %v1643_v24, %v1642_v43  ;;  %v4261_v24 = vpop.permute.xlu1 %4260 }
 0x129   : > { %5650 = vmatmul.mubr.msk.bf16.gmra.mrb[4].mxu0 %vm333_vm1, %v3637_v28  ;;  %v3641_v38 = vpack.c.bf16 %v3613_v21, %v3612_v32  ;;  %v3650_v28 = vpack.c.bf16 %v3631_v40, %v3630_v36  ;;  %v4256_v32 = vpop.permute.xlu0 %4255 }
 0x12a   : > { %5653 = vmatprep.mubr.msk.bf16.mxu0 %vm333_vm1, %v3638_v4  ;;  %v3632_v4 = vld [vmem:[#allocation2 + $0x136] sm:$0xff] }
 0x12b   : > { %v3651_v57 = vpack.c.bf16 %v3633_v46, %v3632_v4 }
 0x12c   : > { %v4266_v35 = vpop.permute.xlu1 %4265 }
 0x12f   : > { %5484 = vmatmul.mubr.msk.bf16.gmra.mrb[28].mxu1 %vm333_vm1, %v6492_v60  ;;  %v2028_v60 = vld [vmem:[#allocation2 + $0xc3] sm:$0xff] }
 0x130   : > { %5487 = vmatprep.mubr.msk.bf16.mxu1 %vm333_vm1, %v6506_v39  ;;  %v2029_v39 = vld [vmem:[#allocation2 + $0xcb] sm:$0xff] }
 0x131   : > { %5654 = vmatmul.mubr.msk.bf16.gmra.mrb[8].mxu0 %vm333_vm1, %v3639_v10  ;;  %v2053_v49 = vpack.c.bf16 %v2029_v39, %v2028_v60 }
 0x132   : > { %5657 = vmatprep.mubr.msk.bf16.mxu0 %vm333_vm1, %v3640_v29 }
 0x137   : > { %5488 = vmatmul.mubr.msk.bf16.gmra.mrb[32].mxu1 %vm333_vm1, %v1661_v50  ;;  %v4271_v50 = vpop.permute.xlu0 %4270 }
 0x138   : > { %5513 = vmatprep.mubr.msk.bf16.mxu1 %vm333_vm1, %v2052_v53 }
 0x139   : > { %5658 = vmatmul.mubr.msk.bf16.gmra.mrb[12].mxu0 %vm333_vm1, %v3641_v38  ;;  %v6606_v53 = vpop.permute.xlu1 %4275 }
 0x13a   : > { %5661 = vmatprep.mubr.msk.bf16.mxu0 %vm333_vm1, %v3642_v41 }
 0x13b   : > { %v6610_v60 = vpop.permute.xlu0 %4280 }
 0x13d   : > { %v6616_v3 = vpop.permute.xlu1 %4285 }
 0x13f   : > { %5514 = vmatmul.mubr.msk.bf16.vlgmr.msra.gmra.mrb[20].mxu1 %vm333_vm1, %v2053_v49  ;;  %v6618_v15 = vpop.permute.xlu0 %4290 }
 0x140   : > { %5517 = vmatprep.mubr.msk.bf16.mxu1 %vm333_vm1, %v2054_v22 }
 0x141   : > { %5662 = vmatmul.mubr.msk.bf16.gmra.mrb[16].mxu0 %vm333_vm1, %v3643_v63  ;;  %v6628_v63 = vpop.permute.xlu1 %4295 }
 0x142   : > { %5665 = vmatprep.mubr.msk.bf16.mxu0 %vm333_vm1, %v3644_v51 }
 0x143   : > { %v6630_v22 = vpop.permute.xlu0 %4300 }
 0x145   : > { %v6638_v55 = vpop.permute.xlu1 %4305 }
 0x147   : > { %5518 = vmatmul.mubr.msk.bf16.gmra.mrb[24].mxu1 %vm333_vm1, %v2055_v31  ;;  %v6642_v17 = vpop.permute.xlu0 %4310 }
 0x148   : > { %5521 = vmatprep.mubr.msk.bf16.mxu1 %vm333_vm1, %v2056_v54 }
 0x149   : > { %5666 = vmatmul.mubr.msk.bf16.gmra.mrb[20].mxu0 %vm333_vm1, %v3645_v62  ;;  %v6644_v56 = vpop.permute.xlu1 %4315 }
 0x14a   : > { %5669 = vmatprep.mubr.msk.bf16.mxu0 %vm333_vm1, %v3646_v61 }
 0x14b   : > { %v6647_v59 = vpop.permute.xlu0 %4320 }
 0x14d   : > { %v6654_v12 = vpop.permute.xlu1 %4325 }
 0x14f   : > { %5522 = vmatmul.mubr.msk.bf16.gmra.mrb[28].mxu1 %vm333_vm1, %v2057_v13 }
 0x150   : > { %5525 = vmatprep.mubr.msk.bf16.mxu1 %vm333_vm1, %v2058_v14 }
 0x151   : > { %5670 = vmatmul.mubr.msk.bf16.gmra.mrb[24].mxu0 %vm333_vm1, %v3647_v58  ;;  %v6656_v58 = vpop.permute.xlu0 %4330 }
 0x152   : > { %5673 = vmatprep.mubr.msk.bf16.mxu0 %vm333_vm1, %v3648_v27 }
 0x157   : > { %5526 = vmatmul.mubr.msk.bf16.gmra.mrb[32].mxu1 %vm333_vm1, %v2059_v25 }
 0x159   : > { %5674 = vmatmul.mubr.msk.bf16.gmra.mrb[28].mxu0 %vm333_vm1, %v3649_v23 }
 0x15a   : > { %5677 = vmatprep.mubr.msk.bf16.mxu0 %vm333_vm1, %v3650_v28 }
 0x161   : > { %5678 = vmatmul.mubr.msk.bf16.gmra.mrb[32].mxu0 %vm333_vm1, %v3651_v57 }
 0x1ca   : > { %v5457_v52 = vpop.f32.mrb[0].mxu1 }
 0x1cb   : > { %v1791_v10 = vpop.f32.mrb[1].mxu1 }
 0x1cc   : > { %v5458_v29 = vpop.f32.mrb[2].mxu1 }
 0x1cd   : > { %v1794_v43 = vpop.f32.mrb[3].mxu1 }
 0x1d2   : > { %v5461_v21 = vpop.f32.mrb[4].mxu1 }
 0x1d3   : > { %v1807_v33 = vpop.f32.mrb[5].mxu1 }
 0x1d4   : > { %v5462_v34 = vpop.f32.mrb[6].mxu1 }
 0x1d5   : > { %v1810_v37 = vpop.f32.mrb[7].mxu1 }
 0x1da   : > { %v6604_v38 = vpop.f32.mrb[8].mxu1 }
 0x1db   : > { %v6608_v41 = vpop.f32.mrb[9].mxu1 }
 0x1dc   : > { %v6612_v39 = vpop.f32.mrb[10].mxu1 }
 0x1dd   : > { %v6614_v42 = vpop.f32.mrb[11].mxu1 }
 0x1e2   : > { %v6620_v47 = vpop.f32.mrb[12].mxu1 }
 0x1e3   : > { %v6622_v48 = vpop.f32.mrb[13].mxu1 }
 0x1e4   : > { %v6624_v19 = vpop.f32.mrb[14].mxu1 }
 0x1e5   : > { %v6626_v49 = vpop.f32.mrb[15].mxu1 }
 0x1ea   : > { %v6632_v51 = vpop.f32.mrb[16].mxu1 }
 0x1eb   : > { %v6634_v30 = vpop.f32.mrb[17].mxu1 }
 0x1ec   : > { %v6636_v0 = vpop.f32.mrb[18].mxu1 }
 0x1ed   : > { %v6640_v44 = vpop.f32.mrb[19].mxu1 }
 0x1f4   : > { %v5647_v2 = vpop.f32.mrb[0].mxu0 }
 0x1f5   : > { %v5683_v31 = vadd.f32 %v5647_v2, %v5457_v52  ;;  %v3781_v62 = vpop.f32.mrb[1].mxu0  ;;  %v6660_v52 = vpop.permute.xlu1 %4335 }
 0x1f6   : > { %v5684_v54 = vadd.f32 %v3781_v62, %v1791_v10  ;;  %v5648_v61 = vpop.f32.mrb[2].mxu0 }
 0x1f7   : > { %v5685_v6 = vadd.f32 %v5648_v61, %v5458_v29  ;;  %v3784_v7 = vpop.f32.mrb[3].mxu0  ;;  %v4430_v11 = vmul.f32 %v5683_v31, %v4261_v24 }
 0x1f8   : > { %v4428_v8 = vmul.f32 %v5684_v54, %v4251_v26  ;;  %v5686_v9 = vadd.f32 %v3784_v7, %v1794_v43 }
 0x1f9   : > { %v5049_v1 = vpack.c.bf16 %v5685_v6, %v5683_v31  ;;  %v4431_v14 = vmul.f32 %v5685_v6, %v4266_v35  ;;  %v4507_v40 = vmul.f32 %v5683_v31, %v4430_v11 }
 0x1fa   : > { %v5044_v45 = vpack.c.bf16 %v5686_v9, %v5684_v54  ;;  %v4429_v13 = vmul.f32 %v5686_v9, %v4256_v32  ;;  %v4505_v27 = vmul.f32 %v5684_v54, %v4428_v8  ;;  %v6662_v32 = vpop.permute.xlu0 %4340 }
 0x1fb   : > { %5151 = vst [vmem:[%s6652_s25 + $0x8] sm:$0xff] %v5049_v1   ;;  %v4508_v46 = vmul.f32 %v5685_v6, %v4431_v14 }
 0x1fc   : > { %5045 = vst [vmem:[%s6652_s25] sm:$0xff] %v5044_v45   ;;  %v4464_v16 = vadd.f32 %v4429_v13, %v4428_v8  ;;  %v4506_v18 = vmul.f32 %v5686_v9, %v4429_v13  ;;  %v5651_v20 = vpop.f32.mrb[4].mxu0  ;;  %v6670_v9 = vpop.permute.xlu1 %4345 }
 0x1fd   : > { %v5687_v5 = vadd.f32 %v5651_v20, %v5461_v21  ;;  %v3797_v36 = vpop.f32.mrb[5].mxu0 }
 0x1fe   : > { %v4465_v25 = vadd.f32 %v4464_v16, %v4430_v11  ;;  %v4541_v23 = vadd.f32 %v4506_v18, %v4505_v27  ;;  %v5688_v28 = vadd.f32 %v3797_v36, %v1807_v33  ;;  %v5652_v4 = vpop.f32.mrb[6].mxu0  ;;  %v6673_v45 = vpop.permute.xlu0 %4350 }
 0x1ff   : > { %v5689_v57 = vadd.f32 %v5652_v4, %v5462_v34  ;;  %v3800_v26 = vpop.f32.mrb[7].mxu0  ;;  %v4434_v33 = vmul.f32 %v5687_v5, %v6610_v60 }
 0x200   : > { %v4542_v10 = vadd.f32 %v4541_v23, %v4507_v40  ;;  %v4432_v29 = vmul.f32 %v5688_v28, %v4271_v50  ;;  %v4466_v43 = vadd.f32 %v4465_v25, %v4431_v14  ;;  %v5690_v24 = vadd.f32 %v3800_v26, %v1810_v37 }
 0x201   : > { %v5059_v21 = vpack.c.bf16 %v5689_v57, %v5687_v5  ;;  %v4435_v6 = vmul.f32 %v5689_v57, %v6616_v3  ;;  %v4511_v60 = vmul.f32 %v5687_v5, %v4434_v33 }
 0x202   : > { %v4467_v35 = vadd.f32 %v4466_v43, %v4432_v29  ;;  %v4509_v2 = vmul.f32 %v5688_v28, %v4432_v29  ;;  %v4543_v31 = vadd.f32 %v4542_v10, %v4508_v46  ;;  %v5054_v62 = vpack.c.bf16 %v5690_v24, %v5688_v28  ;;  %v6684_v46 = vpop.permute.xlu0 %4360 }
 0x203   : > { %5153 = vst [vmem:[%s6652_s25 + $0x18] sm:$0xff] %v5059_v21   ;;  %v4433_v34 = vmul.f32 %v5690_v24, %v6606_v53  ;;  %v4512_v16 = vmul.f32 %v5689_v57, %v4435_v6 }
 0x204   : > { %v4544_v54 = vadd.f32 %v4543_v31, %v4509_v2  ;;  %5152 = vst [vmem:[%s6652_s25 + $0x10] sm:$0xff] %v5054_v62   ;;  %v5655_v61 = vpop.f32.mrb[8].mxu0 }
 0x205   : > { %v4468_v50 = vadd.f32 %v4467_v35, %v4433_v34  ;;  %v4510_v7 = vmul.f32 %v5690_v24, %v4433_v34  ;;  %v5691_v37 = vadd.f32 %v5655_v61, %v6604_v38  ;;  %v3813_v8 = vpop.f32.mrb[9].mxu0 }
 0x206   : > { %v5692_v1 = vadd.f32 %v3813_v8, %v6608_v41  ;;  %v5656_v11 = vpop.f32.mrb[10].mxu0 }
 0x207   : > { %v4469_v13 = vadd.f32 %v4468_v50, %v4434_v33  ;;  %v4545_v53 = vadd.f32 %v4544_v54, %v4510_v7  ;;  %v5693_v14 = vadd.f32 %v5656_v11, %v6612_v39  ;;  %v3816_v3 = vpop.f32.mrb[11].mxu0  ;;  %v4438_v5 = vmul.f32 %v5691_v37, %v6630_v22  ;;  %v6681_v39 = vpop.permute.xlu1 %4355 }
 0x208   : > { %v4436_v27 = vmul.f32 %v5692_v1, %v6618_v15  ;;  %v5694_v38 = vadd.f32 %v3816_v3, %v6614_v42  ;;  %v6695_v50 = vpop.permute.xlu0 %4370 }
 0x209   : > { %v4546_v18 = vadd.f32 %v4545_v53, %v4511_v60  ;;  %v4470_v20 = vadd.f32 %v4469_v13, %v4435_v6  ;;  %v5069_v36 = vpack.c.bf16 %v5693_v14, %v5691_v37  ;;  %v4439_v57 = vmul.f32 %v5693_v14, %v6638_v55 }
 0x20a   : > { %v4513_v41 = vmul.f32 %v5692_v1, %v4436_v27  ;;  %v5064_v40 = vpack.c.bf16 %v5694_v38, %v5692_v1  ;;  %v4437_v25 = vmul.f32 %v5694_v38, %v6628_v63  ;;  %v4515_v43 = vmul.f32 %v5691_v37, %v4438_v5 }
 0x20b   : > { %v4471_v23 = vadd.f32 %v4470_v20, %v4436_v27  ;;  %v4547_v28 = vadd.f32 %v4546_v18, %v4512_v16  ;;  %5155 = vst [vmem:[%s6652_s25 + $0x28] sm:$0xff] %v5069_v36   ;;  %v4516_v55 = vmul.f32 %v5693_v14, %v4439_v57  ;;  %v6692_v54 = vpop.permute.xlu1 %4365 }
 0x20c   : > { %5154 = vst [vmem:[%s6652_s25 + $0x20] sm:$0xff] %v5064_v40   ;;  %v4514_v4 = vmul.f32 %v5694_v38, %v4437_v25  ;;  %v5659_v15 = vpop.f32.mrb[12].mxu0 }
 0x20d   : > { %v4548_v42 = vadd.f32 %v4547_v28, %v4513_v41  ;;  %v4472_v26 = vadd.f32 %v4471_v23, %v4437_v25  ;;  %v5695_v10 = vadd.f32 %v5659_v15, %v6620_v47  ;;  %v3829_v29 = vpop.f32.mrb[13].mxu0  ;;  %v6709_v15 = vpop.permute.xlu0 %4380 }
 0x20e   : > { %v5696_v63 = vadd.f32 %v3829_v29, %v6622_v48  ;;  %v5660_v22 = vpop.f32.mrb[14].mxu0 }
 0x20f   : > { %v4473_v24 = vadd.f32 %v4472_v26, %v4438_v5  ;;  %v4549_v21 = vadd.f32 %v4548_v42, %v4514_v4  ;;  %v5697_v35 = vadd.f32 %v5660_v22, %v6624_v19  ;;  %v3832_v2 = vpop.f32.mrb[15].mxu0  ;;  %v4442_v19 = vmul.f32 %v5695_v10, %v6647_v59  ;;  %v6706_v23 = vpop.permute.xlu1 %4375 }
 0x210   : > { %v4440_v31 = vmul.f32 %v5696_v63, %v6642_v17  ;;  %v5698_v62 = vadd.f32 %v3832_v2, %v6626_v49 }
 0x211   : > { %v4550_v33 = vadd.f32 %v4549_v21, %v4515_v43  ;;  %v4474_v34 = vadd.f32 %v4473_v24, %v4439_v57  ;;  %v5079_v47 = vpack.c.bf16 %v5697_v35, %v5695_v10  ;;  %v4443_v60 = vmul.f32 %v5697_v35, %v6654_v12 }
 0x212   : > { %v4517_v48 = vmul.f32 %v5696_v63, %v4440_v31  ;;  %v5074_v61 = vpack.c.bf16 %v5698_v62, %v5696_v63  ;;  %v4441_v6 = vmul.f32 %v5698_v62, %v6644_v56  ;;  %v5515_v17 = vpop.f32.mrb[20].mxu1  ;;  %v4519_v38 = vmul.f32 %v5695_v10, %v4442_v19 }
 0x213   : > { %v4475_v7 = vadd.f32 %v4474_v34, %v4440_v31  ;;  %v4551_v37 = vadd.f32 %v4550_v33, %v4516_v55  ;;  %5157 = vst [vmem:[%s6652_s25 + $0x38] sm:$0xff] %v5079_v47   ;;  %v2269_v1 = vpop.f32.mrb[21].mxu1  ;;  %v4520_v40 = vmul.f32 %v5697_v35, %v4443_v60 }
 0x214   : > { %5156 = vst [vmem:[%s6652_s25 + $0x30] sm:$0xff] %v5074_v61   ;;  %v4518_v49 = vmul.f32 %v5698_v62, %v4441_v6  ;;  %v5663_v8 = vpop.f32.mrb[16].mxu0  ;;  %v5516_v56 = vpop.f32.mrb[22].mxu1 }
 0x215   : > { %v4552_v11 = vadd.f32 %v4551_v37, %v4517_v48  ;;  %v4476_v13 = vadd.f32 %v4475_v7, %v4441_v6  ;;  %v5699_v53 = vadd.f32 %v5663_v8, %v6632_v51  ;;  %v3845_v14 = vpop.f32.mrb[17].mxu0  ;;  %v2272_v59 = vpop.f32.mrb[23].mxu1 }
 0x216   : > { %v5700_v3 = vadd.f32 %v3845_v14, %v6634_v30  ;;  %v5664_v27 = vpop.f32.mrb[18].mxu0 }
 0x217   : > { %v4477_v16 = vadd.f32 %v4476_v13, %v4442_v19  ;;  %v4553_v18 = vadd.f32 %v4552_v11, %v4518_v49  ;;  %v5701_v20 = vadd.f32 %v5664_v27, %v6636_v0  ;;  %v3848_v36 = vpop.f32.mrb[19].mxu0  ;;  %v4446_v0 = vmul.f32 %v5699_v53, %v6662_v32  ;;  %v4386_v19 = vpop.permute.xlu1 %4385 }
 0x218   : > { %v4444_v41 = vmul.f32 %v5700_v3, %v6656_v58  ;;  %v5702_v12 = vadd.f32 %v3848_v36, %v6640_v44  ;;  %v4391_v49 = vpop.permute.xlu0 %4390 }
 0x219   : > { %v4554_v51 = vadd.f32 %v4553_v18, %v4519_v38  ;;  %v4478_v25 = vadd.f32 %v4477_v16, %v4443_v60  ;;  %v5089_v5 = vpack.c.bf16 %v5701_v20, %v5699_v53  ;;  %v4447_v63 = vmul.f32 %v5701_v20, %v6670_v9 }
 0x21a   : > { %v4521_v30 = vmul.f32 %v5700_v3, %v4444_v41  ;;  %v5084_v28 = vpack.c.bf16 %v5702_v12, %v5700_v3  ;;  %v4445_v4 = vmul.f32 %v5702_v12, %v6660_v52  ;;  %v5519_v58 = vpop.f32.mrb[24].mxu1  ;;  %v4523_v31 = vmul.f32 %v5699_v53, %v4446_v0 }
 0x21b   : > { %v4479_v42 = vadd.f32 %v4478_v25, %v4444_v41  ;;  %v4555_v57 = vadd.f32 %v4554_v51, %v4520_v40  ;;  %5159 = vst [vmem:[%s6652_s25 + $0x48] sm:$0xff] %v5089_v5   ;;  %v2285_v10 = vpop.f32.mrb[25].mxu1  ;;  %v4524_v48 = vmul.f32 %v5701_v20, %v4447_v63 }
 0x21c   : > { %5158 = vst [vmem:[%s6652_s25 + $0x40] sm:$0xff] %v5084_v28   ;;  %v4522_v44 = vmul.f32 %v5702_v12, %v4445_v4  ;;  %v5667_v26 = vpop.f32.mrb[20].mxu0  ;;  %v5520_v21 = vpop.f32.mrb[26].mxu1 }
 0x21d   : > { %v4556_v29 = vadd.f32 %v4555_v57, %v4521_v30  ;;  %v4480_v22 = vadd.f32 %v4479_v42, %v4445_v4  ;;  %v5703_v43 = vadd.f32 %v5667_v26, %v5515_v17  ;;  %v3861_v24 = vpop.f32.mrb[21].mxu0  ;;  %v2288_v2 = vpop.f32.mrb[27].mxu1 }
 0x21e   : > { %v5704_v52 = vadd.f32 %v3861_v24, %v2269_v1  ;;  %v5668_v35 = vpop.f32.mrb[22].mxu0  ;;  %v4396_v28 = vpop.permute.xlu1 %4395 }
 0x21f   : > { %v4481_v32 = vadd.f32 %v4480_v22, %v4446_v0  ;;  %v4557_v62 = vadd.f32 %v4556_v29, %v4522_v44  ;;  %v5705_v55 = vadd.f32 %v5668_v35, %v5516_v56  ;;  %v3864_v33 = vpop.f32.mrb[23].mxu0  ;;  %v4450_v8 = vmul.f32 %v5703_v43, %v6684_v46  ;;  %v4401_v57 = vpop.permute.xlu0 %4400 }
 0x220   : > { %v4448_v34 = vmul.f32 %v5704_v52, %v6673_v45  ;;  %v5706_v47 = vadd.f32 %v3864_v33, %v2272_v59 }
 0x221   : > { %v4558_v61 = vadd.f32 %v4557_v62, %v4523_v31  ;;  %v4482_v9 = vadd.f32 %v4481_v32, %v4447_v63  ;;  %v5099_v6 = vpack.c.bf16 %v5705_v55, %v5703_v43  ;;  %v4451_v56 = vmul.f32 %v5705_v55, %v6692_v54 }
 0x222   : > { %v4525_v7 = vmul.f32 %v5704_v52, %v4448_v34  ;;  %v5094_v37 = vpack.c.bf16 %v5706_v47, %v5704_v52  ;;  %v4449_v17 = vmul.f32 %v5706_v47, %v6681_v39  ;;  %v5523_v60 = vpop.f32.mrb[28].mxu1  ;;  %v4527_v20 = vmul.f32 %v5703_v43, %v4450_v8 }
 0x223   : > { %v4483_v1 = vadd.f32 %v4482_v9, %v4448_v34  ;;  %v4559_v11 = vadd.f32 %v4558_v61, %v4524_v48  ;;  %5161 = vst [vmem:[%s6652_s25 + $0x58] sm:$0xff] %v5099_v6   ;;  %v2301_v53 = vpop.f32.mrb[29].mxu1  ;;  %v4528_v25 = vmul.f32 %v5705_v55, %v4451_v56  ;;  %v4406_v34 = vpop.permute.xlu1 %4405 }
 0x224   : > { %5160 = vst [vmem:[%s6652_s25 + $0x50] sm:$0xff] %v5094_v37   ;;  %v4526_v45 = vmul.f32 %v5706_v47, %v4449_v17  ;;  %v5671_v13 = vpop.f32.mrb[24].mxu0  ;;  %v5524_v38 = vpop.f32.mrb[30].mxu1 }
 0x225   : > { %v4560_v14 = vadd.f32 %v4559_v11, %v4525_v7  ;;  %v4484_v3 = vadd.f32 %v4483_v1, %v4449_v17  ;;  %v5707_v27 = vadd.f32 %v5671_v13, %v5519_v58  ;;  %v3877_v59 = vpop.f32.mrb[25].mxu0  ;;  %v2304_v18 = vpop.f32.mrb[31].mxu1 }
 0x226   : > { %v5708_v16 = vadd.f32 %v3877_v59, %v2285_v10  ;;  %v5672_v39 = vpop.f32.mrb[26].mxu0 }
 0x227   : > { %v4485_v46 = vadd.f32 %v4484_v3, %v4450_v8  ;;  %v4561_v36 = vadd.f32 %v4560_v14, %v4526_v45  ;;  %v5709_v41 = vadd.f32 %v5672_v39, %v5520_v21  ;;  %v3880_v12 = vpop.f32.mrb[27].mxu0  ;;  %v4454_v58 = vmul.f32 %v5707_v27, %v6709_v15 }
 0x228   : > { %v4452_v40 = vmul.f32 %v5708_v16, %v6695_v50  ;;  %v5710_v51 = vadd.f32 %v3880_v12, %v2288_v2 }
 0x229   : > { %v4562_v5 = vadd.f32 %v4561_v36, %v4527_v20  ;;  %v4486_v54 = vadd.f32 %v4485_v46, %v4451_v56  ;;  %v5109_v30 = vpack.c.bf16 %v5709_v41, %v5707_v27  ;;  %v4455_v43 = vmul.f32 %v5709_v41, %v4386_v19 }
 0x22a   : > { %v4529_v4 = vmul.f32 %v5708_v16, %v4452_v40  ;;  %v5104_v0 = vpack.c.bf16 %v5710_v51, %v5708_v16  ;;  %v4453_v42 = vmul.f32 %v5710_v51, %v6706_v23  ;;  %v5527_v10 = vpop.f32.mrb[32].mxu1  ;;  %v4531_v32 = vmul.f32 %v5707_v27, %v4454_v58  ;;  %v4416_v27 = vpop.permute.xlu1 %4415 }
 0x22b   : > { %v4487_v44 = vadd.f32 %v4486_v54, %v4452_v40  ;;  %v4563_v26 = vadd.f32 %v4562_v5, %v4528_v25  ;;  %5163 = vst [vmem:[%s6652_s25 + $0x68] sm:$0xff] %v5109_v30   ;;  %v2317_v63 = vpop.f32.mrb[33].mxu1  ;;  %v4532_v61 = vmul.f32 %v5709_v41, %v4455_v43 }
 0x22c   : > { %5162 = vst [vmem:[%s6652_s25 + $0x60] sm:$0xff] %v5104_v0   ;;  %v4530_v50 = vmul.f32 %v5710_v51, %v4453_v42  ;;  %v5675_v29 = vpop.f32.mrb[28].mxu0  ;;  %v5528_v35 = vpop.f32.mrb[34].mxu1 }
 0x22d   : > { %v4564_v22 = vadd.f32 %v4563_v26, %v4529_v4  ;;  %v4488_v24 = vadd.f32 %v4487_v44, %v4453_v42  ;;  %v5711_v21 = vadd.f32 %v5675_v29, %v5523_v60  ;;  %v3893_v52 = vpop.f32.mrb[29].mxu0  ;;  %v2320_v23 = vpop.f32.mrb[35].mxu1 }
 0x22e   : > { %v5712_v2 = vadd.f32 %v3893_v52, %v2301_v53  ;;  %v5676_v31 = vpop.f32.mrb[30].mxu0  ;;  %v4411_v60 = vpop.permute.xlu0 %4410 }
 0x22f   : > { %v4489_v62 = vadd.f32 %v4488_v24, %v4454_v58  ;;  %v4565_v15 = vadd.f32 %v4564_v22, %v4530_v50  ;;  %v5713_v55 = vadd.f32 %v5676_v31, %v5524_v38  ;;  %v3896_v33 = vpop.f32.mrb[31].mxu0  ;;  %v4458_v8 = vmul.f32 %v5711_v21, %v4401_v57  ;;  %v4426_v57 = vpop.permute.xlu1 %4425 }
 0x230   : > { %v4456_v47 = vmul.f32 %v5712_v2, %v4391_v49  ;;  %v5714_v48 = vadd.f32 %v3896_v33, %v2304_v18 }
 0x231   : > { %v4566_v9 = vadd.f32 %v4565_v15, %v4531_v32  ;;  %v4490_v6 = vadd.f32 %v4489_v62, %v4455_v43  ;;  %v5119_v19 = vpack.c.bf16 %v5713_v55, %v5711_v21  ;;  %v4459_v14 = vmul.f32 %v5713_v55, %v4406_v34 }
 0x232   : > { %v4533_v7 = vmul.f32 %v5712_v2, %v4456_v47  ;;  %v5114_v37 = vpack.c.bf16 %v5714_v48, %v5712_v2  ;;  %v4457_v17 = vmul.f32 %v5714_v48, %v4396_v28  ;;  %v4535_v16 = vmul.f32 %v5711_v21, %v4458_v8  ;;  %v4421_v5 = vpop.permute.xlu0 %4420 }
 0x233   : > { %v4491_v1 = vadd.f32 %v4490_v6, %v4456_v47  ;;  %v4567_v11 = vadd.f32 %v4566_v9, %v4532_v61  ;;  %5165 = vst [vmem:[%s6652_s25 + $0x78] sm:$0xff] %v5119_v19   ;;  %v4536_v12 = vmul.f32 %v5713_v55, %v4459_v14 }
 0x234   : > { %5164 = vst [vmem:[%s6652_s25 + $0x70] sm:$0xff] %v5114_v37   ;;  %v4534_v45 = vmul.f32 %v5714_v48, %v4457_v17  ;;  %v5679_v13 = vpop.f32.mrb[32].mxu0 }
 0x235   : > { %v4568_v53 = vadd.f32 %v4567_v11, %v4533_v7  ;;  %v4492_v56 = vadd.f32 %v4491_v1, %v4457_v17  ;;  %v5715_v49 = vadd.f32 %v5679_v13, %v5527_v10  ;;  %v3909_v3 = vpop.f32.mrb[33].mxu0 }
 0x236   : > { %v5716_v59 = vadd.f32 %v3909_v3, %v2317_v63  ;;  %v5680_v38 = vpop.f32.mrb[34].mxu0 }
 0x237   : > { %v4493_v39 = vadd.f32 %v4492_v56, %v4458_v8  ;;  %v4569_v18 = vadd.f32 %v4568_v53, %v4534_v45  ;;  %v5717_v20 = vadd.f32 %v5680_v38, %v5528_v35  ;;  %v3912_v46 = vpop.f32.mrb[35].mxu0  ;;  %v4462_v4 = vmul.f32 %v5715_v49, %v4421_v5 }
 0x238   : > { %v4460_v36 = vmul.f32 %v5716_v59, %v4411_v60  ;;  %v5718_v41 = vadd.f32 %v3912_v46, %v2320_v23 }
 0x239   : > { %v4570_v40 = vadd.f32 %v4569_v18, %v4535_v16  ;;  %v4494_v51 = vadd.f32 %v4493_v39, %v4459_v14  ;;  %v5129_v25 = vpack.c.bf16 %v5717_v20, %v5715_v49  ;;  %v4463_v26 = vmul.f32 %v5717_v20, %v4426_v57 }
 0x23a   : > { %v4537_v54 = vmul.f32 %v5716_v59, %v4460_v36  ;;  %v5124_v30 = vpack.c.bf16 %v5718_v41, %v5716_v59  ;;  %v4461_v28 = vmul.f32 %v5718_v41, %v4416_v27  ;;  %v4539_v50 = vmul.f32 %v5715_v49, %v4462_v4 }
 0x23b   : > { %v4495_v0 = vadd.f32 %v4494_v51, %v4460_v36  ;;  %v4571_v42 = vadd.f32 %v4570_v40, %v4536_v12  ;;  %5167 = vst [vmem:[%s6652_s25 + $0x88] sm:$0xff] %v5129_v25   ;;  %v4540_v22 = vmul.f32 %v5717_v20, %v4463_v26 }
 0x23c   : > { %5166 = vst [vmem:[%s6652_s25 + $0x80] sm:$0xff] %v5124_v30   ;;  %v4538_v58 = vmul.f32 %v5718_v41, %v4461_v28 }
 0x23d   : > { %v4572_v44 = vadd.f32 %v4571_v42, %v4537_v54  ;;  %v4496_v10 = vadd.f32 %v4495_v0, %v4461_v28 }
 0x23f   : > { %v4497_v29 = vadd.f32 %v4496_v10, %v4462_v4  ;;  %v4573_v63 = vadd.f32 %v4572_v44, %v4538_v58 }
 0x241   : > { %v4498_v43 = vadd.f32 %v4497_v29, %v4463_v26  ;;  %v4574_v24 = vadd.f32 %v4573_v63, %v4539_v50 }
 0x243   : > { %v4499_v21 = vrot.slane %v4498_v43, 4  ;;  %v4575_v52 = vadd.f32 %v4574_v24, %v4540_v22 }
 0x245   : > { %v4500_v35 = vadd.f32 %v4499_v21, %v4498_v43  ;;  %v4576_v2 = vrot.slane %v4575_v52, 4 }
 0x247   : > { %v4501_v31 = vrot.slane %v4500_v35, 2  ;;  %v4577_v23 = vadd.f32 %v4576_v2, %v4575_v52 }
 0x249   : > { %v4502_v32 = vadd.f32 %v4501_v31, %v4500_v35  ;;  %v4578_v62 = vrot.slane %v4577_v23, 2 }
 0x24b   : > { %v4503_v15 = vrot.slane %v4502_v32, 1  ;;  %v4579_v55 = vadd.f32 %v4578_v62, %v4577_v23 }
 0x24d   : > { %v4504_v33 = vadd.f32 %v4503_v15, %v4502_v32  ;;  %v4580_v34 = vrot.slane %v4579_v55, 1 }
 0x24f   : > { %v4581_v47 = vadd.f32 %v4580_v34, %v4579_v55  ;;  %v4583_v48 = vsel %vm4582_vm2, %v4504_v33, 0.0 }
 0x250   : > { %4584 = vst [vmem:[%s241_s29] sm:$0xff] %v4583_v48 }
 0x251   : > { %v4585_v61 = vsel %vm4582_vm2, %v4581_v47, 0.0 }
 0x252   : > { %4586 = vst [vmem:[%s245_s7] sm:$0xff] %v4585_v61 }
 0x253 PF: > { %s16_s18 = sadd.s32 1, %s6000_s18  }
 0x254   : > { %p13_p4 = scmp.ge.s32.totalorder %s16_s18, 4  }
 0x256   :  { %15 = sbr.rel (!%p13_p4) target bundleno = 1 (0x1), region = 94 }

</bundles_post_ra>
